<compile_context>
chip_gen: v5e
topology: v5e:2x2
jax: 0.10.0
libtpu: 0.0.40
codegen_flags: <defaults>
</compile_context>

<pallas_src>
import functools

import numpy as np
import jax
import jax.numpy as jnp
from jax import lax
from jax.experimental import pallas as pl
from jax.experimental.pallas import tpu as pltpu


# ---------------------------------------------------------------------------
# Pallas kernels
# ---------------------------------------------------------------------------
def _conv_rows_kernel(x_ref, w_ref, b_ref, o_ref):
    """Fused valid-conv (stride 1) + bias + ReLU for a tile of images.

    x_ref: (TB, H, W*C)     f32  channels-last rows (W and C folded into lanes)
    w_ref: (KH, W*C, OW*O)  bf16 banded weights: rhs[kh, w*C+c, ow*O+o] = w[o,c,kh,w-ow]
    b_ref: (1, OW*O)        f32  bias tiled across ow
    o_ref: (TB, OH, OW*O)   f32  channels-last conv output rows
    """
    tb = x_ref.shape[0]
    kh_total = w_ref.shape[0]
    oh = o_ref.shape[1]

    def body(b, carry):
        acc = jnp.dot(
            x_ref[b, pl.ds(0, oh), :].astype(jnp.bfloat16),
            w_ref[0],
            preferred_element_type=jnp.float32,
        )
        for kh in range(1, kh_total):
            acc = acc + jnp.dot(
                x_ref[b, pl.ds(kh, oh), :].astype(jnp.bfloat16),
                w_ref[kh],
                preferred_element_type=jnp.float32,
            )
        o_ref[b] = jnp.maximum(acc + b_ref[...], 0.0)
        return carry

    lax.fori_loop(0, tb, body, 0)


def _maxpool2x2_kernel(x_ref, o_ref):
    """2x2 / stride-2 max pool on channels-last data, all in-register.

    x_ref: (TB, H, W//2, 2*C) f32  (free bitcast of (TB, H, W, C): last dim packs the
                                    channel vectors of the two W-neighbours)
    o_ref: (TB, H//2, W//2, C) f32
    """
    tb, h, w_half, c2 = x_ref.shape
    c = c2 // 2
    t = x_ref[...]
    # pool over W: max of the even/odd column channel groups (static lane slices)
    t = jnp.maximum(t[..., :c], t[..., c:])             # (TB, H, W//2, C)
    # pool over H: split the (leading) H dim into pairs and reduce
    t = t.reshape(tb * (h // 2), 2, w_half, c)          # leading-dims-only reshape
    t = jnp.maximum(t[:, 0], t[:, 1])                   # (TB*H//2, W//2, C)
    o_ref[...] = t.reshape(o_ref.shape)


def _matmul_bias_kernel(x_ref, w_ref, b_ref, o_ref, *, relu):
    """o = relu?(x @ w + b) for one (TM, K) row tile; w / b stay resident in VMEM."""
    acc = jnp.dot(
        x_ref[...].astype(jnp.bfloat16), w_ref[...],
        preferred_element_type=jnp.float32,
    )
    acc = acc + b_ref[...]
    if relu:
        acc = jnp.maximum(acc, 0.0)
    o_ref[...] = acc.astype(o_ref.dtype)


# ---------------------------------------------------------------------------
# pallas_call wrappers
# ---------------------------------------------------------------------------
def _parallel_params():
    return pltpu.CompilerParams(dimension_semantics=("parallel",))


def conv_rows(x, w_banded, bias_row, *, oh, tb):
    """x: (Np, H, W*C) f32 -> (Np, OH, OW*O) f32 (fused conv + bias + ReLU)."""
    np_, h, wc = x.shape
    kh_total, _, owo = w_banded.shape
    flops = 2 * np_ * kh_total * oh * wc * owo
    bytes_accessed = x.size * 4 + w_banded.size * 2 + bias_row.size * 4 + np_ * oh * owo * 4
    return pl.pallas_call(
        _conv_rows_kernel,
        out_shape=jax.ShapeDtypeStruct((np_, oh, owo), jnp.float32),
        grid=(np_ // tb,),
        in_specs=[
            pl.BlockSpec((tb, h, wc), lambda i: (i, 0, 0)),
            pl.BlockSpec((kh_total, wc, owo), lambda i: (0, 0, 0)),   # resident weight
            pl.BlockSpec((1, owo), lambda i: (0, 0)),                 # resident bias
        ],
        out_specs=pl.BlockSpec((tb, oh, owo), lambda i: (i, 0, 0)),
        compiler_params=_parallel_params(),
        cost_estimate=pl.CostEstimate(
            flops=flops, transcendentals=0, bytes_accessed=bytes_accessed),
    )(x, w_banded, bias_row)


def maxpool2x2_nhwc(x, *, tb):
    """x: (Np, H, W, C) channels-last -> (Np, H//2, W//2, C)."""
    np_, h, w, c = x.shape
    xin = x.reshape(np_, h, w // 2, 2 * c)   # free row-major bitcast
    return pl.pallas_call(
        _maxpool2x2_kernel,
        out_shape=jax.ShapeDtypeStruct((np_, h // 2, w // 2, c), jnp.float32),
        grid=(np_ // tb,),
        in_specs=[pl.BlockSpec((tb, h, w // 2, 2 * c), lambda i: (i, 0, 0, 0))],
        out_specs=pl.BlockSpec((tb, h // 2, w // 2, c), lambda i: (i, 0, 0, 0)),
        compiler_params=_parallel_params(),
    )(xin)


def matmul_bias(x, w, b, *, relu, tm=256):
    """relu?(x @ w + b); grid over M rows, bf16 weight/bias resident in VMEM."""
    m, k = x.shape
    k2, n = w.shape
    assert k == k2
    tm = min(tm, m)
    b2 = b.reshape(1, n)
    return pl.pallas_call(
        functools.partial(_matmul_bias_kernel, relu=relu),
        out_shape=jax.ShapeDtypeStruct((m, n), jnp.float32),
        grid=(pl.cdiv(m, tm),),
        in_specs=[
            pl.BlockSpec((tm, k), lambda i: (i, 0)),
            pl.BlockSpec((k, n), lambda i: (0, 0)),
            pl.BlockSpec((1, n), lambda i: (0, 0)),
        ],
        out_specs=pl.BlockSpec((tm, n), lambda i: (i, 0)),
        compiler_params=_parallel_params(),
        cost_estimate=pl.CostEstimate(
            flops=2 * m * k * n, transcendentals=0,
            bytes_accessed=x.size * 4 + w.size * 2 + b.size * 4 + m * n * 4),
    )(x, w, b2)


# ---------------------------------------------------------------------------
# Parameters (PyTorch layout) and one-time kernel-layout preparation
# ---------------------------------------------------------------------------
def init_params(key):
    """PyTorch-layout parameters: Conv2d (O, C, kH, kW), Linear (out, in)."""
    ks = jax.random.split(key, 8)

    def u(k, shape, fan_in):
        bound = 1.0 / float(np.sqrt(fan_in))
        return jax.random.uniform(k, shape, jnp.float32, -bound, bound)

    return {
        "conv1_w": u(ks[0], (32, 1, 5, 5), 25),
        "conv1_b": u(ks[1], (32,), 25),
        "conv2_w": u(ks[2], (32, 32, 5, 5), 800),
        "conv2_b": u(ks[3], (32,), 800),
        "fc1_w": u(ks[4], (256, 800), 800),
        "fc1_b": u(ks[5], (256,), 800),
        "fc2_w": u(ks[6], (10, 256), 256),
        "fc2_b": u(ks[7], (10,), 256),
    }


def _banded_conv_weight(w_torch, w_in):
    """(O, C, KH, KW) -> (KH, W_in*C, OW*O) banded matrices so that, per image,
    y[oh, ow*O + o] = sum_kh (x[oh+kh, :] @ rhs[kh])[ow*O + o] equals the valid conv."""
    w = np.asarray(w_torch, np.float32)
    o_ch, c_ch, kh_n, kw_n = w.shape
    ow_n = w_in - kw_n + 1
    rhs = np.zeros((kh_n, w_in * c_ch, ow_n * o_ch), np.float32)
    for kh in range(kh_n):
        for kw in range(kw_n):
            blk = w[:, :, kh, kw].T            # (C, O)
            for ow in range(ow_n):
                wi = ow + kw
                rhs[kh, wi * c_ch:(wi + 1) * c_ch, ow * o_ch:(ow + 1) * o_ch] = blk
    return rhs


def prepare_params(p):
    """One-time conversion of PyTorch-layout params into kernel-ready layouts
    (banded conv weights, pre-transposed/permuted fc weights, bf16 MXU operands)."""
    # fc1 consumes the channels-last (h, w, c) flatten; permute its input axis so the
    # result matches PyTorch's NCHW x.view(N, -1) flatten exactly.
    fc1_w = p["fc1_w"].reshape(256, 32, 5, 5).transpose(2, 3, 1, 0).reshape(800, 256)
    fc2_w = jnp.zeros((256, 128), jnp.float32).at[:, :10].set(p["fc2_w"].T)
    fc2_b = jnp.zeros((128,), jnp.float32).at[:10].set(p["fc2_b"])
    return {
        "conv1_w": jnp.asarray(_banded_conv_weight(p["conv1_w"], 32), jnp.bfloat16),
        "conv1_b": jnp.tile(p["conv1_b"], 28).reshape(1, 28 * 32),
        "conv2_w": jnp.asarray(_banded_conv_weight(p["conv2_w"], 14), jnp.bfloat16),
        "conv2_b": jnp.tile(p["conv2_b"], 10).reshape(1, 10 * 32),
        "fc1_w": fc1_w.astype(jnp.bfloat16),
        "fc1_b": p["fc1_b"],
        "fc2_w": fc2_w.astype(jnp.bfloat16),
        "fc2_b": fc2_b,
    }


# ---------------------------------------------------------------------------
# Forward pass (mirrors CNN3.forward)
# ---------------------------------------------------------------------------
@jax.jit
def cnn3_forward(kp, x):
    """x: (N, 1, 32, 32) float32, NCHW."""
    n = x.shape[0]
    tb = max(1, min(8, n))                 # images per grid step (static)
    n_pad = -(-n // tb) * tb
    h = x.reshape(n, 32, 32)               # C=1: channels-last == plain (H, W)
    if n_pad != n:
        h = jnp.pad(h, ((0, n_pad - n), (0, 0), (0, 0)))

    h = conv_rows(h, kp["conv1_w"], kp["conv1_b"], oh=28, tb=tb)      # (Np, 28, 28*32)
    h = maxpool2x2_nhwc(h.reshape(n_pad, 28, 28, 32), tb=tb)          # (Np, 14, 14, 32)
    h = conv_rows(h.reshape(n_pad, 14, 14 * 32),
                  kp["conv2_w"], kp["conv2_b"], oh=10, tb=tb)         # (Np, 10, 10*32)
    h = maxpool2x2_nhwc(h.reshape(n_pad, 10, 10, 32), tb=tb)          # (Np, 5, 5, 32)

    h = h.reshape(n_pad, 800)              # channels-last flatten (fc1_w was permuted)
    h = matmul_bias(h, kp["fc1_w"], kp["fc1_b"], relu=True)           # (Np, 256)
    h = matmul_bias(h, kp["fc2_w"], kp["fc2_b"], relu=False)          # (Np, 128) padded
    return h[:n, :10]


# ---------------------------------------------------------------------------
# Pure-JAX reference (PyTorch semantics) for a sanity check
# ---------------------------------------------------------------------------
def reference_forward(p, x):
    def conv(x, w, b):
        y = lax.conv_general_dilated(
            x, w, window_strides=(1, 1), padding="VALID",
            dimension_numbers=("NCHW", "OIHW", "NCHW"))
        return jax.nn.relu(y + b[None, :, None, None])

    def pool(x):
        n, c, hh, ww = x.shape
        return x.reshape(n, c, hh // 2, 2, ww // 2, 2).max(axis=(3, 5))

    h = pool(conv(x, p["conv1_w"], p["conv1_b"]))
    h = pool(conv(h, p["conv2_w"], p["conv2_b"]))
    h = h.reshape(x.shape[0], -1)
    h = jax.nn.relu(h @ p["fc1_w"].T + p["fc1_b"])
    return h @ p["fc2_w"].T + p["fc2_b"]


if __name__ == "__main__":
    key = jax.random.PRNGKey(0)
    pkey, xkey = jax.random.split(key)
    params = init_params(pkey)
    kparams = prepare_params(params)

    x = jax.random.normal(xkey, (2, 1, 32, 32), jnp.float32)
    out = cnn3_forward(kparams, x)
    jax.block_until_ready(out)
    assert out.shape == (2, 10) and out.dtype == jnp.float32

    ref = reference_forward(params, x)
    assert jnp.allclose(out, ref, rtol=2e-2, atol=2e-2), (
        f"max abs err {jnp.max(jnp.abs(out - ref))}")

    print("KERNEL_OK")
</pallas_src>

<mosaic_0001>
module attributes {stable_mosaic.version = 11 : i64} {
  func.func @_conv_rows_kernel(%arg0: i32, %arg1: memref<2x32x32xf32, #tpu.memory_space<vmem>>, %arg2: memref<5x32x896xbf16, #tpu.memory_space<vmem>>, %arg3: memref<1x896xf32, #tpu.memory_space<vmem>>, %arg4: memref<2x28x896xf32, #tpu.memory_space<vmem>>) attributes {dimension_semantics = [#tpu.dimension_semantics<parallel>], iteration_bounds = array<i64: 1>, scalar_prefetch = 0 : i64, scratch_operands = 0 : i64, tpu.core_type = #tpu.core_type<tc>, window_params = [{transform_indices = @transform_0, window_bounds = array<i64: 2, 32, 32>}, {pipeline_mode = #tpu.pipeline_mode<synchronous>, transform_indices = @transform_1, window_bounds = array<i64: 5, 32, 896>}, {pipeline_mode = #tpu.pipeline_mode<synchronous>, transform_indices = @transform_2, window_bounds = array<i64: 1, 896>}, {transform_indices = @transform_3, window_bounds = array<i64: 2, 28, 896>}]} {
    %c0_i32 = arith.constant 0 : i32
    %c2_i32 = arith.constant 2 : i32
    %0 = arith.addi %c0_i32, %c2_i32 : i32
    %c1_i32 = arith.constant 1 : i32
    scf.for %arg5 = %c0_i32 to %0 step %c1_i32  : i32 {
      %1 = arith.index_cast %arg5 : i32 to index
      %c0 = arith.constant 0 : index
      %c0_1 = arith.constant 0 : index
      %2 = vector.load %arg1[%1, %c0, %c0_1] : memref<2x32x32xf32, #tpu.memory_space<vmem>>, vector<1x28x32xf32>
      %3 = vector.shape_cast %2 : vector<1x28x32xf32> to vector<28x32xf32>
      %4 = arith.truncf %3 : vector<28x32xf32> to vector<28x32xbf16>
      %c0_2 = arith.constant 0 : index
      %c0_3 = arith.constant 0 : index
      %c0_4 = arith.constant 0 : index
      %5 = vector.load %arg2[%c0_2, %c0_3, %c0_4] : memref<5x32x896xbf16, #tpu.memory_space<vmem>>, vector<1x32x896xbf16>
      %6 = vector.shape_cast %5 : vector<1x32x896xbf16> to vector<32x896xbf16>
      %cst = arith.constant dense<0.000000e+00> : vector<28x896xf32>
      %7 = tpu.matmul %4, %6, %cst {dimension_numbers = #tpu.dot_dimension_numbers<[1], [0], [0], [1], [0, 0, 1, 1], [], []>} : vector<28x32xbf16>, vector<32x896xbf16>, vector<28x896xf32> -> vector<28x896xf32>
      %8 = arith.index_cast %arg5 : i32 to index
      %c1 = arith.constant 1 : index
      %c0_5 = arith.constant 0 : index
      %9 = vector.load %arg1[%8, %c1, %c0_5] : memref<2x32x32xf32, #tpu.memory_space<vmem>>, vector<1x28x32xf32>
      %10 = vector.shape_cast %9 : vector<1x28x32xf32> to vector<28x32xf32>
      %11 = arith.truncf %10 : vector<28x32xf32> to vector<28x32xbf16>
      %c1_6 = arith.constant 1 : index
      %c0_7 = arith.constant 0 : index
      %c0_8 = arith.constant 0 : index
      %12 = vector.load %arg2[%c1_6, %c0_7, %c0_8] : memref<5x32x896xbf16, #tpu.memory_space<vmem>>, vector<1x32x896xbf16>
      %13 = vector.shape_cast %12 : vector<1x32x896xbf16> to vector<32x896xbf16>
      %cst_9 = arith.constant dense<0.000000e+00> : vector<28x896xf32>
      %14 = tpu.matmul %11, %13, %cst_9 {dimension_numbers = #tpu.dot_dimension_numbers<[1], [0], [0], [1], [0, 0, 1, 1], [], []>} : vector<28x32xbf16>, vector<32x896xbf16>, vector<28x896xf32> -> vector<28x896xf32>
      %15 = arith.addf %7, %14 : vector<28x896xf32>
      %16 = arith.index_cast %arg5 : i32 to index
      %c2 = arith.constant 2 : index
      %c0_10 = arith.constant 0 : index
      %17 = vector.load %arg1[%16, %c2, %c0_10] : memref<2x32x32xf32, #tpu.memory_space<vmem>>, vector<1x28x32xf32>
      %18 = vector.shape_cast %17 : vector<1x28x32xf32> to vector<28x32xf32>
      %19 = arith.truncf %18 : vector<28x32xf32> to vector<28x32xbf16>
      %c2_11 = arith.constant 2 : index
      %c0_12 = arith.constant 0 : index
      %c0_13 = arith.constant 0 : index
      %20 = vector.load %arg2[%c2_11, %c0_12, %c0_13] : memref<5x32x896xbf16, #tpu.memory_space<vmem>>, vector<1x32x896xbf16>
      %21 = vector.shape_cast %20 : vector<1x32x896xbf16> to vector<32x896xbf16>
      %cst_14 = arith.constant dense<0.000000e+00> : vector<28x896xf32>
      %22 = tpu.matmul %19, %21, %cst_14 {dimension_numbers = #tpu.dot_dimension_numbers<[1], [0], [0], [1], [0, 0, 1, 1], [], []>} : vector<28x32xbf16>, vector<32x896xbf16>, vector<28x896xf32> -> vector<28x896xf32>
      %23 = arith.addf %15, %22 : vector<28x896xf32>
      %24 = arith.index_cast %arg5 : i32 to index
      %c3 = arith.constant 3 : index
      %c0_15 = arith.constant 0 : index
      %25 = vector.load %arg1[%24, %c3, %c0_15] : memref<2x32x32xf32, #tpu.memory_space<vmem>>, vector<1x28x32xf32>
      %26 = vector.shape_cast %25 : vector<1x28x32xf32> to vector<28x32xf32>
      %27 = arith.truncf %26 : vector<28x32xf32> to vector<28x32xbf16>
      %c3_16 = arith.constant 3 : index
      %c0_17 = arith.constant 0 : index
      %c0_18 = arith.constant 0 : index
      %28 = vector.load %arg2[%c3_16, %c0_17, %c0_18] : memref<5x32x896xbf16, #tpu.memory_space<vmem>>, vector<1x32x896xbf16>
      %29 = vector.shape_cast %28 : vector<1x32x896xbf16> to vector<32x896xbf16>
      %cst_19 = arith.constant dense<0.000000e+00> : vector<28x896xf32>
      %30 = tpu.matmul %27, %29, %cst_19 {dimension_numbers = #tpu.dot_dimension_numbers<[1], [0], [0], [1], [0, 0, 1, 1], [], []>} : vector<28x32xbf16>, vector<32x896xbf16>, vector<28x896xf32> -> vector<28x896xf32>
      %31 = arith.addf %23, %30 : vector<28x896xf32>
      %32 = arith.index_cast %arg5 : i32 to index
      %c4 = arith.constant 4 : index
      %c0_20 = arith.constant 0 : index
      %33 = vector.load %arg1[%32, %c4, %c0_20] : memref<2x32x32xf32, #tpu.memory_space<vmem>>, vector<1x28x32xf32>
      %34 = vector.shape_cast %33 : vector<1x28x32xf32> to vector<28x32xf32>
      %35 = arith.truncf %34 : vector<28x32xf32> to vector<28x32xbf16>
      %c4_21 = arith.constant 4 : index
      %c0_22 = arith.constant 0 : index
      %c0_23 = arith.constant 0 : index
      %36 = vector.load %arg2[%c4_21, %c0_22, %c0_23] : memref<5x32x896xbf16, #tpu.memory_space<vmem>>, vector<1x32x896xbf16>
      %37 = vector.shape_cast %36 : vector<1x32x896xbf16> to vector<32x896xbf16>
      %cst_24 = arith.constant dense<0.000000e+00> : vector<28x896xf32>
      %38 = tpu.matmul %35, %37, %cst_24 {dimension_numbers = #tpu.dot_dimension_numbers<[1], [0], [0], [1], [0, 0, 1, 1], [], []>} : vector<28x32xbf16>, vector<32x896xbf16>, vector<28x896xf32> -> vector<28x896xf32>
      %39 = arith.addf %31, %38 : vector<28x896xf32>
      %c0_25 = arith.constant 0 : index
      %c0_26 = arith.constant 0 : index
      %40 = vector.load %arg3[%c0_25, %c0_26] : memref<1x896xf32, #tpu.memory_space<vmem>>, vector<1x896xf32>
      %41 = vector.broadcast %40 : vector<1x896xf32> to vector<28x896xf32>
      %42 = arith.addf %39, %41 : vector<28x896xf32>
      %cst_27 = arith.constant 0.000000e+00 : f32
      %43 = vector.broadcast %cst_27 : f32 to vector<28x896xf32>
      %44 = arith.maximumf %42, %43 : vector<28x896xf32>
      %45 = arith.index_cast %arg5 : i32 to index
      %c0_28 = arith.constant 0 : index
      %c0_29 = arith.constant 0 : index
      %46 = vector.load %arg4[%45, %c0_28, %c0_29] : memref<2x28x896xf32, #tpu.memory_space<vmem>>, vector<1x28x896xf32>
      %47 = vector.shape_cast %46 : vector<1x28x896xf32> to vector<28x896xf32>
      %48 = vector.shape_cast %44 : vector<28x896xf32> to vector<1x28x896xf32>
      tpu.vector_store %arg4[%45, %c0_28, %c0_29], %48 {strides = array<i32>} : memref<2x28x896xf32, #tpu.memory_space<vmem>>, vector<1x28x896xf32>,
    }
    %c2_i32_0 = arith.constant 2 : i32
    return
  }
  func.func @transform_0(%arg0: i32) -> (i32, i32, i32) {
    %c0_i32 = arith.constant 0 : i32
    %c0_i32_0 = arith.constant 0 : i32
    %c0_i32_1 = arith.constant 0 : i32
    return %arg0, %c0_i32, %c0_i32_0 : i32, i32, i32
  }
  func.func @transform_1(%arg0: i32) -> (i32, i32, i32) {
    %c0_i32 = arith.constant 0 : i32
    %c0_i32_0 = arith.constant 0 : i32
    %c0_i32_1 = arith.constant 0 : i32
    %c0_i32_2 = arith.constant 0 : i32
    return %c0_i32, %c0_i32_0, %c0_i32_1 : i32, i32, i32
  }
  func.func @transform_2(%arg0: i32) -> (i32, i32) {
    %c0_i32 = arith.constant 0 : i32
    %c0_i32_0 = arith.constant 0 : i32
    %c0_i32_1 = arith.constant 0 : i32
    return %c0_i32, %c0_i32_0 : i32, i32
  }
  func.func @transform_3(%arg0: i32) -> (i32, i32, i32) {
    %c0_i32 = arith.constant 0 : i32
    %c0_i32_0 = arith.constant 0 : i32
    %c0_i32_1 = arith.constant 0 : i32
    return %arg0, %c0_i32, %c0_i32_0 : i32, i32, i32
  }
}

module attributes {stable_mosaic.version = 11 : i64} {
  func.func @_maxpool2x2_kernel(%arg0: i32, %arg1: memref<2x28x14x64xf32, #tpu.memory_space<vmem>>, %arg2: memref<2x14x14x32xf32, #tpu.memory_space<vmem>>) attributes {dimension_semantics = [#tpu.dimension_semantics<parallel>], iteration_bounds = array<i64: 1>, scalar_prefetch = 0 : i64, scratch_operands = 0 : i64, tpu.core_type = #tpu.core_type<tc>, window_params = [{transform_indices = @transform_0, window_bounds = array<i64: 2, 28, 14, 64>}, {transform_indices = @transform_1, window_bounds = array<i64: 2, 14, 14, 32>}]} {
    %c0 = arith.constant 0 : index
    %c0_0 = arith.constant 0 : index
    %c0_1 = arith.constant 0 : index
    %c0_2 = arith.constant 0 : index
    %0 = vector.load %arg1[%c0, %c0_0, %c0_1, %c0_2] : memref<2x28x14x64xf32, #tpu.memory_space<vmem>>, vector<2x28x14x64xf32>
    %1 = vector.extract_strided_slice %0 {offsets = [0, 0, 0, 0], sizes = [2, 28, 14, 32], strides = [1, 1, 1, 1]} : vector<2x28x14x64xf32> to vector<2x28x14x32xf32>
    %2 = vector.extract_strided_slice %0 {offsets = [0, 0, 0, 32], sizes = [2, 28, 14, 32], strides = [1, 1, 1, 1]} : vector<2x28x14x64xf32> to vector<2x28x14x32xf32>
    %3 = arith.maximumf %1, %2 : vector<2x28x14x32xf32>
    %4 = vector.shape_cast %3 : vector<2x28x14x32xf32> to vector<28x2x14x32xf32>
    %5 = vector.extract_strided_slice %4 {offsets = [0, 0, 0, 0], sizes = [28, 1, 14, 32], strides = [1, 1, 1, 1]} : vector<28x2x14x32xf32> to vector<28x1x14x32xf32>
    %6 = vector.shape_cast %5 : vector<28x1x14x32xf32> to vector<28x14x32xf32>
    %7 = vector.extract_strided_slice %4 {offsets = [0, 1, 0, 0], sizes = [28, 1, 14, 32], strides = [1, 1, 1, 1]} : vector<28x2x14x32xf32> to vector<28x1x14x32xf32>
    %8 = vector.shape_cast %7 : vector<28x1x14x32xf32> to vector<28x14x32xf32>
    %9 = arith.maximumf %6, %8 : vector<28x14x32xf32>
    %10 = vector.shape_cast %9 : vector<28x14x32xf32> to vector<2x14x14x32xf32>
    %c0_3 = arith.constant 0 : index
    %c0_4 = arith.constant 0 : index
    %c0_5 = arith.constant 0 : index
    %c0_6 = arith.constant 0 : index
    %11 = vector.load %arg2[%c0_3, %c0_4, %c0_5, %c0_6] : memref<2x14x14x32xf32, #tpu.memory_space<vmem>>, vector<2x14x14x32xf32>
    tpu.vector_store %arg2[%c0_3, %c0_4, %c0_5, %c0_6], %10 {strides = array<i32>} : memref<2x14x14x32xf32, #tpu.memory_space<vmem>>, vector<2x14x14x32xf32>,
    return
  }
  func.func @transform_0(%arg0: i32) -> (i32, i32, i32, i32) {
    %c0_i32 = arith.constant 0 : i32
    %c0_i32_0 = arith.constant 0 : i32
    %c0_i32_1 = arith.constant 0 : i32
    %c0_i32_2 = arith.constant 0 : i32
    return %arg0, %c0_i32, %c0_i32_0, %c0_i32_1 : i32, i32, i32, i32
  }
  func.func @transform_1(%arg0: i32) -> (i32, i32, i32, i32) {
    %c0_i32 = arith.constant 0 : i32
    %c0_i32_0 = arith.constant 0 : i32
    %c0_i32_1 = arith.constant 0 : i32
    %c0_i32_2 = arith.constant 0 : i32
    return %arg0, %c0_i32, %c0_i32_0, %c0_i32_1 : i32, i32, i32, i32
  }
}

module attributes {stable_mosaic.version = 11 : i64} {
  func.func @_conv_rows_kernel(%arg0: i32, %arg1: memref<2x14x448xf32, #tpu.memory_space<vmem>>, %arg2: memref<5x448x320xbf16, #tpu.memory_space<vmem>>, %arg3: memref<1x320xf32, #tpu.memory_space<vmem>>, %arg4: memref<2x10x320xf32, #tpu.memory_space<vmem>>) attributes {dimension_semantics = [#tpu.dimension_semantics<parallel>], iteration_bounds = array<i64: 1>, scalar_prefetch = 0 : i64, scratch_operands = 0 : i64, tpu.core_type = #tpu.core_type<tc>, window_params = [{transform_indices = @transform_0, window_bounds = array<i64: 2, 14, 448>}, {pipeline_mode = #tpu.pipeline_mode<synchronous>, transform_indices = @transform_1, window_bounds = array<i64: 5, 448, 320>}, {pipeline_mode = #tpu.pipeline_mode<synchronous>, transform_indices = @transform_2, window_bounds = array<i64: 1, 320>}, {transform_indices = @transform_3, window_bounds = array<i64: 2, 10, 320>}]} {
    %c0_i32 = arith.constant 0 : i32
    %c2_i32 = arith.constant 2 : i32
    %0 = arith.addi %c0_i32, %c2_i32 : i32
    %c1_i32 = arith.constant 1 : i32
    scf.for %arg5 = %c0_i32 to %0 step %c1_i32  : i32 {
      %1 = arith.index_cast %arg5 : i32 to index
      %c0 = arith.constant 0 : index
      %c0_1 = arith.constant 0 : index
      %2 = vector.load %arg1[%1, %c0, %c0_1] : memref<2x14x448xf32, #tpu.memory_space<vmem>>, vector<1x10x448xf32>
      %3 = vector.shape_cast %2 : vector<1x10x448xf32> to vector<10x448xf32>
      %4 = arith.truncf %3 : vector<10x448xf32> to vector<10x448xbf16>
      %c0_2 = arith.constant 0 : index
      %c0_3 = arith.constant 0 : index
      %c0_4 = arith.constant 0 : index
      %5 = vector.load %arg2[%c0_2, %c0_3, %c0_4] : memref<5x448x320xbf16, #tpu.memory_space<vmem>>, vector<1x448x320xbf16>
      %6 = vector.shape_cast %5 : vector<1x448x320xbf16> to vector<448x320xbf16>
      %cst = arith.constant dense<0.000000e+00> : vector<10x320xf32>
      %7 = tpu.matmul %4, %6, %cst {dimension_numbers = #tpu.dot_dimension_numbers<[1], [0], [0], [1], [0, 0, 1, 1], [], []>} : vector<10x448xbf16>, vector<448x320xbf16>, vector<10x320xf32> -> vector<10x320xf32>
      %8 = arith.index_cast %arg5 : i32 to index
      %c1 = arith.constant 1 : index
      %c0_5 = arith.constant 0 : index
      %9 = vector.load %arg1[%8, %c1, %c0_5] : memref<2x14x448xf32, #tpu.memory_space<vmem>>, vector<1x10x448xf32>
      %10 = vector.shape_cast %9 : vector<1x10x448xf32> to vector<10x448xf32>
      %11 = arith.truncf %10 : vector<10x448xf32> to vector<10x448xbf16>
      %c1_6 = arith.constant 1 : index
      %c0_7 = arith.constant 0 : index
      %c0_8 = arith.constant 0 : index
      %12 = vector.load %arg2[%c1_6, %c0_7, %c0_8] : memref<5x448x320xbf16, #tpu.memory_space<vmem>>, vector<1x448x320xbf16>
      %13 = vector.shape_cast %12 : vector<1x448x320xbf16> to vector<448x320xbf16>
      %cst_9 = arith.constant dense<0.000000e+00> : vector<10x320xf32>
      %14 = tpu.matmul %11, %13, %cst_9 {dimension_numbers = #tpu.dot_dimension_numbers<[1], [0], [0], [1], [0, 0, 1, 1], [], []>} : vector<10x448xbf16>, vector<448x320xbf16>, vector<10x320xf32> -> vector<10x320xf32>
      %15 = arith.addf %7, %14 : vector<10x320xf32>
      %16 = arith.index_cast %arg5 : i32 to index
      %c2 = arith.constant 2 : index
      %c0_10 = arith.constant 0 : index
      %17 = vector.load %arg1[%16, %c2, %c0_10] : memref<2x14x448xf32, #tpu.memory_space<vmem>>, vector<1x10x448xf32>
      %18 = vector.shape_cast %17 : vector<1x10x448xf32> to vector<10x448xf32>
      %19 = arith.truncf %18 : vector<10x448xf32> to vector<10x448xbf16>
      %c2_11 = arith.constant 2 : index
      %c0_12 = arith.constant 0 : index
      %c0_13 = arith.constant 0 : index
      %20 = vector.load %arg2[%c2_11, %c0_12, %c0_13] : memref<5x448x320xbf16, #tpu.memory_space<vmem>>, vector<1x448x320xbf16>
      %21 = vector.shape_cast %20 : vector<1x448x320xbf16> to vector<448x320xbf16>
      %cst_14 = arith.constant dense<0.000000e+00> : vector<10x320xf32>
      %22 = tpu.matmul %19, %21, %cst_14 {dimension_numbers = #tpu.dot_dimension_numbers<[1], [0], [0], [1], [0, 0, 1, 1], [], []>} : vector<10x448xbf16>, vector<448x320xbf16>, vector<10x320xf32> -> vector<10x320xf32>
      %23 = arith.addf %15, %22 : vector<10x320xf32>
      %24 = arith.index_cast %arg5 : i32 to index
      %c3 = arith.constant 3 : index
      %c0_15 = arith.constant 0 : index
      %25 = vector.load %arg1[%24, %c3, %c0_15] : memref<2x14x448xf32, #tpu.memory_space<vmem>>, vector<1x10x448xf32>
      %26 = vector.shape_cast %25 : vector<1x10x448xf32> to vector<10x448xf32>
      %27 = arith.truncf %26 : vector<10x448xf32> to vector<10x448xbf16>
      %c3_16 = arith.constant 3 : index
      %c0_17 = arith.constant 0 : index
      %c0_18 = arith.constant 0 : index
      %28 = vector.load %arg2[%c3_16, %c0_17, %c0_18] : memref<5x448x320xbf16, #tpu.memory_space<vmem>>, vector<1x448x320xbf16>
      %29 = vector.shape_cast %28 : vector<1x448x320xbf16> to vector<448x320xbf16>
      %cst_19 = arith.constant dense<0.000000e+00> : vector<10x320xf32>
      %30 = tpu.matmul %27, %29, %cst_19 {dimension_numbers = #tpu.dot_dimension_numbers<[1], [0], [0], [1], [0, 0, 1, 1], [], []>} : vector<10x448xbf16>, vector<448x320xbf16>, vector<10x320xf32> -> vector<10x320xf32>
      %31 = arith.addf %23, %30 : vector<10x320xf32>
      %32 = arith.index_cast %arg5 : i32 to index
      %c4 = arith.constant 4 : index
      %c0_20 = arith.constant 0 : index
      %33 = vector.load %arg1[%32, %c4, %c0_20] : memref<2x14x448xf32, #tpu.memory_space<vmem>>, vector<1x10x448xf32>
      %34 = vector.shape_cast %33 : vector<1x10x448xf32> to vector<10x448xf32>
      %35 = arith.truncf %34 : vector<10x448xf32> to vector<10x448xbf16>
      %c4_21 = arith.constant 4 : index
      %c0_22 = arith.constant 0 : index
      %c0_23 = arith.constant 0 : index
      %36 = vector.load %arg2[%c4_21, %c0_22, %c0_23] : memref<5x448x320xbf16, #tpu.memory_space<vmem>>, vector<1x448x320xbf16>
      %37 = vector.shape_cast %36 : vector<1x448x320xbf16> to vector<448x320xbf16>
      %cst_24 = arith.constant dense<0.000000e+00> : vector<10x320xf32>
      %38 = tpu.matmul %35, %37, %cst_24 {dimension_numbers = #tpu.dot_dimension_numbers<[1], [0], [0], [1], [0, 0, 1, 1], [], []>} : vector<10x448xbf16>, vector<448x320xbf16>, vector<10x320xf32> -> vector<10x320xf32>
      %39 = arith.addf %31, %38 : vector<10x320xf32>
      %c0_25 = arith.constant 0 : index
      %c0_26 = arith.constant 0 : index
      %40 = vector.load %arg3[%c0_25, %c0_26] : memref<1x320xf32, #tpu.memory_space<vmem>>, vector<1x320xf32>
      %41 = vector.broadcast %40 : vector<1x320xf32> to vector<10x320xf32>
      %42 = arith.addf %39, %41 : vector<10x320xf32>
      %cst_27 = arith.constant 0.000000e+00 : f32
      %43 = vector.broadcast %cst_27 : f32 to vector<10x320xf32>
      %44 = arith.maximumf %42, %43 : vector<10x320xf32>
      %45 = arith.index_cast %arg5 : i32 to index
      %c0_28 = arith.constant 0 : index
      %c0_29 = arith.constant 0 : index
      %46 = vector.load %arg4[%45, %c0_28, %c0_29] : memref<2x10x320xf32, #tpu.memory_space<vmem>>, vector<1x10x320xf32>
      %47 = vector.shape_cast %46 : vector<1x10x320xf32> to vector<10x320xf32>
      %48 = vector.shape_cast %44 : vector<10x320xf32> to vector<1x10x320xf32>
      tpu.vector_store %arg4[%45, %c0_28, %c0_29], %48 {strides = array<i32>} : memref<2x10x320xf32, #tpu.memory_space<vmem>>, vector<1x10x320xf32>,
    }
    %c2_i32_0 = arith.constant 2 : i32
    return
  }
  func.func @transform_0(%arg0: i32) -> (i32, i32, i32) {
    %c0_i32 = arith.constant 0 : i32
    %c0_i32_0 = arith.constant 0 : i32
    %c0_i32_1 = arith.constant 0 : i32
    return %arg0, %c0_i32, %c0_i32_0 : i32, i32, i32
  }
  func.func @transform_1(%arg0: i32) -> (i32, i32, i32) {
    %c0_i32 = arith.constant 0 : i32
    %c0_i32_0 = arith.constant 0 : i32
    %c0_i32_1 = arith.constant 0 : i32
    %c0_i32_2 = arith.constant 0 : i32
    return %c0_i32, %c0_i32_0, %c0_i32_1 : i32, i32, i32
  }
  func.func @transform_2(%arg0: i32) -> (i32, i32) {
    %c0_i32 = arith.constant 0 : i32
    %c0_i32_0 = arith.constant 0 : i32
    %c0_i32_1 = arith.constant 0 : i32
    return %c0_i32, %c0_i32_0 : i32, i32
  }
  func.func @transform_3(%arg0: i32) -> (i32, i32, i32) {
    %c0_i32 = arith.constant 0 : i32
    %c0_i32_0 = arith.constant 0 : i32
    %c0_i32_1 = arith.constant 0 : i32
    return %arg0, %c0_i32, %c0_i32_0 : i32, i32, i32
  }
}

module attributes {stable_mosaic.version = 11 : i64} {
  func.func @_maxpool2x2_kernel(%arg0: i32, %arg1: memref<2x10x5x64xf32, #tpu.memory_space<vmem>>, %arg2: memref<2x5x5x32xf32, #tpu.memory_space<vmem>>) attributes {dimension_semantics = [#tpu.dimension_semantics<parallel>], iteration_bounds = array<i64: 1>, scalar_prefetch = 0 : i64, scratch_operands = 0 : i64, tpu.core_type = #tpu.core_type<tc>, window_params = [{transform_indices = @transform_0, window_bounds = array<i64: 2, 10, 5, 64>}, {transform_indices = @transform_1, window_bounds = array<i64: 2, 5, 5, 32>}]} {
    %c0 = arith.constant 0 : index
    %c0_0 = arith.constant 0 : index
    %c0_1 = arith.constant 0 : index
    %c0_2 = arith.constant 0 : index
    %0 = vector.load %arg1[%c0, %c0_0, %c0_1, %c0_2] : memref<2x10x5x64xf32, #tpu.memory_space<vmem>>, vector<2x10x5x64xf32>
    %1 = vector.extract_strided_slice %0 {offsets = [0, 0, 0, 0], sizes = [2, 10, 5, 32], strides = [1, 1, 1, 1]} : vector<2x10x5x64xf32> to vector<2x10x5x32xf32>
    %2 = vector.extract_strided_slice %0 {offsets = [0, 0, 0, 32], sizes = [2, 10, 5, 32], strides = [1, 1, 1, 1]} : vector<2x10x5x64xf32> to vector<2x10x5x32xf32>
    %3 = arith.maximumf %1, %2 : vector<2x10x5x32xf32>
    %4 = vector.shape_cast %3 : vector<2x10x5x32xf32> to vector<10x2x5x32xf32>
    %5 = vector.extract_strided_slice %4 {offsets = [0, 0, 0, 0], sizes = [10, 1, 5, 32], strides = [1, 1, 1, 1]} : vector<10x2x5x32xf32> to vector<10x1x5x32xf32>
    %6 = vector.shape_cast %5 : vector<10x1x5x32xf32> to vector<10x5x32xf32>
    %7 = vector.extract_strided_slice %4 {offsets = [0, 1, 0, 0], sizes = [10, 1, 5, 32], strides = [1, 1, 1, 1]} : vector<10x2x5x32xf32> to vector<10x1x5x32xf32>
    %8 = vector.shape_cast %7 : vector<10x1x5x32xf32> to vector<10x5x32xf32>
    %9 = arith.maximumf %6, %8 : vector<10x5x32xf32>
    %10 = vector.shape_cast %9 : vector<10x5x32xf32> to vector<2x5x5x32xf32>
    %c0_3 = arith.constant 0 : index
    %c0_4 = arith.constant 0 : index
    %c0_5 = arith.constant 0 : index
    %c0_6 = arith.constant 0 : index
    %11 = vector.load %arg2[%c0_3, %c0_4, %c0_5, %c0_6] : memref<2x5x5x32xf32, #tpu.memory_space<vmem>>, vector<2x5x5x32xf32>
    tpu.vector_store %arg2[%c0_3, %c0_4, %c0_5, %c0_6], %10 {strides = array<i32>} : memref<2x5x5x32xf32, #tpu.memory_space<vmem>>, vector<2x5x5x32xf32>,
    return
  }
  func.func @transform_0(%arg0: i32) -> (i32, i32, i32, i32) {
    %c0_i32 = arith.constant 0 : i32
    %c0_i32_0 = arith.constant 0 : i32
    %c0_i32_1 = arith.constant 0 : i32
    %c0_i32_2 = arith.constant 0 : i32
    return %arg0, %c0_i32, %c0_i32_0, %c0_i32_1 : i32, i32, i32, i32
  }
  func.func @transform_1(%arg0: i32) -> (i32, i32, i32, i32) {
    %c0_i32 = arith.constant 0 : i32
    %c0_i32_0 = arith.constant 0 : i32
    %c0_i32_1 = arith.constant 0 : i32
    %c0_i32_2 = arith.constant 0 : i32
    return %arg0, %c0_i32, %c0_i32_0, %c0_i32_1 : i32, i32, i32, i32
  }
}

module attributes {stable_mosaic.version = 11 : i64} {
  func.func @_matmul_bias_kernel(%arg0: i32, %arg1: memref<2x800xf32, #tpu.memory_space<vmem>>, %arg2: memref<800x256xbf16, #tpu.memory_space<vmem>>, %arg3: memref<1x256xf32, #tpu.memory_space<vmem>>, %arg4: memref<2x256xf32, #tpu.memory_space<vmem>>) attributes {dimension_semantics = [#tpu.dimension_semantics<parallel>], iteration_bounds = array<i64: 1>, scalar_prefetch = 0 : i64, scratch_operands = 0 : i64, tpu.core_type = #tpu.core_type<tc>, window_params = [{transform_indices = @transform_0, window_bounds = array<i64: 2, 800>}, {pipeline_mode = #tpu.pipeline_mode<synchronous>, transform_indices = @transform_1, window_bounds = array<i64: 800, 256>}, {pipeline_mode = #tpu.pipeline_mode<synchronous>, transform_indices = @transform_2, window_bounds = array<i64: 1, 256>}, {transform_indices = @transform_3, window_bounds = array<i64: 2, 256>}]} {
    %c0 = arith.constant 0 : index
    %c0_0 = arith.constant 0 : index
    %0 = vector.load %arg1[%c0, %c0_0] : memref<2x800xf32, #tpu.memory_space<vmem>>, vector<2x800xf32>
    %1 = arith.truncf %0 : vector<2x800xf32> to vector<2x800xbf16>
    %c0_1 = arith.constant 0 : index
    %c0_2 = arith.constant 0 : index
    %2 = vector.load %arg2[%c0_1, %c0_2] : memref<800x256xbf16, #tpu.memory_space<vmem>>, vector<800x256xbf16>
    %cst = arith.constant dense<0.000000e+00> : vector<2x256xf32>
    %3 = tpu.matmul %1, %2, %cst {dimension_numbers = #tpu.dot_dimension_numbers<[1], [0], [0], [1], [0, 0, 1, 1], [], []>} : vector<2x800xbf16>, vector<800x256xbf16>, vector<2x256xf32> -> vector<2x256xf32>
    %c0_3 = arith.constant 0 : index
    %c0_4 = arith.constant 0 : index
    %4 = vector.load %arg3[%c0_3, %c0_4] : memref<1x256xf32, #tpu.memory_space<vmem>>, vector<1x256xf32>
    %5 = vector.broadcast %4 : vector<1x256xf32> to vector<2x256xf32>
    %6 = arith.addf %3, %5 : vector<2x256xf32>
    %cst_5 = arith.constant 0.000000e+00 : f32
    %7 = vector.broadcast %cst_5 : f32 to vector<2x256xf32>
    %8 = arith.maximumf %6, %7 : vector<2x256xf32>
    %c0_6 = arith.constant 0 : index
    %c0_7 = arith.constant 0 : index
    %9 = vector.load %arg4[%c0_6, %c0_7] : memref<2x256xf32, #tpu.memory_space<vmem>>, vector<2x256xf32>
    tpu.vector_store %arg4[%c0_6, %c0_7], %8 {strides = array<i32>} : memref<2x256xf32, #tpu.memory_space<vmem>>, vector<2x256xf32>,
    return
  }
  func.func @transform_0(%arg0: i32) -> (i32, i32) {
    %c0_i32 = arith.constant 0 : i32
    %c0_i32_0 = arith.constant 0 : i32
    return %arg0, %c0_i32 : i32, i32
  }
  func.func @transform_1(%arg0: i32) -> (i32, i32) {
    %c0_i32 = arith.constant 0 : i32
    %c0_i32_0 = arith.constant 0 : i32
    %c0_i32_1 = arith.constant 0 : i32
    return %c0_i32, %c0_i32_0 : i32, i32
  }
  func.func @transform_2(%arg0: i32) -> (i32, i32) {
    %c0_i32 = arith.constant 0 : i32
    %c0_i32_0 = arith.constant 0 : i32
    %c0_i32_1 = arith.constant 0 : i32
    return %c0_i32, %c0_i32_0 : i32, i32
  }
  func.func @transform_3(%arg0: i32) -> (i32, i32) {
    %c0_i32 = arith.constant 0 : i32
    %c0_i32_0 = arith.constant 0 : i32
    return %arg0, %c0_i32 : i32, i32
  }
}

module attributes {stable_mosaic.version = 11 : i64} {
  func.func @_matmul_bias_kernel(%arg0: i32, %arg1: memref<2x256xf32, #tpu.memory_space<vmem>>, %arg2: memref<256x128xbf16, #tpu.memory_space<vmem>>, %arg3: memref<1x128xf32, #tpu.memory_space<vmem>>, %arg4: memref<2x128xf32, #tpu.memory_space<vmem>>) attributes {dimension_semantics = [#tpu.dimension_semantics<parallel>], iteration_bounds = array<i64: 1>, scalar_prefetch = 0 : i64, scratch_operands = 0 : i64, tpu.core_type = #tpu.core_type<tc>, window_params = [{transform_indices = @transform_0, window_bounds = array<i64: 2, 256>}, {pipeline_mode = #tpu.pipeline_mode<synchronous>, transform_indices = @transform_1, window_bounds = array<i64: 256, 128>}, {pipeline_mode = #tpu.pipeline_mode<synchronous>, transform_indices = @transform_2, window_bounds = array<i64: 1, 128>}, {transform_indices = @transform_3, window_bounds = array<i64: 2, 128>}]} {
    %c0 = arith.constant 0 : index
    %c0_0 = arith.constant 0 : index
    %0 = vector.load %arg1[%c0, %c0_0] : memref<2x256xf32, #tpu.memory_space<vmem>>, vector<2x256xf32>
    %1 = arith.truncf %0 : vector<2x256xf32> to vector<2x256xbf16>
    %c0_1 = arith.constant 0 : index
    %c0_2 = arith.constant 0 : index
    %2 = vector.load %arg2[%c0_1, %c0_2] : memref<256x128xbf16, #tpu.memory_space<vmem>>, vector<256x128xbf16>
    %cst = arith.constant dense<0.000000e+00> : vector<2x128xf32>
    %3 = tpu.matmul %1, %2, %cst {dimension_numbers = #tpu.dot_dimension_numbers<[1], [0], [0], [1], [0, 0, 1, 1], [], []>} : vector<2x256xbf16>, vector<256x128xbf16>, vector<2x128xf32> -> vector<2x128xf32>
    %c0_3 = arith.constant 0 : index
    %c0_4 = arith.constant 0 : index
    %4 = vector.load %arg3[%c0_3, %c0_4] : memref<1x128xf32, #tpu.memory_space<vmem>>, vector<1x128xf32>
    %5 = vector.broadcast %4 : vector<1x128xf32> to vector<2x128xf32>
    %6 = arith.addf %3, %5 : vector<2x128xf32>
    %c0_5 = arith.constant 0 : index
    %c0_6 = arith.constant 0 : index
    %7 = vector.load %arg4[%c0_5, %c0_6] : memref<2x128xf32, #tpu.memory_space<vmem>>, vector<2x128xf32>
    tpu.vector_store %arg4[%c0_5, %c0_6], %6 {strides = array<i32>} : memref<2x128xf32, #tpu.memory_space<vmem>>, vector<2x128xf32>,
    return
  }
  func.func @transform_0(%arg0: i32) -> (i32, i32) {
    %c0_i32 = arith.constant 0 : i32
    %c0_i32_0 = arith.constant 0 : i32
    return %arg0, %c0_i32 : i32, i32
  }
  func.func @transform_1(%arg0: i32) -> (i32, i32) {
    %c0_i32 = arith.constant 0 : i32
    %c0_i32_0 = arith.constant 0 : i32
    %c0_i32_1 = arith.constant 0 : i32
    return %c0_i32, %c0_i32_0 : i32, i32
  }
  func.func @transform_2(%arg0: i32) -> (i32, i32) {
    %c0_i32 = arith.constant 0 : i32
    %c0_i32_0 = arith.constant 0 : i32
    %c0_i32_1 = arith.constant 0 : i32
    return %c0_i32, %c0_i32_0 : i32, i32
  }
  func.func @transform_3(%arg0: i32) -> (i32, i32) {
    %c0_i32 = arith.constant 0 : i32
    %c0_i32_0 = arith.constant 0 : i32
    return %arg0, %c0_i32 : i32, i32
  }
}

</mosaic_0001>

<bundles_post_ra>
// kernel: cnn3_forward.7
= control target key start
LH: loop header
LB: loop body
LE: loop exit
PB: predicated region body
PF: predicated region fallthrough
CT: control target
= control target key end

     0   :  { %s799_s10 = smov 96   ;;  %vm736_vm0 = vcmask 261120   ;;  %vm738_vm1 = vcmask 259072   ;;  %s1930_s0 = inlined_call_operand.vmem [shape: f32[2,28,14,64], index: 0, kind: input, shape index: {}]   ;;  %s1931_s1 = inlined_call_operand.vmem [shape: f32[2,14,14,32], index: 1, kind: output, shape index: {}]  }
   0x1   :  { %v813_v0 = vld [vmem:[%s1930_s0 + $0x10] sm:$0xff]  ;;  %v818_v1 = vld [vmem:[%s1930_s0] sm:$0xff]  ;;  %v834_v3 = vld [vmem:[%s1930_s0 + $0x18] sm:$0x3f] }
   0x2   :  { %236 = vrot.lane.b32.xlu1 %v813_v0, %s799_s10  ;;  %232 = vrot.lane.b32.xlu0 %v818_v1, %s799_s10  ;;  %v827_v2 = vld [vmem:[%s1930_s0 + $0x20] sm:$0xff]  ;;  %v839_v4 = vld [vmem:[%s1930_s0 + $0x8] sm:$0x3f] }
   0x3   :  { %240 = vrot.lane.b32.xlu2 %v827_v2, %s799_s10  ;;  %v844_v5 = vld [vmem:[%s1930_s0 + $0x28] sm:$0x3f]  ;;  %v855_v6 = vld [vmem:[%s1930_s0 + $0x38] sm:$0x3f]  ;;  %v860_v7 = vld [vmem:[%s1930_s0 + $0x30] sm:$0xff] }
   0x4   :  { %v865_v8 = vld [vmem:[%s1930_s0 + $0x40] sm:$0xff]  ;;  %v876_v9 = vld [vmem:[%s1930_s0 + $0x50] sm:$0xff]  ;;  %v881_v10 = vld [vmem:[%s1930_s0 + $0x48] sm:$0x3f] }
   0x5   :  { %v886_v11 = vld [vmem:[%s1930_s0 + $0x58] sm:$0x3f]  ;;  %v897_v12 = vld [vmem:[%s1930_s0 + $0x68] sm:$0x3f]  ;;  %v902_v13 = vld [vmem:[%s1930_s0 + $0x60] sm:$0xff] }
   0x6   :  { %v907_v14 = vld [vmem:[%s1930_s0 + $0x70] sm:$0xff]  ;;  %v918_v15 = vld [vmem:[%s1930_s0 + $0x80] sm:$0xff]  ;;  %v923_v16 = vld [vmem:[%s1930_s0 + $0x78] sm:$0x3f] }
   0x7   :  { %v928_v17 = vld [vmem:[%s1930_s0 + $0x88] sm:$0x3f]  ;;  %v939_v18 = vld [vmem:[%s1930_s0 + $0x98] sm:$0x3f]  ;;  %v944_v19 = vld [vmem:[%s1930_s0 + $0x90] sm:$0xff] }
   0x8   :  { %v949_v20 = vld [vmem:[%s1930_s0 + $0xa0] sm:$0xff]  ;;  %v960_v21 = vld [vmem:[%s1930_s0 + $0xb0] sm:$0xff]  ;;  %v965_v22 = vld [vmem:[%s1930_s0 + $0xa8] sm:$0x3f] }
   0x9   :  { %v970_v23 = vld [vmem:[%s1930_s0 + $0xb8] sm:$0x3f]  ;;  %v981_v24 = vld [vmem:[%s1930_s0 + $0xc8] sm:$0x3f]  ;;  %v986_v25 = vld [vmem:[%s1930_s0 + $0xc0] sm:$0xff] }
   0xa   :  { %238 = vrot.lane.b32.xlu1 %v834_v3, %s799_s10  ;;  %234 = vrot.lane.b32.xlu0 %v839_v4, %s799_s10  ;;  %v991_v26 = vld [vmem:[%s1930_s0 + $0xd0] sm:$0xff]  ;;  %v1002_v27 = vld [vmem:[%s1930_s0 + $0xe0] sm:$0xff] }
   0xb   :  { %242 = vrot.lane.b32.xlu2 %v844_v5, %s799_s10  ;;  %v1007_v28 = vld [vmem:[%s1930_s0 + $0xd8] sm:$0x3f]  ;;  %v1012_v29 = vld [vmem:[%s1930_s0 + $0xe8] sm:$0x3f]  ;;  %v1028_v31 = vld [vmem:[%s1930_s0 + $0xf0] sm:$0xff] }
   0xc   :  { %v1023_v30 = vld [vmem:[%s1930_s0 + $0xf8] sm:$0x3f]  ;;  %v1033_v32 = vld [vmem:[%s1930_s0 + $0x100] sm:$0xff]  ;;  %v1044_v33 = vld [vmem:[%s1930_s0 + $0x110] sm:$0xff] }
   0xd   :  { %v1049_v34 = vld [vmem:[%s1930_s0 + $0x108] sm:$0x3f]  ;;  %v1054_v35 = vld [vmem:[%s1930_s0 + $0x118] sm:$0x3f]  ;;  %v1070_v38 = vld [vmem:[%s1930_s0 + $0x120] sm:$0xff] }
   0xe   :  { %v1065_v37 = vld [vmem:[%s1930_s0 + $0x128] sm:$0x3f]  ;;  %v1075_v39 = vld [vmem:[%s1930_s0 + $0x130] sm:$0xff]  ;;  %v1086_v41 = vld [vmem:[%s1930_s0 + $0x140] sm:$0xff] }
   0xf   :  { %v1091_v42 = vld [vmem:[%s1930_s0 + $0x138] sm:$0x3f]  ;;  %v1096_v43 = vld [vmem:[%s1930_s0 + $0x148] sm:$0x3f]  ;;  %v1112_v46 = vld [vmem:[%s1930_s0 + $0x150] sm:$0xff] }
  0x10   :  { %v1107_v45 = vld [vmem:[%s1930_s0 + $0x158] sm:$0x3f]  ;;  %v1117_v47 = vld [vmem:[%s1930_s0 + $0x160] sm:$0xff]  ;;  %v1130_v54 = vld [vmem:[%s1930_s0 + $0x170] sm:$0xff] }
  0x11   :  { %v1135_v55 = vld [vmem:[%s1930_s0 + $0x168] sm:$0x3f]  ;;  %v1144_v56 = vld [vmem:[%s1930_s0 + $0x178] sm:$0x3f] }
  0x12   :  { %246 = vrot.lane.b32.xlu1 %v855_v6, %s799_s10  ;;  %244 = vrot.lane.b32.xlu0 %v860_v7, %s799_s10  ;;  %v1157_v63 = vld [vmem:[%s1930_s0 + $0x188] sm:$0x3f] }
  0x13   :  { %248 = vrot.lane.b32.xlu2 %v865_v8, %s799_s10 }
  0x1a   :  { %252 = vrot.lane.b32.xlu1 %v876_v9, %s799_s10  ;;  %250 = vrot.lane.b32.xlu0 %v881_v10, %s799_s10 }
  0x1b   :  { %254 = vrot.lane.b32.xlu2 %v886_v11, %s799_s10 }
  0x22   :  { %258 = vrot.lane.b32.xlu1 %v897_v12, %s799_s10  ;;  %256 = vrot.lane.b32.xlu0 %v902_v13, %s799_s10 }
  0x23   :  { %260 = vrot.lane.b32.xlu2 %v907_v14, %s799_s10 }
  0x2a   :  { %264 = vrot.lane.b32.xlu1 %v918_v15, %s799_s10  ;;  %262 = vrot.lane.b32.xlu0 %v923_v16, %s799_s10 }
  0x2b   :  { %266 = vrot.lane.b32.xlu2 %v928_v17, %s799_s10 }
  0x32   :  { %270 = vrot.lane.b32.xlu1 %v939_v18, %s799_s10  ;;  %268 = vrot.lane.b32.xlu0 %v944_v19, %s799_s10 }
  0x33   :  { %272 = vrot.lane.b32.xlu2 %v949_v20, %s799_s10 }
  0x3a   :  { %276 = vrot.lane.b32.xlu1 %v960_v21, %s799_s10  ;;  %274 = vrot.lane.b32.xlu0 %v965_v22, %s799_s10 }
  0x3b   :  { %278 = vrot.lane.b32.xlu2 %v970_v23, %s799_s10 }
  0x42   :  { %282 = vrot.lane.b32.xlu1 %v981_v24, %s799_s10  ;;  %280 = vrot.lane.b32.xlu0 %v986_v25, %s799_s10 }
  0x43   :  { %284 = vrot.lane.b32.xlu2 %v991_v26, %s799_s10 }
  0x4a   :  { %288 = vrot.lane.b32.xlu1 %v1002_v27, %s799_s10  ;;  %286 = vrot.lane.b32.xlu0 %v1007_v28, %s799_s10 }
  0x4b   :  { %290 = vrot.lane.b32.xlu2 %v1012_v29, %s799_s10 }
  0x52   :  { %294 = vrot.lane.b32.xlu1 %v1023_v30, %s799_s10  ;;  %292 = vrot.lane.b32.xlu0 %v1028_v31, %s799_s10 }
  0x53   :  { %296 = vrot.lane.b32.xlu2 %v1033_v32, %s799_s10 }
  0x5a   :  { %300 = vrot.lane.b32.xlu1 %v1044_v33, %s799_s10  ;;  %298 = vrot.lane.b32.xlu0 %v1049_v34, %s799_s10 }
  0x5b   :  { %302 = vrot.lane.b32.xlu2 %v1054_v35, %s799_s10 }
  0x5d   :  { %v241_v36 = vpop.permute.xlu2 %240 }
  0x62   :  { %306 = vrot.lane.b32.xlu1 %v1065_v37, %s799_s10  ;;  %304 = vrot.lane.b32.xlu0 %v1070_v38, %s799_s10 }
  0x63   :  { %308 = vrot.lane.b32.xlu2 %v1075_v39, %s799_s10 }
  0x65   :  { %v243_v40 = vpop.permute.xlu2 %242 }
  0x6a   :  { %312 = vrot.lane.b32.xlu1 %v1086_v41, %s799_s10  ;;  %310 = vrot.lane.b32.xlu0 %v1091_v42, %s799_s10 }
  0x6b   :  { %314 = vrot.lane.b32.xlu2 %v1096_v43, %s799_s10 }
  0x6d   :  { %v249_v44 = vpop.permute.xlu2 %248 }
  0x72   :  { %318 = vrot.lane.b32.xlu1 %v1107_v45, %s799_s10  ;;  %316 = vrot.lane.b32.xlu0 %v1112_v46, %s799_s10 }
  0x73   :  { %320 = vrot.lane.b32.xlu2 %v1117_v47, %s799_s10 }
  0x74   :  { %v237_v48 = vpop.permute.xlu1 %236  ;;  %v233_v49 = vpop.permute.xlu0 %232 }
  0x75   :  { %v570_v50 = vmax.f32 %v813_v0, %v237_v48  ;;  %v568_v51 = vmax.f32 %v818_v1, %v233_v49  ;;  %v255_v52 = vpop.permute.xlu2 %254  ;;  %v1162_v0 = vld [vmem:[%s1930_s0 + $0x180] sm:$0xff]  ;;  %v1171_v1 = vld [vmem:[%s1930_s0 + $0x190] sm:$0xff]  ;;  %v572_v49 = vmax.f32 %v827_v2, %v241_v36  ;;  %v1200_v2 = vld [vmem:[%s1930_s0 + $0x1a8] sm:$0x3f] }
  0x77   :  { %v680_v53 = vmax.f32 %v568_v51, %v570_v50 }
  0x79   :  { %737 = vst.msk [vmem:[%s1931_s1] sm:$0xff] %vm736_vm0, %v680_v53 }
  0x7a   :  { %324 = vrot.lane.b32.xlu1 %v1130_v54, %s799_s10  ;;  %322 = vrot.lane.b32.xlu0 %v1135_v55, %s799_s10 }
  0x7b   :  { %326 = vrot.lane.b32.xlu2 %v1144_v56, %s799_s10 }
  0x7c   :  { %v239_v57 = vpop.permute.xlu1 %238  ;;  %v235_v58 = vpop.permute.xlu0 %234 }
  0x7d   :  { %v571_v59 = vmax.f32 %v834_v3, %v239_v57  ;;  %v569_v60 = vmax.f32 %v839_v4, %v235_v58  ;;  %v261_v61 = vpop.permute.xlu2 %260  ;;  %v573_v3 = vmax.f32 %v844_v5, %v243_v40  ;;  %v1191_v5 = vld [vmem:[%s1930_s0 + $0x198] sm:$0x3f] }
  0x7f   :  { %v681_v62 = vmax.f32 %v569_v60, %v571_v59  ;;  %v1186_v59 = vld [vmem:[%s1930_s0 + $0x1a0] sm:$0xff] }
  0x81   :  { %739 = vst.msk [vmem:[%s1931_s1 + $0x8] sm:$0x3f] %vm738_vm1, %v681_v62 }
  0x82   :  { %330 = vrot.lane.b32.xlu1 %v1157_v63, %s799_s10  ;;  %328 = vrot.lane.b32.xlu0 %v1162_v0, %s799_s10 }
  0x83   :  { %332 = vrot.lane.b32.xlu2 %v1171_v1, %s799_s10 }
  0x84   :  { %v247_v4 = vpop.permute.xlu1 %246  ;;  %v245_v48 = vpop.permute.xlu0 %244 }
  0x85   :  { %v575_v50 = vmax.f32 %v855_v6, %v247_v4  ;;  %v574_v51 = vmax.f32 %v860_v7, %v245_v48  ;;  %v267_v53 = vpop.permute.xlu2 %266  ;;  %v576_v6 = vmax.f32 %v865_v8, %v249_v44  ;;  %v579_v7 = vmax.f32 %v886_v11, %v255_v52  ;;  %v1224_v8 = vld [vmem:[%s1930_s0 + $0x1b0] sm:$0xff] }
  0x87   :  { %v683_v57 = vmax.f32 %v573_v3, %v575_v50  ;;  %v682_v58 = vmax.f32 %v572_v49, %v574_v51  ;;  %v1219_v49 = vld [vmem:[%s1930_s0 + $0x1b8] sm:$0x3f] }
  0x89   :  { %741 = vst.msk [vmem:[%s1931_s1 + $0x18] sm:$0x3f] %vm738_vm1, %v683_v57  ;;  %v1250_v57 = vld [vmem:[%s1930_s0 + $0x1d0] sm:$0xff] }
  0x8a   :  { %740 = vst.msk [vmem:[%s1931_s1 + $0x10] sm:$0xff] %vm736_vm0, %v682_v58  ;;  %336 = vrot.lane.b32.xlu1 %v1186_v59, %s799_s10  ;;  %334 = vrot.lane.b32.xlu0 %v1191_v5, %s799_s10  ;;  %v1255_v58 = vld [vmem:[%s1930_s0 + $0x1c8] sm:$0x3f] }
  0x8b   :  { %338 = vrot.lane.b32.xlu2 %v1200_v2, %s799_s10 }
  0x8c   :  { %v253_v36 = vpop.permute.xlu1 %252  ;;  %v251_v40 = vpop.permute.xlu0 %250 }
  0x8d   :  { %v578_v60 = vmax.f32 %v876_v9, %v253_v36  ;;  %v577_v62 = vmax.f32 %v881_v10, %v251_v40  ;;  %v273_v3 = vpop.permute.xlu2 %272  ;;  %v1233_v9 = vld [vmem:[%s1930_s0 + $0x1c0] sm:$0xff]  ;;  %v582_v10 = vmax.f32 %v907_v14, %v261_v61 }
  0x8f   :  { %v684_v4 = vmax.f32 %v576_v6, %v578_v60  ;;  %v685_v48 = vmax.f32 %v577_v62, %v579_v7  ;;  %v1277_v60 = vld [vmem:[%s1930_s0 + $0x1e8] sm:$0x3f]  ;;  %v1282_v62 = vld [vmem:[%s1930_s0 + $0x1e0] sm:$0xff] }
  0x91   :  { %742 = vst.msk [vmem:[%s1931_s1 + $0x20] sm:$0xff] %vm736_vm0, %v684_v4 }
  0x92   :  { %743 = vst.msk [vmem:[%s1931_s1 + $0x28] sm:$0x3f] %vm738_vm1, %v685_v48  ;;  %342 = vrot.lane.b32.xlu1 %v1219_v49, %s799_s10  ;;  %340 = vrot.lane.b32.xlu0 %v1224_v8, %s799_s10 }
  0x93   :  { %344 = vrot.lane.b32.xlu2 %v1233_v9, %s799_s10 }
  0x94   :  { %v259_v11 = vpop.permute.xlu1 %258  ;;  %v257_v44 = vpop.permute.xlu0 %256 }
  0x95   :  { %v580_v52 = vmax.f32 %v902_v13, %v257_v44  ;;  %v279_v50 = vpop.permute.xlu2 %278  ;;  %v1264_v13 = vld [vmem:[%s1930_s0 + $0x1d8] sm:$0x3f]  ;;  %v581_v14 = vmax.f32 %v897_v12, %v259_v11  ;;  %v1291_v12 = vld [vmem:[%s1930_s0 + $0x1f0] sm:$0xff] }
  0x97   :  { %v686_v51 = vmax.f32 %v580_v52, %v582_v10 }
  0x99   :  { %744 = vst.msk [vmem:[%s1931_s1 + $0x30] sm:$0xff] %vm736_vm0, %v686_v51 }
  0x9a   :  { %348 = vrot.lane.b32.xlu1 %v1250_v57, %s799_s10  ;;  %346 = vrot.lane.b32.xlu0 %v1255_v58, %s799_s10 }
  0x9b   :  { %350 = vrot.lane.b32.xlu2 %v1264_v13, %s799_s10 }
  0x9c   :  { %v265_v61 = vpop.permute.xlu1 %264  ;;  %v263_v6 = vpop.permute.xlu0 %262 }
  0x9d   :  { %v583_v7 = vmax.f32 %v923_v16, %v263_v6  ;;  %v285_v36 = vpop.permute.xlu2 %284  ;;  %v585_v16 = vmax.f32 %v928_v17, %v267_v53  ;;  %v584_v4 = vmax.f32 %v918_v15, %v265_v61  ;;  %v1306_v6 = vld [vmem:[%s1930_s0 + $0x200] sm:$0xff]  ;;  %v1311_v15 = vld [vmem:[%s1930_s0 + $0x1f8] sm:$0x3f]  ;;  %v1320_v17 = vld [vmem:[%s1930_s0 + $0x208] sm:$0x3f] }
  0x9f   :  { %v687_v40 = vmax.f32 %v581_v14, %v583_v7 }
  0xa1   :  { %745 = vst.msk [vmem:[%s1931_s1 + $0x38] sm:$0x3f] %vm738_vm1, %v687_v40 }
  0xa2   :  { %354 = vrot.lane.b32.xlu1 %v1277_v60, %s799_s10  ;;  %352 = vrot.lane.b32.xlu0 %v1282_v62, %s799_s10 }
  0xa3   :  { %356 = vrot.lane.b32.xlu2 %v1291_v12, %s799_s10 }
  0xa4   :  { %v271_v48 = vpop.permute.xlu1 %270  ;;  %v269_v10 = vpop.permute.xlu0 %268 }
  0xa5   :  { %v587_v11 = vmax.f32 %v939_v18, %v271_v48  ;;  %v586_v44 = vmax.f32 %v944_v19, %v269_v10  ;;  %v291_v52 = vpop.permute.xlu2 %290  ;;  %v588_v18 = vmax.f32 %v949_v20, %v273_v3  ;;  %v591_v19 = vmax.f32 %v970_v23, %v279_v50  ;;  %v1339_v10 = vld [vmem:[%s1930_s0 + $0x218] sm:$0x3f]  ;;  %v1344_v20 = vld [vmem:[%s1930_s0 + $0x210] sm:$0xff] }
  0xa7   :  { %v689_v51 = vmax.f32 %v585_v16, %v587_v11  ;;  %v688_v14 = vmax.f32 %v584_v4, %v586_v44 }
  0xa9   :  { %747 = vst.msk [vmem:[%s1931_s1 + $0x48] sm:$0x3f] %vm738_vm1, %v689_v51  ;;  %v1370_v51 = vld [vmem:[%s1930_s0 + $0x230] sm:$0xff] }
  0xaa   :  { %746 = vst.msk [vmem:[%s1931_s1 + $0x40] sm:$0xff] %vm736_vm0, %v688_v14  ;;  %360 = vrot.lane.b32.xlu1 %v1306_v6, %s799_s10  ;;  %358 = vrot.lane.b32.xlu0 %v1311_v15, %s799_s10  ;;  %v1375_v14 = vld [vmem:[%s1930_s0 + $0x228] sm:$0x3f] }
  0xab   :  { %362 = vrot.lane.b32.xlu2 %v1320_v17, %s799_s10 }
  0xac   :  { %v277_v53 = vpop.permute.xlu1 %276  ;;  %v275_v61 = vpop.permute.xlu0 %274 }
  0xad   :  { %v590_v7 = vmax.f32 %v960_v21, %v277_v53  ;;  %v589_v40 = vmax.f32 %v965_v22, %v275_v61  ;;  %v297_v16 = vpop.permute.xlu2 %296  ;;  %v1353_v21 = vld [vmem:[%s1930_s0 + $0x220] sm:$0xff]  ;;  %v594_v22 = vmax.f32 %v991_v26, %v285_v36 }
  0xaf   :  { %v690_v4 = vmax.f32 %v588_v18, %v590_v7  ;;  %v691_v48 = vmax.f32 %v589_v40, %v591_v19  ;;  %v1397_v7 = vld [vmem:[%s1930_s0 + $0x248] sm:$0x3f]  ;;  %v1402_v40 = vld [vmem:[%s1930_s0 + $0x240] sm:$0xff] }
  0xb1   :  { %748 = vst.msk [vmem:[%s1931_s1 + $0x50] sm:$0xff] %vm736_vm0, %v690_v4 }
  0xb2   :  { %749 = vst.msk [vmem:[%s1931_s1 + $0x58] sm:$0x3f] %vm738_vm1, %v691_v48  ;;  %366 = vrot.lane.b32.xlu1 %v1339_v10, %s799_s10  ;;  %364 = vrot.lane.b32.xlu0 %v1344_v20, %s799_s10 }
  0xb3   :  { %368 = vrot.lane.b32.xlu2 %v1353_v21, %s799_s10 }
  0xb4   :  { %v283_v23 = vpop.permute.xlu1 %282  ;;  %v281_v3 = vpop.permute.xlu0 %280 }
  0xb5   :  { %v592_v50 = vmax.f32 %v986_v25, %v281_v3  ;;  %v303_v11 = vpop.permute.xlu2 %302  ;;  %v1384_v25 = vld [vmem:[%s1930_s0 + $0x238] sm:$0x3f]  ;;  %v593_v26 = vmax.f32 %v981_v24, %v283_v23  ;;  %v1411_v24 = vld [vmem:[%s1930_s0 + $0x250] sm:$0xff] }
  0xb7   :  { %v692_v44 = vmax.f32 %v592_v50, %v594_v22 }
  0xb9   :  { %750 = vst.msk [vmem:[%s1931_s1 + $0x60] sm:$0xff] %vm736_vm0, %v692_v44 }
  0xba   :  { %372 = vrot.lane.b32.xlu1 %v1370_v51, %s799_s10  ;;  %370 = vrot.lane.b32.xlu0 %v1375_v14, %s799_s10 }
  0xbb   :  { %374 = vrot.lane.b32.xlu2 %v1384_v25, %s799_s10 }
  0xbc   :  { %v289_v36 = vpop.permute.xlu1 %288  ;;  %v287_v18 = vpop.permute.xlu0 %286 }
  0xbd   :  { %v595_v19 = vmax.f32 %v1007_v28, %v287_v18  ;;  %v309_v53 = vpop.permute.xlu2 %308  ;;  %v597_v28 = vmax.f32 %v1012_v29, %v291_v52  ;;  %v596_v4 = vmax.f32 %v1002_v27, %v289_v36  ;;  %v1426_v18 = vld [vmem:[%s1930_s0 + $0x260] sm:$0xff]  ;;  %v1431_v27 = vld [vmem:[%s1930_s0 + $0x258] sm:$0x3f]  ;;  %v1440_v29 = vld [vmem:[%s1930_s0 + $0x268] sm:$0x3f] }
  0xbf   :  { %v693_v61 = vmax.f32 %v593_v26, %v595_v19 }
  0xc1   :  { %751 = vst.msk [vmem:[%s1931_s1 + $0x68] sm:$0x3f] %vm738_vm1, %v693_v61 }
  0xc2   :  { %378 = vrot.lane.b32.xlu1 %v1397_v7, %s799_s10  ;;  %376 = vrot.lane.b32.xlu0 %v1402_v40, %s799_s10 }
  0xc3   :  { %380 = vrot.lane.b32.xlu2 %v1411_v24, %s799_s10 }
  0xc4   :  { %v295_v48 = vpop.permute.xlu1 %294  ;;  %v293_v22 = vpop.permute.xlu0 %292 }
  0xc5   :  { %v599_v23 = vmax.f32 %v1023_v30, %v295_v48  ;;  %v598_v3 = vmax.f32 %v1028_v31, %v293_v22  ;;  %v315_v50 = vpop.permute.xlu2 %314  ;;  %v600_v30 = vmax.f32 %v1033_v32, %v297_v16  ;;  %v603_v31 = vmax.f32 %v1054_v35, %v303_v11  ;;  %v1459_v22 = vld [vmem:[%s1930_s0 + $0x278] sm:$0x3f]  ;;  %v1464_v32 = vld [vmem:[%s1930_s0 + $0x270] sm:$0xff] }
  0xc7   :  { %v695_v44 = vmax.f32 %v597_v28, %v599_v23  ;;  %v694_v26 = vmax.f32 %v596_v4, %v598_v3 }
  0xc9   :  { %753 = vst.msk [vmem:[%s1931_s1 + $0x78] sm:$0x3f] %vm738_vm1, %v695_v44  ;;  %v1490_v44 = vld [vmem:[%s1930_s0 + $0x290] sm:$0xff] }
  0xca   :  { %752 = vst.msk [vmem:[%s1931_s1 + $0x70] sm:$0xff] %vm736_vm0, %v694_v26  ;;  %384 = vrot.lane.b32.xlu1 %v1426_v18, %s799_s10  ;;  %382 = vrot.lane.b32.xlu0 %v1431_v27, %s799_s10  ;;  %v1495_v26 = vld [vmem:[%s1930_s0 + $0x288] sm:$0x3f] }
  0xcb   :  { %386 = vrot.lane.b32.xlu2 %v1440_v29, %s799_s10 }
  0xcc   :  { %v301_v52 = vpop.permute.xlu1 %300  ;;  %v299_v36 = vpop.permute.xlu0 %298 }
  0xcd   :  { %v602_v19 = vmax.f32 %v1044_v33, %v301_v52  ;;  %v601_v61 = vmax.f32 %v1049_v34, %v299_v36  ;;  %v321_v28 = vpop.permute.xlu2 %320  ;;  %v1473_v33 = vld [vmem:[%s1930_s0 + $0x280] sm:$0xff]  ;;  %v606_v34 = vmax.f32 %v1075_v39, %v309_v53 }
  0xcf   :  { %v696_v4 = vmax.f32 %v600_v30, %v602_v19  ;;  %v697_v48 = vmax.f32 %v601_v61, %v603_v31  ;;  %v1517_v19 = vld [vmem:[%s1930_s0 + $0x2a8] sm:$0x3f]  ;;  %v1522_v61 = vld [vmem:[%s1930_s0 + $0x2a0] sm:$0xff] }
  0xd1   :  { %754 = vst.msk [vmem:[%s1931_s1 + $0x80] sm:$0xff] %vm736_vm0, %v696_v4 }
  0xd2   :  { %755 = vst.msk [vmem:[%s1931_s1 + $0x88] sm:$0x3f] %vm738_vm1, %v697_v48  ;;  %390 = vrot.lane.b32.xlu1 %v1459_v22, %s799_s10  ;;  %388 = vrot.lane.b32.xlu0 %v1464_v32, %s799_s10 }
  0xd3   :  { %392 = vrot.lane.b32.xlu2 %v1473_v33, %s799_s10 }
  0xd4   :  { %v307_v35 = vpop.permute.xlu1 %306  ;;  %v305_v16 = vpop.permute.xlu0 %304 }
  0xd5   :  { %v604_v11 = vmax.f32 %v1070_v38, %v305_v16  ;;  %v327_v23 = vpop.permute.xlu2 %326  ;;  %v1504_v38 = vld [vmem:[%s1930_s0 + $0x298] sm:$0x3f]  ;;  %v605_v39 = vmax.f32 %v1065_v37, %v307_v35  ;;  %v1531_v37 = vld [vmem:[%s1930_s0 + $0x2b0] sm:$0xff] }
  0xd7   :  { %v698_v3 = vmax.f32 %v604_v11, %v606_v34 }
  0xd9   :  { %756 = vst.msk [vmem:[%s1931_s1 + $0x90] sm:$0xff] %vm736_vm0, %v698_v3 }
  0xda   :  { %396 = vrot.lane.b32.xlu1 %v1490_v44, %s799_s10  ;;  %394 = vrot.lane.b32.xlu0 %v1495_v26, %s799_s10 }
  0xdb   :  { %398 = vrot.lane.b32.xlu2 %v1504_v38, %s799_s10 }
  0xdc   :  { %v313_v53 = vpop.permute.xlu1 %312  ;;  %v311_v30 = vpop.permute.xlu0 %310 }
  0xdd   :  { %v607_v31 = vmax.f32 %v1091_v42, %v311_v30  ;;  %v333_v52 = vpop.permute.xlu2 %332  ;;  %v609_v42 = vmax.f32 %v1096_v43, %v315_v50  ;;  %v608_v4 = vmax.f32 %v1086_v41, %v313_v53  ;;  %v1546_v30 = vld [vmem:[%s1930_s0 + $0x2c0] sm:$0xff]  ;;  %v1551_v41 = vld [vmem:[%s1930_s0 + $0x2b8] sm:$0x3f]  ;;  %v1560_v43 = vld [vmem:[%s1930_s0 + $0x2c8] sm:$0x3f] }
  0xdf   :  { %v699_v36 = vmax.f32 %v605_v39, %v607_v31 }
  0xe1   :  { %757 = vst.msk [vmem:[%s1931_s1 + $0x98] sm:$0x3f] %vm738_vm1, %v699_v36 }
  0xe2   :  { %402 = vrot.lane.b32.xlu1 %v1517_v19, %s799_s10  ;;  %400 = vrot.lane.b32.xlu0 %v1522_v61, %s799_s10 }
  0xe3   :  { %404 = vrot.lane.b32.xlu2 %v1531_v37, %s799_s10 }
  0xe4   :  { %v319_v48 = vpop.permute.xlu1 %318  ;;  %v317_v34 = vpop.permute.xlu0 %316 }
  0xe5   :  { %v611_v35 = vmax.f32 %v1107_v45, %v319_v48  ;;  %v610_v16 = vmax.f32 %v1112_v46, %v317_v34  ;;  %v339_v11 = vpop.permute.xlu2 %338  ;;  %v612_v45 = vmax.f32 %v1117_v47, %v321_v28  ;;  %v615_v46 = vmax.f32 %v1144_v56, %v327_v23  ;;  %v1579_v34 = vld [vmem:[%s1930_s0 + $0x2d8] sm:$0x3f]  ;;  %v1584_v47 = vld [vmem:[%s1930_s0 + $0x2d0] sm:$0xff] }
  0xe7   :  { %v701_v3 = vmax.f32 %v609_v42, %v611_v35  ;;  %v700_v39 = vmax.f32 %v608_v4, %v610_v16 }
  0xe9   :  { %759 = vst.msk [vmem:[%s1931_s1 + $0xa8] sm:$0x3f] %vm738_vm1, %v701_v3  ;;  %v1610_v3 = vld [vmem:[%s1930_s0 + $0x2f0] sm:$0xff] }
  0xea   :  { %758 = vst.msk [vmem:[%s1931_s1 + $0xa0] sm:$0xff] %vm736_vm0, %v700_v39  ;;  %408 = vrot.lane.b32.xlu1 %v1546_v30, %s799_s10  ;;  %406 = vrot.lane.b32.xlu0 %v1551_v41, %s799_s10  ;;  %v1615_v39 = vld [vmem:[%s1930_s0 + $0x2e8] sm:$0x3f] }
  0xeb   :  { %410 = vrot.lane.b32.xlu2 %v1560_v43, %s799_s10 }
  0xec   :  { %v325_v50 = vpop.permute.xlu1 %324  ;;  %v323_v53 = vpop.permute.xlu0 %322 }
  0xed   :  { %v614_v31 = vmax.f32 %v1130_v54, %v325_v50  ;;  %v613_v36 = vmax.f32 %v1135_v55, %v323_v53  ;;  %v345_v42 = vpop.permute.xlu2 %344  ;;  %v1593_v54 = vld [vmem:[%s1930_s0 + $0x2e0] sm:$0xff]  ;;  %v618_v55 = vmax.f32 %v1171_v1, %v333_v52 }
  0xef   :  { %v702_v4 = vmax.f32 %v612_v45, %v614_v31  ;;  %v703_v48 = vmax.f32 %v613_v36, %v615_v46  ;;  %v1637_v31 = vld [vmem:[%s1930_s0 + $0x308] sm:$0x3f]  ;;  %v1642_v36 = vld [vmem:[%s1930_s0 + $0x300] sm:$0xff] }
  0xf1   :  { %760 = vst.msk [vmem:[%s1931_s1 + $0xb0] sm:$0xff] %vm736_vm0, %v702_v4 }
  0xf2   :  { %761 = vst.msk [vmem:[%s1931_s1 + $0xb8] sm:$0x3f] %vm738_vm1, %v703_v48  ;;  %414 = vrot.lane.b32.xlu1 %v1579_v34, %s799_s10  ;;  %412 = vrot.lane.b32.xlu0 %v1584_v47, %s799_s10 }
  0xf3   :  { %416 = vrot.lane.b32.xlu2 %v1593_v54, %s799_s10 }
  0xf4   :  { %v331_v56 = vpop.permute.xlu1 %330  ;;  %v329_v28 = vpop.permute.xlu0 %328 }
  0xf5   :  { %v616_v23 = vmax.f32 %v1162_v0, %v329_v28  ;;  %v351_v35 = vpop.permute.xlu2 %350  ;;  %v1624_v0 = vld [vmem:[%s1930_s0 + $0x2f8] sm:$0x3f]  ;;  %v617_v1 = vmax.f32 %v1157_v63, %v331_v56  ;;  %v1651_v63 = vld [vmem:[%s1930_s0 + $0x310] sm:$0xff] }
  0xf7   :  { %v704_v16 = vmax.f32 %v616_v23, %v618_v55 }
  0xf9   :  { %762 = vst.msk [vmem:[%s1931_s1 + $0xc0] sm:$0xff] %vm736_vm0, %v704_v16 }
  0xfa   :  { %420 = vrot.lane.b32.xlu1 %v1610_v3, %s799_s10  ;;  %418 = vrot.lane.b32.xlu0 %v1615_v39, %s799_s10 }
  0xfb   :  { %422 = vrot.lane.b32.xlu2 %v1624_v0, %s799_s10 }
  0xfc   :  { %v337_v52 = vpop.permute.xlu1 %336  ;;  %v335_v45 = vpop.permute.xlu0 %334 }
  0xfd   :  { %v619_v46 = vmax.f32 %v1191_v5, %v335_v45  ;;  %v357_v50 = vpop.permute.xlu2 %356  ;;  %v621_v5 = vmax.f32 %v1200_v2, %v339_v11  ;;  %v620_v4 = vmax.f32 %v1186_v59, %v337_v52  ;;  %v1666_v45 = vld [vmem:[%s1930_s0 + $0x320] sm:$0xff]  ;;  %v1671_v59 = vld [vmem:[%s1930_s0 + $0x318] sm:$0x3f]  ;;  %v1680_v2 = vld [vmem:[%s1930_s0 + $0x328] sm:$0x3f] }
  0xff   :  { %v705_v53 = vmax.f32 %v617_v1, %v619_v46 }
 0x101   :  { %763 = vst.msk [vmem:[%s1931_s1 + $0xc8] sm:$0x3f] %vm738_vm1, %v705_v53 }
 0x102   :  { %426 = vrot.lane.b32.xlu1 %v1637_v31, %s799_s10  ;;  %424 = vrot.lane.b32.xlu0 %v1642_v36, %s799_s10 }
 0x103   :  { %428 = vrot.lane.b32.xlu2 %v1651_v63, %s799_s10 }
 0x104   :  { %v343_v48 = vpop.permute.xlu1 %342  ;;  %v341_v55 = vpop.permute.xlu0 %340 }
 0x105   :  { %v623_v56 = vmax.f32 %v1219_v49, %v343_v48  ;;  %v622_v28 = vmax.f32 %v1224_v8, %v341_v55  ;;  %v363_v23 = vpop.permute.xlu2 %362  ;;  %v624_v49 = vmax.f32 %v1233_v9, %v345_v42  ;;  %v627_v8 = vmax.f32 %v1264_v13, %v351_v35  ;;  %v1699_v55 = vld [vmem:[%s1930_s0 + $0x338] sm:$0x3f]  ;;  %v1704_v9 = vld [vmem:[%s1930_s0 + $0x330] sm:$0xff] }
 0x107   :  { %v707_v16 = vmax.f32 %v621_v5, %v623_v56  ;;  %v706_v1 = vmax.f32 %v620_v4, %v622_v28 }
 0x109   :  { %765 = vst.msk [vmem:[%s1931_s1 + $0xd8] sm:$0x3f] %vm738_vm1, %v707_v16  ;;  %v1730_v16 = vld [vmem:[%s1930_s0 + $0x350] sm:$0xff] }
 0x10a   :  { %764 = vst.msk [vmem:[%s1931_s1 + $0xd0] sm:$0xff] %vm736_vm0, %v706_v1  ;;  %432 = vrot.lane.b32.xlu1 %v1666_v45, %s799_s10  ;;  %430 = vrot.lane.b32.xlu0 %v1671_v59, %s799_s10  ;;  %v1735_v1 = vld [vmem:[%s1930_s0 + $0x348] sm:$0x3f] }
 0x10b   :  { %434 = vrot.lane.b32.xlu2 %v1680_v2, %s799_s10 }
 0x10c   :  { %v349_v11 = vpop.permute.xlu1 %348  ;;  %v347_v52 = vpop.permute.xlu0 %346 }
 0x10d   :  { %v626_v46 = vmax.f32 %v1250_v57, %v349_v11  ;;  %v625_v53 = vmax.f32 %v1255_v58, %v347_v52  ;;  %v369_v5 = vpop.permute.xlu2 %368  ;;  %v1713_v57 = vld [vmem:[%s1930_s0 + $0x340] sm:$0xff]  ;;  %v630_v58 = vmax.f32 %v1291_v12, %v357_v50 }
 0x10f   :  { %v708_v4 = vmax.f32 %v624_v49, %v626_v46  ;;  %v709_v48 = vmax.f32 %v625_v53, %v627_v8  ;;  %v1757_v46 = vld [vmem:[%s1930_s0 + $0x360] sm:$0xff]  ;;  %v1762_v53 = vld [vmem:[%s1930_s0 + $0x368] sm:$0x3f] }
 0x111   :  { %766 = vst.msk [vmem:[%s1931_s1 + $0xe0] sm:$0xff] %vm736_vm0, %v708_v4 }
 0x112   :  { %767 = vst.msk [vmem:[%s1931_s1 + $0xe8] sm:$0x3f] %vm738_vm1, %v709_v48  ;;  %438 = vrot.lane.b32.xlu1 %v1699_v55, %s799_s10  ;;  %436 = vrot.lane.b32.xlu0 %v1704_v9, %s799_s10 }
 0x113   :  { %440 = vrot.lane.b32.xlu2 %v1713_v57, %s799_s10 }
 0x114   :  { %v355_v13 = vpop.permute.xlu1 %354  ;;  %v353_v42 = vpop.permute.xlu0 %352 }
 0x115   :  { %v628_v35 = vmax.f32 %v1282_v62, %v353_v42  ;;  %v375_v56 = vpop.permute.xlu2 %374  ;;  %v1744_v62 = vld [vmem:[%s1930_s0 + $0x358] sm:$0x3f]  ;;  %v629_v12 = vmax.f32 %v1277_v60, %v355_v13  ;;  %v1771_v60 = vld [vmem:[%s1930_s0 + $0x370] sm:$0xff] }
 0x117   :  { %v710_v28 = vmax.f32 %v628_v35, %v630_v58 }
 0x119   :  { %768 = vst.msk [vmem:[%s1931_s1 + $0xf0] sm:$0xff] %vm736_vm0, %v710_v28 }
 0x11a   :  { %444 = vrot.lane.b32.xlu1 %v1730_v16, %s799_s10  ;;  %442 = vrot.lane.b32.xlu0 %v1735_v1, %s799_s10 }
 0x11b   :  { %446 = vrot.lane.b32.xlu2 %v1744_v62, %s799_s10 }
 0x11c   :  { %v361_v50 = vpop.permute.xlu1 %360  ;;  %v359_v49 = vpop.permute.xlu0 %358 }
 0x11d   :  { %v631_v8 = vmax.f32 %v1311_v15, %v359_v49  ;;  %v381_v11 = vpop.permute.xlu2 %380  ;;  %v633_v15 = vmax.f32 %v1320_v17, %v363_v23  ;;  %v632_v4 = vmax.f32 %v1306_v6, %v361_v50  ;;  %v1786_v49 = vld [vmem:[%s1930_s0 + $0x378] sm:$0x3f]  ;;  %v636_v6 = vmax.f32 %v1353_v21, %v369_v5 }
 0x11e   :  { %v639_v17 = vmax.f32 %v1384_v25, %v375_v56  ;;  %v642_v21 = vmax.f32 %v1411_v24, %v381_v11 }
 0x11f   :  { %v711_v52 = vmax.f32 %v629_v12, %v631_v8 }
 0x121   :  { %769 = vst.msk [vmem:[%s1931_s1 + $0xf8] sm:$0x3f] %vm738_vm1, %v711_v52 }
 0x122   :  { %448 = vrot.lane.b32.xlu0 %v1757_v46, %s799_s10  ;;  %450 = vrot.lane.b32.xlu1 %v1762_v53, %s799_s10 }
 0x123   :  { %452 = vrot.lane.b32.xlu2 %v1771_v60, %s799_s10 }
 0x124   :  { %v367_v48 = vpop.permute.xlu1 %366  ;;  %v365_v58 = vpop.permute.xlu0 %364 }
 0x125   :  { %v635_v13 = vmax.f32 %v1339_v10, %v367_v48  ;;  %v634_v42 = vmax.f32 %v1344_v20, %v365_v58  ;;  %v387_v35 = vpop.permute.xlu2 %386 }
 0x127   :  { %v713_v28 = vmax.f32 %v633_v15, %v635_v13  ;;  %v712_v12 = vmax.f32 %v632_v4, %v634_v42 }
 0x129   :  { %771 = vst.msk [vmem:[%s1931_s1 + $0x108] sm:$0x3f] %vm738_vm1, %v713_v28 }
 0x12a   :  { %770 = vst.msk [vmem:[%s1931_s1 + $0x100] sm:$0xff] %vm736_vm0, %v712_v12  ;;  %454 = vrot.lane.b32.xlu0 %v1786_v49, %s799_s10 }
 0x12c   :  { %v373_v10 = vpop.permute.xlu1 %372  ;;  %v371_v20 = vpop.permute.xlu0 %370 }
 0x12d   :  { %v638_v23 = vmax.f32 %v1370_v51, %v373_v10  ;;  %v637_v50 = vmax.f32 %v1375_v14, %v371_v20  ;;  %v393_v8 = vpop.permute.xlu2 %392 }
 0x12f   :  { %v714_v52 = vmax.f32 %v636_v6, %v638_v23  ;;  %v715_v15 = vmax.f32 %v637_v50, %v639_v17 }
 0x131   :  { %772 = vst.msk [vmem:[%s1931_s1 + $0x110] sm:$0xff] %vm736_vm0, %v714_v52 }
 0x132   :  { %773 = vst.msk [vmem:[%s1931_s1 + $0x118] sm:$0x3f] %vm738_vm1, %v715_v15 }
 0x134   :  { %v379_v25 = vpop.permute.xlu1 %378  ;;  %v377_v5 = vpop.permute.xlu0 %376 }
 0x135   :  { %v640_v51 = vmax.f32 %v1402_v40, %v377_v5  ;;  %v399_v14 = vpop.permute.xlu2 %398  ;;  %v641_v4 = vmax.f32 %v1397_v7, %v379_v25  ;;  %v645_v40 = vmax.f32 %v1440_v29, %v387_v35 }
 0x136   :  { %v651_v29 = vmax.f32 %v1504_v38, %v399_v14 }
 0x137   :  { %v716_v56 = vmax.f32 %v640_v51, %v642_v21 }
 0x139   :  { %774 = vst.msk [vmem:[%s1931_s1 + $0x120] sm:$0xff] %vm736_vm0, %v716_v56 }
 0x13c   :  { %v385_v48 = vpop.permute.xlu1 %384  ;;  %v383_v58 = vpop.permute.xlu0 %382 }
 0x13d   :  { %v643_v13 = vmax.f32 %v1431_v27, %v383_v58  ;;  %v405_v28 = vpop.permute.xlu2 %404  ;;  %v644_v24 = vmax.f32 %v1426_v18, %v385_v48  ;;  %v648_v18 = vmax.f32 %v1473_v33, %v393_v8 }
 0x13e   :  { %v654_v33 = vmax.f32 %v1531_v37, %v405_v28 }
 0x13f   :  { %v717_v42 = vmax.f32 %v641_v4, %v643_v13 }
 0x141   :  { %775 = vst.msk [vmem:[%s1931_s1 + $0x128] sm:$0x3f] %vm738_vm1, %v717_v42 }
 0x144   :  { %v391_v11 = vpop.permute.xlu1 %390  ;;  %v389_v12 = vpop.permute.xlu0 %388 }
 0x145   :  { %v647_v6 = vmax.f32 %v1459_v22, %v391_v11  ;;  %v646_v7 = vmax.f32 %v1464_v32, %v389_v12  ;;  %v411_v27 = vpop.permute.xlu2 %410 }
 0x147   :  { %v719_v17 = vmax.f32 %v645_v40, %v647_v6  ;;  %v718_v10 = vmax.f32 %v644_v24, %v646_v7 }
 0x149   :  { %777 = vst.msk [vmem:[%s1931_s1 + $0x138] sm:$0x3f] %vm738_vm1, %v719_v17 }
 0x14a   :  { %776 = vst.msk [vmem:[%s1931_s1 + $0x130] sm:$0xff] %vm736_vm0, %v718_v10 }
 0x14c   :  { %v397_v22 = vpop.permute.xlu1 %396  ;;  %v395_v35 = vpop.permute.xlu0 %394 }
 0x14d   :  { %v650_v32 = vmax.f32 %v1490_v44, %v397_v22  ;;  %v649_v20 = vmax.f32 %v1495_v26, %v395_v35  ;;  %v417_v38 = vpop.permute.xlu2 %416 }
 0x14f   :  { %v720_v23 = vmax.f32 %v648_v18, %v650_v32  ;;  %v721_v50 = vmax.f32 %v649_v20, %v651_v29 }
 0x151   :  { %778 = vst.msk [vmem:[%s1931_s1 + $0x140] sm:$0xff] %vm736_vm0, %v720_v23 }
 0x152   :  { %779 = vst.msk [vmem:[%s1931_s1 + $0x148] sm:$0x3f] %vm738_vm1, %v721_v50 }
 0x154   :  { %v403_v8 = vpop.permute.xlu1 %402  ;;  %v401_v52 = vpop.permute.xlu0 %400 }
 0x155   :  { %v652_v44 = vmax.f32 %v1522_v61, %v401_v52  ;;  %v653_v15 = vmax.f32 %v1517_v19, %v403_v8  ;;  %v423_v51 = vpop.permute.xlu2 %422  ;;  %v657_v61 = vmax.f32 %v1560_v43, %v411_v27 }
 0x156   :  { %v663_v43 = vmax.f32 %v1624_v0, %v423_v51 }
 0x157   :  { %v722_v26 = vmax.f32 %v652_v44, %v654_v33 }
 0x159   :  { %780 = vst.msk [vmem:[%s1931_s1 + $0x150] sm:$0xff] %vm736_vm0, %v722_v26 }
 0x15c   :  { %v409_v21 = vpop.permute.xlu1 %408  ;;  %v407_v25 = vpop.permute.xlu0 %406 }
 0x15d   :  { %v655_v5 = vmax.f32 %v1551_v41, %v407_v25  ;;  %v656_v37 = vmax.f32 %v1546_v30, %v409_v21  ;;  %v429_v41 = vpop.permute.xlu2 %428  ;;  %v660_v30 = vmax.f32 %v1593_v54, %v417_v38 }
 0x15e   :  { %v666_v54 = vmax.f32 %v1651_v63, %v429_v41 }
 0x15f   :  { %v723_v14 = vmax.f32 %v653_v15, %v655_v5 }
 0x161   :  { %781 = vst.msk [vmem:[%s1931_s1 + $0x158] sm:$0x3f] %vm738_vm1, %v723_v14 }
 0x164   :  { %v415_v56 = vpop.permute.xlu1 %414  ;;  %v413_v4 = vpop.permute.xlu0 %412 }
 0x165   :  { %v659_v48 = vmax.f32 %v1579_v34, %v415_v56  ;;  %v658_v19 = vmax.f32 %v1584_v47, %v413_v4  ;;  %v435_v11 = vpop.permute.xlu2 %434 }
 0x167   :  { %v725_v58 = vmax.f32 %v657_v61, %v659_v48  ;;  %v724_v13 = vmax.f32 %v656_v37, %v658_v19 }
 0x169   :  { %783 = vst.msk [vmem:[%s1931_s1 + $0x168] sm:$0x3f] %vm738_vm1, %v725_v58 }
 0x16a   :  { %782 = vst.msk [vmem:[%s1931_s1 + $0x160] sm:$0xff] %vm736_vm0, %v724_v13 }
 0x16c   :  { %v421_v34 = vpop.permute.xlu1 %420  ;;  %v419_v42 = vpop.permute.xlu0 %418 }
 0x16d   :  { %v662_v47 = vmax.f32 %v1610_v3, %v421_v34  ;;  %v661_v28 = vmax.f32 %v1615_v39, %v419_v42  ;;  %v441_v7 = vpop.permute.xlu2 %440 }
 0x16f   :  { %v726_v40 = vmax.f32 %v660_v30, %v662_v47  ;;  %v727_v24 = vmax.f32 %v661_v28, %v663_v43 }
 0x171   :  { %784 = vst.msk [vmem:[%s1931_s1 + $0x170] sm:$0xff] %vm736_vm0, %v726_v40 }
 0x172   :  { %785 = vst.msk [vmem:[%s1931_s1 + $0x178] sm:$0x3f] %vm738_vm1, %v727_v24 }
 0x174   :  { %v427_v0 = vpop.permute.xlu1 %426  ;;  %v425_v12 = vpop.permute.xlu0 %424 }
 0x175   :  { %v664_v3 = vmax.f32 %v1642_v36, %v425_v12  ;;  %v665_v6 = vmax.f32 %v1637_v31, %v427_v0  ;;  %v669_v36 = vmax.f32 %v1680_v2, %v435_v11  ;;  %v447_v32 = vpop.permute.xlu2 %446 }
 0x177   :  { %v728_v39 = vmax.f32 %v664_v3, %v666_v54 }
 0x179   :  { %786 = vst.msk [vmem:[%s1931_s1 + $0x180] sm:$0xff] %vm736_vm0, %v728_v39 }
 0x17c   :  { %v433_v17 = vpop.permute.xlu1 %432  ;;  %v431_v10 = vpop.permute.xlu0 %430 }
 0x17d   :  { %v667_v27 = vmax.f32 %v1671_v59, %v431_v10  ;;  %v668_v63 = vmax.f32 %v1666_v45, %v433_v17  ;;  %v672_v45 = vmax.f32 %v1713_v57, %v441_v7  ;;  %v675_v59 = vmax.f32 %v1744_v62, %v447_v32  ;;  %v453_v8 = vpop.permute.xlu2 %452 }
 0x17e   :  { %v678_v57 = vmax.f32 %v1771_v60, %v453_v8 }
 0x17f   :  { %v729_v18 = vmax.f32 %v665_v6, %v667_v27 }
 0x181   :  { %787 = vst.msk [vmem:[%s1931_s1 + $0x188] sm:$0x3f] %vm738_vm1, %v729_v18 }
 0x184   :  { %v439_v29 = vpop.permute.xlu1 %438  ;;  %v437_v22 = vpop.permute.xlu0 %436 }
 0x185   :  { %v671_v35 = vmax.f32 %v1699_v55, %v439_v29  ;;  %v670_v31 = vmax.f32 %v1704_v9, %v437_v22 }
 0x187   :  { %v731_v20 = vmax.f32 %v669_v36, %v671_v35  ;;  %v730_v23 = vmax.f32 %v668_v63, %v670_v31 }
 0x189   :  { %789 = vst.msk [vmem:[%s1931_s1 + $0x198] sm:$0x3f] %vm738_vm1, %v731_v20 }
 0x18a   :  { %788 = vst.msk [vmem:[%s1931_s1 + $0x190] sm:$0xff] %vm736_vm0, %v730_v23 }
 0x18c   :  { %v445_v2 = vpop.permute.xlu1 %444  ;;  %v443_v55 = vpop.permute.xlu0 %442 }
 0x18d   :  { %v674_v9 = vmax.f32 %v1730_v16, %v445_v2  ;;  %v673_v50 = vmax.f32 %v1735_v1, %v443_v55 }
 0x18f   :  { %v732_v33 = vmax.f32 %v672_v45, %v674_v9  ;;  %v733_v38 = vmax.f32 %v673_v50, %v675_v59 }
 0x191   :  { %790 = vst.msk [vmem:[%s1931_s1 + $0x1a0] sm:$0xff] %vm736_vm0, %v732_v33 }
 0x192   :  { %791 = vst.msk [vmem:[%s1931_s1 + $0x1a8] sm:$0x3f] %vm738_vm1, %v733_v38 }
 0x194   :  { %v449_v62 = vpop.permute.xlu0 %448  ;;  %v451_v1 = vpop.permute.xlu1 %450 }
 0x195   :  { %v676_v16 = vmax.f32 %v1757_v46, %v449_v62  ;;  %v677_v44 = vmax.f32 %v1762_v53, %v451_v1 }
 0x197   :  { %v734_v52 = vmax.f32 %v676_v16, %v678_v57 }
 0x199   :  { %792 = vst.msk [vmem:[%s1931_s1 + $0x1b0] sm:$0xff] %vm736_vm0, %v734_v52 }
 0x19c   :  { %v455_v26 = vpop.permute.xlu0 %454 }
 0x19d   :  { %v679_v15 = vmax.f32 %v1786_v49, %v455_v26 }
 0x19f   :  { %v735_v21 = vmax.f32 %v677_v44, %v679_v15 }
 0x1a1   :  { %793 = vst.msk [vmem:[%s1931_s1 + $0x1b8] sm:$0x3f] %vm738_vm1, %v735_v21 }

// kernel: cnn3_forward.6
= control target key start
LH: loop header
LB: loop body
LE: loop exit
PB: predicated region body
PF: predicated region fallthrough
CT: control target
= control target key end

     0   :  { %8 = vsyncpa [#allocation3], 0  ;;  %s2537_s0 = inlined_call_operand.hbm [shape: f32[2,32,32], index: 0, kind: input, shape index: {}]   ;;  %s2538_s1 = inlined_call_operand.hbm [shape: bf16[5,32,896], index: 1, kind: input, shape index: {}]   ;;  %s2539_s2 = inlined_call_operand.hbm [shape: f32[1,896], index: 2, kind: input, shape index: {}]   ;;  %s2540_s3 = inlined_call_operand.vmem [shape: f32[2,28,896], index: 3, kind: output, shape index: {}]  }
   0x1   :  { %9 = vsyncpa [#allocation5], 0  ;;  %s27_s14 = sshll.u32 %s2538_s1, 4  ;;  %s1964_s15 = smov [#allocation4]   ;;  %s28_s14 = int_to_ptr.hbm [resolvable:$true] %s27_s14 }
   0x2   :  { %s29_s16 = sshll.u32 %s1964_s15, 4  ;;  %s14_s19 = sshll.u32 %s2537_s0, 4  ;;  %s30_s16 = int_to_ptr.vmem [resolvable:$true] %s29_s16  ;;  %s15_s19 = int_to_ptr.hbm [resolvable:$true] %s14_s19 }
   0x3   :  { %s1965_s20 = smov 448   ;;  %s1966_s21 = smov 28  }
   0x4   :  { %35 = dma.hbm_to_vmem [thread:$0]  %s28_s14, 8960, %s30_s16, [#allocation5], %s1965_s20, %s1965_s20, %s1966_s21  }
   0x5   :  { %s1967_s22 = smov [#allocation2]   ;;  %s1968_s24 = smov 128  }
   0x6   :  { %s16_s23 = sshll.u32 %s1967_s22, 4  ;;  %s1969_s25 = smov 8   ;;  %s17_s23 = int_to_ptr.vmem [resolvable:$true] %s16_s23 }
   0x7   :  { %22 = dma.hbm_to_vmem [thread:$0]  %s15_s19, 1024, %s17_s23, [#allocation3], %s1968_s24, %s1968_s24, %s1969_s25  }
   0x8   :  { %s41_s27 = sshll.u32 %s2539_s2, 4  ;;  %s1970_s28 = smov [#allocation6]   ;;  %s42_s27 = int_to_ptr.hbm [resolvable:$true] %s41_s27 }
   0x9   :  { %s43_s29 = sshll.u32 %s1970_s28, 4  ;;  %s44_s29 = int_to_ptr.vmem [resolvable:$true] %s43_s29 }
   0xa   :  { %46 = dma.hbm_to_vmem [thread:$0]  %s42_s27, 112, %s44_s29, [#allocation5]  }
   0xb   :  { %1956 = dma.done.wait [#allocation3], 1024  }
   0xc   :  { %1957 = vsyncadd [#allocation3], 4294966272 }
   0xd   :  { %1958 = dma.done.wait [#allocation5], 9072  }
   0xe   :  { %1959 = vsyncadd [#allocation5], 4294958224  ;;  %s2000_s0 = smov 0  }
   0xf LB: > { %v1471_v0 = vld [vmem:[#allocation4 + $0xa8] sm:$0xf]  ;;  %v1816_v1 = vld [vmem:[#allocation4 + $0xc0] sm:$0xf0]  ;;  %v1813_v2 = vld [vmem:[#allocation4 + $0xac] sm:$0xf]  ;;  %s1962_s0 = sphi %s2000_s0, %s65_s0  }
  0x10   : > { %v1472_v3 = vor.u32 %v1816_v1, %v1471_v0  ;;  %v1473_v4 = vld [vmem:[#allocation4 + $0xc4] sm:$0xf0]  ;;  %v1479_v5 = vld [vmem:[#allocation4 + $0xb0] sm:$0xf]  ;;  %v1817_v6 = vld [vmem:[#allocation4 + $0xc8] sm:$0xf0] }
  0x11   : > { %v1476_v7 = vor.u32 %v1813_v2, %v1473_v4  ;;  %v1480_v8 = vor.u32 %v1817_v6, %v1479_v5  ;;  %v1443_v9 = vld [vmem:[#allocation4 + $0x70] sm:$0xf]  ;;  %v1809_v10 = vld [vmem:[#allocation4 + $0x88] sm:$0xf0]  ;;  %v1806_v11 = vld [vmem:[#allocation4 + $0x74] sm:$0xf] }
  0x12   : > { %198 = vmatpush.bf16.msra.mxu0 %v1472_v3  ;;  %1863 = vmatpush.bf16.msra.mxu3 %v1472_v3  ;;  %v1444_v12 = vor.u32 %v1809_v10, %v1443_v9  ;;  %v1445_v13 = vld [vmem:[#allocation4 + $0x8c] sm:$0xf0]  ;;  %v1451_v14 = vld [vmem:[#allocation4 + $0x78] sm:$0xf]  ;;  %v1810_v15 = vld [vmem:[#allocation4 + $0x90] sm:$0xf0] }
  0x13   : > { %217 = vmatpush.bf16.msra.mxu1 %v1476_v7  ;;  %236 = vmatpush.bf16.msra.mxu2 %v1480_v8  ;;  %v1448_v16 = vor.u32 %v1806_v11, %v1445_v13  ;;  %v1452_v17 = vor.u32 %v1810_v15, %v1451_v14  ;;  %s1440_s2 = sshll.u32 %s1962_s0, 5  ;;  %v1495_v18 = vld [vmem:[#allocation4 + $0xc0] sm:$0xf]  ;;  %v1819_v19 = vld [vmem:[#allocation4 + $0xd8] sm:$0xf0]  ;;  %vm185_vm0 = vcmask 261120  }
  0x14   : > { %v1815_v20 = vld [vmem:[#allocation4 + $0xbc] sm:$0xf]  ;;  %s2006_s30 = scalar_lea.vmem [#allocation2], %s1440_s2  ;;  %v1496_v24 = vor.u32 %v1819_v19, %v1495_v18  ;;  %v1489_v27 = vld [vmem:[#allocation4 + $0xd4] sm:$0xf0]  ;;  %s1862_s4 = smul.u32 224, %s1962_s0 }
  0x15   : > { %v90_v21 = vld [vmem:[%s2006_s30 + $0x1] sm:$0xff]  ;;  %v91_v22 = vld [vmem:[%s2006_s30 + $0x9] sm:$0xff]  ;;  %v92_v23 = vld [vmem:[%s2006_s30 + $0x11] sm:$0xff]  ;;  %v1492_v30 = vor.u32 %v1815_v20, %v1489_v27  ;;  %s65_s0 = sadd.s32 1, %s1962_s0  }
  0x16   : > { %199 = vmatpush.bf16.msra.mxu0 %v1444_v12  ;;  %1864 = vmatpush.bf16.msra.mxu3 %v1444_v12  ;;  %v2011_v25 = vpack.c.bf16 %v91_v22, %v90_v21  ;;  %v93_v26 = vld [vmem:[%s2006_s30 + $0x19] sm:$0xf]  ;;  %v1814_v28 = vld [vmem:[#allocation4 + $0xb4] sm:$0xf]  ;;  %v1481_v31 = vld [vmem:[#allocation4 + $0xcc] sm:$0xf0]  ;;  %s2410_s7 = scalar_lea.vmem %s2540_s3, %s1862_s4 }
  0x17   : > { %218 = vmatpush.bf16.msra.mxu1 %v1448_v16  ;;  %237 = vmatpush.bf16.msra.mxu2 %v1452_v17  ;;  %v2014_v29 = vpack.c.bf16 %v93_v26, %v92_v23  ;;  %v1487_v32 = vld [vmem:[#allocation4 + $0xb8] sm:$0xf]  ;;  %v1818_v33 = vld [vmem:[#allocation4 + $0xd0] sm:$0xf0]  ;;  %v1484_v34 = vor.u32 %v1814_v28, %v1481_v31  ;;  %v1807_v36 = vld [vmem:[#allocation4 + $0x7c] sm:$0xf] }
  0x18   : > { %v1488_v35 = vor.u32 %v1818_v33, %v1487_v32  ;;  %v1453_v37 = vld [vmem:[#allocation4 + $0x94] sm:$0xf0]  ;;  %v1459_v38 = vld [vmem:[#allocation4 + $0x80] sm:$0xf]  ;;  %v1811_v39 = vld [vmem:[#allocation4 + $0x98] sm:$0xf0] }
  0x19   : > { %1497 = vmatmul.msk.bf16.vlgmr.msra.gmra.mxu0 %vm185_vm0, %v2011_v25  ;;  %1498 = vmatmul.msk.bf16.vlgmr.msra.gmra.mxu3 %vm185_vm0, %v2014_v29  ;;  %v1467_v40 = vld [vmem:[#allocation4 + $0x88] sm:$0xf]  ;;  %v1812_v41 = vld [vmem:[#allocation4 + $0xa0] sm:$0xf0]  ;;  %v1461_v44 = vld [vmem:[#allocation4 + $0x9c] sm:$0xf0]  ;;  %v1456_v46 = vor.u32 %v1807_v36, %v1453_v37  ;;  %v1460_v51 = vor.u32 %v1811_v39, %v1459_v38 }
  0x1a   : > { %1499 = vmatmul.msk.bf16.vlgmr.msra.gmra.mxu1 %vm185_vm0, %v2011_v25  ;;  %1501 = vmatmul.msk.bf16.vlgmr.msra.gmra.mxu2 %vm185_vm0, %v2011_v25  ;;  %v1468_v42 = vor.u32 %v1812_v41, %v1467_v40  ;;  %v1808_v43 = vld [vmem:[#allocation4 + $0x84] sm:$0xf]  ;;  %v1541_v45 = vld [vmem:[#allocation4 + $0x38] sm:$0xf]  ;;  %v1802_v48 = vld [vmem:[#allocation4 + $0x50] sm:$0xf0] }
  0x1b   : > { %312 = vmatpush.bf16.msrb.mxu2 %v1496_v24  ;;  %293 = vmatpush.bf16.msrb.mxu1 %v1492_v30  ;;  %v1464_v47 = vor.u32 %v1808_v43, %v1461_v44  ;;  %v1800_v49 = vld [vmem:[#allocation4 + $0x44] sm:$0xf]  ;;  %v1551_v50 = vld [vmem:[#allocation4 + $0x5c] sm:$0xf0]  ;;  %v1542_v52 = vor.u32 %v1802_v48, %v1541_v45  ;;  %v1799_v54 = vld [vmem:[#allocation4 + $0x3c] sm:$0xf] }
  0x1c   : > { %255 = vmatpush.bf16.msrb.mxu3 %v1484_v34  ;;  %274 = vmatpush.bf16.msrb.mxu0 %v1488_v35  ;;  %v1554_v53 = vor.u32 %v1800_v49, %v1551_v50  ;;  %v1543_v55 = vld [vmem:[#allocation4 + $0x54] sm:$0xf0]  ;;  %v1549_v56 = vld [vmem:[#allocation4 + $0x40] sm:$0xf]  ;;  %v1803_v58 = vld [vmem:[#allocation4 + $0x58] sm:$0xf0] }
  0x1d   : > { %v1546_v57 = vor.u32 %v1799_v54, %v1543_v55  ;;  %v1513_v59 = vld [vmem:[#allocation4] sm:$0xf]  ;;  %v1795_v60 = vld [vmem:[#allocation4 + $0x18] sm:$0xf0]  ;;  %v1550_v61 = vor.u32 %v1803_v58, %v1549_v56  ;;  %v1792_v62 = vld [vmem:[#allocation4 + $0x4] sm:$0xf] }
  0x1e   : > { %v1515_v63 = vld [vmem:[#allocation4 + $0x1c] sm:$0xf0]  ;;  %v1514_v0 = vor.u32 %v1795_v60, %v1513_v59  ;;  %v1793_v2 = vld [vmem:[#allocation4 + $0xc] sm:$0xf]  ;;  %v1523_v3 = vld [vmem:[#allocation4 + $0x24] sm:$0xf0] }
  0x1f   : > { %313 = vmatpush.bf16.msrb.mxu2 %v1468_v42  ;;  %294 = vmatpush.bf16.msrb.mxu1 %v1464_v47  ;;  %v1518_v1 = vor.u32 %v1792_v62, %v1515_v63  ;;  %v1521_v4 = vld [vmem:[#allocation4 + $0x8] sm:$0xf]  ;;  %v1526_v5 = vor.u32 %v1793_v2, %v1523_v3  ;;  %v1796_v6 = vld [vmem:[#allocation4 + $0x20] sm:$0xf0]  ;;  %v1611_v10 = vld [vmem:[#allocation4 + $0x118] sm:$0xf] }
  0x20   : > { %256 = vmatpush.bf16.msrb.mxu3 %v1456_v46  ;;  %275 = vmatpush.bf16.msrb.mxu0 %v1460_v51  ;;  %v1522_v7 = vor.u32 %v1796_v6, %v1521_v4  ;;  %v1557_v8 = vld [vmem:[#allocation4 + $0x48] sm:$0xf]  ;;  %v1804_v9 = vld [vmem:[#allocation4 + $0x60] sm:$0xf0]  ;;  %v1830_v12 = vld [vmem:[#allocation4 + $0x130] sm:$0xf0] }
  0x21   : > { %v1558_v11 = vor.u32 %v1804_v9, %v1557_v8  ;;  %v1801_v13 = vld [vmem:[#allocation4 + $0x4c] sm:$0xf]  ;;  %v1559_v14 = vld [vmem:[#allocation4 + $0x64] sm:$0xf0]  ;;  %v1612_v15 = vor.u32 %v1830_v12, %v1611_v10  ;;  %v1565_v17 = vld [vmem:[#allocation4 + $0x50] sm:$0xf] }
  0x22   : > { %v1562_v16 = vor.u32 %v1801_v13, %v1559_v14  ;;  %v1805_v18 = vld [vmem:[#allocation4 + $0x68] sm:$0xf0]  ;;  %v1529_v19 = vld [vmem:[#allocation4 + $0x10] sm:$0xf]  ;;  %v1794_v22 = vld [vmem:[#allocation4 + $0x14] sm:$0xf] }
  0x23   : > { %466 = vmatpush.bf16.msra.mxu2 %v1554_v53  ;;  %447 = vmatpush.bf16.msra.mxu1 %v1550_v61  ;;  %v1566_v20 = vor.u32 %v1805_v18, %v1565_v17  ;;  %v1797_v21 = vld [vmem:[#allocation4 + $0x28] sm:$0xf0]  ;;  %v1531_v23 = vld [vmem:[#allocation4 + $0x2c] sm:$0xf0]  ;;  %v68_v26 = vld [vmem:[%s2006_s30] sm:$0xff]  ;;  %p62_p0 = scmp.ge.s32.totalorder %s65_s0, 2  }
  0x24   : > { %409 = vmatpush.bf16.msra.mxu3 %v1542_v52  ;;  %428 = vmatpush.bf16.msra.mxu0 %v1546_v57  ;;  %v1530_v24 = vor.u32 %v1797_v21, %v1529_v19  ;;  %v69_v27 = vld [vmem:[%s2006_s30 + $0x8] sm:$0xff]  ;;  %v1583_v30 = vld [vmem:[#allocation4 + $0xe0] sm:$0xf]  ;;  %v1823_v31 = vld [vmem:[#allocation4 + $0xf8] sm:$0xf0] }
  0x25   : > { %v72_v28 = vpack.c.bf16 %v69_v27, %v68_v26  ;;  %v1537_v32 = vld [vmem:[#allocation4 + $0x18] sm:$0xf]  ;;  %v1584_v33 = vor.u32 %v1823_v31, %v1583_v30  ;;  %v1798_v34 = vld [vmem:[#allocation4 + $0x30] sm:$0xf0]  ;;  %v1627_v40 = vld [vmem:[#allocation4 + $0x128] sm:$0xf] }
  0x26   : > { %v1538_v35 = vor.u32 %v1798_v34, %v1537_v32  ;;  %v70_v36 = vld [vmem:[%s2006_s30 + $0x10] sm:$0xff]  ;;  %v71_v37 = vld [vmem:[%s2006_s30 + $0x18] sm:$0xf]  ;;  %v1832_v42 = vld [vmem:[#allocation4 + $0x140] sm:$0xf0] }
  0x27   : > { %467 = vmatpush.bf16.msra.mxu2 %v1526_v5  ;;  %448 = vmatpush.bf16.msra.mxu1 %v1522_v7  ;;  %v2050_v38 = vpack.c.bf16 %v71_v37, %v70_v36  ;;  %v1613_v39 = vld [vmem:[#allocation4 + $0x134] sm:$0xf0]  ;;  %v1619_v43 = vld [vmem:[#allocation4 + $0x120] sm:$0xf]  ;;  %v1831_v44 = vld [vmem:[#allocation4 + $0x138] sm:$0xf0]  ;;  %v1628_v45 = vor.u32 %v1832_v42, %v1627_v40 }
  0x28   : > { %410 = vmatpush.bf16.msra.mxu3 %v1514_v0  ;;  %429 = vmatpush.bf16.msra.mxu0 %v1518_v1  ;;  %v1620_v46 = vor.u32 %v1831_v44, %v1619_v43  ;;  %v1828_v47 = vld [vmem:[#allocation4 + $0x124] sm:$0xf]  ;;  %v1621_v48 = vld [vmem:[#allocation4 + $0x13c] sm:$0xf0]  ;;  %v1591_v52 = vld [vmem:[#allocation4 + $0xe8] sm:$0xf] }
  0x29   : > { %1503 = vmatmul.msk.bf16.vlgmr.msrb.gmra.mxu3 %vm185_vm0, %v2011_v25  ;;  %1505 = vmatmul.msk.bf16.vlgmr.msrb.gmra.mxu0 %vm185_vm0, %v2011_v25  ;;  %v1820_v49 = vld [vmem:[#allocation4 + $0xe4] sm:$0xf]  ;;  %v1624_v50 = vor.u32 %v1828_v47, %v1621_v48  ;;  %v1585_v51 = vld [vmem:[#allocation4 + $0xfc] sm:$0xf0]  ;;  %v1599_v56 = vld [vmem:[#allocation4 + $0xf0] sm:$0xf] }
  0x2a   : > { %1500 = vmatmul.msk.bf16.gmra.mxu1 %vm185_vm0, %v2014_v29  ;;  %1502 = vmatmul.msk.bf16.gmra.mxu2 %vm185_vm0, %v2014_v29  ;;  %v1824_v53 = vld [vmem:[#allocation4 + $0x100] sm:$0xf0]  ;;  %v1588_v54 = vor.u32 %v1820_v49, %v1585_v51  ;;  %v1825_v57 = vld [vmem:[#allocation4 + $0x108] sm:$0xf0]  ;;  %v1593_v60 = vld [vmem:[#allocation4 + $0x104] sm:$0xf0] }
  0x2b   : > { %v1592_v55 = vor.u32 %v1824_v53, %v1591_v52  ;;  %v1821_v58 = vld [vmem:[#allocation4 + $0xec] sm:$0xf]  ;;  %v1600_v59 = vor.u32 %v1825_v57, %v1599_v56  ;;  %v536_v62 = vld [vmem:[%s2006_s30 + $0x2] sm:$0xff]  ;;  %v1635_v7 = vld [vmem:[#allocation4 + $0x130] sm:$0xf] }
  0x2c   : > { %485 = vmatpush.bf16.msrb.mxu3 %v1558_v11  ;;  %504 = vmatpush.bf16.msrb.mxu0 %v1562_v16  ;;  %v1596_v61 = vor.u32 %v1821_v58, %v1593_v60  ;;  %v537_v63 = vld [vmem:[%s2006_s30 + $0xa] sm:$0xff]  ;;  %v1844_v11 = vld [vmem:[#allocation4 + $0x1a0] sm:$0xf0]  ;;  %v538_v13 = vld [vmem:[%s2006_s30 + $0x12] sm:$0xff] }
  0x2d   : > { %v2066_v0 = vpack.c.bf16 %v537_v63, %v536_v62  ;;  %v1829_v1 = vld [vmem:[#allocation4 + $0x12c] sm:$0xf]  ;;  %v1629_v2 = vld [vmem:[#allocation4 + $0x144] sm:$0xf0]  ;;  %v539_v14 = vld [vmem:[%s2006_s30 + $0x1a] sm:$0xf] }
  0x2e   : > { %v1841_v3 = vld [vmem:[#allocation4 + $0x18c] sm:$0xf]  ;;  %v1632_v4 = vor.u32 %v1829_v1, %v1629_v2  ;;  %v1683_v5 = vld [vmem:[#allocation4 + $0x1a4] sm:$0xf0]  ;;  %v1601_v16 = vld [vmem:[#allocation4 + $0x10c] sm:$0xf0] }
  0x2f   : > { %v1686_v6 = vor.u32 %v1841_v3, %v1683_v5  ;;  %v1833_v8 = vld [vmem:[#allocation4 + $0x148] sm:$0xf0]  ;;  %v1681_v9 = vld [vmem:[#allocation4 + $0x188] sm:$0xf]  ;;  %v1607_v17 = vld [vmem:[#allocation4 + $0xf8] sm:$0xf] }
  0x30   : > { %486 = vmatpush.bf16.msrb.mxu3 %v1530_v24  ;;  %v1636_v10 = vor.u32 %v1833_v8, %v1635_v7  ;;  %v1682_v12 = vor.u32 %v1844_v11, %v1681_v9  ;;  %v1826_v19 = vld [vmem:[#allocation4 + $0x110] sm:$0xf0]  ;;  %v1837_v26 = vld [vmem:[#allocation4 + $0x168] sm:$0xf0]  ;;  %v1689_v31 = vld [vmem:[#allocation4 + $0x190] sm:$0xf] }
  0x31   : > { %v1608_v21 = vor.u32 %v1826_v19, %v1607_v17  ;;  %v1845_v32 = vld [vmem:[#allocation4 + $0x1a8] sm:$0xf0]  ;;  %v1842_v40 = vld [vmem:[#allocation4 + $0x194] sm:$0xf]  ;;  %v1697_v42 = vld [vmem:[#allocation4 + $0x198] sm:$0xf] }
  0x32   : > { %v1690_v34 = vor.u32 %v1845_v32, %v1689_v31  ;;  %v1846_v44 = vld [vmem:[#allocation4 + $0x1b0] sm:$0xf0]  ;;  %v1661_v47 = vld [vmem:[#allocation4 + $0x158] sm:$0xf]  ;;  %v1835_v49 = vld [vmem:[#allocation4 + $0x15c] sm:$0xf] }
  0x33   : > { %v1838_v48 = vld [vmem:[#allocation4 + $0x170] sm:$0xf0]  ;;  %v1663_v52 = vld [vmem:[#allocation4 + $0x174] sm:$0xf0]  ;;  %v1836_v56 = vld [vmem:[#allocation4 + $0x164] sm:$0xf] }
  0x34   : > { %v1662_v51 = vor.u32 %v1838_v48, %v1661_v47  ;;  %v1671_v57 = vld [vmem:[#allocation4 + $0x17c] sm:$0xf0]  ;;  %v799_v3 = vld [vmem:[%s2006_s30 + $0xb] sm:$0xff]  ;;  %v1751_v19 = vld [vmem:[#allocation4 + $0x1f8] sm:$0xf] }
  0x35   : > { %v1674_v58 = vor.u32 %v1836_v56, %v1671_v57  ;;  %v1669_v63 = vld [vmem:[#allocation4 + $0x160] sm:$0xf]  ;;  %v1677_v31 = vld [vmem:[#allocation4 + $0x168] sm:$0xf]  ;;  %v1840_v32 = vld [vmem:[#allocation4 + $0x180] sm:$0xf0] }
  0x36   : > { %v798_v2 = vld [vmem:[%s2006_s30 + $0x3] sm:$0xff] }
  0x37   : > { %v2139_v7 = vpack.c.bf16 %v799_v3, %v798_v2  ;;  %v1705_v9 = vld [vmem:[#allocation4 + $0x1a0] sm:$0xf]  ;;  %v1852_v47 = vld [vmem:[#allocation4 + $0x1e0] sm:$0xf0] }
  0x38   : > { %v1759_v11 = vld [vmem:[#allocation4 + $0x200] sm:$0xf]  ;;  %v1848_v57 = vld [vmem:[#allocation4 + $0x1c4] sm:$0xf] }
  0x39   : > { %1504 = vmatmul.msk.bf16.gmra.mxu3 %vm185_vm0, %v2014_v29  ;;  %1506 = vmatmul.msk.bf16.gmra.mxu0 %vm185_vm0, %v2014_v29 }
  0x3a   : > { %1507 = vmatmul.msk.bf16.vlgmr.msrb.gmra.mxu1 %vm185_vm0, %v2011_v25  ;;  %1509 = vmatmul.msk.bf16.vlgmr.msrb.gmra.mxu2 %vm185_vm0, %v2011_v25  ;;  %v1534_v25 = vor.u32 %v1794_v22, %v1531_v23  ;;  %v1834_v22 = vld [vmem:[#allocation4 + $0x154] sm:$0xf]  ;;  %v1655_v23 = vld [vmem:[#allocation4 + $0x16c] sm:$0xf0] }
  0x3b   : > { %643 = vmatpush.bf16.msrb.mxu2 %v1612_v15  ;;  %523 = vmatpush.bf16.msrb.mxu1 %v1566_v20  ;;  %v1822_v15 = vld [vmem:[#allocation4 + $0xf4] sm:$0xf]  ;;  %v2077_v20 = vpack.c.bf16 %v539_v14, %v538_v13  ;;  %v1658_v24 = vor.u32 %v1834_v22, %v1655_v23  ;;  %v1859_v13 = vld [vmem:[#allocation4 + $0x218] sm:$0xf0]  ;;  %v1753_v23 = vld [vmem:[#allocation4 + $0x214] sm:$0xf0] }
  0x3c   : > { %505 = vmatpush.bf16.msrb.mxu0 %v1534_v25  ;;  %v1604_v18 = vor.u32 %v1822_v15, %v1601_v16  ;;  %v1653_v25 = vld [vmem:[#allocation4 + $0x150] sm:$0xf]  ;;  %v1760_v15 = vor.u32 %v1859_v13, %v1759_v11 }
  0x3d   : > { %v1654_v27 = vor.u32 %v1837_v26, %v1653_v25  ;;  %v800_v25 = vld [vmem:[%s2006_s30 + $0x13] sm:$0xff]  ;;  %v801_v26 = vld [vmem:[%s2006_s30 + $0x1b] sm:$0xf] }
  0x3f   : > { %644 = vmatpush.bf16.msrb.mxu2 %v1584_v33  ;;  %524 = vmatpush.bf16.msrb.mxu1 %v1538_v35  ;;  %v1843_v33 = vld [vmem:[#allocation4 + $0x19c] sm:$0xf]  ;;  %v1699_v35 = vld [vmem:[#allocation4 + $0x1b4] sm:$0xf0] }
  0x40   : > { %v1702_v37 = vor.u32 %v1843_v33, %v1699_v35  ;;  %v1723_v33 = vld [vmem:[#allocation4 + $0x1c0] sm:$0xf]  ;;  %v1678_v35 = vor.u32 %v1840_v32, %v1677_v31  ;;  %v1857_v31 = vld [vmem:[#allocation4 + $0x20c] sm:$0xf] }
  0x49   : > { %1567 = vmatmul.msk.bf16.vlgmr.msra.gmra.mxu3 %vm185_vm0, %v72_v28  ;;  %1569 = vmatmul.msk.bf16.vlgmr.msra.gmra.mxu0 %vm185_vm0, %v72_v28 }
  0x4a   : > { %1508 = vmatmul.msk.bf16.gmra.mxu1 %vm185_vm0, %v2014_v29  ;;  %1510 = vmatmul.msk.bf16.gmra.mxu2 %vm185_vm0, %v2014_v29  ;;  %v1827_v29 = vld [vmem:[#allocation4 + $0x11c] sm:$0xf] }
  0x4b   : > { %v1616_v41 = vor.u32 %v1827_v29, %v1613_v39  ;;  %681 = vmatpush.bf16.msra.mxu0 %v1620_v46 }
  0x4d   : > { %662 = vmatpush.bf16.msra.mxu3 %v1616_v41  ;;  %v1691_v41 = vld [vmem:[#allocation4 + $0x1ac] sm:$0xf0] }
  0x4e   : > { %v1694_v43 = vor.u32 %v1842_v40, %v1691_v41  ;;  %v2165_v41 = vpack.c.bf16 %v801_v26, %v800_v25  ;;  %v1767_v25 = vld [vmem:[#allocation4 + $0x208] sm:$0xf]  ;;  %v1860_v26 = vld [vmem:[#allocation4 + $0x220] sm:$0xf0] }
  0x4f   : > { %682 = vmatpush.bf16.msra.mxu0 %v1592_v55  ;;  %v1768_v32 = vor.u32 %v1860_v26, %v1767_v25 }
  0x51   : > { %663 = vmatpush.bf16.msra.mxu3 %v1588_v54  ;;  %v1666_v54 = vor.u32 %v1835_v49, %v1663_v52 }
  0x59   : > { %1568 = vmatmul.msk.bf16.gmra.mxu3 %vm185_vm0, %v2050_v38  ;;  %1570 = vmatmul.msk.bf16.gmra.mxu0 %vm185_vm0, %v2050_v38 }
  0x5a   : > { %1571 = vmatmul.msk.bf16.vlgmr.msra.gmra.mxu1 %vm185_vm0, %v72_v28  ;;  %1573 = vmatmul.msk.bf16.vlgmr.msra.gmra.mxu2 %vm185_vm0, %v72_v28 }
  0x5b   : > { %719 = vmatpush.bf16.msra.mxu2 %v1628_v45  ;;  %700 = vmatpush.bf16.msra.mxu1 %v1624_v50  ;;  %v1698_v45 = vor.u32 %v1846_v44, %v1697_v42 }
  0x5f   : > { %720 = vmatpush.bf16.msra.mxu2 %v1600_v59  ;;  %701 = vmatpush.bf16.msra.mxu1 %v1596_v61 }
  0x69   : > { %1575 = vmatmul.msk.bf16.vlgmr.msrb.gmra.mxu3 %vm185_vm0, %v72_v28  ;;  %1577 = vmatmul.msk.bf16.vlgmr.msrb.gmra.mxu0 %vm185_vm0, %v72_v28 }
  0x6a   : > { %1572 = vmatmul.msk.bf16.gmra.mxu1 %vm185_vm0, %v2050_v38  ;;  %1574 = vmatmul.msk.bf16.gmra.mxu2 %vm185_vm0, %v2050_v38 }
  0x6b   : > { %738 = vmatpush.bf16.msrb.mxu3 %v1632_v4  ;;  %757 = vmatpush.bf16.msrb.mxu0 %v1636_v10  ;;  %v1847_v10 = vld [vmem:[#allocation4 + $0x1b8] sm:$0xf0] }
  0x6f   : > { %739 = vmatpush.bf16.msrb.mxu3 %v1604_v18  ;;  %758 = vmatpush.bf16.msrb.mxu0 %v1608_v21  ;;  %v1855_v21 = vld [vmem:[#allocation4 + $0x1fc] sm:$0xf] }
  0x79   : > { %1576 = vmatmul.msk.bf16.gmra.mxu3 %vm185_vm0, %v2050_v38  ;;  %1578 = vmatmul.msk.bf16.gmra.mxu0 %vm185_vm0, %v2050_v38 }
  0x7a   : > { %1579 = vmatmul.msk.bf16.vlgmr.msrb.gmra.mxu1 %vm185_vm0, %v72_v28  ;;  %1637 = vmatmul.msk.bf16.vlgmr.msrb.gmra.mxu2 %vm185_vm0, %v2066_v0 }
  0x7b   : > { %924 = vmatpush.bf16.msrb.mxu2 %v1686_v6  ;;  %905 = vmatpush.bf16.msrb.mxu1 %v1682_v12  ;;  %v1706_v12 = vor.u32 %v1847_v10, %v1705_v9 }
  0x7f   : > { %925 = vmatpush.bf16.msrb.mxu2 %v1658_v24  ;;  %906 = vmatpush.bf16.msrb.mxu1 %v1654_v27  ;;  %v1756_v24 = vor.u32 %v1855_v21, %v1753_v23 }
  0x89   : > { %1639 = vmatmul.msk.bf16.vlgmr.msra.gmra.mxu3 %vm185_vm0, %v2066_v0  ;;  %1641 = vmatmul.msk.bf16.vlgmr.msra.gmra.mxu0 %vm185_vm0, %v2066_v0 }
  0x8a   : > { %1580 = vmatmul.msk.bf16.gmra.mxu1 %vm185_vm0, %v2050_v38  ;;  %1638 = vmatmul.msk.bf16.gmra.mxu2 %vm185_vm0, %v2077_v20 }
  0x8b   : > { %943 = vmatpush.bf16.msra.mxu3 %v1690_v34  ;;  %962 = vmatpush.bf16.msra.mxu0 %v1694_v43 }
  0x8f   : > { %944 = vmatpush.bf16.msra.mxu3 %v1662_v51  ;;  %963 = vmatpush.bf16.msra.mxu0 %v1666_v54 }
  0x96   : > { %v2087_v28 = vpop.f32.mrf.mxu0 }
  0x97   : > { %v2089_v30 = vpop.f32.mrf.mxu1 }
  0x99   : > { %1640 = vmatmul.msk.bf16.gmra.mxu3 %vm185_vm0, %v2077_v20  ;;  %1642 = vmatmul.msk.bf16.gmra.mxu0 %vm185_vm0, %v2077_v20 }
  0x9a   : > { %1643 = vmatmul.msk.bf16.vlgmr.msra.gmra.mxu1 %vm185_vm0, %v2066_v0  ;;  %1645 = vmatmul.msk.bf16.vlgmr.msra.gmra.mxu2 %vm185_vm0, %v2066_v0 }
  0x9b   : > { %1000 = vmatpush.bf16.msra.mxu2 %v1702_v37  ;;  %981 = vmatpush.bf16.msra.mxu1 %v1698_v45  ;;  %v1851_v37 = vld [vmem:[#allocation4 + $0x1d8] sm:$0xf0]  ;;  %v1731_v45 = vld [vmem:[#allocation4 + $0x1c8] sm:$0xf] }
  0x9c   : > { %v2099_v36 = vpop.f32.mrf.mxu3  ;;  %v1724_v42 = vor.u32 %v1851_v37, %v1723_v33  ;;  %v1732_v48 = vor.u32 %v1852_v47, %v1731_v45  ;;  %v1060_v33 = vld [vmem:[%s2006_s30 + $0x4] sm:$0xff]  ;;  %v1739_v45 = vld [vmem:[#allocation4 + $0x1d0] sm:$0xf] }
  0x9d   : > { %v2101_v38 = vpop.f32.mrf.mxu2 }
  0x9e   : > { %v2103_v29 = vpop.f32.mrf.mxu0 }
  0x9f   : > { %v2105_v39 = vpop.f32.mrf.mxu1  ;;  %1001 = vmatpush.bf16.msra.mxu2 %v1674_v58  ;;  %v1725_v58 = vld [vmem:[#allocation4 + $0x1dc] sm:$0xf0] }
  0xa4   : > { %v2107_v46 = vpop.f32.mrf.mxu3 }
  0xa5   : > { %v2109_v50 = vpop.f32.mrf.mxu2 }
  0xa6   : > { %v2111_v53 = vpop.f32.mrf.mxu0 }
  0xa7   : > { %v2113_v55 = vpop.f32.mrf.mxu1 }
  0xa9   : > { %1647 = vmatmul.msk.bf16.vlgmr.msrb.gmra.mxu3 %vm185_vm0, %v2066_v0  ;;  %1649 = vmatmul.msk.bf16.vlgmr.msrb.gmra.mxu0 %vm185_vm0, %v2066_v0  ;;  %v1839_v0 = vld [vmem:[#allocation4 + $0x178] sm:$0xf0] }
  0xaa   : > { %1644 = vmatmul.msk.bf16.gmra.mxu1 %vm185_vm0, %v2077_v20  ;;  %1646 = vmatmul.msk.bf16.gmra.mxu2 %vm185_vm0, %v2077_v20  ;;  %v1670_v1 = vor.u32 %v1839_v0, %v1669_v63  ;;  %v1728_v63 = vor.u32 %v1848_v57, %v1725_v58 }
  0xab   : > { %1019 = vmatpush.bf16.msrb.mxu3 %v1706_v12  ;;  %v1861_v12 = vld [vmem:[#allocation4 + $0x228] sm:$0xf0] }
  0xac   : > { %v2123_v59 = vpop.f32.mrf.mxu3  ;;  %982 = vmatpush.bf16.msra.mxu1 %v1670_v1 }
  0xad   : > { %v2125_v60 = vpop.f32.mrf.mxu2 }
  0xae   : > { %v2127_v61 = vpop.f32.mrf.mxu0 }
  0xaf   : > { %v2129_v62 = vpop.f32.mrf.mxu1  ;;  %1020 = vmatpush.bf16.msrb.mxu3 %v1678_v35  ;;  %v1061_v35 = vld [vmem:[%s2006_s30 + $0xc] sm:$0xff] }
  0xb4   : > { %v2133_v4 = vpop.f32.mrf.mxu3 }
  0xb5   : > { %v2135_v5 = vpop.f32.mrf.mxu2 }
  0xb6   : > { %v2137_v6 = vpop.f32.mrf.mxu0 }
  0xb7   : > { %v2141_v8 = vpop.f32.mrf.mxu1 }
  0xb9   : > { %1648 = vmatmul.msk.bf16.gmra.mxu3 %vm185_vm0, %v2077_v20  ;;  %1650 = vmatmul.msk.bf16.gmra.mxu0 %vm185_vm0, %v2077_v20  ;;  %v1858_v20 = vld [vmem:[#allocation4 + $0x210] sm:$0xf0] }
  0xba   : > { %1707 = vmatmul.msk.bf16.vlgmr.msrb.gmra.mxu1 %vm185_vm0, %v2139_v7  ;;  %1709 = vmatmul.msk.bf16.vlgmr.msrb.gmra.mxu2 %vm185_vm0, %v2139_v7  ;;  %v1752_v22 = vor.u32 %v1858_v20, %v1751_v19 }
  0xbb   : > { %1205 = vmatpush.bf16.msrb.mxu2 %v1760_v15  ;;  %1186 = vmatpush.bf16.msrb.mxu1 %v1756_v24 }
  0xbc   : > { %v2151_v14 = vpop.f32.mrf.mxu3  ;;  %1167 = vmatpush.bf16.msrb.mxu0 %v1752_v22 }
  0xbd   : > { %v2153_v16 = vpop.f32.mrf.mxu2 }
  0xbe   : > { %v2155_v17 = vpop.f32.mrf.mxu0 }
  0xbf   : > { %v2157_v18 = vpop.f32.mrf.mxu1  ;;  %1206 = vmatpush.bf16.msrb.mxu2 %v1732_v48  ;;  %1187 = vmatpush.bf16.msrb.mxu1 %v1728_v63 }
  0xc0   : > { %1168 = vmatpush.bf16.msrb.mxu0 %v1724_v42  ;;  %v1733_v42 = vld [vmem:[#allocation4 + $0x1e4] sm:$0xf0] }
  0xc4   : > { %v2161_v27 = vpop.f32.mrf.mxu3 }
  0xc5   : > { %v2163_v34 = vpop.f32.mrf.mxu2 }
  0xc6   : > { %v431_v40 = vpop.f32.mrf.mxu0 }
  0xc7   : > { %v2167_v43 = vpop.f32.mrf.mxu1  ;;  %v2170_v44 = vadd.f32 %v431_v40, %v2089_v30  ;;  %v1849_v40 = vld [vmem:[#allocation4 + $0x1cc] sm:$0xf] }
  0xc8   : > { %v1736_v48 = vor.u32 %v1849_v40, %v1733_v42 }
  0xc9   : > { %1711 = vmatmul.msk.bf16.vlgmr.msra.gmra.mxu3 %vm185_vm0, %v2139_v7  ;;  %1713 = vmatmul.msk.bf16.vlgmr.msra.gmra.mxu0 %vm185_vm0, %v2139_v7 }
  0xca   : > { %1708 = vmatmul.msk.bf16.gmra.mxu1 %vm185_vm0, %v2165_v41  ;;  %1710 = vmatmul.msk.bf16.gmra.mxu2 %vm185_vm0, %v2165_v41 }
  0xcb   : > { %1243 = vmatpush.bf16.msra.mxu0 %v1768_v32 }
  0xcc   : > { %v412_v49 = vpop.f32.mrf.mxu3 }
  0xcd   : > { %v2180_v30 = vpop.f32.mrf.mxu2  ;;  %v2183_v51 = vadd.f32 %v412_v49, %v2087_v28  ;;  %v1853_v49 = vld [vmem:[#allocation4 + $0x1e8] sm:$0xf0] }
  0xce   : > { %v433_v52 = vpop.f32.mrf.mxu0  ;;  %v1740_v58 = vor.u32 %v1853_v49, %v1739_v45 }
  0xcf   : > { %v2185_v54 = vpop.f32.mrf.mxu1  ;;  %v2188_v56 = vadd.f32 %v433_v52, %v2105_v39  ;;  %v1761_v39 = vld [vmem:[#allocation4 + $0x21c] sm:$0xf0] }
  0xd0   : > { %1244 = vmatpush.bf16.msra.mxu0 %v1740_v58 }
  0xd4   : > { %v414_v0 = vpop.f32.mrf.mxu3 }
  0xd5   : > { %v2190_v1 = vpop.f32.mrf.mxu2  ;;  %v2193_v2 = vadd.f32 %v414_v0, %v2103_v29  ;;  %v1856_v29 = vld [vmem:[#allocation4 + $0x204] sm:$0xf] }
  0xd6   : > { %v436_v3 = vpop.f32.mrf.mxu0  ;;  %v1764_v11 = vor.u32 %v1856_v29, %v1761_v39 }
  0xd7   : > { %v2196_v28 = vadd.f32 %v436_v3, %v2113_v55  ;;  %v450_v9 = vpop.f32.mrf.mxu1  ;;  %v1775_v55 = vld [vmem:[#allocation4 + $0x210] sm:$0xf] }
  0xd8   : > { %v2199_v10 = vadd.f32 %v450_v9, %v2101_v38  ;;  %v1776_v38 = vor.u32 %v1861_v12, %v1775_v55  ;;  %1224 = vmatpush.bf16.msra.mxu3 %v1764_v11 }
  0xd9   : > { %1712 = vmatmul.msk.bf16.gmra.mxu3 %vm185_vm0, %v2165_v41  ;;  %1714 = vmatmul.msk.bf16.gmra.mxu0 %vm185_vm0, %v2165_v41 }
  0xda   : > { %1715 = vmatmul.msk.bf16.vlgmr.msra.gmra.mxu1 %vm185_vm0, %v2139_v7  ;;  %1717 = vmatmul.msk.bf16.vlgmr.msra.gmra.mxu2 %vm185_vm0, %v2139_v7 }
  0xdb   : > { %1281 = vmatpush.bf16.msra.mxu2 %v1776_v38  ;;  %v1741_v38 = vld [vmem:[#allocation4 + $0x1ec] sm:$0xf0] }
  0xdc   : > { %v417_v13 = vpop.f32.mrf.mxu3  ;;  %1225 = vmatpush.bf16.msra.mxu3 %v1736_v48 }
  0xdd   : > { %v2210_v15 = vadd.f32 %v417_v13, %v2099_v36  ;;  %v469_v19 = vpop.f32.mrf.mxu2  ;;  %v1769_v36 = vld [vmem:[#allocation4 + $0x224] sm:$0xf0]  ;;  %v1850_v13 = vld [vmem:[#allocation4 + $0x1d4] sm:$0xf] }
  0xde   : > { %v2213_v20 = vadd.f32 %v469_v19, %v2123_v59  ;;  %v438_v21 = vpop.f32.mrf.mxu0  ;;  %v1772_v37 = vor.u32 %v1857_v31, %v1769_v36  ;;  %v1744_v19 = vor.u32 %v1850_v13, %v1741_v38 }
  0xdf   : > { %v2216_v22 = vadd.f32 %v438_v21, %v2129_v62  ;;  %v452_v23 = vpop.f32.mrf.mxu1  ;;  %v1062_v21 = vld [vmem:[%s2006_s30 + $0x14] sm:$0xff] }
  0xe0   : > { %v2219_v24 = vadd.f32 %v452_v23, %v2109_v50  ;;  %1262 = vmatpush.bf16.msra.mxu1 %v1772_v37  ;;  %v2226_v50 = vpack.c.bf16 %v1061_v35, %v1060_v33  ;;  %v1063_v23 = vld [vmem:[%s2006_s30 + $0x1c] sm:$0xf] }
  0xe4   : > { %v419_v59 = vpop.f32.mrf.mxu3  ;;  %1263 = vmatpush.bf16.msra.mxu1 %v1744_v19 }
  0xe5   : > { %v2224_v62 = vadd.f32 %v419_v59, %v2107_v46  ;;  %v471_v47 = vpop.f32.mrf.mxu2  ;;  %v1747_v46 = vld [vmem:[#allocation4 + $0x1d8] sm:$0xf] }
  0xe6   : > { %v2229_v52 = vadd.f32 %v471_v47, %v2133_v4  ;;  %v507_v57 = vpop.f32.mrf.mxu0  ;;  %v1854_v4 = vld [vmem:[#allocation4 + $0x1f0] sm:$0xf0] }
  0xe7   : > { %v455_v63 = vpop.f32.mrf.mxu1  ;;  %v2232_v0 = vadd.f32 %v507_v57, %v2141_v8  ;;  %v1748_v8 = vor.u32 %v1854_v4, %v1747_v46 }
  0xe8   : > { %v2235_v3 = vadd.f32 %v455_v63, %v2125_v60 }
  0xe9   : > { %1719 = vmatmul.msk.bf16.vlgmr.msrb.gmra.mxu3 %vm185_vm0, %v2139_v7  ;;  %1777 = vmatmul.msk.bf16.vlgmr.msrb.gmra.mxu0 %vm185_vm0, %v2226_v50 }
  0xea   : > { %1716 = vmatmul.msk.bf16.gmra.mxu1 %vm185_vm0, %v2165_v41  ;;  %1718 = vmatmul.msk.bf16.gmra.mxu2 %vm185_vm0, %v2165_v41 }
  0xeb   : > { %1282 = vmatpush.bf16.msra.mxu2 %v1748_v8 }
  0xec   : > { %v488_v60 = vpop.f32.mrf.mxu3 }
  0xed   : > { %v474_v9 = vpop.f32.mrf.mxu2  ;;  %v2246_v29 = vadd.f32 %v488_v60, %v2111_v53 }
  0xee   : > { %v2249_v7 = vadd.f32 %v474_v9, %v2151_v14  ;;  %v509_v39 = vpop.f32.mrf.mxu0  ;;  %v2260_v14 = vpack.c.bf16 %v1063_v23, %v1062_v21 }
  0xef   : > { %v457_v55 = vpop.f32.mrf.mxu1  ;;  %v2252_v11 = vadd.f32 %v509_v39, %v2157_v18 }
  0xf0   : > { %v2255_v12 = vadd.f32 %v457_v55, %v2135_v5 }
  0xf4   : > { %v490_v53 = vpop.f32.mrf.mxu3 }
  0xf5   : > { %v476_v25 = vpop.f32.mrf.mxu2  ;;  %v491_v26 = vadd.f32 %v490_v53, %v2127_v61 }
  0xf6   : > { %v2263_v31 = vadd.f32 %v476_v25, %v2161_v27  ;;  %v512_v18 = vpop.f32.mrf.mxu0 }
  0xf7   : > { %v2266_v32 = vadd.f32 %v512_v18, %v2167_v43  ;;  %v526_v5 = vpop.f32.mrf.mxu1 }
  0xf8   : > { %v527_v36 = vadd.f32 %v526_v5, %v2153_v16 }
  0xf9   : > { %1720 = vmatmul.msk.bf16.gmra.mxu3 %vm185_vm0, %v2165_v41  ;;  %1778 = vmatmul.msk.bf16.gmra.mxu0 %vm185_vm0, %v2260_v14 }
  0xfa   : > { %1779 = vmatmul.msk.bf16.vlgmr.msrb.gmra.mxu1 %vm185_vm0, %v2226_v50  ;;  %1781 = vmatmul.msk.bf16.vlgmr.msrb.gmra.mxu2 %vm185_vm0, %v2226_v50 }
  0xfc   : > { %v493_v61 = vpop.f32.mrf.mxu3 }
  0xfd   : > { %v494_v27 = vadd.f32 %v493_v61, %v2137_v6  ;;  %v646_v43 = vpop.f32.mrf.mxu2 }
  0xfe   : > { %v2279_v33 = vadd.f32 %v646_v43, %v2183_v51  ;;  %v514_v16 = vpop.f32.mrf.mxu0 }
  0xff   : > { %v2282_v35 = vadd.f32 %v514_v16, %v2185_v54  ;;  %v528_v41 = vpop.f32.mrf.mxu1 }
 0x100   : > { %v529_v37 = vadd.f32 %v528_v41, %v2163_v34 }
 0x104   : > { %v495_v59 = vpop.f32.mrf.mxu3 }
 0x105   : > { %v496_v40 = vadd.f32 %v495_v59, %v2155_v17  ;;  %v648_v42 = vpop.f32.mrf.mxu2 }
 0x106   : > { %v2287_v45 = vadd.f32 %v648_v42, %v2193_v2  ;;  %v684_v47 = vpop.f32.mrf.mxu0 }
 0x107   : > { %v531_v6 = vpop.f32.mrf.mxu1  ;;  %v2290_v48 = vadd.f32 %v684_v47, %v2199_v10 }
 0x108   : > { %v532_v51 = vadd.f32 %v531_v6, %v2180_v30 }
 0x109   : > { %1783 = vmatmul.msk.bf16.vlgmr.msra.gmra.mxu3 %vm185_vm0, %v2226_v50  ;;  %1785 = vmatmul.msk.bf16.vlgmr.msra.gmra.mxu0 %vm185_vm0, %v2226_v50 }
 0x10a   : > { %1780 = vmatmul.msk.bf16.gmra.mxu1 %vm185_vm0, %v2260_v14  ;;  %1782 = vmatmul.msk.bf16.gmra.mxu2 %vm185_vm0, %v2260_v14 }
 0x10c   : > { %v665_v17 = vpop.f32.mrf.mxu3 }
 0x10d   : > { %v651_v34 = vpop.f32.mrf.mxu2  ;;  %v2302_v54 = vadd.f32 %v665_v17, %v2170_v44 }
 0x10e   : > { %v2305_v2 = vadd.f32 %v651_v34, %v2210_v15  ;;  %v686_v30 = vpop.f32.mrf.mxu0 }
 0x10f   : > { %v533_v10 = vpop.f32.mrf.mxu1  ;;  %v2308_v49 = vadd.f32 %v686_v30, %v2219_v24 }
 0x110   : > { %v534_v57 = vadd.f32 %v533_v10, %v2190_v1 }
 0x114   : > { %v667_v58 = vpop.f32.mrf.mxu3 }
 0x115   : > { %v653_v63 = vpop.f32.mrf.mxu2  ;;  %v2312_v46 = vadd.f32 %v667_v58, %v2188_v56 }
 0x116   : > { %v2315_v4 = vadd.f32 %v653_v63, %v2224_v62  ;;  %v689_v44 = vpop.f32.mrf.mxu0 }
 0x117   : > { %v2318_v8 = vadd.f32 %v689_v44, %v2235_v3  ;;  %v703_v15 = vpop.f32.mrf.mxu1 }
 0x118   : > { %v773_v60 = vadd.f32 %v703_v15, %v2213_v20 }
 0x119   : > { %1784 = vmatmul.msk.bf16.gmra.mxu3 %vm185_vm0, %v2260_v14  ;;  %1786 = vmatmul.msk.bf16.gmra.mxu0 %vm185_vm0, %v2260_v14 }
 0x11a   : > { %1787 = vmatmul.msk.bf16.vlgmr.msra.gmra.mxu1 %vm185_vm0, %v2226_v50  ;;  %1789 = vmatmul.msk.bf16.vlgmr.msra.gmra.mxu2 %vm185_vm0, %v2226_v50 }
 0x11c   : > { %v670_v56 = vpop.f32.mrf.mxu3 }
 0x11d   : > { %v2330_v1 = vadd.f32 %v670_v56, %v2196_v28  ;;  %v722_v24 = vpop.f32.mrf.mxu2 }
 0x11e   : > { %v2333_v62 = vadd.f32 %v722_v24, %v2246_v29  ;;  %v691_v20 = vpop.f32.mrf.mxu0 }
 0x11f   : > { %v2336_v3 = vadd.f32 %v691_v20, %v2255_v12  ;;  %v705_v9 = vpop.f32.mrf.mxu1 }
 0x120   : > { %v780_v39 = vadd.f32 %v705_v9, %v2229_v52  ;;  %v2396_v9 = vld [vmem:[#allocation6] sm:$0xff] }
 0x124   : > { %v672_v55 = vpop.f32.mrf.mxu3 }
 0x125   : > { %v2340_v13 = vadd.f32 %v672_v55, %v2216_v22  ;;  %v724_v50 = vpop.f32.mrf.mxu2 }
 0x126   : > { %v2342_v38 = vadd.f32 %v724_v50, %v491_v26  ;;  %v760_v28 = vpop.f32.mrf.mxu0 }
 0x127   : > { %v708_v19 = vpop.f32.mrf.mxu1  ;;  %v2344_v21 = vadd.f32 %v760_v28, %v527_v36  ;;  %v1324_v28 = vperm.slane %v2396_v9, 0 }
 0x128   : > { %v787_v29 = vadd.f32 %v708_v19, %v2249_v7 }
 0x12a   : > { %1788 = vmatmul.msk.bf16.gmra.mxu1 %vm185_vm0, %v2260_v14  ;;  %1790 = vmatmul.msk.bf16.gmra.mxu2 %vm185_vm0, %v2260_v14 }
 0x12c   : > { %v741_v52 = vpop.f32.mrf.mxu3 }
 0x12d   : > { %v727_v12 = vpop.f32.mrf.mxu2  ;;  %v2352_v22 = vadd.f32 %v741_v52, %v2232_v0 }
 0x12e   : > { %v2354_v23 = vadd.f32 %v727_v12, %v494_v27  ;;  %v762_v53 = vpop.f32.mrf.mxu0 }
 0x12f   : > { %v710_v25 = vpop.f32.mrf.mxu1  ;;  %v2356_v26 = vadd.f32 %v762_v53, %v529_v37 }
 0x130   : > { %v794_v18 = vadd.f32 %v710_v25, %v2263_v31 }
 0x134   : > { %v743_v7 = vpop.f32.mrf.mxu3 }
 0x135   : > { %v729_v5 = vpop.f32.mrf.mxu2  ;;  %v2360_v36 = vadd.f32 %v743_v7, %v2252_v11 }
 0x136   : > { %v2362_v61 = vadd.f32 %v729_v5, %v496_v40  ;;  %v765_v14 = vpop.f32.mrf.mxu0 }
 0x137   : > { %v2364_v43 = vadd.f32 %v765_v14, %v532_v51  ;;  %v908_v0 = vpop.f32.mrf.mxu1 }
 0x138   : > { %v1032_v55 = vadd.f32 %v908_v0, %v2279_v33 }
 0x13c   : > { %v746_v16 = vpop.f32.mrf.mxu3 }
 0x13d   : > { %v2367_v27 = vadd.f32 %v746_v16, %v2266_v32  ;;  %v927_v41 = vpop.f32.mrf.mxu2 }
 0x13e   : > { %v767_v37 = vpop.f32.mrf.mxu0 }
 0x13f   : > { %v2369_v59 = vadd.f32 %v767_v37, %v534_v57  ;;  %v910_v31 = vpop.f32.mrf.mxu1 }
 0x140   : > { %v1039_v33 = vadd.f32 %v910_v31, %v2287_v45  ;;  %v2428_v31 = vperm.slane %v2396_v9, 1 }
 0x144   : > { %v748_v42 = vpop.f32.mrf.mxu3 }
 0x145   : > { %v2372_v47 = vadd.f32 %v748_v42, %v2282_v35  ;;  %v929_v11 = vpop.f32.mrf.mxu2 }
 0x146   : > { %v965_v40 = vpop.f32.mrf.mxu0 }
 0x147   : > { %v913_v6 = vpop.f32.mrf.mxu1  ;;  %v2374_v17 = vadd.f32 %v965_v40, %v773_v60 }
 0x148   : > { %v1046_v42 = vadd.f32 %v913_v6, %v2305_v2 }
 0x14c   : > { %v946_v51 = vpop.f32.mrf.mxu3 }
 0x14d   : > { %v2376_v34 = vpop.f32.mrf.mxu2  ;;  %v1034_v2 = vadd.f32 %v946_v51, %v2290_v48 }
 0x14e   : > { %v967_v30 = vpop.f32.mrf.mxu0 }
 0x14f   : > { %v915_v32 = vpop.f32.mrf.mxu1  ;;  %v2378_v10 = vadd.f32 %v967_v30, %v780_v39  ;;  %v1033_v30 = vadd.f32 %v927_v41, %v2302_v54 }
 0x150   : > { %v1053_v54 = vadd.f32 %v915_v32, %v2315_v4 }
 0x154   : > { %v2380_v57 = vpop.f32.mrf.mxu3 }
 0x155   : > { %v2382_v58 = vpop.f32.mrf.mxu2  ;;  %v1041_v32 = vadd.f32 %v2380_v57, %v2308_v49 }
 0x156   : > { %v970_v63 = vpop.f32.mrf.mxu0 }
 0x157   : > { %v2384_v35 = vadd.f32 %v970_v63, %v787_v29  ;;  %v2386_v44 = vpop.f32.mrf.mxu1 }
 0x15c   : > { %v2388_v15 = vpop.f32.mrf.mxu3 }
 0x15d   : > { %v2390_v60 = vpop.f32.mrf.mxu2 }
 0x15e   : > { %v972_v56 = vpop.f32.mrf.mxu0 }
 0x15f   : > { %v2392_v24 = vadd.f32 %v972_v56, %v794_v18  ;;  %v2394_v20 = vpop.f32.mrf.mxu1 }
 0x164   : > { %v2398_v39 = vpop.f32.mrf.mxu3 }
 0x165   : > { %v2401_v50 = vpop.f32.mrf.mxu2 }
 0x166   : > { %v1170_v19 = vpop.f32.mrf.mxu0 }
 0x167   : > { %v2405_v29 = vpop.f32.mrf.mxu1  ;;  %v1294_v52 = vadd.f32 %v1170_v19, %v1032_v55 }
 0x169   : > { %v1338_v12 = vadd.f32 %v1324_v28, %v1294_v52 }
 0x16b   : > { %v1366_v53 = vmax.f32 %v1338_v12, 0.0 }
 0x16c   : > { %v2412_v25 = vpop.f32.mrf.mxu3 }
 0x16d   : > { %1397 = vst [vmem:[%s2410_s7] sm:$0xff] %v1366_v53  ;;  %v2416_v18 = vpop.f32.mrf.mxu2 }
 0x16e   : > { %v1172_v7 = vpop.f32.mrf.mxu0 }
 0x16f   : > { %v2418_v5 = vpop.f32.mrf.mxu1  ;;  %v1301_v14 = vadd.f32 %v1172_v7, %v1039_v33  ;;  %v2435_v33 = vperm.slane %v2396_v9, 2  ;;  %v1040_v7 = vadd.f32 %v929_v11, %v2312_v46 }
 0x171   : > { %v1345_v0 = vadd.f32 %v1324_v28, %v1301_v14 }
 0x173   : > { %v1373_v16 = vmax.f32 %v1345_v0, 0.0 }
 0x174   : > { %v2420_v37 = vpop.f32.mrf.mxu3 }
 0x175   : > { %1404 = vst [vmem:[%s2410_s7 + $0x38] sm:$0xff] %v1373_v16  ;;  %v2424_v40 = vpop.f32.mrf.mxu2 }
 0x176   : > { %v1175_v45 = vpop.f32.mrf.mxu0 }
 0x177   : > { %v1308_v63 = vadd.f32 %v1175_v45, %v1046_v42  ;;  %v1189_v56 = vpop.f32.mrf.mxu1 }
 0x178   : > { %v1295_v55 = vadd.f32 %v1189_v56, %v1033_v30  ;;  %v1036_v56 = vadd.f32 %v2386_v44, %v2333_v62 }
 0x179   : > { %v1352_v19 = vadd.f32 %v1324_v28, %v1308_v63 }
 0x17a   : > { %v1339_v52 = vadd.f32 %v2428_v31, %v1295_v55 }
 0x17b   : > { %v1380_v12 = vmax.f32 %v1352_v19, 0.0  ;;  %v2452_v19 = vperm.slane %v2396_v9, 4 }
 0x17c   : > { %v1367_v6 = vmax.f32 %v1339_v52, 0.0  ;;  %v2432_v53 = vpop.f32.mrf.mxu3 }
 0x17d   : > { %1411 = vst [vmem:[%s2410_s7 + $0x70] sm:$0xff] %v1380_v12  ;;  %v1208_v41 = vpop.f32.mrf.mxu2 }
 0x17e   : > { %1398 = vst [vmem:[%s2410_s7 + $0x8] sm:$0xff] %v1367_v6  ;;  %v1296_v14 = vadd.f32 %v1208_v41, %v1034_v2  ;;  %v1177_v0 = vpop.f32.mrf.mxu0 }
 0x17f   : > { %v1315_v16 = vadd.f32 %v1177_v0, %v1053_v54  ;;  %v1191_v42 = vpop.f32.mrf.mxu1  ;;  %v1043_v0 = vadd.f32 %v2394_v20, %v2342_v38 }
 0x180   : > { %v1340_v48 = vadd.f32 %v2435_v33, %v1296_v14  ;;  %v1302_v51 = vadd.f32 %v1191_v42, %v1040_v7  ;;  %v2461_v7 = vperm.slane %v2396_v9, 3 }
 0x181   : > { %v1359_v30 = vadd.f32 %v1324_v28, %v1315_v16  ;;  %v1047_v28 = vadd.f32 %v2376_v34, %v2330_v1  ;;  %v1048_v1 = vadd.f32 %v2388_v15, %v2318_v8 }
 0x182   : > { %v1368_v45 = vmax.f32 %v1340_v48, 0.0  ;;  %v1346_v63 = vadd.f32 %v2428_v31, %v1302_v51  ;;  %v1054_v48 = vadd.f32 %v2382_v58, %v2340_v13  ;;  %v1055_v58 = vadd.f32 %v2398_v39, %v2336_v3 }
 0x183   : > { %v1387_v4 = vmax.f32 %v1359_v30, 0.0  ;;  %v2489_v3 = vperm.slane %v2396_v9, 5 }
 0x184   : > { %1399 = vst [vmem:[%s2410_s7 + $0x10] sm:$0xff] %v1368_v45  ;;  %v1374_v46 = vmax.f32 %v1346_v63, 0.0  ;;  %v2446_v11 = vpop.f32.mrf.mxu3 }
 0x185   : > { %1418 = vst [vmem:[%s2410_s7 + $0xa8] sm:$0xf] %v1387_v4  ;;  %v1210_v55 = vpop.f32.mrf.mxu2 }
 0x186   : > { %1405 = vst [vmem:[%s2410_s7 + $0x40] sm:$0xff] %v1374_v46  ;;  %v1303_v52 = vadd.f32 %v1210_v55, %v1041_v32  ;;  %v1246_v49 = vpop.f32.mrf.mxu0  ;;  %v1050_v55 = vadd.f32 %v2405_v29, %v2354_v23 }
 0x187   : > { %v1194_v57 = vpop.f32.mrf.mxu1  ;;  %v1298_v12 = vadd.f32 %v1246_v49, %v1036_v56  ;;  %v1037_v49 = vadd.f32 %v2390_v60, %v2352_v22 }
 0x188   : > { %v1347_v2 = vadd.f32 %v2435_v33, %v1303_v52  ;;  %v1309_v6 = vadd.f32 %v1194_v57, %v1047_v28 }
 0x189   : > { %v1342_v62 = vadd.f32 %v2452_v19, %v1298_v12 }
 0x18a   : > { %v1375_v44 = vmax.f32 %v1347_v2, 0.0  ;;  %v1353_v54 = vadd.f32 %v2428_v31, %v1309_v6 }
 0x18b   : > { %v1370_v41 = vmax.f32 %v1342_v62, 0.0 }
 0x18c   : > { %1406 = vst [vmem:[%s2410_s7 + $0x48] sm:$0xff] %v1375_v44  ;;  %v1381_v34 = vmax.f32 %v1353_v54, 0.0  ;;  %v1227_v14 = vpop.f32.mrf.mxu3  ;;  %v1038_v44 = vadd.f32 %v2412_v25, %v2344_v21 }
 0x18d   : > { %1401 = vst [vmem:[%s2410_s7 + $0x20] sm:$0xff] %v1370_v41  ;;  %v1213_v16 = vpop.f32.mrf.mxu2  ;;  %v1297_v42 = vadd.f32 %v1227_v14, %v2374_v17 }
 0x18e   : > { %1412 = vst [vmem:[%s2410_s7 + $0x78] sm:$0xff] %v1381_v34  ;;  %v1310_v51 = vadd.f32 %v1213_v16, %v1048_v1  ;;  %v1248_v30 = vpop.f32.mrf.mxu0  ;;  %v1330_v1 = vperm.slane %v2396_v9, 6 }
 0x18f   : > { %v1341_v8 = vadd.f32 %v2461_v7, %v1297_v42  ;;  %v1196_v15 = vpop.f32.mrf.mxu1  ;;  %v1305_v45 = vadd.f32 %v1248_v30, %v1043_v0  ;;  %v1044_v0 = vadd.f32 %v2401_v50, %v2360_v36  ;;  %v1045_v50 = vadd.f32 %v2420_v37, %v2356_v26 }
 0x190   : > { %v1354_v63 = vadd.f32 %v2435_v33, %v1310_v51  ;;  %v1316_v38 = vadd.f32 %v1196_v15, %v1054_v48 }
 0x191   : > { %v1369_v20 = vmax.f32 %v1341_v8, 0.0  ;;  %v1349_v4 = vadd.f32 %v2452_v19, %v1305_v45 }
 0x192   : > { %v1382_v17 = vmax.f32 %v1354_v63, 0.0  ;;  %v1360_v32 = vadd.f32 %v2428_v31, %v1316_v38 }
 0x193   : > { %1400 = vst [vmem:[%s2410_s7 + $0x18] sm:$0xff] %v1369_v20  ;;  %v1377_v13 = vmax.f32 %v1349_v4, 0.0 }
 0x194   : > { %1413 = vst [vmem:[%s2410_s7 + $0x80] sm:$0xff] %v1382_v17  ;;  %v1388_v46 = vmax.f32 %v1360_v32, 0.0  ;;  %v1229_v56 = vpop.f32.mrf.mxu3 }
 0x195   : > { %1408 = vst [vmem:[%s2410_s7 + $0x58] sm:$0xff] %v1377_v13  ;;  %v1215_v28 = vpop.f32.mrf.mxu2  ;;  %v1304_v52 = vadd.f32 %v1229_v56, %v2378_v10 }
 0x196   : > { %1419 = vst [vmem:[%s2410_s7 + $0xb0] sm:$0xf] %v1388_v46  ;;  %v1317_v31 = vadd.f32 %v1215_v28, %v1055_v58  ;;  %v1251_v57 = vpop.f32.mrf.mxu0  ;;  %v1058_v58 = vadd.f32 %v2424_v40, %v2372_v47 }
 0x197   : > { %v1348_v39 = vadd.f32 %v2461_v7, %v1304_v52  ;;  %v1312_v12 = vadd.f32 %v1251_v57, %v1050_v55  ;;  %v1265_v23 = vpop.f32.mrf.mxu1 }
 0x198   : > { %v1361_v29 = vadd.f32 %v2435_v33, %v1317_v31  ;;  %v1299_v2 = vadd.f32 %v1265_v23, %v1037_v49  ;;  %v1057_v33 = vadd.f32 %v2418_v5, %v2362_v61  ;;  %v1059_v49 = vadd.f32 %v2446_v11, %v2369_v59 }
 0x199   : > { %v1376_v6 = vmax.f32 %v1348_v39, 0.0  ;;  %v1356_v10 = vadd.f32 %v2452_v19, %v1312_v12 }
 0x19a   : > { %v1389_v22 = vmax.f32 %v1361_v29, 0.0  ;;  %v1343_v60 = vadd.f32 %v2489_v3, %v1299_v2 }
 0x19b   : > { %1407 = vst [vmem:[%s2410_s7 + $0x50] sm:$0xff] %v1376_v6  ;;  %v1384_v62 = vmax.f32 %v1356_v10, 0.0 }
 0x19c   : > { %1420 = vst [vmem:[%s2410_s7 + $0xb8] sm:$0xf] %v1389_v22  ;;  %v1371_v54 = vmax.f32 %v1343_v60, 0.0  ;;  %v1232_v41 = vpop.f32.mrf.mxu3 }
 0x19d   : > { %1415 = vst [vmem:[%s2410_s7 + $0x90] sm:$0xff] %v1384_v62  ;;  %v1311_v34 = vadd.f32 %v1232_v41, %v2384_v35  ;;  %v1284_v14 = vpop.f32.mrf.mxu2 }
 0x19e   : > { %1402 = vst [vmem:[%s2410_s7 + $0x28] sm:$0xff] %v1371_v54  ;;  %v1300_v16 = vadd.f32 %v1284_v14, %v1038_v44  ;;  %v1253_v21 = vpop.f32.mrf.mxu0 }
 0x19f   : > { %v1355_v25 = vadd.f32 %v2461_v7, %v1311_v34  ;;  %v1319_v42 = vadd.f32 %v1253_v21, %v1057_v33  ;;  %v1267_v9 = vpop.f32.mrf.mxu1 }
 0x1a0   : > { %v1344_v48 = vadd.f32 %v1330_v1, %v1300_v16  ;;  %v1306_v61 = vadd.f32 %v1267_v9, %v1044_v0 }
 0x1a1   : > { %v1383_v5 = vmax.f32 %v1355_v25, 0.0  ;;  %v1363_v51 = vadd.f32 %v2452_v19, %v1319_v42  ;;  %v1051_v19 = vadd.f32 %v2416_v18, %v2367_v27 }
 0x1a2   : > { %v1372_v35 = vmax.f32 %v1344_v48, 0.0  ;;  %v1350_v30 = vadd.f32 %v2489_v3, %v1306_v61 }
 0x1a3   : > { %1414 = vst [vmem:[%s2410_s7 + $0x88] sm:$0xff] %v1383_v5  ;;  %v1391_v36 = vmax.f32 %v1363_v51, 0.0 }
 0x1a4   : > { %1403 = vst [vmem:[%s2410_s7 + $0x30] sm:$0xff] %v1372_v35  ;;  %v1378_v8 = vmax.f32 %v1350_v30, 0.0  ;;  %v1234_v15 = vpop.f32.mrf.mxu3 }
 0x1a5   : > { %1422 = vst [vmem:[%s2410_s7 + $0xc8] sm:$0xf] %v1391_v36  ;;  %v1318_v45 = vadd.f32 %v1234_v15, %v2392_v24  ;;  %v1286_v63 = vpop.f32.mrf.mxu2  ;;  %v1052_v24 = vadd.f32 %v2432_v53, %v2364_v43 }
 0x1a6   : > { %1409 = vst [vmem:[%s2410_s7 + $0x60] sm:$0xff] %v1378_v8  ;;  %v1307_v38 = vadd.f32 %v1286_v63, %v1045_v50 }
 0x1a7   : > { %v1362_v20 = vadd.f32 %v2461_v7, %v1318_v45  ;;  %v1270_v4 = vpop.f32.mrf.mxu1 }
 0x1a8   : > { %v1351_v17 = vadd.f32 %v1330_v1, %v1307_v38  ;;  %v1313_v26 = vadd.f32 %v1270_v4, %v1051_v19 }
 0x1a9   : > { %v1390_v37 = vmax.f32 %v1362_v20, 0.0 }
 0x1aa   : > { %v1379_v32 = vmax.f32 %v1351_v17, 0.0  ;;  %v1357_v13 = vadd.f32 %v2489_v3, %v1313_v26 }
 0x1ab   : > { %1421 = vst [vmem:[%s2410_s7 + $0xc0] sm:$0xf] %v1390_v37 }
 0x1ac   : > { %1410 = vst [vmem:[%s2410_s7 + $0x68] sm:$0xff] %v1379_v32  ;;  %v1385_v27 = vmax.f32 %v1357_v13, 0.0 }
 0x1ad   : > { %v1289_v18 = vpop.f32.mrf.mxu2 }
 0x1ae   : > { %1416 = vst [vmem:[%s2410_s7 + $0x98] sm:$0xff] %v1385_v27  ;;  %v1314_v7 = vadd.f32 %v1289_v18, %v1052_v24 }
 0x1af   : > { %v1272_v46 = vpop.f32.mrf.mxu1 }
 0x1b0   : > { %v1358_v56 = vadd.f32 %v1330_v1, %v1314_v7  ;;  %v1320_v55 = vadd.f32 %v1272_v46, %v1058_v58 }
 0x1b2   : > { %v1386_v28 = vmax.f32 %v1358_v56, 0.0  ;;  %v1364_v52 = vadd.f32 %v2489_v3, %v1320_v55 }
 0x1b4   : > { %1417 = vst [vmem:[%s2410_s7 + $0xa0] sm:$0xff] %v1386_v28  ;;  %v1392_v43 = vmax.f32 %v1364_v52, 0.0 }
 0x1b5   : > { %v1291_v53 = vpop.f32.mrf.mxu2 }
 0x1b6   : > { %1423 = vst [vmem:[%s2410_s7 + $0xd0] sm:$0xf] %v1392_v43  ;;  %v1321_v31 = vadd.f32 %v1291_v53, %v1059_v49 }
 0x1b8   : > { %v1365_v57 = vadd.f32 %v1330_v1, %v1321_v31  ;;  %64 = sbr.rel (!%p62_p0) target bundleno = 15 (0xf), region = 57 }
 0x1ba   : > { %v1393_v39 = vmax.f32 %v1365_v57, 0.0 }
 0x1bc   : > { %1424 = vst [vmem:[%s2410_s7 + $0xd8] sm:$0xf] %v1393_v39 }
 0x1bd   :  { %1429 = vsyncpa [#allocation3], 1 }
 0x1be   :  { %1430 = vsyncpa [#allocation5], 1 }

// kernel: cnn3_forward.9
= control target key start
LH: loop header
LB: loop body
LE: loop exit
PB: predicated region body
PF: predicated region fallthrough
CT: control target
= control target key end

     0   :  { %s154_s10 = smov 96   ;;  %vm138_vm0 = vcmask 258048   ;;  %s309_s0 = inlined_call_operand.vmem [shape: f32[2,10,5,64], index: 0, kind: input, shape index: {}]   ;;  %s310_s1 = inlined_call_operand.vmem [shape: f32[2,5,5,32], index: 1, kind: output, shape index: {}]  }
   0x1   :  { %v10_v0 = vld [vmem:[%s309_s0 + $0x10] sm:$0x1f]  ;;  %v8_v1 = vld [vmem:[%s309_s0] sm:$0x1f]  ;;  %v11_v3 = vld [vmem:[%s309_s0 + $0x18] sm:$0x1f] }
   0x2   :  { %52 = vrot.lane.b32.xlu1 %v10_v0, %s154_s10  ;;  %48 = vrot.lane.b32.xlu0 %v8_v1, %s154_s10  ;;  %v12_v2 = vld [vmem:[%s309_s0 + $0x20] sm:$0x1f]  ;;  %v9_v4 = vld [vmem:[%s309_s0 + $0x8] sm:$0x1f] }
   0x3   :  { %56 = vrot.lane.b32.xlu2 %v12_v2, %s154_s10  ;;  %v13_v5 = vld [vmem:[%s309_s0 + $0x28] sm:$0x1f]  ;;  %v15_v6 = vld [vmem:[%s309_s0 + $0x38] sm:$0x1f]  ;;  %v14_v7 = vld [vmem:[%s309_s0 + $0x30] sm:$0x1f] }
   0x4   :  { %v198_v8 = vld [vmem:[%s309_s0 + $0x40] sm:$0x1f]  ;;  %v18_v9 = vld [vmem:[%s309_s0 + $0x50] sm:$0x1f]  ;;  %v17_v10 = vld [vmem:[%s309_s0 + $0x48] sm:$0x1f] }
   0x5   :  { %v19_v11 = vld [vmem:[%s309_s0 + $0x58] sm:$0x1f]  ;;  %v21_v12 = vld [vmem:[%s309_s0 + $0x68] sm:$0x1f]  ;;  %v20_v13 = vld [vmem:[%s309_s0 + $0x60] sm:$0x1f] }
   0x6   :  { %v225_v14 = vld [vmem:[%s309_s0 + $0x70] sm:$0x1f]  ;;  %v234_v15 = vld [vmem:[%s309_s0 + $0x80] sm:$0x1f]  ;;  %v239_v16 = vld [vmem:[%s309_s0 + $0x78] sm:$0x1f] }
   0x7   :  { %v25_v17 = vld [vmem:[%s309_s0 + $0x88] sm:$0x1f]  ;;  %v252_v18 = vld [vmem:[%s309_s0 + $0x98] sm:$0x1f]  ;;  %v257_v19 = vld [vmem:[%s309_s0 + $0x90] sm:$0x1f] }
   0xa   :  { %54 = vrot.lane.b32.xlu1 %v11_v3, %s154_s10  ;;  %50 = vrot.lane.b32.xlu0 %v9_v4, %s154_s10 }
   0xb   :  { %58 = vrot.lane.b32.xlu2 %v13_v5, %s154_s10 }
  0x12   :  { %62 = vrot.lane.b32.xlu1 %v15_v6, %s154_s10  ;;  %60 = vrot.lane.b32.xlu0 %v14_v7, %s154_s10 }
  0x13   :  { %64 = vrot.lane.b32.xlu2 %v198_v8, %s154_s10 }
  0x1a   :  { %68 = vrot.lane.b32.xlu1 %v18_v9, %s154_s10  ;;  %66 = vrot.lane.b32.xlu0 %v17_v10, %s154_s10 }
  0x1b   :  { %70 = vrot.lane.b32.xlu2 %v19_v11, %s154_s10 }
  0x22   :  { %74 = vrot.lane.b32.xlu1 %v21_v12, %s154_s10  ;;  %72 = vrot.lane.b32.xlu0 %v20_v13, %s154_s10 }
  0x23   :  { %76 = vrot.lane.b32.xlu2 %v225_v14, %s154_s10 }
  0x2a   :  { %80 = vrot.lane.b32.xlu1 %v234_v15, %s154_s10  ;;  %78 = vrot.lane.b32.xlu0 %v239_v16, %s154_s10 }
  0x2b   :  { %82 = vrot.lane.b32.xlu2 %v25_v17, %s154_s10 }
  0x32   :  { %86 = vrot.lane.b32.xlu1 %v252_v18, %s154_s10  ;;  %84 = vrot.lane.b32.xlu0 %v257_v19, %s154_s10 }
  0x5d   :  { %v57_v20 = vpop.permute.xlu2 %56 }
  0x5e   :  { %v112_v21 = vmax.f32 %v12_v2, %v57_v20 }
  0x65   :  { %v59_v22 = vpop.permute.xlu2 %58 }
  0x66   :  { %v113_v23 = vmax.f32 %v13_v5, %v59_v22 }
  0x68   :  { %v130_v24 = vmax.f32 %v112_v21, %v113_v23 }
  0x6a   :  { %141 = vst.msk [vmem:[%s310_s1 + $0x10] sm:$0x1f] %vm138_vm0, %v130_v24 }
  0x6d   :  { %v65_v27 = vpop.permute.xlu2 %64 }
  0x6e   :  { %v116_v42 = vmax.f32 %v198_v8, %v65_v27 }
  0x74   :  { %v53_v25 = vpop.permute.xlu1 %52  ;;  %v49_v26 = vpop.permute.xlu0 %48 }
  0x75   :  { %v110_v30 = vmax.f32 %v10_v0, %v53_v25  ;;  %v108_v31 = vmax.f32 %v8_v1, %v49_v26  ;;  %v71_v36 = vpop.permute.xlu2 %70 }
  0x76   :  { %v119_v43 = vmax.f32 %v19_v11, %v71_v36 }
  0x7c   :  { %v55_v28 = vpop.permute.xlu1 %54  ;;  %v51_v29 = vpop.permute.xlu0 %50 }
  0x7d   :  { %v111_v32 = vmax.f32 %v11_v3, %v55_v28  ;;  %v109_v33 = vmax.f32 %v9_v4, %v51_v29  ;;  %v77_v48 = vpop.permute.xlu2 %76 }
  0x7e   :  { %v122_v57 = vmax.f32 %v225_v14, %v77_v48 }
  0x7f   :  { %v129_v34 = vmax.f32 %v110_v30, %v111_v32  ;;  %v128_v35 = vmax.f32 %v108_v31, %v109_v33 }
  0x81   :  { %140 = vst.msk [vmem:[%s310_s1 + $0x8] sm:$0x1f] %vm138_vm0, %v129_v34 }
  0x82   :  { %139 = vst.msk [vmem:[%s310_s1] sm:$0x1f] %vm138_vm0, %v128_v35 }
  0x84   :  { %v63_v37 = vpop.permute.xlu1 %62  ;;  %v61_v38 = vpop.permute.xlu0 %60 }
  0x85   :  { %v115_v39 = vmax.f32 %v15_v6, %v63_v37  ;;  %v114_v40 = vmax.f32 %v14_v7, %v61_v38  ;;  %v83_v56 = vpop.permute.xlu2 %82 }
  0x86   :  { %v125_v58 = vmax.f32 %v25_v17, %v83_v56 }
  0x87   :  { %v131_v41 = vmax.f32 %v114_v40, %v115_v39 }
  0x89   :  { %142 = vst.msk [vmem:[%s310_s1 + $0x18] sm:$0x1f] %vm138_vm0, %v131_v41 }
  0x8c   :  { %v69_v44 = vpop.permute.xlu1 %68  ;;  %v67_v45 = vpop.permute.xlu0 %66 }
  0x8d   :  { %v118_v46 = vmax.f32 %v18_v9, %v69_v44  ;;  %v117_v47 = vmax.f32 %v17_v10, %v67_v45 }
  0x8f   :  { %v133_v49 = vmax.f32 %v118_v46, %v119_v43  ;;  %v132_v50 = vmax.f32 %v116_v42, %v117_v47 }
  0x91   :  { %144 = vst.msk [vmem:[%s310_s1 + $0x28] sm:$0x1f] %vm138_vm0, %v133_v49 }
  0x92   :  { %143 = vst.msk [vmem:[%s310_s1 + $0x20] sm:$0x1f] %vm138_vm0, %v132_v50 }
  0x94   :  { %v75_v51 = vpop.permute.xlu1 %74  ;;  %v73_v52 = vpop.permute.xlu0 %72 }
  0x95   :  { %v121_v53 = vmax.f32 %v21_v12, %v75_v51  ;;  %v120_v54 = vmax.f32 %v20_v13, %v73_v52 }
  0x97   :  { %v134_v55 = vmax.f32 %v120_v54, %v121_v53 }
  0x99   :  { %145 = vst.msk [vmem:[%s310_s1 + $0x30] sm:$0x1f] %vm138_vm0, %v134_v55 }
  0x9c   :  { %v81_v59 = vpop.permute.xlu1 %80  ;;  %v79_v60 = vpop.permute.xlu0 %78 }
  0x9d   :  { %v124_v61 = vmax.f32 %v234_v15, %v81_v59  ;;  %v123_v62 = vmax.f32 %v239_v16, %v79_v60 }
  0x9f   :  { %v136_v63 = vmax.f32 %v124_v61, %v125_v58  ;;  %v135_v0 = vmax.f32 %v122_v57, %v123_v62 }
  0xa1   :  { %147 = vst.msk [vmem:[%s310_s1 + $0x40] sm:$0x1f] %vm138_vm0, %v136_v63 }
  0xa2   :  { %146 = vst.msk [vmem:[%s310_s1 + $0x38] sm:$0x1f] %vm138_vm0, %v135_v0 }
  0xa4   :  { %v87_v1 = vpop.permute.xlu1 %86  ;;  %v85_v2 = vpop.permute.xlu0 %84 }
  0xa5   :  { %v127_v3 = vmax.f32 %v252_v18, %v87_v1  ;;  %v126_v4 = vmax.f32 %v257_v19, %v85_v2 }
  0xa7   :  { %v137_v5 = vmax.f32 %v126_v4, %v127_v3 }
  0xa9   :  { %148 = vst.msk [vmem:[%s310_s1 + $0x48] sm:$0x1f] %vm138_vm0, %v137_v5 }

// kernel: cnn3_forward.11
= control target key start
LH: loop header
LB: loop body
LE: loop exit
PB: predicated region body
PF: predicated region fallthrough
CT: control target
= control target key end

     0   :  { %s385_s0 = inlined_call_operand.vmem [shape: f32[2,256], index: 0, kind: input, shape index: {}]   ;;  %s386_s1 = inlined_call_operand.vmem [shape: bf16[256,128], index: 1, kind: input, shape index: {}]   ;;  %s387_s2 = inlined_call_operand.vmem [shape: f32[1,128], index: 2, kind: input, shape index: {}]   ;;  %s388_s3 = inlined_call_operand.hbm [shape: f32[2,128], index: 3, kind: output, shape index: {}]  }
   0x1   :  { %v270_v0 = vld [vmem:[%s386_s1 + $0x38] sm:$0xff]  ;;  %v269_v2 = vld [vmem:[%s386_s1 + $0x30] sm:$0xff]  ;;  %v15_v4 = vld [vmem:[%s385_s0] sm:$0xf] }
   0x2   :  { %v278_v1 = vld [vmem:[%s386_s1 + $0x78] sm:$0xff]  ;;  %156 = vmatpush.bf16.msra.mxu0 %v270_v0  ;;  %v277_v3 = vld [vmem:[%s386_s1 + $0x70] sm:$0xff]  ;;  %v268_v5 = vld [vmem:[%s386_s1 + $0x28] sm:$0xff]  ;;  %17 = vst [vmem:[#allocation1] ss:$4 sm:$0xff] %v15_v4 }
   0x3   :  { %169 = vmatpush.bf16.msra.mxu1 %v278_v1  ;;  %v276_v6 = vld [vmem:[%s386_s1 + $0x68] sm:$0xff] }
   0x6   :  { %157 = vmatpush.bf16.msra.mxu0 %v269_v2 }
   0x7   :  { %170 = vmatpush.bf16.msra.mxu1 %v277_v3 }
   0x8   :  { %8 = vsyncpa [#allocation3], 0  ;;  %v267_v7 = vld [vmem:[%s386_s1 + $0x20] sm:$0xff]  ;;  %v266_v9 = vld [vmem:[%s386_s1 + $0x18] sm:$0xff]  ;;  %s307_s20 = smov [#allocation2]   ;;  %s190_s23 = sshll.u32 %s388_s3, 4  ;;  %s191_s23 = int_to_ptr.hbm [resolvable:$true] %s190_s23 }
   0x9   :  { %v275_v8 = vld [vmem:[%s386_s1 + $0x60] sm:$0xff]  ;;  %v274_v10 = vld [vmem:[%s386_s1 + $0x58] sm:$0xff]  ;;  %v265_v11 = vld [vmem:[%s386_s1 + $0x10] sm:$0xff]  ;;  %s188_s21 = sshll.u32 %s307_s20, 4  ;;  %s189_s21 = int_to_ptr.vmem [resolvable:$true] %s188_s21 }
   0xa   :  { %158 = vmatpush.bf16.msra.mxu0 %v268_v5  ;;  %v273_v12 = vld [vmem:[%s386_s1 + $0x50] sm:$0xff]  ;;  %v264_v13 = vld [vmem:[%s386_s1 + $0x8] sm:$0xff]  ;;  %v263_v15 = vld [vmem:[%s386_s1] sm:$0xff] }
   0xb   :  { %171 = vmatpush.bf16.msra.mxu1 %v276_v6  ;;  %v272_v14 = vld [vmem:[%s386_s1 + $0x48] sm:$0xff]  ;;  %v271_v16 = vld [vmem:[%s386_s1 + $0x40] sm:$0xff] }
   0xc   :  { %v18_v17 = vld.sshfl [vmem:[#allocation1] sm:$0xff pattern:$0x73625140]  ;;  %v19_v18 = vld.sshfl [vmem:[#allocation1 + $0x8] sm:$0xff pattern:$0x73625140] }
   0xd   :  { %v22_v19 = vpack.c.bf16 %v18_v17, %v18_v17  ;;  %v23_v20 = vpack.c.bf16 %v19_v18, %v19_v18  ;;  %v280_v21 = vld [vmem:[%s387_s2] ss:$0 sm:$0xff] }
   0xe   :  { %159 = vmatpush.bf16.msra.mxu0 %v267_v7 }
   0xf   :  { %172 = vmatpush.bf16.msra.mxu1 %v275_v8 }
  0x12   :  { %160 = vmatpush.bf16.msra.mxu0 %v266_v9 }
  0x13   :  { %173 = vmatpush.bf16.msra.mxu1 %v274_v10 }
  0x16   :  { %161 = vmatpush.bf16.msra.mxu0 %v265_v11 }
  0x17   :  { %174 = vmatpush.bf16.msra.mxu1 %v273_v12 }
  0x1a   :  { %162 = vmatpush.bf16.msra.mxu0 %v264_v13 }
  0x1b   :  { %175 = vmatpush.bf16.msra.mxu1 %v272_v14 }
  0x1e   :  { %163 = vmatpush.bf16.msra.mxu0 %v263_v15 }
  0x1f   :  { %176 = vmatpush.bf16.msra.mxu1 %v271_v16 }
  0x21   :  { %164 = vmatmul.bf16.vlgmr.msra.gmra.mxu0 %v22_v19 }
  0x22   :  { %177 = vmatmul.bf16.vlgmr.msra.gmra.mxu1 %v23_v20 }
  0x9e   :  { %v165_v22 = vpop.f32.mrf.mxu0 }
  0x9f   :  { %v178_v23 = vpop.f32.mrf.mxu1  ;;  %v166_v24 = vadd.f32 %v280_v21, %v165_v22 }
  0xa1   :  { %v179_v25 = vadd.f32 %v178_v23, %v166_v24 }
  0xa3   :  { %182 = vst [vmem:[#allocation2] sm:$0x3] %v179_v25 }
  0xa4   :  { %193 = dma.vmem_to_hbm [thread:$0]  %s189_s21, 32, %s191_s23, [#allocation3]  }
  0xa6   :  { %v167_v26 = vpop.f32.mrf.mxu0 }
  0xa7   :  { %v180_v27 = vpop.f32.mrf.mxu1 }
  0xa8   :  { %305 = dma.done.wait [#allocation3], 32  }
  0xa9   :  { %306 = vsyncadd [#allocation3], 4294967264 }
  0xaa   :  { %198 = vsyncpa [#allocation3], 1 }

// kernel: cnn3_forward.10
= control target key start
LH: loop header
LB: loop body
LE: loop exit
PB: predicated region body
PF: predicated region fallthrough
CT: control target
= control target key end

     0   :  { %vm649_vm0 = vcmask 261120   ;;  %vm840_vm1 = vcmask 1041408   ;;  %s2012_s1 = inlined_call_operand.vmem [shape: bf16[800,256], index: 1, kind: input, shape index: {}]   ;;  %s2013_s0 = inlined_call_operand.vmem [shape: f32[2,800], index: 0, kind: input, shape index: {}]   ;;  %s2014_s2 = inlined_call_operand.vmem [shape: f32[1,256], index: 2, kind: input, shape index: {}]   ;;  %s2015_s3 = inlined_call_operand.vmem [shape: f32[2,256], index: 3, kind: output, shape index: {}]  }
   0x1   :  { %v906_v0 = vld [vmem:[%s2012_s1 + $0x70] sm:$0xf]  ;;  %v1265_v1 = vld [vmem:[%s2012_s1 + $0x74] sm:$0xf0]  ;;  %v898_v11 = vld [vmem:[%s2012_s1 + $0x60] sm:$0xf] }
   0x2   :  { %v1034_v2 = vld [vmem:[%s2012_s1 + $0x170] sm:$0xf]  ;;  %v907_v3 = vor.u32 %v1265_v1, %v906_v0  ;;  %v1297_v4 = vld [vmem:[%s2012_s1 + $0x174] sm:$0xf0]  ;;  %v1263_v13 = vld [vmem:[%s2012_s1 + $0x64] sm:$0xf0] }
   0x3   :  { %v1098_v5 = vld [vmem:[%s2012_s1 + $0x1f0] sm:$0xf]  ;;  %v1313_v6 = vld [vmem:[%s2012_s1 + $0x1f4] sm:$0xf0]  ;;  %v1035_v7 = vor.u32 %v1297_v4, %v1034_v2  ;;  %v1026_v14 = vld [vmem:[%s2012_s1 + $0x160] sm:$0xf]  ;;  %v899_v16 = vor.u32 %v1263_v13, %v898_v11 }
   0x4   :  { %v1099_v8 = vor.u32 %v1313_v6, %v1098_v5  ;;  %v970_v9 = vld [vmem:[%s2012_s1 + $0xf0] sm:$0xf]  ;;  %v1281_v10 = vld [vmem:[%s2012_s1 + $0xf4] sm:$0xf0]  ;;  %653 = vmatpush.bf16.msra.mxu0 %v907_v3  ;;  %v1295_v15 = vld [vmem:[%s2012_s1 + $0x164] sm:$0xf0] }
   0x5   :  { %v971_v12 = vor.u32 %v1281_v10, %v970_v9  ;;  %679 = vmatpush.bf16.msra.mxu2 %v1035_v7  ;;  %v1027_v17 = vor.u32 %v1295_v15, %v1026_v14  ;;  %v1090_v18 = vld [vmem:[%s2012_s1 + $0x1e0] sm:$0xf]  ;;  %v1311_v19 = vld [vmem:[%s2012_s1 + $0x1e4] sm:$0xf0]  ;;  %v890_v23 = vld [vmem:[%s2012_s1 + $0x50] sm:$0xf] }
   0x6   :  { %692 = vmatpush.bf16.msra.mxu3 %v1099_v8  ;;  %v962_v20 = vld [vmem:[%s2012_s1 + $0xe0] sm:$0xf]  ;;  %v1091_v21 = vor.u32 %v1311_v19, %v1090_v18  ;;  %v1279_v22 = vld [vmem:[%s2012_s1 + $0xe4] sm:$0xf0]  ;;  %v1261_v24 = vld [vmem:[%s2012_s1 + $0x54] sm:$0xf0] }
   0x7   :  { %666 = vmatpush.bf16.msra.mxu1 %v971_v12  ;;  %v963_v25 = vor.u32 %v1279_v22, %v962_v20  ;;  %v1018_v26 = vld [vmem:[%s2012_s1 + $0x150] sm:$0xf]  ;;  %v1293_v27 = vld [vmem:[%s2012_s1 + $0x154] sm:$0xf0]  ;;  %v891_v29 = vor.u32 %v1261_v24, %v890_v23  ;;  %v882_v35 = vld [vmem:[%s2012_s1 + $0x40] sm:$0xf] }
   0x8   :  { %v1082_v28 = vld [vmem:[%s2012_s1 + $0x1d0] sm:$0xf]  ;;  %654 = vmatpush.bf16.msra.mxu0 %v899_v16  ;;  %v1309_v30 = vld [vmem:[%s2012_s1 + $0x1d4] sm:$0xf0]  ;;  %v1019_v33 = vor.u32 %v1293_v27, %v1018_v26  ;;  %v1259_v36 = vld [vmem:[%s2012_s1 + $0x44] sm:$0xf0] }
   0x9   :  { %v954_v31 = vld [vmem:[%s2012_s1 + $0xd0] sm:$0xf]  ;;  %v1277_v32 = vld [vmem:[%s2012_s1 + $0xd4] sm:$0xf0]  ;;  %680 = vmatpush.bf16.msra.mxu2 %v1027_v17  ;;  %v1083_v34 = vor.u32 %v1309_v30, %v1082_v28  ;;  %v1010_v37 = vld [vmem:[%s2012_s1 + $0x140] sm:$0xf]  ;;  %v883_v44 = vor.u32 %v1259_v36, %v882_v35 }
   0xa   :  { %693 = vmatpush.bf16.msra.mxu3 %v1091_v21  ;;  %v955_v38 = vor.u32 %v1277_v32, %v954_v31  ;;  %v1291_v39 = vld [vmem:[%s2012_s1 + $0x144] sm:$0xf0]  ;;  %v1074_v40 = vld [vmem:[%s2012_s1 + $0x1c0] sm:$0xf]  ;;  %v874_v47 = vld [vmem:[%s2012_s1 + $0x30] sm:$0xf] }
   0xb   :  { %667 = vmatpush.bf16.msra.mxu1 %v963_v25  ;;  %v1307_v41 = vld [vmem:[%s2012_s1 + $0x1c4] sm:$0xf0]  ;;  %v946_v42 = vld [vmem:[%s2012_s1 + $0xc0] sm:$0xf]  ;;  %v1011_v45 = vor.u32 %v1291_v39, %v1010_v37  ;;  %v1257_v48 = vld [vmem:[%s2012_s1 + $0x34] sm:$0xf0] }
   0xc   :  { %v1275_v43 = vld [vmem:[%s2012_s1 + $0xc4] sm:$0xf0]  ;;  %655 = vmatpush.bf16.msra.mxu0 %v891_v29  ;;  %v1075_v46 = vor.u32 %v1307_v41, %v1074_v40  ;;  %v1002_v49 = vld [vmem:[%s2012_s1 + $0x130] sm:$0xf]  ;;  %v1289_v51 = vld [vmem:[%s2012_s1 + $0x134] sm:$0xf0]  ;;  %v875_v56 = vor.u32 %v1257_v48, %v874_v47 }
   0xd   :  { %681 = vmatpush.bf16.msra.mxu2 %v1019_v33  ;;  %v947_v50 = vor.u32 %v1275_v43, %v946_v42  ;;  %v1066_v52 = vld [vmem:[%s2012_s1 + $0x1b0] sm:$0xf]  ;;  %v1305_v53 = vld [vmem:[%s2012_s1 + $0x1b4] sm:$0xf0]  ;;  %v1003_v57 = vor.u32 %v1289_v51, %v1002_v49  ;;  %v866_v59 = vld [vmem:[%s2012_s1 + $0x20] sm:$0xf] }
   0xe   :  { %694 = vmatpush.bf16.msra.mxu3 %v1083_v34  ;;  %v938_v54 = vld [vmem:[%s2012_s1 + $0xb0] sm:$0xf]  ;;  %v1273_v55 = vld [vmem:[%s2012_s1 + $0xb4] sm:$0xf0]  ;;  %v1067_v58 = vor.u32 %v1305_v53, %v1066_v52  ;;  %v1255_v60 = vld [vmem:[%s2012_s1 + $0x24] sm:$0xf0] }
   0xf   :  { %668 = vmatpush.bf16.msra.mxu1 %v955_v38  ;;  %v994_v61 = vld [vmem:[%s2012_s1 + $0x120] sm:$0xf]  ;;  %v939_v62 = vor.u32 %v1273_v55, %v938_v54  ;;  %v1287_v63 = vld [vmem:[%s2012_s1 + $0x124] sm:$0xf0]  ;;  %v867_v4 = vor.u32 %v1255_v60, %v866_v59  ;;  %v858_v5 = vld [vmem:[%s2012_s1 + $0x10] sm:$0xf] }
  0x10   :  { %656 = vmatpush.bf16.msra.mxu0 %v883_v44  ;;  %v1058_v0 = vld [vmem:[%s2012_s1 + $0x1a0] sm:$0xf]  ;;  %v1303_v1 = vld [vmem:[%s2012_s1 + $0x1a4] sm:$0xf0]  ;;  %v995_v6 = vor.u32 %v1287_v63, %v994_v61  ;;  %v1253_v8 = vld [vmem:[%s2012_s1 + $0x14] sm:$0xf0] }
  0x11   :  { %682 = vmatpush.bf16.msra.mxu2 %v1011_v45  ;;  %v930_v2 = vld [vmem:[%s2012_s1 + $0xa0] sm:$0xf]  ;;  %v1271_v3 = vld [vmem:[%s2012_s1 + $0xa4] sm:$0xf0]  ;;  %v1059_v7 = vor.u32 %v1303_v1, %v1058_v0  ;;  %v986_v9 = vld [vmem:[%s2012_s1 + $0x110] sm:$0xf]  ;;  %v859_v18 = vor.u32 %v1253_v8, %v858_v5 }
  0x12   :  { %695 = vmatpush.bf16.msra.mxu3 %v1075_v46  ;;  %v1285_v10 = vld [vmem:[%s2012_s1 + $0x114] sm:$0xf0]  ;;  %v931_v11 = vor.u32 %v1271_v3, %v930_v2  ;;  %v1050_v12 = vld [vmem:[%s2012_s1 + $0x190] sm:$0xf]  ;;  %v850_v16 = vld [vmem:[%s2012_s1] sm:$0xf] }
  0x13   :  { %669 = vmatpush.bf16.msra.mxu1 %v947_v50  ;;  %v1301_v13 = vld [vmem:[%s2012_s1 + $0x194] sm:$0xf0]  ;;  %v922_v14 = vld [vmem:[%s2012_s1 + $0x90] sm:$0xf]  ;;  %v1251_v17 = vld [vmem:[%s2012_s1 + $0x4] sm:$0xf0]  ;;  %v987_v25 = vor.u32 %v1285_v10, %v986_v9 }
  0x14   :  { %657 = vmatpush.bf16.msra.mxu0 %v875_v56  ;;  %v1269_v15 = vld [vmem:[%s2012_s1 + $0x94] sm:$0xf0]  ;;  %v978_v19 = vld [vmem:[%s2012_s1 + $0x100] sm:$0xf]  ;;  %v1283_v20 = vld [vmem:[%s2012_s1 + $0x104] sm:$0xf0]  ;;  %v1051_v26 = vor.u32 %v1301_v13, %v1050_v12  ;;  %v851_v35 = vor.u32 %v1251_v17, %v850_v16 }
  0x15   :  { %683 = vmatpush.bf16.msra.mxu2 %v1003_v57  ;;  %v1042_v21 = vld [vmem:[%s2012_s1 + $0x180] sm:$0xf]  ;;  %v1299_v22 = vld [vmem:[%s2012_s1 + $0x184] sm:$0xf0]  ;;  %v1162_v27 = vld [vmem:[%s2012_s1 + $0x270] sm:$0xf]  ;;  %v923_v29 = vor.u32 %v1269_v15, %v922_v14  ;;  %v979_v39 = vor.u32 %v1283_v20, %v978_v19 }
  0x16   :  { %696 = vmatpush.bf16.msra.mxu3 %v1067_v58  ;;  %v15_v23 = vld [vmem:[%s2013_s0] sm:$0xff]  ;;  %v16_v24 = vld [vmem:[%s2013_s0 + $0x8] sm:$0x3f]  ;;  %v1329_v28 = vld [vmem:[%s2012_s1 + $0x274] sm:$0xf0]  ;;  %v1043_v40 = vor.u32 %v1299_v22, %v1042_v21 }
  0x17   :  { %670 = vmatpush.bf16.msra.mxu1 %v939_v62  ;;  %19 = vst [vmem:[#allocation1] ss:$4 sm:$0xff] %v15_v23  ;;  %v1242_v30 = vld [vmem:[%s2012_s1 + $0x310] sm:$0xf]  ;;  %v1349_v31 = vld [vmem:[%s2012_s1 + $0x314] sm:$0xf0]  ;;  %v1163_v44 = vor.u32 %v1329_v28, %v1162_v27 }
  0x18   :  { %658 = vmatpush.bf16.msra.mxu0 %v867_v4  ;;  %21 = vst [vmem:[#allocation1 + $0x20] ss:$4 sm:$0xff] %v16_v24  ;;  %v1264_v32 = vld [vmem:[%s2012_s1 + $0x74] sm:$0xf]  ;;  %v908_v33 = vld [vmem:[%s2012_s1 + $0x78] sm:$0xf0]  ;;  %v1243_v45 = vor.u32 %v1349_v31, %v1242_v30 }
  0x19   :  { %684 = vmatpush.bf16.msra.mxu2 %v995_v6  ;;  %v914_v34 = vld [vmem:[%s2012_s1 + $0x80] sm:$0xf]  ;;  %v1267_v36 = vld [vmem:[%s2012_s1 + $0x84] sm:$0xf0]  ;;  %v1226_v37 = vld [vmem:[%s2012_s1 + $0x2f0] sm:$0xf]  ;;  %v911_v49 = vor.u32 %v1264_v32, %v908_v33 }
  0x1a   :  { %697 = vmatpush.bf16.msra.mxu3 %v1059_v7  ;;  %v1345_v38 = vld [vmem:[%s2012_s1 + $0x2f4] sm:$0xf0]  ;;  %v1154_v41 = vld [vmem:[%s2012_s1 + $0x260] sm:$0xf]  ;;  %v1327_v42 = vld [vmem:[%s2012_s1 + $0x264] sm:$0xf0]  ;;  %v915_v50 = vor.u32 %v1267_v36, %v914_v34 }
  0x1b   :  { %671 = vmatpush.bf16.msra.mxu1 %v931_v11  ;;  %v1234_v43 = vld [vmem:[%s2012_s1 + $0x300] sm:$0xf]  ;;  %v1347_v46 = vld [vmem:[%s2012_s1 + $0x304] sm:$0xf0]  ;;  %v1262_v47 = vld [vmem:[%s2012_s1 + $0x64] sm:$0xf]  ;;  %v1227_v55 = vor.u32 %v1345_v38, %v1226_v37  ;;  %v1155_v61 = vor.u32 %v1327_v42, %v1154_v41 }
  0x1c   :  { %659 = vmatpush.bf16.msra.mxu0 %v859_v18  ;;  %v900_v48 = vld [vmem:[%s2012_s1 + $0x68] sm:$0xf0]  ;;  %v1280_v51 = vld [vmem:[%s2012_s1 + $0xf4] sm:$0xf]  ;;  %v972_v52 = vld [vmem:[%s2012_s1 + $0xf8] sm:$0xf0]  ;;  %v1235_v62 = vor.u32 %v1347_v46, %v1234_v43 }
  0x1d   :  { %685 = vmatpush.bf16.msra.mxu2 %v987_v25  ;;  %v1218_v53 = vld [vmem:[%s2012_s1 + $0x2e0] sm:$0xf]  ;;  %v1343_v58 = vld [vmem:[%s2012_s1 + $0x2e4] sm:$0xf0]  ;;  %v903_v1 = vor.u32 %v1262_v47, %v900_v48  ;;  %v975_v2 = vor.u32 %v1280_v51, %v972_v52  ;;  %v1146_v3 = vld [vmem:[%s2012_s1 + $0x250] sm:$0xf] }
  0x1e   :  { %698 = vmatpush.bf16.msra.mxu3 %v1051_v26  ;;  %v24_v54 = vld.sshfl [vmem:[#allocation1 + $0x10] sm:$0xff pattern:$0x73625140]  ;;  %v22_v56 = vld.sshfl [vmem:[#allocation1] sm:$0xff pattern:$0x73625140]  ;;  %v1219_v6 = vor.u32 %v1343_v58, %v1218_v53 }
  0x1f   :  { %672 = vmatpush.bf16.msra.mxu1 %v923_v29  ;;  %v1619_v57 = vpack.c.bf16 %v24_v54, %v24_v54  ;;  %v1624_v59 = vpack.c.bf16 %v22_v56, %v22_v56  ;;  %v25_v60 = vld.sshfl [vmem:[#allocation1 + $0x18] sm:$0xff pattern:$0x73625140]  ;;  %v23_v0 = vld.sshfl [vmem:[#allocation1 + $0x8] sm:$0xff pattern:$0x73625140] }
  0x20   :  { %660 = vmatpush.bf16.msra.mxu0 %v851_v35  ;;  %v1626_v63 = vpack.c.bf16 %v25_v60, %v25_v60  ;;  %v1325_v4 = vld [vmem:[%s2012_s1 + $0x254] sm:$0xf0]  ;;  %v1260_v5 = vld [vmem:[%s2012_s1 + $0x54] sm:$0xf]  ;;  %v892_v7 = vld [vmem:[%s2012_s1 + $0x58] sm:$0xf0]  ;;  %v1655_v12 = vpack.c.bf16 %v23_v0, %v23_v0 }
  0x21   :  { %686 = vmatpush.bf16.msra.mxu2 %v979_v39  ;;  %v1278_v8 = vld [vmem:[%s2012_s1 + $0xe4] sm:$0xf]  ;;  %v964_v9 = vld [vmem:[%s2012_s1 + $0xe8] sm:$0xf0]  ;;  %v1210_v10 = vld [vmem:[%s2012_s1 + $0x2d0] sm:$0xf]  ;;  %v1147_v13 = vor.u32 %v1325_v4, %v1146_v3  ;;  %v895_v14 = vor.u32 %v1260_v5, %v892_v7 }
  0x22   :  { %699 = vmatpush.bf16.msra.mxu3 %v1043_v40  ;;  %v1341_v11 = vld [vmem:[%s2012_s1 + $0x2d4] sm:$0xf0]  ;;  %v967_v15 = vor.u32 %v1278_v8, %v964_v9  ;;  %v1138_v16 = vld [vmem:[%s2012_s1 + $0x240] sm:$0xf]  ;;  %v1323_v17 = vld [vmem:[%s2012_s1 + $0x244] sm:$0xf0] }
  0x23   :  { %673 = vmatpush.bf16.msra.mxu1 %v915_v50  ;;  %661 = vmatmul.bf16.vlgmr.msra.gmra.mxu0 %v1624_v59  ;;  %v1258_v18 = vld [vmem:[%s2012_s1 + $0x44] sm:$0xf]  ;;  %v1211_v19 = vor.u32 %v1341_v11, %v1210_v10  ;;  %v884_v20 = vld [vmem:[%s2012_s1 + $0x48] sm:$0xf0]  ;;  %v1276_v21 = vld [vmem:[%s2012_s1 + $0xd4] sm:$0xf]  ;;  %v1139_v25 = vor.u32 %v1323_v17, %v1138_v16 }
  0x24   :  { %705 = vmatpush.bf16.msrb.mxu0 %v1163_v44  ;;  %687 = vmatmul.bf16.vlgmr.msra.gmra.mxu2 %v1619_v57  ;;  %v956_v22 = vld [vmem:[%s2012_s1 + $0xd8] sm:$0xf0]  ;;  %v1202_v23 = vld [vmem:[%s2012_s1 + $0x2c0] sm:$0xf]  ;;  %v1339_v24 = vld [vmem:[%s2012_s1 + $0x2c4] sm:$0xf0]  ;;  %v887_v26 = vor.u32 %v1258_v18, %v884_v20 }
  0x25   :  { %737 = vmatpush.bf16.msrb.mxu2 %v1243_v45  ;;  %700 = vmatmul.bf16.vlgmr.msra.gmra.mxu3 %v1626_v63  ;;  %v959_v27 = vor.u32 %v1276_v21, %v956_v22  ;;  %v1130_v28 = vld [vmem:[%s2012_s1 + $0x230] sm:$0xf]  ;;  %v1321_v29 = vld [vmem:[%s2012_s1 + $0x234] sm:$0xf0]  ;;  %v1256_v30 = vld [vmem:[%s2012_s1 + $0x34] sm:$0xf]  ;;  %v1203_v31 = vor.u32 %v1339_v24, %v1202_v23 }
  0x26   :  { %744 = vmatpush.bf16.msrb.mxu3 %v911_v49  ;;  %674 = vmatmul.bf16.vlgmr.msra.gmra.mxu1 %v1655_v12  ;;  %v876_v32 = vld [vmem:[%s2012_s1 + $0x38] sm:$0xf0]  ;;  %v1274_v33 = vld [vmem:[%s2012_s1 + $0xc4] sm:$0xf]  ;;  %v948_v34 = vld [vmem:[%s2012_s1 + $0xc8] sm:$0xf0]  ;;  %v1131_v37 = vor.u32 %v1321_v29, %v1130_v28 }
  0x27   :  { %718 = vmatpush.bf16.msrb.mxu1 %v1227_v55  ;;  %v1194_v35 = vld [vmem:[%s2012_s1 + $0x2b0] sm:$0xf]  ;;  %v1337_v36 = vld [vmem:[%s2012_s1 + $0x2b4] sm:$0xf0]  ;;  %v879_v39 = vor.u32 %v1256_v30, %v876_v32  ;;  %v951_v40 = vor.u32 %v1274_v33, %v948_v34  ;;  %v1122_v41 = vld [vmem:[%s2012_s1 + $0x220] sm:$0xf] }
  0x28   :  { %706 = vmatpush.bf16.msrb.mxu0 %v1155_v61  ;;  %v28_v38 = vld.sshfl [vmem:[#allocation1 + $0x30] sm:$0xff pattern:$0x73625140]  ;;  %v1319_v42 = vld [vmem:[%s2012_s1 + $0x224] sm:$0xf0]  ;;  %v1195_v44 = vor.u32 %v1337_v36, %v1194_v35 }
  0x29   :  { %738 = vmatpush.bf16.msrb.mxu2 %v1235_v62  ;;  %v1254_v43 = vld [vmem:[%s2012_s1 + $0x24] sm:$0xf]  ;;  %v868_v45 = vld [vmem:[%s2012_s1 + $0x28] sm:$0xf0]  ;;  %v1272_v46 = vld [vmem:[%s2012_s1 + $0xb4] sm:$0xf]  ;;  %v1724_v48 = vpack.c.bf16 %v28_v38, %v28_v38  ;;  %v1123_v51 = vor.u32 %v1319_v42, %v1122_v41 }
  0x2a   :  { %745 = vmatpush.bf16.msrb.mxu3 %v903_v1  ;;  %v940_v47 = vld [vmem:[%s2012_s1 + $0xb8] sm:$0xf0]  ;;  %v1186_v49 = vld [vmem:[%s2012_s1 + $0x2a0] sm:$0xf]  ;;  %v1335_v50 = vld [vmem:[%s2012_s1 + $0x2a4] sm:$0xf0]  ;;  %v871_v52 = vor.u32 %v1254_v43, %v868_v45 }
  0x2b   :  { %719 = vmatpush.bf16.msrb.mxu1 %v1219_v6  ;;  %v943_v53 = vor.u32 %v1272_v46, %v940_v47  ;;  %v1114_v54 = vld [vmem:[%s2012_s1 + $0x210] sm:$0xf]  ;;  %v1317_v55 = vld [vmem:[%s2012_s1 + $0x214] sm:$0xf0]  ;;  %v1252_v56 = vld [vmem:[%s2012_s1 + $0x14] sm:$0xf]  ;;  %v1187_v58 = vor.u32 %v1335_v50, %v1186_v49 }
  0x2c   :  { %707 = vmatpush.bf16.msrb.mxu0 %v1147_v13  ;;  %v860_v60 = vld [vmem:[%s2012_s1 + $0x18] sm:$0xf0]  ;;  %v1270_v61 = vld [vmem:[%s2012_s1 + $0xa4] sm:$0xf]  ;;  %v932_v62 = vld [vmem:[%s2012_s1 + $0xa8] sm:$0xf0] }
  0x2d   :  { %757 = vmatpush.bf16.msra.mxu2 %v975_v2  ;;  %v1178_v0 = vld [vmem:[%s2012_s1 + $0x290] sm:$0xf]  ;;  %v1333_v1 = vld [vmem:[%s2012_s1 + $0x294] sm:$0xf0]  ;;  %v1115_v2 = vor.u32 %v1317_v55, %v1114_v54  ;;  %v1106_v3 = vld [vmem:[%s2012_s1 + $0x200] sm:$0xf]  ;;  %v863_v6 = vor.u32 %v1252_v56, %v860_v60  ;;  %v935_v7 = vor.u32 %v1270_v61, %v932_v62 }
  0x2e   :  { %746 = vmatpush.bf16.msrb.mxu3 %v895_v14  ;;  %v1315_v4 = vld [vmem:[%s2012_s1 + $0x204] sm:$0xf0]  ;;  %v1250_v5 = vld [vmem:[%s2012_s1 + $0x4] sm:$0xf]  ;;  %v852_v8 = vld [vmem:[%s2012_s1 + $0x8] sm:$0xf0]  ;;  %v1179_v11 = vor.u32 %v1333_v1, %v1178_v0 }
  0x2f   :  { %720 = vmatpush.bf16.msrb.mxu1 %v1211_v19  ;;  %v1268_v9 = vld [vmem:[%s2012_s1 + $0x94] sm:$0xf]  ;;  %v924_v10 = vld [vmem:[%s2012_s1 + $0x98] sm:$0xf0]  ;;  %v1170_v17 = vld [vmem:[%s2012_s1 + $0x280] sm:$0xf]  ;;  %v1107_v19 = vor.u32 %v1315_v4, %v1106_v3  ;;  %v855_v22 = vor.u32 %v1250_v5, %v852_v8 }
  0x30   :  { %708 = vmatpush.bf16.msrb.mxu0 %v1139_v25  ;;  %v1296_v13 = vld [vmem:[%s2012_s1 + $0x174] sm:$0xf]  ;;  %v1036_v14 = vld [vmem:[%s2012_s1 + $0x178] sm:$0xf0]  ;;  %v1331_v18 = vld [vmem:[%s2012_s1 + $0x284] sm:$0xf0]  ;;  %v927_v23 = vor.u32 %v1268_v9, %v924_v10 }
  0x31   :  { %758 = vmatpush.bf16.msra.mxu2 %v967_v15  ;;  %v1328_v15 = vld [vmem:[%s2012_s1 + $0x274] sm:$0xf]  ;;  %v1164_v16 = vld [vmem:[%s2012_s1 + $0x278] sm:$0xf0]  ;;  %v1266_v28 = vld [vmem:[%s2012_s1 + $0x84] sm:$0xf]  ;;  %v1171_v30 = vor.u32 %v1331_v18, %v1170_v17 }
  0x32   :  { %747 = vmatpush.bf16.msrb.mxu3 %v887_v26  ;;  %v26_v20 = vld.sshfl [vmem:[#allocation1 + $0x20] sm:$0xff pattern:$0x73625140]  ;;  %v1312_v21 = vld [vmem:[%s2012_s1 + $0x1f4] sm:$0xf]  ;;  %v1039_v26 = vor.u32 %v1296_v13, %v1036_v14 }
  0x33   :  { %721 = vmatpush.bf16.msrb.mxu1 %v1203_v31  ;;  %v1100_v24 = vld [vmem:[%s2012_s1 + $0x1f8] sm:$0xf0]  ;;  %v27_v25 = vld.sshfl [vmem:[#allocation1 + $0x28] sm:$0xff pattern:$0x73625140]  ;;  %v1806_v31 = vpack.c.bf16 %v26_v20, %v26_v20 }
  0x34   :  { %709 = vmatpush.bf16.msrb.mxu0 %v1131_v37  ;;  %1248 = vmatmul.msk.bf16.vlgmr.msrb.gmra.mxu2 %vm649_vm0, %v1724_v48  ;;  %v916_v29 = vld [vmem:[%s2012_s1 + $0x88] sm:$0xf0]  ;;  %v1294_v32 = vld [vmem:[%s2012_s1 + $0x164] sm:$0xf]  ;;  %v1103_v35 = vor.u32 %v1312_v21, %v1100_v24  ;;  %v1344_v37 = vld [vmem:[%s2012_s1 + $0x2f4] sm:$0xf]  ;;  %v1832_v42 = vpack.c.bf16 %v27_v25, %v27_v25 }
  0x35   :  { %759 = vmatpush.bf16.msra.mxu2 %v959_v27  ;;  %v1167_v27 = vor.u32 %v1328_v15, %v1164_v16  ;;  %v1028_v33 = vld [vmem:[%s2012_s1 + $0x168] sm:$0xf0]  ;;  %v1326_v34 = vld [vmem:[%s2012_s1 + $0x264] sm:$0xf]  ;;  %v1228_v38 = vld [vmem:[%s2012_s1 + $0x2f8] sm:$0xf0] }
  0x36   :  { %748 = vmatpush.bf16.msrb.mxu3 %v879_v39  ;;  %v1156_v36 = vld [vmem:[%s2012_s1 + $0x268] sm:$0xf0]  ;;  %v919_v39 = vor.u32 %v1266_v28, %v916_v29  ;;  %v1031_v43 = vor.u32 %v1294_v32, %v1028_v33  ;;  %v1231_v45 = vor.u32 %v1344_v37, %v1228_v38  ;;  %v1292_v46 = vld [vmem:[%s2012_s1 + $0x154] sm:$0xf]  ;;  %v1020_v47 = vld [vmem:[%s2012_s1 + $0x158] sm:$0xf0] }
  0x37   :  { %722 = vmatpush.bf16.msrb.mxu1 %v1195_v44  ;;  %v1092_v41 = vld [vmem:[%s2012_s1 + $0x1e8] sm:$0xf0]  ;;  %v1159_v44 = vor.u32 %v1326_v34, %v1156_v36  ;;  %v1324_v49 = vld [vmem:[%s2012_s1 + $0x254] sm:$0xf]  ;;  %v1084_v55 = vld [vmem:[%s2012_s1 + $0x1d8] sm:$0xf0]  ;;  %v1023_v56 = vor.u32 %v1292_v46, %v1020_v47 }
  0x38   :  { %710 = vmatpush.bf16.msrb.mxu0 %v1123_v51  ;;  %v1148_v51 = vld [vmem:[%s2012_s1 + $0x258] sm:$0xf0]  ;;  %v1308_v54 = vld [vmem:[%s2012_s1 + $0x1d4] sm:$0xf]  ;;  %v1012_v61 = vld [vmem:[%s2012_s1 + $0x148] sm:$0xf0] }
  0x39   :  { %760 = vmatpush.bf16.msra.mxu2 %v951_v40  ;;  %v1310_v40 = vld [vmem:[%s2012_s1 + $0x1e4] sm:$0xf]  ;;  %v1087_v0 = vor.u32 %v1308_v54, %v1084_v55  ;;  %v1140_v1 = vld [vmem:[%s2012_s1 + $0x248] sm:$0xf0]  ;;  %v1212_v3 = vld [vmem:[%s2012_s1 + $0x2d8] sm:$0xf0] }
  0x3a   :  { %749 = vmatpush.bf16.msrb.mxu3 %v871_v52  ;;  %v1095_v50 = vor.u32 %v1310_v40, %v1092_v41  ;;  %v1342_v52 = vld [vmem:[%s2012_s1 + $0x2e4] sm:$0xf]  ;;  %v1076_v5 = vld [vmem:[%s2012_s1 + $0x1c8] sm:$0xf0]  ;;  %v1288_v9 = vld [vmem:[%s2012_s1 + $0x134] sm:$0xf] }
  0x3b   :  { %723 = vmatpush.bf16.msrb.mxu1 %v1187_v58  ;;  %v1151_v58 = vor.u32 %v1324_v49, %v1148_v51  ;;  %v1322_v62 = vld [vmem:[%s2012_s1 + $0x244] sm:$0xf]  ;;  %v1320_v10 = vld [vmem:[%s2012_s1 + $0x234] sm:$0xf]  ;;  %v1132_v13 = vld [vmem:[%s2012_s1 + $0x238] sm:$0xf0] }
  0x3c   :  { %711 = vmatpush.bf16.msrb.mxu0 %v1115_v2  ;;  %v1340_v2 = vld [vmem:[%s2012_s1 + $0x2d4] sm:$0xf]  ;;  %v1306_v4 = vld [vmem:[%s2012_s1 + $0x1c4] sm:$0xf]  ;;  %v1204_v15 = vld [vmem:[%s2012_s1 + $0x2c8] sm:$0xf0] }
  0x3d   :  { %761 = vmatpush.bf16.msra.mxu2 %v943_v53  ;;  %v1220_v53 = vld [vmem:[%s2012_s1 + $0x2e8] sm:$0xf0]  ;;  %v1215_v8 = vor.u32 %v1340_v2, %v1212_v3  ;;  %v1338_v14 = vld [vmem:[%s2012_s1 + $0x2c4] sm:$0xf]  ;;  %v1304_v16 = vld [vmem:[%s2012_s1 + $0x1b4] sm:$0xf] }
  0x3e   :  { %750 = vmatpush.bf16.msrb.mxu3 %v863_v6  ;;  %v1223_v60 = vor.u32 %v1342_v52, %v1220_v53  ;;  %v1068_v17 = vld [vmem:[%s2012_s1 + $0x1b8] sm:$0xf0]  ;;  %v1207_v20 = vor.u32 %v1338_v14, %v1204_v15  ;;  %v1286_v21 = vld [vmem:[%s2012_s1 + $0x124] sm:$0xf]  ;;  %v1124_v25 = vld [vmem:[%s2012_s1 + $0x228] sm:$0xf0] }
  0x3f   :  { %724 = vmatpush.bf16.msrb.mxu1 %v1179_v11  ;;  %v1079_v11 = vor.u32 %v1306_v4, %v1076_v5  ;;  %v1071_v24 = vor.u32 %v1304_v16, %v1068_v17  ;;  %v1302_v28 = vld [vmem:[%s2012_s1 + $0x1a4] sm:$0xf]  ;;  %v1060_v29 = vld [vmem:[%s2012_s1 + $0x1a8] sm:$0xf0]  ;;  %v1284_v34 = vld [vmem:[%s2012_s1 + $0x114] sm:$0xf] }
  0x40   :  { %712 = vmatpush.bf16.msrb.mxu0 %v1107_v19  ;;  %v1135_v19 = vor.u32 %v1320_v10, %v1132_v13  ;;  %v1316_v36 = vld [vmem:[%s2012_s1 + $0x214] sm:$0xf]  ;;  %v1063_v37 = vor.u32 %v1302_v28, %v1060_v29  ;;  %v1116_v38 = vld [vmem:[%s2012_s1 + $0x218] sm:$0xf0]  ;;  %v1188_v40 = vld [vmem:[%s2012_s1 + $0x2a8] sm:$0xf0] }
  0x41   :  { %762 = vmatpush.bf16.msra.mxu2 %v935_v7  ;;  %v1143_v7 = vor.u32 %v1322_v62, %v1140_v1  ;;  %v1300_v41 = vld [vmem:[%s2012_s1 + $0x194] sm:$0xf]  ;;  %v1119_v46 = vor.u32 %v1316_v36, %v1116_v38  ;;  %v980_v49 = vld [vmem:[%s2012_s1 + $0x108] sm:$0xf0]  ;;  %v1180_v54 = vld [vmem:[%s2012_s1 + $0x298] sm:$0xf0] }
  0x42   :  { %751 = vmatpush.bf16.msrb.mxu3 %v855_v22  ;;  %v996_v22 = vld [vmem:[%s2012_s1 + $0x128] sm:$0xf0]  ;;  %v1332_v53 = vld [vmem:[%s2012_s1 + $0x294] sm:$0xf]  ;;  %v1298_v55 = vld [vmem:[%s2012_s1 + $0x184] sm:$0xf] }
  0x43   :  { %725 = vmatpush.bf16.msrb.mxu1 %v1171_v30  ;;  %713 = vmatmul.bf16.vlgmr.msrb.gmra.mxu0 %v1806_v31  ;;  %v999_v30 = vor.u32 %v1286_v21, %v996_v22  ;;  %v1108_v51 = vld [vmem:[%s2012_s1 + $0x208] sm:$0xf0]  ;;  %v1183_v62 = vor.u32 %v1332_v53, %v1180_v54  ;;  %v1330_v2 = vld [vmem:[%s2012_s1 + $0x284] sm:$0xf] }
  0x44   :  { %770 = vmatpush.bf16.msra.mxu0 %v1039_v26  ;;  %v1336_v26 = vld [vmem:[%s2012_s1 + $0x2b4] sm:$0xf]  ;;  %v1172_v3 = vld [vmem:[%s2012_s1 + $0x288] sm:$0xf0]  ;;  %v1346_v4 = vld [vmem:[%s2012_s1 + $0x304] sm:$0xf] }
  0x45   :  { %763 = vmatpush.bf16.msra.mxu2 %v927_v23  ;;  %752 = vmatmul.bf16.vlgmr.msrb.gmra.mxu3 %v1624_v59  ;;  %v1290_v59 = vld [vmem:[%s2012_s1 + $0x144] sm:$0xf]  ;;  %v1236_v5 = vld [vmem:[%s2012_s1 + $0x308] sm:$0xf0] }
  0x46   :  { %796 = vmatpush.bf16.msra.mxu3 %v1167_v27  ;;  %726 = vmatmul.bf16.vlgmr.msrb.gmra.mxu1 %v1832_v42  ;;  %v1015_v6 = vor.u32 %v1290_v59, %v1012_v61  ;;  %v1318_v23 = vld [vmem:[%s2012_s1 + $0x224] sm:$0xf]  ;;  %v1196_v27 = vld [vmem:[%s2012_s1 + $0x2b8] sm:$0xf0] }
  0x47   :  { %783 = vmatpush.bf16.msra.mxu1 %v1103_v35  ;;  %v1127_v32 = vor.u32 %v1318_v23, %v1124_v25  ;;  %v1199_v33 = vor.u32 %v1336_v26, %v1196_v27  ;;  %v988_v35 = vld [vmem:[%s2012_s1 + $0x118] sm:$0xf0] }
  0x48   :  { %771 = vmatpush.bf16.msra.mxu0 %v1031_v43  ;;  %v1052_v43 = vld [vmem:[%s2012_s1 + $0x198] sm:$0xf0] }
  0x49   :  { %764 = vmatpush.bf16.msra.mxu2 %v919_v39  ;;  %v1334_v39 = vld [vmem:[%s2012_s1 + $0x2a4] sm:$0xf]  ;;  %v1055_v52 = vor.u32 %v1300_v41, %v1052_v43 }
  0x4a   :  { %797 = vmatpush.bf16.msra.mxu3 %v1159_v44  ;;  %v991_v44 = vor.u32 %v1284_v34, %v988_v35  ;;  %v1191_v47 = vor.u32 %v1334_v39, %v1188_v40 }
  0x4b   :  { %784 = vmatpush.bf16.msra.mxu1 %v1095_v50  ;;  %v1314_v50 = vld [vmem:[%s2012_s1 + $0x204] sm:$0xf] }
  0x4c   :  { %765 = vmatmul.bf16.vlgmr.msra.gmra.mxu2 %v1655_v12  ;;  %772 = vmatpush.bf16.msra.mxu0 %v1023_v56  ;;  %v1004_v12 = vld [vmem:[%s2012_s1 + $0x138] sm:$0xf0]  ;;  %v1044_v56 = vld [vmem:[%s2012_s1 + $0x188] sm:$0xf0]  ;;  %v1111_v61 = vor.u32 %v1314_v50, %v1108_v51 }
  0x4d   :  { %809 = vmatpush.bf16.msrb.mxu2 %v1231_v45  ;;  %v1007_v18 = vor.u32 %v1288_v9, %v1004_v12  ;;  %v1282_v45 = vld [vmem:[%s2012_s1 + $0x104] sm:$0xf] }
  0x4e   :  { %798 = vmatpush.bf16.msra.mxu3 %v1151_v58  ;;  %v1348_v58 = vld [vmem:[%s2012_s1 + $0x314] sm:$0xf]  ;;  %v983_v59 = vor.u32 %v1282_v45, %v980_v49 }
  0x4f   :  { %785 = vmatpush.bf16.msra.mxu1 %v1087_v0  ;;  %v1047_v0 = vor.u32 %v1298_v55, %v1044_v56 }
  0x50   :  { %773 = vmatpush.bf16.msra.mxu0 %v1015_v6  ;;  %v1175_v6 = vor.u32 %v1330_v2, %v1172_v3 }
  0x51   :  { %810 = vmatpush.bf16.msrb.mxu2 %v1223_v60  ;;  %v1244_v60 = vld [vmem:[%s2012_s1 + $0x318] sm:$0xf0] }
  0x52   :  { %799 = vmatpush.bf16.msra.mxu3 %v1143_v7  ;;  %v1247_v1 = vor.u32 %v1348_v58, %v1244_v60  ;;  %v1239_v7 = vor.u32 %v1346_v4, %v1236_v5 }
  0x53   :  { %786 = vmatpush.bf16.msra.mxu1 %v1079_v11 }
  0x54   :  { %774 = vmatpush.bf16.msra.mxu0 %v1007_v18 }
  0x55   :  { %811 = vmatpush.bf16.msrb.mxu2 %v1215_v8  ;;  %v143_v8 = vld [vmem:[%s2014_s2] sm:$0x3] }
  0x56   :  { %800 = vmatpush.bf16.msra.mxu3 %v1135_v19  ;;  %v145_v9 = vperm.slane %v143_v8, 0  ;;  %v146_v27 = vperm.slane %v143_v8, 1 }
  0x57   :  { %787 = vmatpush.bf16.msra.mxu1 %v1071_v24 }
  0x58   :  { %775 = vmatpush.bf16.msra.mxu0 %v999_v30 }
  0x59   :  { %812 = vmatpush.bf16.msrb.mxu2 %v1207_v20 }
  0x5a   :  { %801 = vmatpush.bf16.msra.mxu3 %v1127_v32 }
  0x5b   :  { %788 = vmatpush.bf16.msra.mxu1 %v1063_v37 }
  0x5c   :  { %776 = vmatpush.bf16.msra.mxu0 %v991_v44 }
  0x5d   :  { %813 = vmatpush.bf16.msrb.mxu2 %v1199_v33 }
  0x5e   :  { %802 = vmatpush.bf16.msra.mxu3 %v1119_v46 }
  0x5f   :  { %789 = vmatpush.bf16.msra.mxu1 %v1055_v52 }
  0x60   :  { %777 = vmatpush.bf16.msra.mxu0 %v983_v59 }
  0x61   :  { %814 = vmatpush.bf16.msrb.mxu2 %v1191_v47 }
  0x62   :  { %803 = vmatpush.bf16.msra.mxu3 %v1111_v61 }
  0x63   :  { %790 = vmatpush.bf16.msra.mxu1 %v1047_v0  ;;  %778 = vmatmul.bf16.vlgmr.msra.gmra.mxu0 %v1619_v57 }
  0x64   :  { %828 = vmatpush.bf16.msrb.mxu0 %v1247_v1 }
  0x65   :  { %815 = vmatpush.bf16.msrb.mxu2 %v1183_v62  ;;  %804 = vmatmul.bf16.vlgmr.msra.gmra.mxu3 %v1806_v31 }
  0x66   :  { %791 = vmatmul.bf16.vlgmr.msra.gmra.mxu1 %v1626_v63 }
  0x68   :  { %829 = vmatpush.bf16.msrb.mxu0 %v1239_v7 }
  0x69   :  { %816 = vmatpush.bf16.msrb.mxu2 %v1175_v6 }
  0x6c   :  { %817 = vmatmul.bf16.vlgmr.msrb.gmra.mxu2 %v1832_v42 }
  0x73   :  { %1249 = vmatmul.msk.bf16.vlgmr.msrb.gmra.mxu0 %vm649_vm0, %v1724_v48 }
  0xa0   :  { %v662_v12 = vpop.f32.mrf.mxu0 }
  0xa1   :  { %v663_v10 = vadd.f32 %v662_v12, %v145_v9 }
  0xa3   :  { %v675_v11 = vpop.f32.mrf.mxu1 }
  0xa4   :  { %v676_v13 = vadd.f32 %v675_v11, %v663_v10 }
  0xa7   :  { %v688_v57 = vpop.f32.mrf.mxu2 }
  0xa8   :  { %v701_v31 = vpop.f32.mrf.mxu3  ;;  %v689_v14 = vadd.f32 %v688_v57, %v676_v13  ;;  %v664_v63 = vpop.f32.mrf.mxu0 }
  0xaa   :  { %v702_v15 = vadd.f32 %v701_v31, %v689_v14 }
  0xab   :  { %v677_v16 = vpop.f32.mrf.mxu1 }
  0xaf   :  { %v690_v17 = vpop.f32.mrf.mxu2 }
  0xb0   :  { %v703_v42 = vpop.f32.mrf.mxu3 }
  0xb7   :  { %v740_v18 = vpop.f32.mrf.mxu2 }
  0xbf   :  { %v742_v48 = vpop.f32.mrf.mxu2 }
  0xc0   :  { %v714_v19 = vpop.f32.mrf.mxu0 }
  0xc1   :  { %v715_v36 = vadd.f32 %v714_v19, %v702_v15 }
  0xc3   :  { %v727_v20 = vpop.f32.mrf.mxu1 }
  0xc4   :  { %v728_v40 = vadd.f32 %v727_v20, %v715_v36 }
  0xc6   :  { %v741_v46 = vadd.f32 %v740_v18, %v728_v40 }
  0xc8   :  { %v753_v21 = vpop.f32.mrf.mxu3  ;;  %v716_v22 = vpop.f32.mrf.mxu0  ;;  %v835_v51 = vmax.f32 %v741_v46, 0.0 }
  0xc9   :  { %v754_v28 = vadd.f32 %v753_v21, %v146_v27 }
  0xcb   :  { %v729_v24 = vpop.f32.mrf.mxu1 }
  0xcf   :  { %v766_v23 = vpop.f32.mrf.mxu2 }
  0xd0   :  { %v755_v25 = vpop.f32.mrf.mxu3  ;;  %v767_v32 = vadd.f32 %v766_v23, %v754_v28 }
  0xd7   :  { %v768_v26 = vpop.f32.mrf.mxu2 }
  0xe0   :  { %v779_v29 = vpop.f32.mrf.mxu0 }
  0xe1   :  { %v780_v33 = vadd.f32 %v779_v29, %v767_v32 }
  0xe3   :  { %v792_v30 = vpop.f32.mrf.mxu1 }
  0xe4   :  { %v793_v38 = vadd.f32 %v792_v30, %v780_v33 }
  0xe8   :  { %v805_v34 = vpop.f32.mrf.mxu3  ;;  %v781_v35 = vpop.f32.mrf.mxu0 }
  0xe9   :  { %v806_v41 = vadd.f32 %v805_v34, %v793_v38 }
  0xeb   :  { %v794_v37 = vpop.f32.mrf.mxu1 }
  0xef   :  { %v818_v39 = vpop.f32.mrf.mxu2 }
  0xf0   :  { %v819_v43 = vadd.f32 %v818_v39, %v806_v41  ;;  %v807_v44 = vpop.f32.mrf.mxu3  ;;  %v831_v45 = vpop.f32.mrf.mxu0 }
  0xf2   :  { %v832_v47 = vadd.f32 %v831_v45, %v819_v43 }
  0xf4   :  { %v836_v49 = vmax.f32 %v832_v47, 0.0 }
  0xf6   :  { %v839_v52 = vrot.slane %v836_v49, 6 }
  0xf7   :  { %v820_v50 = vpop.f32.mrf.mxu2 }
  0xf8   :  { %v841_v53 = vsel %vm840_vm1, %v835_v51, %v839_v52  ;;  %v833_v54 = vpop.f32.mrf.mxu0 }
  0xf9   :  { %843 = vst [vmem:[%s2015_s3] sm:$0xf] %v841_v53 }

// kernel: cnn3_forward.8
= control target key start
LH: loop header
LB: loop body
LE: loop exit
PB: predicated region body
PF: predicated region fallthrough
CT: control target
= control target key end

     0   :  { %s6497_s12 = smov 0   ;;  %s9300_s0 = inlined_call_operand.vmem [shape: f32[2,14,448], index: 0, kind: input, shape index: {}]   ;;  %s9301_s1 = inlined_call_operand.vmem [shape: bf16[5,448,320], index: 1, kind: input, shape index: {}]   ;;  %s9302_s2 = inlined_call_operand.vmem [shape: f32[1,320], index: 2, kind: input, shape index: {}]   ;;  %s9303_s3 = inlined_call_operand.vmem [shape: f32[2,10,320], index: 3, kind: output, shape index: {}]  }
   0x1 LB: > { %v4093_v0 = vld [vmem:[%s9301_s1 + $0x348] sm:$0xf]  ;;  %v6146_v1 = vld [vmem:[%s9301_s1 + $0x350] sm:$0xf0]  ;;  %v4081_v11 = vld [vmem:[%s9301_s1 + $0x330] sm:$0xf]  ;;  %s6475_s12 = sphi %s6497_s12, %s20_s12  }
   0x2   : > { %v4189_v2 = vld [vmem:[%s9301_s1 + $0x408] sm:$0xf]  ;;  %v4094_v3 = vor.u32 %v6146_v1, %v4093_v0  ;;  %v6170_v4 = vld [vmem:[%s9301_s1 + $0x410] sm:$0xf0]  ;;  %v6143_v13 = vld [vmem:[%s9301_s1 + $0x338] sm:$0xf0] }
   0x3   : > { %v4285_v5 = vld [vmem:[%s9301_s1 + $0x4c8] sm:$0xf]  ;;  %v6194_v6 = vld [vmem:[%s9301_s1 + $0x4d0] sm:$0xf0]  ;;  %v4190_v7 = vor.u32 %v6170_v4, %v4189_v2  ;;  %v4177_v14 = vld [vmem:[%s9301_s1 + $0x3f0] sm:$0xf]  ;;  %v4082_v16 = vor.u32 %v6143_v13, %v4081_v11 }
   0x4   : > { %v4286_v8 = vor.u32 %v6194_v6, %v4285_v5  ;;  %v4333_v9 = vld [vmem:[%s9301_s1 + $0x528] sm:$0xf]  ;;  %v6206_v10 = vld [vmem:[%s9301_s1 + $0x530] sm:$0xf0]  ;;  %756 = vmatpush.bf16.msra.mxu0 %v4094_v3  ;;  %v6167_v15 = vld [vmem:[%s9301_s1 + $0x3f8] sm:$0xf0] }
   0x5   : > { %v4334_v12 = vor.u32 %v6206_v10, %v4333_v9  ;;  %770 = vmatpush.bf16.msra.mxu1 %v4190_v7  ;;  %v4178_v17 = vor.u32 %v6167_v15, %v4177_v14  ;;  %v4273_v18 = vld [vmem:[%s9301_s1 + $0x4b0] sm:$0xf]  ;;  %v6191_v19 = vld [vmem:[%s9301_s1 + $0x4b8] sm:$0xf0]  ;;  %v4069_v23 = vld [vmem:[%s9301_s1 + $0x318] sm:$0xf] }
   0x6   : > { %784 = vmatpush.bf16.msra.mxu2 %v4286_v8  ;;  %v4321_v20 = vld [vmem:[%s9301_s1 + $0x510] sm:$0xf]  ;;  %v4274_v21 = vor.u32 %v6191_v19, %v4273_v18  ;;  %v6203_v22 = vld [vmem:[%s9301_s1 + $0x518] sm:$0xf0]  ;;  %v6140_v24 = vld [vmem:[%s9301_s1 + $0x320] sm:$0xf0] }
   0x7   : > { %802 = vmatpush.bf16.msra.mxu3 %v4334_v12  ;;  %v4322_v25 = vor.u32 %v6203_v22, %v4321_v20  ;;  %v4165_v26 = vld [vmem:[%s9301_s1 + $0x3d8] sm:$0xf]  ;;  %v6164_v27 = vld [vmem:[%s9301_s1 + $0x3e0] sm:$0xf0]  ;;  %v4070_v29 = vor.u32 %v6140_v24, %v4069_v23  ;;  %v4057_v35 = vld [vmem:[%s9301_s1 + $0x300] sm:$0xf] }
   0x8   : > { %v4261_v28 = vld [vmem:[%s9301_s1 + $0x498] sm:$0xf]  ;;  %757 = vmatpush.bf16.msra.mxu0 %v4082_v16  ;;  %v6188_v30 = vld [vmem:[%s9301_s1 + $0x4a0] sm:$0xf0]  ;;  %v4166_v33 = vor.u32 %v6164_v27, %v4165_v26  ;;  %v6137_v36 = vld [vmem:[%s9301_s1 + $0x308] sm:$0xf0] }
   0x9   : > { %v4309_v31 = vld [vmem:[%s9301_s1 + $0x4f8] sm:$0xf]  ;;  %v6200_v32 = vld [vmem:[%s9301_s1 + $0x500] sm:$0xf0]  ;;  %771 = vmatpush.bf16.msra.mxu1 %v4178_v17  ;;  %v4262_v34 = vor.u32 %v6188_v30, %v4261_v28  ;;  %v4153_v37 = vld [vmem:[%s9301_s1 + $0x3c0] sm:$0xf]  ;;  %v4058_v44 = vor.u32 %v6137_v36, %v4057_v35 }
   0xa   : > { %785 = vmatpush.bf16.msra.mxu2 %v4274_v21  ;;  %v4310_v38 = vor.u32 %v6200_v32, %v4309_v31  ;;  %v6161_v39 = vld [vmem:[%s9301_s1 + $0x3c8] sm:$0xf0]  ;;  %v4249_v40 = vld [vmem:[%s9301_s1 + $0x480] sm:$0xf]  ;;  %v4095_v46 = vld [vmem:[%s9301_s1 + $0x354] sm:$0xf0] }
   0xb   : > { %803 = vmatpush.bf16.msra.mxu3 %v4322_v25  ;;  %v6185_v41 = vld [vmem:[%s9301_s1 + $0x488] sm:$0xf0]  ;;  %v4297_v42 = vld [vmem:[%s9301_s1 + $0x4e0] sm:$0xf]  ;;  %v4154_v47 = vor.u32 %v6161_v39, %v4153_v37  ;;  %v4045_v49 = vld [vmem:[%s9301_s1 + $0x2e8] sm:$0xf] }
   0xc   : > { %v6197_v43 = vld [vmem:[%s9301_s1 + $0x4e8] sm:$0xf0]  ;;  %758 = vmatpush.bf16.msra.mxu0 %v4070_v29  ;;  %v4250_v48 = vor.u32 %v6185_v41, %v4249_v40  ;;  %v6134_v50 = vld [vmem:[%s9301_s1 + $0x2f0] sm:$0xf0]  ;;  %v4141_v51 = vld [vmem:[%s9301_s1 + $0x3a8] sm:$0xf] }
   0xd   : > { %v6145_v45 = vld [vmem:[%s9301_s1 + $0x34c] sm:$0xf]  ;;  %772 = vmatpush.bf16.msra.mxu1 %v4166_v33  ;;  %v4298_v52 = vor.u32 %v6197_v43, %v4297_v42  ;;  %v6158_v53 = vld [vmem:[%s9301_s1 + $0x3b0] sm:$0xf0]  ;;  %v4237_v54 = vld [vmem:[%s9301_s1 + $0x468] sm:$0xf]  ;;  %v4046_v57 = vor.u32 %v6134_v50, %v4045_v49 }
   0xe   : > { %786 = vmatpush.bf16.msra.mxu2 %v4262_v34  ;;  %v6182_v55 = vld [vmem:[%s9301_s1 + $0x470] sm:$0xf0]  ;;  %v4098_v56 = vor.u32 %v6145_v45, %v4095_v46  ;;  %v4083_v59 = vld [vmem:[%s9301_s1 + $0x33c] sm:$0xf0]  ;;  %v4142_v60 = vor.u32 %v6158_v53, %v4141_v51  ;;  %v4033_v62 = vld [vmem:[%s9301_s1 + $0x2d0] sm:$0xf] }
   0xf   : > { %804 = vmatpush.bf16.msra.mxu3 %v4310_v38  ;;  %v6142_v58 = vld [vmem:[%s9301_s1 + $0x334] sm:$0xf]  ;;  %v4238_v61 = vor.u32 %v6182_v55, %v4237_v54  ;;  %v6131_v63 = vld [vmem:[%s9301_s1 + $0x2d8] sm:$0xf0]  ;;  %v4129_v0 = vld [vmem:[%s9301_s1 + $0x390] sm:$0xf] }
  0x10   : > { %759 = vmatpush.bf16.msra.mxu0 %v4058_v44  ;;  %v6155_v1 = vld [vmem:[%s9301_s1 + $0x398] sm:$0xf0]  ;;  %v4225_v2 = vld [vmem:[%s9301_s1 + $0x450] sm:$0xf]  ;;  %v4086_v4 = vor.u32 %v6142_v58, %v4083_v59  ;;  %v4034_v5 = vor.u32 %v6131_v63, %v4033_v62  ;;  %v4071_v7 = vld [vmem:[%s9301_s1 + $0x324] sm:$0xf0] }
  0x11   : > { %773 = vmatpush.bf16.msra.mxu1 %v4154_v47  ;;  %v6179_v3 = vld [vmem:[%s9301_s1 + $0x458] sm:$0xf0]  ;;  %v4130_v8 = vor.u32 %v6155_v1, %v4129_v0  ;;  %v4021_v10 = vld [vmem:[%s9301_s1 + $0x2b8] sm:$0xf]  ;;  %v6128_v11 = vld [vmem:[%s9301_s1 + $0x2c0] sm:$0xf0] }
  0x12   : > { %787 = vmatpush.bf16.msra.mxu2 %v4250_v48  ;;  %v6139_v6 = vld [vmem:[%s9301_s1 + $0x31c] sm:$0xf]  ;;  %v4226_v9 = vor.u32 %v6179_v3, %v4225_v2  ;;  %v4117_v12 = vld [vmem:[%s9301_s1 + $0x378] sm:$0xf]  ;;  %v6152_v13 = vld [vmem:[%s9301_s1 + $0x380] sm:$0xf0]  ;;  %v4022_v18 = vor.u32 %v6128_v11, %v4021_v10 }
  0x13   : > { %805 = vmatpush.bf16.msra.mxu3 %v4298_v52  ;;  %v4213_v14 = vld [vmem:[%s9301_s1 + $0x438] sm:$0xf]  ;;  %v6176_v15 = vld [vmem:[%s9301_s1 + $0x440] sm:$0xf0]  ;;  %v4074_v16 = vor.u32 %v6139_v6, %v4071_v7  ;;  %v4059_v19 = vld [vmem:[%s9301_s1 + $0x30c] sm:$0xf0]  ;;  %v4118_v22 = vor.u32 %v6152_v13, %v4117_v12 }
  0x14   : > { %760 = vmatpush.bf16.msra.mxu0 %v4046_v57  ;;  %v6136_v17 = vld [vmem:[%s9301_s1 + $0x304] sm:$0xf]  ;;  %v4009_v20 = vld [vmem:[%s9301_s1 + $0x2a0] sm:$0xf]  ;;  %v6125_v21 = vld [vmem:[%s9301_s1 + $0x2a8] sm:$0xf0]  ;;  %v4214_v23 = vor.u32 %v6176_v15, %v4213_v14 }
  0x15   : > { %774 = vmatpush.bf16.msra.mxu1 %v4142_v60  ;;  %v4105_v24 = vld [vmem:[%s9301_s1 + $0x360] sm:$0xf]  ;;  %v6149_v25 = vld [vmem:[%s9301_s1 + $0x368] sm:$0xf0]  ;;  %v4062_v30 = vor.u32 %v6136_v17, %v4059_v19  ;;  %v4191_v31 = vld [vmem:[%s9301_s1 + $0x414] sm:$0xf0]  ;;  %v4010_v34 = vor.u32 %v6125_v21, %v4009_v20 }
  0x16   : > { %788 = vmatpush.bf16.msra.mxu2 %v4238_v61  ;;  %v4201_v26 = vld [vmem:[%s9301_s1 + $0x420] sm:$0xf]  ;;  %v6173_v27 = vld [vmem:[%s9301_s1 + $0x428] sm:$0xf0]  ;;  %v4287_v33 = vld [vmem:[%s9301_s1 + $0x4d4] sm:$0xf0]  ;;  %v4106_v38 = vor.u32 %v6149_v25, %v4105_v24 }
  0x17   : > { %812 = vmatpush.bf16.msrb.mxu3 %v4098_v56  ;;  %v6133_v28 = vld [vmem:[%s9301_s1 + $0x2ec] sm:$0xf]  ;;  %v4047_v35 = vld [vmem:[%s9301_s1 + $0x2f4] sm:$0xf0]  ;;  %v4202_v39 = vor.u32 %v6173_v27, %v4201_v26  ;;  %v6130_v40 = vld [vmem:[%s9301_s1 + $0x2d4] sm:$0xf] }
  0x18   : > { %761 = vmatpush.bf16.msra.mxu0 %v4034_v5  ;;  %v6169_v29 = vld [vmem:[%s9301_s1 + $0x40c] sm:$0xf]  ;;  %v4335_v37 = vld [vmem:[%s9301_s1 + $0x534] sm:$0xf0]  ;;  %v4035_v41 = vld [vmem:[%s9301_s1 + $0x2dc] sm:$0xf0]  ;;  %v4050_v47 = vor.u32 %v6133_v28, %v4047_v35 }
  0x19   : > { %775 = vmatpush.bf16.msra.mxu1 %v4130_v8  ;;  %v6193_v32 = vld [vmem:[%s9301_s1 + $0x4cc] sm:$0xf]  ;;  %v6166_v42 = vld [vmem:[%s9301_s1 + $0x3f4] sm:$0xf]  ;;  %v4194_v43 = vor.u32 %v6169_v29, %v4191_v31  ;;  %v4179_v45 = vld [vmem:[%s9301_s1 + $0x3fc] sm:$0xf0]  ;;  %v4038_v59 = vor.u32 %v6130_v40, %v4035_v41 }
  0x1a   : > { %789 = vmatpush.bf16.msra.mxu2 %v4226_v9  ;;  %v6205_v36 = vld [vmem:[%s9301_s1 + $0x52c] sm:$0xf]  ;;  %v4290_v44 = vor.u32 %v6193_v32, %v4287_v33  ;;  %v6190_v46 = vld [vmem:[%s9301_s1 + $0x4b4] sm:$0xf]  ;;  %s6039_s10 = sshll.u32 %s6475_s12, 6  ;;  %v4182_v60 = vor.u32 %v6166_v42, %v4179_v45  ;;  %vm752_vm0 = vcmask 523264  }
  0x1b   : > { %813 = vmatpush.bf16.msrb.mxu3 %v4086_v4  ;;  %v4338_v48 = vor.u32 %v6205_v36, %v4335_v37  ;;  %v4275_v49 = vld [vmem:[%s9301_s1 + $0x4bc] sm:$0xf0]  ;;  %v6202_v50 = vld [vmem:[%s9301_s1 + $0x514] sm:$0xf]  ;;  %s6746_s20 = scalar_lea.vmem %s9300_s0, %s6039_s10  ;;  %v6751_v52 = vld [vmem:[%s9301_s1 + $0x2bc] sm:$0xf] }
  0x1c   : > { %762 = vmatpush.bf16.msra.mxu0 %v4022_v18  ;;  %v4323_v51 = vld [vmem:[%s9301_s1 + $0x51c] sm:$0xf0]  ;;  %v150_v53 = vld [vmem:[%s6746_s20 + $0x10] sm:$0xfe]  ;;  %v6758_v55 = vld [vmem:[%s9301_s1 + $0x2c4] sm:$0xf0]  ;;  %v4278_v61 = vor.u32 %v6190_v46, %v4275_v49 }
  0x1d   : > { %776 = vmatpush.bf16.msra.mxu1 %v4118_v22  ;;  %v154_v54 = vld [vmem:[%s6746_s20 + $0x30] sm:$0x7]  ;;  %v6163_v56 = vld [vmem:[%s9301_s1 + $0x3dc] sm:$0xf]  ;;  %v4167_v57 = vld [vmem:[%s9301_s1 + $0x3e4] sm:$0xf0]  ;;  %v4326_v1 = vor.u32 %v6202_v50, %v4323_v51  ;;  %v4026_v10 = vor.u32 %v6751_v52, %v6758_v55 }
  0x1e   : > { %790 = vmatpush.bf16.msra.mxu2 %v4214_v23  ;;  %v158_v58 = vpack.c.bf16 %v154_v54, %v150_v53  ;;  %v6187_v62 = vld [vmem:[%s9301_s1 + $0x49c] sm:$0xf]  ;;  %v155_v0 = vld [vmem:[%s6746_s20 + $0x38] sm:$0x7]  ;;  %v4263_v2 = vld [vmem:[%s9301_s1 + $0x4a4] sm:$0xf0]  ;;  %v4170_v18 = vor.u32 %v6163_v56, %v4167_v57 }
  0x1f   : > { %814 = vmatpush.bf16.msrb.mxu3 %v4074_v16  ;;  %v151_v63 = vld [vmem:[%s6746_s20 + $0x18] sm:$0xfe]  ;;  %v4311_v7 = vld [vmem:[%s9301_s1 + $0x504] sm:$0xf0]  ;;  %v148_v8 = vld [vmem:[%s6746_s20] sm:$0xfe]  ;;  %v4266_v19 = vor.u32 %v6187_v62, %v4263_v2 }
  0x20   : > { %763 = vmatpush.bf16.msra.mxu0 %v4010_v34  ;;  %v6199_v3 = vld [vmem:[%s9301_s1 + $0x4fc] sm:$0xf]  ;;  %v288_v4 = vshrl.u32 %v158_v58, 16  ;;  %v290_v5 = vshll.u32 %v158_v58, 16  ;;  %v159_v6 = vpack.c.bf16 %v155_v0, %v151_v63  ;;  %v152_v9 = vld [vmem:[%s6746_s20 + $0x20] sm:$0x7] }
  0x21   : > { %777 = vmatpush.bf16.msra.mxu1 %v4106_v38  ;;  %v6160_v12 = vld [vmem:[%s9301_s1 + $0x3c4] sm:$0xf]  ;;  %v4155_v13 = vld [vmem:[%s9301_s1 + $0x3cc] sm:$0xf0]  ;;  %v149_v17 = vld [vmem:[%s6746_s20 + $0x8] sm:$0xfe]  ;;  %v156_v24 = vpack.c.bf16 %v152_v9, %v148_v8  ;;  %v4314_v26 = vor.u32 %v6199_v3, %v4311_v7 }
  0x22   : > { %791 = vmatpush.bf16.msra.mxu2 %v4202_v39  ;;  %v292_v11 = vrot.slane %v290_v5, 1  ;;  %v6184_v14 = vld [vmem:[%s9301_s1 + $0x484] sm:$0xf]  ;;  %v295_v15 = vshrl.u32 %v159_v6, 16  ;;  %v297_v16 = vshll.u32 %v159_v6, 16  ;;  %v4158_v40 = vor.u32 %v6160_v12, %v4155_v13  ;;  %s6460_s8 = smul.u32 48, %s6475_s12 }
  0x23   : > { %815 = vmatpush.bf16.msrb.mxu3 %v4062_v30  ;;  %v6124_v20 = vld [vmem:[%s9301_s1 + $0x2a4] sm:$0xf]  ;;  %v4011_v21 = vld [vmem:[%s9301_s1 + $0x2ac] sm:$0xf0]  ;;  %v153_v25 = vld [vmem:[%s6746_s20 + $0x28] sm:$0x7] }
  0x24   : > { %826 = vmatpush.bf16.msrb.mxu0 %v4194_v43  ;;  %v4251_v22 = vld [vmem:[%s9301_s1 + $0x48c] sm:$0xf0]  ;;  %v6196_v23 = vld [vmem:[%s9301_s1 + $0x4e4] sm:$0xf]  ;;  %v6807_v27 = vor.u32 %v292_v11, %v288_v4  ;;  %v299_v29 = vrot.slane %v297_v16, 1  ;;  %v157_v31 = vpack.c.bf16 %v153_v25, %v149_v17  ;;  %v276_v34 = vshll.u32 %v156_v24, 16  ;;  %s9279_s11 = scalar_lea.vmem %s9303_s3, %s6460_s8 }
  0x25   : > { %840 = vmatpush.bf16.msrb.mxu1 %v4290_v44  ;;  %v4299_v28 = vld [vmem:[%s9301_s1 + $0x4ec] sm:$0xf0]  ;;  %v6147_v32 = vld [vmem:[%s9301_s1 + $0x358] sm:$0xf0]  ;;  %v274_v37 = vshrl.u32 %v156_v24, 16  ;;  %v4254_v41 = vor.u32 %v6184_v14, %v4251_v22  ;;  %v4014_v45 = vor.u32 %v6124_v20, %v4011_v21  ;;  %vm3878_vm1 = vcmask 517120  }
  0x26   : > { %858 = vmatpush.bf16.msrb.mxu2 %v4338_v48  ;;  %v4101_v30 = vld [vmem:[%s9301_s1 + $0x350] sm:$0xf]  ;;  %v6822_v35 = vor.u32 %v299_v29, %v295_v15  ;;  %v6171_v36 = vld [vmem:[%s9301_s1 + $0x418] sm:$0xf0]  ;;  %v281_v38 = vshrl.u32 %v157_v31, 16  ;;  %v283_v39 = vshll.u32 %v157_v31, 16  ;;  %v4302_v46 = vor.u32 %v6196_v23, %v4299_v28 }
  0x27   : > { %816 = vmatpush.bf16.msrb.mxu3 %v4050_v47  ;;  %v4197_v33 = vld [vmem:[%s9301_s1 + $0x410] sm:$0xf]  ;;  %792 = vmatmul.bf16.vlgmr.msra.gmra.mxu2 %v6807_v27  ;;  %v278_v42 = vrot.slane %v276_v34, 1  ;;  %v6157_v43 = vld [vmem:[%s9301_s1 + $0x3ac] sm:$0xf]  ;;  %v4102_v50 = vor.u32 %v6147_v32, %v4101_v30  ;;  %s20_s12 = sadd.s32 1, %s6475_s12  }
  0x28   : > { %827 = vmatpush.bf16.msrb.mxu0 %v4182_v60  ;;  %v4143_v44 = vld [vmem:[%s9301_s1 + $0x3b4] sm:$0xf0]  ;;  %v285_v47 = vrot.slane %v283_v39, 1  ;;  %v6181_v48 = vld [vmem:[%s9301_s1 + $0x46c] sm:$0xf]  ;;  %4343 = vmatmul.msk.bf16.vlgmr.msra.gmra.mxu3 %vm752_vm0, %v6822_v35  ;;  %v4198_v51 = vor.u32 %v6171_v36, %v4197_v33  ;;  %p17_p0 = scmp.ge.s32.totalorder %s20_s12, 2  }
  0x29   : > { %841 = vmatpush.bf16.msrb.mxu1 %v4278_v61  ;;  %v4239_v49 = vld [vmem:[%s9301_s1 + $0x474] sm:$0xf0]  ;;  %v6844_v53 = vor.u32 %v278_v42, %v274_v37  ;;  %v6144_v55 = vld [vmem:[%s9301_s1 + $0x340] sm:$0xf0]  ;;  %v4146_v58 = vor.u32 %v6157_v43, %v4143_v44  ;;  %v6154_v60 = vld [vmem:[%s9301_s1 + $0x394] sm:$0xf] }
  0x2a   : > { %859 = vmatpush.bf16.msrb.mxu2 %v4326_v1  ;;  %v4089_v52 = vld [vmem:[%s9301_s1 + $0x338] sm:$0xf]  ;;  %v6846_v54 = vor.u32 %v285_v47, %v281_v38  ;;  %v6168_v57 = vld [vmem:[%s9301_s1 + $0x400] sm:$0xf0]  ;;  %v4131_v61 = vld [vmem:[%s9301_s1 + $0x39c] sm:$0xf0] }
  0x2b   : > { %817 = vmatpush.bf16.msrb.mxu3 %v4038_v59  ;;  %v4185_v56 = vld [vmem:[%s9301_s1 + $0x3f8] sm:$0xf]  ;;  %v4242_v59 = vor.u32 %v6181_v48, %v4239_v49  ;;  %v6178_v62 = vld [vmem:[%s9301_s1 + $0x454] sm:$0xf]  ;;  %v4227_v63 = vld [vmem:[%s9301_s1 + $0x45c] sm:$0xf0]  ;;  %v4090_v0 = vor.u32 %v6144_v55, %v4089_v52  ;;  %764 = vmatmul.bf16.vlgmr.msra.gmra.mxu0 %v6844_v53  ;;  %v4134_v6 = vor.u32 %v6154_v60, %v4131_v61 }
  0x2c   : > { %828 = vmatpush.bf16.msrb.mxu0 %v4170_v18  ;;  %v4186_v1 = vor.u32 %v6168_v57, %v4185_v56  ;;  %v4077_v2 = vld [vmem:[%s9301_s1 + $0x320] sm:$0xf]  ;;  %778 = vmatmul.bf16.vlgmr.msra.gmra.mxu1 %v6846_v54  ;;  %v6141_v3 = vld [vmem:[%s9301_s1 + $0x328] sm:$0xf0]  ;;  %v4230_v7 = vor.u32 %v6178_v62, %v4227_v63  ;;  %v6151_v8 = vld [vmem:[%s9301_s1 + $0x37c] sm:$0xf] }
  0x2d   : > { %842 = vmatpush.bf16.msrb.mxu1 %v4266_v19  ;;  %v4173_v4 = vld [vmem:[%s9301_s1 + $0x3e0] sm:$0xf]  ;;  %v6165_v5 = vld [vmem:[%s9301_s1 + $0x3e8] sm:$0xf0]  ;;  %v4119_v9 = vld [vmem:[%s9301_s1 + $0x384] sm:$0xf0]  ;;  %v4078_v12 = vor.u32 %v6141_v3, %v4077_v2 }
  0x2e   : > { %860 = vmatpush.bf16.msrb.mxu2 %v4314_v26  ;;  %v4215_v11 = vld [vmem:[%s9301_s1 + $0x444] sm:$0xf0]  ;;  %v4174_v13 = vor.u32 %v6165_v5, %v4173_v4  ;;  %v6138_v15 = vld [vmem:[%s9301_s1 + $0x310] sm:$0xf0]  ;;  %v4122_v18 = vor.u32 %v6151_v8, %v4119_v9  ;;  %v6148_v20 = vld [vmem:[%s9301_s1 + $0x364] sm:$0xf] }
  0x2f   : > { %818 = vmatpush.bf16.msrb.mxu3 %v4026_v10  ;;  %v6175_v10 = vld [vmem:[%s9301_s1 + $0x43c] sm:$0xf]  ;;  %v4065_v14 = vld [vmem:[%s9301_s1 + $0x308] sm:$0xf]  ;;  %v6162_v17 = vld [vmem:[%s9301_s1 + $0x3d0] sm:$0xf0] }
  0x30   : > { %829 = vmatpush.bf16.msrb.mxu0 %v4158_v40  ;;  %v4161_v16 = vld [vmem:[%s9301_s1 + $0x3c8] sm:$0xf]  ;;  %v4218_v19 = vor.u32 %v6175_v10, %v4215_v11  ;;  %v4107_v21 = vld [vmem:[%s9301_s1 + $0x36c] sm:$0xf0]  ;;  %v6172_v22 = vld [vmem:[%s9301_s1 + $0x424] sm:$0xf]  ;;  %v4066_v26 = vor.u32 %v6138_v15, %v4065_v14 }
  0x31   : > { %843 = vmatpush.bf16.msrb.mxu1 %v4254_v41  ;;  %v4203_v23 = vld [vmem:[%s9301_s1 + $0x42c] sm:$0xf0]  ;;  %v4162_v28 = vor.u32 %v6162_v17, %v4161_v16  ;;  %v6195_v29 = vld [vmem:[%s9301_s1 + $0x4d8] sm:$0xf0]  ;;  %v4110_v36 = vor.u32 %v6148_v20, %v4107_v21  ;;  %v4041_v40 = vld [vmem:[%s9301_s1 + $0x2d8] sm:$0xf] }
  0x32   : > { %861 = vmatpush.bf16.msrb.mxu2 %v4302_v46  ;;  %v4053_v24 = vld [vmem:[%s9301_s1 + $0x2f0] sm:$0xf]  ;;  %v6207_v31 = vld [vmem:[%s9301_s1 + $0x538] sm:$0xf0]  ;;  %v4206_v37 = vor.u32 %v6172_v22, %v4203_v23  ;;  %v4281_v41 = vld [vmem:[%s9301_s1 + $0x4b8] sm:$0xf] }
  0x33   : > { %819 = vmatpush.bf16.msrb.mxu3 %v4014_v45  ;;  %v4293_v25 = vld [vmem:[%s9301_s1 + $0x4d0] sm:$0xf]  ;;  %v6135_v32 = vld [vmem:[%s9301_s1 + $0x2f8] sm:$0xf0]  ;;  %v6192_v44 = vld [vmem:[%s9301_s1 + $0x4c0] sm:$0xf0] }
  0x34   : > { %830 = vmatpush.bf16.msrb.mxu0 %v4146_v58  ;;  %v4341_v30 = vld [vmem:[%s9301_s1 + $0x530] sm:$0xf]  ;;  %v6159_v34 = vld [vmem:[%s9301_s1 + $0x3b8] sm:$0xf0]  ;;  %v4294_v38 = vor.u32 %v6195_v29, %v4293_v25  ;;  %v4054_v42 = vor.u32 %v6135_v32, %v4053_v24  ;;  %v4329_v45 = vld [vmem:[%s9301_s1 + $0x518] sm:$0xf] }
  0x35   : > { %844 = vmatpush.bf16.msrb.mxu1 %v4242_v59  ;;  %v4149_v33 = vld [vmem:[%s9301_s1 + $0x3b0] sm:$0xf]  ;;  %v4342_v39 = vor.u32 %v6207_v31, %v4341_v30  ;;  %v6204_v46 = vld [vmem:[%s9301_s1 + $0x520] sm:$0xf0]  ;;  %v4137_v48 = vld [vmem:[%s9301_s1 + $0x398] sm:$0xf] }
  0x36   : > { %868 = vmatpush.bf16.msra.mxu2 %v4102_v50  ;;  %v4150_v43 = vor.u32 %v6159_v34, %v4149_v33  ;;  %v6132_v47 = vld [vmem:[%s9301_s1 + $0x2e0] sm:$0xf0]  ;;  %v4282_v50 = vor.u32 %v6192_v44, %v4281_v41  ;;  %v4029_v52 = vld [vmem:[%s9301_s1 + $0x2c0] sm:$0xf]  ;;  %v6189_v58 = vld [vmem:[%s9301_s1 + $0x4a8] sm:$0xf0] }
  0x37   : > { %882 = vmatpush.bf16.msra.mxu3 %v4198_v51  ;;  %4344 = vmatmul.msk.bf16.vlgmr.msrb.gmra.mxu2 %vm752_vm0, %v6822_v35  ;;  %v6156_v49 = vld [vmem:[%s9301_s1 + $0x3a0] sm:$0xf0]  ;;  %v4330_v51 = vor.u32 %v6204_v46, %v4329_v45  ;;  %v4269_v55 = vld [vmem:[%s9301_s1 + $0x4a0] sm:$0xf]  ;;  %v4042_v56 = vor.u32 %v6132_v47, %v4041_v40  ;;  %v6201_v60 = vld [vmem:[%s9301_s1 + $0x508] sm:$0xf0] }
  0x38   : > { %831 = vmatpush.bf16.msrb.mxu0 %v4134_v6  ;;  %820 = vmatmul.bf16.vlgmr.msrb.gmra.mxu3 %v6844_v53  ;;  %v4138_v57 = vor.u32 %v6156_v49, %v4137_v48  ;;  %v4317_v59 = vld [vmem:[%s9301_s1 + $0x500] sm:$0xf]  ;;  %v6129_v61 = vld [vmem:[%s9301_s1 + $0x2c8] sm:$0xf0]  ;;  %v4017_v2 = vld [vmem:[%s9301_s1 + $0x2a8] sm:$0xf] }
  0x39   : > { %845 = vmatpush.bf16.msrb.mxu1 %v4230_v7  ;;  %v4125_v62 = vld [vmem:[%s9301_s1 + $0x380] sm:$0xf]  ;;  %v6153_v63 = vld [vmem:[%s9301_s1 + $0x388] sm:$0xf0]  ;;  %v6126_v3 = vld [vmem:[%s9301_s1 + $0x2b0] sm:$0xf0]  ;;  %v4030_v5 = vor.u32 %v6129_v61, %v4029_v52 }
  0x3a   : > { %869 = vmatpush.bf16.msra.mxu2 %v4090_v0  ;;  %v4270_v0 = vor.u32 %v6189_v58, %v4269_v55  ;;  %v4257_v4 = vld [vmem:[%s9301_s1 + $0x488] sm:$0xf]  ;;  %v4126_v6 = vor.u32 %v6153_v63, %v4125_v62  ;;  %v6186_v7 = vld [vmem:[%s9301_s1 + $0x490] sm:$0xf0]  ;;  %v4018_v20 = vor.u32 %v6126_v3, %v4017_v2  ;;  %v4245_v22 = vld [vmem:[%s9301_s1 + $0x470] sm:$0xf] }
  0x3b   : > { %883 = vmatpush.bf16.msra.mxu3 %v4186_v1  ;;  %v4318_v1 = vor.u32 %v6201_v60, %v4317_v59  ;;  %v4305_v8 = vld [vmem:[%s9301_s1 + $0x4e8] sm:$0xf]  ;;  %v6198_v9 = vld [vmem:[%s9301_s1 + $0x4f0] sm:$0xf0]  ;;  %v4258_v16 = vor.u32 %v6186_v7, %v4257_v4  ;;  %v6183_v23 = vld [vmem:[%s9301_s1 + $0x478] sm:$0xf0] }
  0x3c   : > { %832 = vmatpush.bf16.msrb.mxu0 %v4122_v18  ;;  %v4113_v10 = vld [vmem:[%s9301_s1 + $0x368] sm:$0xf]  ;;  %v6150_v11 = vld [vmem:[%s9301_s1 + $0x370] sm:$0xf0]  ;;  %v4306_v17 = vor.u32 %v6198_v9, %v4305_v8  ;;  %v6059_v29 = vld [vmem:[%s9301_s1 + $0x98] sm:$0xf0]  ;;  %v4246_v32 = vor.u32 %v6183_v23, %v4245_v22 }
  0x3d   : > { %846 = vmatpush.bf16.msrb.mxu1 %v4218_v19  ;;  %v4528_v14 = vld [vmem:[%s9301_s1 + $0x168] sm:$0xf]  ;;  %v6086_v15 = vld [vmem:[%s9301_s1 + $0x170] sm:$0xf0]  ;;  %v4114_v21 = vor.u32 %v6150_v11, %v4113_v10  ;;  %v4516_v30 = vld [vmem:[%s9301_s1 + $0x150] sm:$0xf] }
  0x3e   : > { %870 = vmatpush.bf16.msra.mxu2 %v4078_v12  ;;  %v4432_v12 = vld [vmem:[%s9301_s1 + $0xa8] sm:$0xf]  ;;  %v6110_v19 = vld [vmem:[%s9301_s1 + $0x230] sm:$0xf0]  ;;  %v4529_v25 = vor.u32 %v6086_v15, %v4528_v14  ;;  %v6083_v31 = vld [vmem:[%s9301_s1 + $0x158] sm:$0xf0] }
  0x3f   : > { %884 = vmatpush.bf16.msra.mxu3 %v4174_v13  ;;  %v6062_v13 = vld [vmem:[%s9301_s1 + $0xb0] sm:$0xf0]  ;;  %v4624_v18 = vld [vmem:[%s9301_s1 + $0x228] sm:$0xf]  ;;  %v4612_v33 = vld [vmem:[%s9301_s1 + $0x210] sm:$0xf] }
  0x40   : > { %833 = vmatpush.bf16.msrb.mxu0 %v4110_v36  ;;  %v4433_v24 = vor.u32 %v6062_v13, %v4432_v12  ;;  %v6107_v34 = vld [vmem:[%s9301_s1 + $0x218] sm:$0xf0]  ;;  %v4233_v36 = vld [vmem:[%s9301_s1 + $0x458] sm:$0xf]  ;;  %v6080_v44 = vld [vmem:[%s9301_s1 + $0x140] sm:$0xf0] }
  0x41   : > { %847 = vmatpush.bf16.msrb.mxu1 %v4206_v37  ;;  %v6180_v37 = vld [vmem:[%s9301_s1 + $0x460] sm:$0xf0]  ;;  %v4408_v40 = vld [vmem:[%s9301_s1 + $0x78] sm:$0xf]  ;;  %v4613_v41 = vor.u32 %v6107_v34, %v4612_v33  ;;  %v4221_v48 = vld [vmem:[%s9301_s1 + $0x440] sm:$0xf] }
  0x42   : > { %871 = vmatpush.bf16.msra.mxu2 %v4066_v26  ;;  %v4420_v26 = vld [vmem:[%s9301_s1 + $0x90] sm:$0xf]  ;;  %v4234_v45 = vor.u32 %v6180_v37, %v4233_v36  ;;  %v4600_v46 = vld [vmem:[%s9301_s1 + $0x1f8] sm:$0xf]  ;;  %v6104_v47 = vld [vmem:[%s9301_s1 + $0x200] sm:$0xf0] }
  0x43   : > { %885 = vmatpush.bf16.msra.mxu3 %v4162_v28  ;;  %834 = vmatmul.bf16.vlgmr.msrb.gmra.mxu0 %v6846_v54  ;;  %v4625_v28 = vor.u32 %v6110_v19, %v4624_v18  ;;  %v6177_v49 = vld [vmem:[%s9301_s1 + $0x448] sm:$0xf0]  ;;  %v4396_v52 = vld [vmem:[%s9301_s1 + $0x60] sm:$0xf]  ;;  %v4209_v60 = vld [vmem:[%s9301_s1 + $0x428] sm:$0xf] }
  0x44   : > { %896 = vmatpush.bf16.msra.mxu0 %v4294_v38  ;;  %848 = vmatmul.bf16.vlgmr.msrb.gmra.mxu1 %v6807_v27  ;;  %v4421_v38 = vor.u32 %v6059_v29, %v4420_v26  ;;  %v6053_v55 = vld [vmem:[%s9301_s1 + $0x68] sm:$0xf0]  ;;  %v4588_v58 = vld [vmem:[%s9301_s1 + $0x1e0] sm:$0xf]  ;;  %v6174_v61 = vld [vmem:[%s9301_s1 + $0x430] sm:$0xf0] }
  0x45   : > { %914 = vmatpush.bf16.msra.mxu1 %v4342_v39  ;;  %v4517_v39 = vor.u32 %v6083_v31, %v4516_v30  ;;  %v6101_v59 = vld [vmem:[%s9301_s1 + $0x1e8] sm:$0xf0]  ;;  %v4384_v63 = vld [vmem:[%s9301_s1 + $0x48] sm:$0xf]  ;;  %v6050_v3 = vld [vmem:[%s9301_s1 + $0x50] sm:$0xf0] }
  0x46   : > { %872 = vmatpush.bf16.msra.mxu2 %v4054_v42  ;;  %v6056_v42 = vld [vmem:[%s9301_s1 + $0x80] sm:$0xf0]  ;;  %v4589_v2 = vor.u32 %v6101_v59, %v4588_v58  ;;  %v4480_v4 = vld [vmem:[%s9301_s1 + $0x108] sm:$0xf]  ;;  %v6098_v8 = vld [vmem:[%s9301_s1 + $0x1d0] sm:$0xf0]  ;;  %v4385_v10 = vor.u32 %v6050_v3, %v4384_v63 }
  0x47   : > { %886 = vmatpush.bf16.msra.mxu3 %v4150_v43  ;;  %v4504_v43 = vld [vmem:[%s9301_s1 + $0x138] sm:$0xf]  ;;  %v4576_v7 = vld [vmem:[%s9301_s1 + $0x1c8] sm:$0xf]  ;;  %v4372_v12 = vld [vmem:[%s9301_s1 + $0x30] sm:$0xf] }
  0x48   : > { %897 = vmatpush.bf16.msra.mxu0 %v4282_v50  ;;  %v4409_v50 = vor.u32 %v6056_v42, %v4408_v40  ;;  %v4660_v13 = vld [vmem:[%s9301_s1 + $0x270] sm:$0xf]  ;;  %v6119_v14 = vld [vmem:[%s9301_s1 + $0x278] sm:$0xf0]  ;;  %v4577_v15 = vor.u32 %v6098_v8, %v4576_v7  ;;  %v6116_v26 = vld [vmem:[%s9301_s1 + $0x260] sm:$0xf0] }
  0x49   : > { %915 = vmatpush.bf16.msra.mxu1 %v4330_v51  ;;  %v4505_v51 = vor.u32 %v6080_v44, %v4504_v43  ;;  %v6071_v18 = vld [vmem:[%s9301_s1 + $0xf8] sm:$0xf0]  ;;  %v4564_v19 = vld [vmem:[%s9301_s1 + $0x1b0] sm:$0xf]  ;;  %v6044_v29 = vld [vmem:[%s9301_s1 + $0x20] sm:$0xf0] }
  0x4a   : > { %873 = vmatpush.bf16.msra.mxu2 %v4042_v56  ;;  %v4492_v56 = vld [vmem:[%s9301_s1 + $0x120] sm:$0xf]  ;;  %v4456_v30 = vld [vmem:[%s9301_s1 + $0xd8] sm:$0xf]  ;;  %v6068_v31 = vld [vmem:[%s9301_s1 + $0xe0] sm:$0xf0] }
  0x4b   : > { %887 = vmatpush.bf16.msra.mxu3 %v4138_v57  ;;  %v4222_v57 = vor.u32 %v6177_v49, %v4221_v48  ;;  %v4348_v34 = vld [vmem:[%s9301_s1] sm:$0xf]  ;;  %v6041_v36 = vld [vmem:[%s9301_s1 + $0x8] sm:$0xf0]  ;;  %v4457_v40 = vor.u32 %v6068_v31, %v4456_v30  ;;  %v4626_v49 = vld [vmem:[%s9301_s1 + $0x234] sm:$0xf0] }
  0x4c   : > { %898 = vmatpush.bf16.msra.mxu0 %v4270_v0  ;;  %v4672_v0 = vld [vmem:[%s9301_s1 + $0x288] sm:$0xf]  ;;  %v4444_v37 = vld [vmem:[%s9301_s1 + $0xc0] sm:$0xf]  ;;  %v6113_v43 = vld [vmem:[%s9301_s1 + $0x248] sm:$0xf0] }
  0x4d   : > { %916 = vmatpush.bf16.msra.mxu1 %v4318_v1  ;;  %v6122_v1 = vld [vmem:[%s9301_s1 + $0x290] sm:$0xf0]  ;;  %v4636_v42 = vld [vmem:[%s9301_s1 + $0x240] sm:$0xf]  ;;  %v6109_v48 = vld [vmem:[%s9301_s1 + $0x22c] sm:$0xf] }
  0x4e   : > { %874 = vmatpush.bf16.msra.mxu2 %v4030_v5  ;;  %v6074_v5 = vld [vmem:[%s9301_s1 + $0x110] sm:$0xf0]  ;;  %v4673_v9 = vor.u32 %v6122_v1, %v4672_v0  ;;  %v29_v58 = vld [vmem:[%s6746_s20 + $0x28] sm:$0x3]  ;;  %v6085_v59 = vld [vmem:[%s9301_s1 + $0x16c] sm:$0xf]  ;;  %v4629_v0 = vor.u32 %v6109_v48, %v4626_v49 }
  0x4f   : > { %888 = vmatpush.bf16.msra.mxu3 %v4126_v6  ;;  %v4210_v6 = vor.u32 %v6174_v61, %v4209_v60  ;;  %v4481_v11 = vor.u32 %v6074_v5, %v4480_v4  ;;  %v30_v63 = vld [vmem:[%s6746_s20 + $0x30] sm:$0x3]  ;;  %v4422_v3 = vld [vmem:[%s9301_s1 + $0x9c] sm:$0xf0]  ;;  %v6106_v4 = vld [vmem:[%s9301_s1 + $0x214] sm:$0xf] }
  0x50   : > { %899 = vmatpush.bf16.msra.mxu0 %v4258_v16  ;;  %v6047_v16 = vld [vmem:[%s9301_s1 + $0x38] sm:$0xf0]  ;;  %v4614_v7 = vld [vmem:[%s9301_s1 + $0x21c] sm:$0xf0]  ;;  %v6118_v8 = vld [vmem:[%s9301_s1 + $0x274] sm:$0xf] }
  0x51   : > { %917 = vmatpush.bf16.msra.mxu1 %v4306_v17  ;;  %v4468_v17 = vld [vmem:[%s9301_s1 + $0xf0] sm:$0xf]  ;;  %v4373_v22 = vor.u32 %v6047_v16, %v4372_v12  ;;  %v27_v12 = vld [vmem:[%s6746_s20 + $0x18] sm:$0xff]  ;;  %v4518_v16 = vld [vmem:[%s9301_s1 + $0x15c] sm:$0xf0] }
  0x52   : > { %875 = vmatpush.bf16.msra.mxu2 %v4018_v20  ;;  %v6095_v20 = vld [vmem:[%s9301_s1 + $0x1b8] sm:$0xf0]  ;;  %v4469_v23 = vor.u32 %v6071_v18, %v4468_v17  ;;  %v4617_v17 = vor.u32 %v6106_v4, %v4614_v7  ;;  %v4506_v30 = vld [vmem:[%s9301_s1 + $0x144] sm:$0xf0]  ;;  %v4386_v48 = vld [vmem:[%s9301_s1 + $0x54] sm:$0xf0] }
  0x53   : > { %889 = vmatpush.bf16.msra.mxu3 %v4114_v21  ;;  %v4661_v21 = vor.u32 %v6119_v14, %v4660_v13  ;;  %v31_v13 = vld [vmem:[%s6746_s20 + $0x38] sm:$0x3]  ;;  %v4470_v4 = vld [vmem:[%s9301_s1 + $0xfc] sm:$0xf0] }
  0x54   : > { %900 = vmatpush.bf16.msra.mxu0 %v4246_v32  ;;  %4345 = vmatmul.msk.bf16.vlgmr.msra.gmra.mxu1 %vm752_vm0, %v6822_v35  ;;  %v4397_v35 = vor.u32 %v6053_v55, %v4396_v52  ;;  %v4552_v32 = vld [vmem:[%s9301_s1 + $0x198] sm:$0xf]  ;;  %v28_v55 = vld [vmem:[%s6746_s20 + $0x20] sm:$0x3] }
  0x55   : > { %1375 = vmatpush.bf16.msrb.mxu1 %v4433_v24  ;;  %876 = vmatmul.bf16.vlgmr.msra.gmra.mxu2 %v6844_v53  ;;  %v4601_v53 = vor.u32 %v6104_v47, %v4600_v46  ;;  %v4360_v24 = vld [vmem:[%s9301_s1 + $0x18] sm:$0xf]  ;;  %v6061_v46 = vld [vmem:[%s9301_s1 + $0xac] sm:$0xf] }
  0x56   : > { %1389 = vmatpush.bf16.msrb.mxu2 %v4529_v25  ;;  %890 = vmatmul.bf16.vlgmr.msra.gmra.mxu3 %v6846_v54  ;;  %v6077_v54 = vld [vmem:[%s9301_s1 + $0x128] sm:$0xf0]  ;;  %v4648_v25 = vld [vmem:[%s9301_s1 + $0x258] sm:$0xf] }
  0x57   : > { %1403 = vmatpush.bf16.msrb.mxu3 %v4625_v28  ;;  %v4493_v62 = vor.u32 %v6077_v54, %v4492_v56  ;;  %v4565_v28 = vor.u32 %v6095_v20, %v4564_v19  ;;  %v4649_v33 = vor.u32 %v6116_v26, %v4648_v25  ;;  %v4434_v47 = vld [vmem:[%s9301_s1 + $0xb4] sm:$0xf0]  ;;  %v4349_v56 = vor.u32 %v6041_v36, %v4348_v34  ;;  %v6055_v19 = vld [vmem:[%s9301_s1 + $0x7c] sm:$0xf]  ;;  %v4410_v20 = vld [vmem:[%s9301_s1 + $0x84] sm:$0xf0] }
  0x58   : > { %901 = vmatpush.bf16.msra.mxu0 %v4234_v45  ;;  %v6089_v45 = vld [vmem:[%s9301_s1 + $0x188] sm:$0xf0]  ;;  %v4674_v52 = vld [vmem:[%s9301_s1 + $0x294] sm:$0xf0]  ;;  %v4437_v61 = vor.u32 %v6061_v46, %v4434_v47  ;;  %v7299_v25 = vpack.c.bf16 %v31_v13, %v27_v12  ;;  %v6100_v34 = vld [vmem:[%s9301_s1 + $0x1e4] sm:$0xf] }
  0x59   : > { %1376 = vmatpush.bf16.msrb.mxu1 %v4421_v38  ;;  %v6065_v38 = vld [vmem:[%s9301_s1 + $0xc8] sm:$0xf0]  ;;  %v4590_v36 = vld [vmem:[%s9301_s1 + $0x1ec] sm:$0xf0]  ;;  %v6091_v12 = vld [vmem:[%s9301_s1 + $0x19c] sm:$0xf] }
  0x5a   : > { %1390 = vmatpush.bf16.msrb.mxu2 %v4517_v39  ;;  %v4361_v39 = vor.u32 %v6044_v29, %v4360_v24  ;;  %v4445_v54 = vor.u32 %v6065_v38, %v4444_v37  ;;  %v4650_v24 = vld [vmem:[%s9301_s1 + $0x264] sm:$0xf0]  ;;  %v6079_v29 = vld [vmem:[%s9301_s1 + $0x13c] sm:$0xf]  ;;  %v6112_v37 = vld [vmem:[%s9301_s1 + $0x244] sm:$0xf] }
  0x5b   : > { %1404 = vmatpush.bf16.msrb.mxu3 %v4613_v41  ;;  %v4540_v41 = vld [vmem:[%s9301_s1 + $0x180] sm:$0xf]  ;;  %v4638_v38 = vld [vmem:[%s9301_s1 + $0x24c] sm:$0xf0]  ;;  %v6049_v47 = vld [vmem:[%s9301_s1 + $0x4c] sm:$0xf] }
  0x5c   : > { %902 = vmatpush.bf16.msra.mxu0 %v4222_v57  ;;  %v25_v57 = vld [vmem:[%s6746_s20 + $0x8] sm:$0xff]  ;;  %v4541_v60 = vor.u32 %v6089_v45, %v4540_v41  ;;  %v6063_v41 = vld [vmem:[%s9301_s1 + $0xb8] sm:$0xf0]  ;;  %v4593_v45 = vor.u32 %v6100_v34, %v4590_v36  ;;  %v4641_v46 = vor.u32 %v6112_v37, %v4638_v38  ;;  %v6064_v36 = vld [vmem:[%s9301_s1 + $0xc4] sm:$0xf] }
  0x5d   : > { %1377 = vmatpush.bf16.msrb.mxu1 %v4409_v50  ;;  %v6121_v50 = vld [vmem:[%s9301_s1 + $0x28c] sm:$0xf]  ;;  %v4554_v13 = vld [vmem:[%s9301_s1 + $0x1a4] sm:$0xf0]  ;;  %v4446_v37 = vld [vmem:[%s9301_s1 + $0xcc] sm:$0xf0] }
  0x5e   : > { %1391 = vmatpush.bf16.msrb.mxu2 %v4505_v51  ;;  %v4637_v51 = vor.u32 %v6113_v43, %v4636_v42  ;;  %v4677_v1 = vor.u32 %v6121_v50, %v4674_v52  ;;  %v6076_v43 = vld [vmem:[%s9301_s1 + $0x124] sm:$0xf]  ;;  %v6097_v50 = vld [vmem:[%s9301_s1 + $0x1cc] sm:$0xf] }
  0x5f   : > { %1405 = vmatpush.bf16.msrb.mxu3 %v4601_v53  ;;  %v24_v53 = vld [vmem:[%s6746_s20] sm:$0xff] }
  0x60   : > { %903 = vmatpush.bf16.msra.mxu0 %v4210_v6  ;;  %v7256_v5 = vpack.c.bf16 %v28_v55, %v24_v53  ;;  %v7258_v6 = vpack.c.bf16 %v29_v58, %v25_v57  ;;  %v4428_v53 = vld [vmem:[%s9301_s1 + $0x98] sm:$0xf]  ;;  %v6060_v55 = vld [vmem:[%s9301_s1 + $0xa0] sm:$0xf0] }
  0x61   : > { %1378 = vmatpush.bf16.msrb.mxu1 %v4397_v35  ;;  %v4530_v35 = vld [vmem:[%s9301_s1 + $0x174] sm:$0xf0] }
  0x62   : > { %1392 = vmatpush.bf16.msrb.mxu2 %v4493_v62  ;;  %v26_v62 = vld [vmem:[%s6746_s20 + $0x10] sm:$0xff]  ;;  %v4482_v57 = vld [vmem:[%s9301_s1 + $0x114] sm:$0xf0] }
  0x63   : > { %1406 = vmatpush.bf16.msrb.mxu3 %v4589_v2  ;;  %904 = vmatmul.bf16.vlgmr.msra.gmra.mxu0 %v6807_v27  ;;  %v6092_v27 = vld [vmem:[%s9301_s1 + $0x1a0] sm:$0xf0]  ;;  %v6058_v2 = vld [vmem:[%s9301_s1 + $0x94] sm:$0xf] }
  0x64   : > { %1421 = vmatpush.bf16.msrb.mxu0 %v4673_v9  ;;  %v4553_v44 = vor.u32 %v6092_v27, %v4552_v32  ;;  %v4662_v9 = vld [vmem:[%s9301_s1 + $0x27c] sm:$0xf0]  ;;  %v4425_v14 = vor.u32 %v6058_v2, %v4422_v3  ;;  %v6052_v27 = vld [vmem:[%s9301_s1 + $0x64] sm:$0xf]  ;;  %v6070_v3 = vld [vmem:[%s9301_s1 + $0xf4] sm:$0xf] }
  0x65   : > { %1379 = vmatpush.bf16.msrb.mxu1 %v4385_v10  ;;  %v4533_v10 = vor.u32 %v6085_v59, %v4530_v35  ;;  %v4665_v18 = vor.u32 %v6118_v8, %v4662_v9  ;;  %v6046_v59 = vld [vmem:[%s9301_s1 + $0x34] sm:$0xf]  ;;  %v6043_v8 = vld [vmem:[%s9301_s1 + $0x1c] sm:$0xf]  ;;  %v4362_v9 = vld [vmem:[%s9301_s1 + $0x24] sm:$0xf0] }
  0x66   : > { %1393 = vmatpush.bf16.msrb.mxu2 %v4481_v11  ;;  %v7269_v11 = vpack.c.bf16 %v30_v63, %v26_v62  ;;  %v6094_v35 = vld [vmem:[%s9301_s1 + $0x1b4] sm:$0xf]  ;;  %v4566_v62 = vld [vmem:[%s9301_s1 + $0x1bc] sm:$0xf0] }
  0x67   : > { %1407 = vmatpush.bf16.msrb.mxu3 %v4577_v15  ;;  %v6082_v15 = vld [vmem:[%s9301_s1 + $0x154] sm:$0xf]  ;;  %v4569_v7 = vor.u32 %v6094_v35, %v4566_v62  ;;  %v4656_v35 = vld [vmem:[%s9301_s1 + $0x260] sm:$0xf]  ;;  %v6117_v62 = vld [vmem:[%s9301_s1 + $0x268] sm:$0xf0] }
  0x68   : > { %1422 = vmatpush.bf16.msrb.mxu0 %v4661_v21  ;;  %v6103_v21 = vld [vmem:[%s9301_s1 + $0x1fc] sm:$0xf]  ;;  %v4521_v26 = vor.u32 %v6082_v15, %v4518_v16  ;;  %v4404_v15 = vld [vmem:[%s9301_s1 + $0x68] sm:$0xf]  ;;  %v6054_v16 = vld [vmem:[%s9301_s1 + $0x70] sm:$0xf0] }
  0x69   : > { %1380 = vmatpush.bf16.msrb.mxu1 %v4373_v22  ;;  %v4602_v22 = vld [vmem:[%s9301_s1 + $0x204] sm:$0xf0] }
  0x6a   : > { %1394 = vmatpush.bf16.msrb.mxu2 %v4469_v23  ;;  %v6115_v23 = vld [vmem:[%s9301_s1 + $0x25c] sm:$0xf]  ;;  %v4605_v31 = vor.u32 %v6103_v21, %v4602_v22  ;;  %v4557_v21 = vor.u32 %v6091_v12, %v4554_v13  ;;  %v4350_v22 = vld [vmem:[%s9301_s1 + $0xc] sm:$0xf0]  ;;  %v6114_v12 = vld [vmem:[%s9301_s1 + $0x250] sm:$0xf0] }
  0x6b   : > { %1408 = vmatpush.bf16.msrb.mxu3 %v4565_v28  ;;  %v4413_v28 = vor.u32 %v6055_v19, %v4410_v20  ;;  %v4653_v32 = vor.u32 %v6115_v23, %v4650_v24  ;;  %v4458_v19 = vld [vmem:[%s9301_s1 + $0xe4] sm:$0xf0]  ;;  %v6040_v20 = vld [vmem:[%s9301_s1 + $0x4] sm:$0xf]  ;;  %v4542_v24 = vld [vmem:[%s9301_s1 + $0x18c] sm:$0xf0] }
  0x6c   : > { %1423 = vmatpush.bf16.msrb.mxu0 %v4649_v33  ;;  %v4398_v33 = vld [vmem:[%s9301_s1 + $0x6c] sm:$0xf0]  ;;  %v6088_v23 = vld [vmem:[%s9301_s1 + $0x184] sm:$0xf]  ;;  %v4353_v34 = vor.u32 %v6040_v20, %v4350_v22  ;;  %v6102_v20 = vld [vmem:[%s9301_s1 + $0x1f0] sm:$0xf0] }
  0x6d   : > { %1381 = vmatpush.bf16.msrb.mxu1 %v4361_v39  ;;  %v4509_v39 = vor.u32 %v6079_v29, %v4506_v30  ;;  %v4401_v42 = vor.u32 %v6052_v27, %v4398_v33  ;;  %v4536_v29 = vld [vmem:[%s9301_s1 + $0x170] sm:$0xf]  ;;  %v6087_v30 = vld [vmem:[%s9301_s1 + $0x178] sm:$0xf0]  ;;  %v4545_v38 = vor.u32 %v6088_v23, %v4542_v24 }
  0x6e   : > { %1395 = vmatpush.bf16.msrb.mxu2 %v4457_v40  ;;  %v4440_v40 = vld [vmem:[%s9301_s1 + $0xb0] sm:$0xf]  ;;  %v6123_v33 = vld [vmem:[%s9301_s1 + $0x298] sm:$0xf0] }
  0x6f   : > { %1409 = vmatpush.bf16.msrb.mxu3 %v4553_v44  ;;  %v4494_v44 = vld [vmem:[%s9301_s1 + $0x12c] sm:$0xf0]  ;;  %v4441_v49 = vor.u32 %v6063_v41, %v4440_v40  ;;  %v6111_v41 = vld [vmem:[%s9301_s1 + $0x238] sm:$0xf0] }
  0x70   : > { %1424 = vmatpush.bf16.msrb.mxu0 %v4637_v51  ;;  %v4578_v51 = vld [vmem:[%s9301_s1 + $0x1d4] sm:$0xf0]  ;;  %v4497_v52 = vor.u32 %v6076_v43, %v4494_v44  ;;  %v4680_v27 = vld [vmem:[%s9301_s1 + $0x290] sm:$0xf]  ;;  %v6075_v23 = vld [vmem:[%s9301_s1 + $0x118] sm:$0xf0] }
  0x71   : > { %1382 = vmatpush.bf16.msrb.mxu1 %v4349_v56  ;;  %v4389_v56 = vor.u32 %v6049_v47, %v4386_v48  ;;  %v4581_v58 = vor.u32 %v6097_v50, %v4578_v51  ;;  %v4632_v40 = vld [vmem:[%s9301_s1 + $0x230] sm:$0xf]  ;;  %v4681_v43 = vor.u32 %v6123_v33, %v4680_v27  ;;  %v4524_v44 = vld [vmem:[%s9301_s1 + $0x158] sm:$0xf]  ;;  %v6048_v48 = vld [vmem:[%s9301_s1 + $0x40] sm:$0xf0] }
  0x72   : > { %1396 = vmatpush.bf16.msrb.mxu2 %v4445_v54  ;;  %v6073_v54 = vld [vmem:[%s9301_s1 + $0x10c] sm:$0xf]  ;;  %v4380_v47 = vld [vmem:[%s9301_s1 + $0x38] sm:$0xf]  ;;  %v6120_v51 = vld [vmem:[%s9301_s1 + $0x280] sm:$0xf0] }
  0x73   : > { %1410 = vmatpush.bf16.msrb.mxu3 %v4541_v60  ;;  %4682 = vmatmul.msk.bf16.vlgmr.msrb.gmra.mxu0 %vm752_vm0, %v7299_v25  ;;  %v4374_v60 = vld [vmem:[%s9301_s1 + $0x3c] sm:$0xf0]  ;;  %v4485_v63 = vor.u32 %v6073_v54, %v4482_v57  ;;  %v4668_v50 = vld [vmem:[%s9301_s1 + $0x278] sm:$0xf]  ;;  %v6081_v57 = vld [vmem:[%s9301_s1 + $0x148] sm:$0xf0] }
  0x74   : > { %1431 = vmatpush.bf16.msra.mxu0 %v4437_v61  ;;  %1383 = vmatmul.bf16.vlgmr.msrb.gmra.mxu1 %v7256_v5  ;;  %v4429_v61 = vor.u32 %v6060_v55, %v4428_v53  ;;  %v4377_v2 = vor.u32 %v6046_v59, %v4374_v60  ;;  %v4620_v53 = vld [vmem:[%s9301_s1 + $0x218] sm:$0xf]  ;;  %v6108_v55 = vld [vmem:[%s9301_s1 + $0x220] sm:$0xf0]  ;;  %v4512_v54 = vld [vmem:[%s9301_s1 + $0x140] sm:$0xf] }
  0x75   : > { %1397 = vmatmul.bf16.vlgmr.msrb.gmra.mxu2 %v7258_v6  ;;  %1445 = vmatpush.bf16.msra.mxu1 %v4533_v10  ;;  %v4368_v59 = vld [vmem:[%s9301_s1 + $0x20] sm:$0xf]  ;;  %v6045_v60 = vld [vmem:[%s9301_s1 + $0x28] sm:$0xf0]  ;;  %v4488_v22 = vld [vmem:[%s9301_s1 + $0x110] sm:$0xf] }
  0x76   : > { %1459 = vmatpush.bf16.msra.mxu2 %v4629_v0  ;;  %1411 = vmatmul.bf16.vlgmr.msrb.gmra.mxu3 %v7269_v11  ;;  %v4416_v0 = vld [vmem:[%s9301_s1 + $0x80] sm:$0xf]  ;;  %v4489_v27 = vor.u32 %v6075_v23, %v4488_v22  ;;  %v6227_v33 = vld [vmem:[%s9301_s1 + $0x5d8] sm:$0xf0]  ;;  %v4823_v22 = vld [vmem:[%s9301_s1 + $0x570] sm:$0xf] }
  0x77   : > { %1477 = vmatpush.bf16.msra.mxu3 %v4677_v1  ;;  %v6057_v1 = vld [vmem:[%s9301_s1 + $0x88] sm:$0xf0]  ;;  %v6215_v23 = vld [vmem:[%s9301_s1 + $0x578] sm:$0xf0] }
  0x78   : > { %1432 = vmatpush.bf16.msra.mxu0 %v4425_v14  ;;  %v4417_v10 = vor.u32 %v6057_v1, %v4416_v0  ;;  %v4473_v14 = vor.u32 %v6070_v3, %v4470_v4  ;;  %v4608_v0 = vld [vmem:[%s9301_s1 + $0x200] sm:$0xf]  ;;  %v6105_v1 = vld [vmem:[%s9301_s1 + $0x208] sm:$0xf0]  ;;  %v4356_v3 = vld [vmem:[%s9301_s1 + $0x8] sm:$0xf] }
  0x79   : > { %1446 = vmatpush.bf16.msra.mxu1 %v4521_v26  ;;  %v4405_v26 = vor.u32 %v6054_v16, %v4404_v15  ;;  %v4500_v4 = vld [vmem:[%s9301_s1 + $0x128] sm:$0xf]  ;;  %v4609_v13 = vor.u32 %v6105_v1, %v4608_v0  ;;  %v6254_v16 = vld [vmem:[%s9301_s1 + $0x6b0] sm:$0xf0] }
  0x7a   : > { %1460 = vmatpush.bf16.msra.mxu2 %v4617_v17  ;;  %v4365_v17 = vor.u32 %v6043_v8, %v4362_v9  ;;  %v4657_v8 = vor.u32 %v6117_v62, %v4656_v35  ;;  %v6042_v9 = vld [vmem:[%s9301_s1 + $0x10] sm:$0xf0]  ;;  %v4979_v15 = vld [vmem:[%s9301_s1 + $0x6a8] sm:$0xf] }
  0x7b   : > { %1478 = vmatpush.bf16.msra.mxu3 %v4665_v18  ;;  %v6067_v18 = vld [vmem:[%s9301_s1 + $0xdc] sm:$0xf]  ;;  %v5075_v62 = vld [vmem:[%s9301_s1 + $0x768] sm:$0xf] }
  0x7c   : > { %1433 = vmatpush.bf16.msra.mxu0 %v4413_v28  ;;  %v4392_v28 = vld [vmem:[%s9301_s1 + $0x50] sm:$0xf]  ;;  %v4835_v1 = vld [vmem:[%s9301_s1 + $0x588] sm:$0xf] }
  0x7d   : > { %1447 = vmatpush.bf16.msra.mxu1 %v4509_v39  ;;  %v4537_v39 = vor.u32 %v6087_v30, %v4536_v29  ;;  %v4871_v30 = vld [vmem:[%s9301_s1 + $0x5d0] sm:$0xf] }
  0x7e   : > { %1461 = vmatpush.bf16.msra.mxu2 %v4605_v31  ;;  %v4461_v31 = vor.u32 %v6067_v18, %v4458_v19  ;;  %v6230_v18 = vld [vmem:[%s9301_s1 + $0x5f0] sm:$0xf0]  ;;  %v4596_v19 = vld [vmem:[%s9301_s1 + $0x1e8] sm:$0xf] }
  0x7f   : > { %1479 = vmatpush.bf16.msra.mxu3 %v4653_v32  ;;  %v6051_v32 = vld [vmem:[%s9301_s1 + $0x58] sm:$0xf0]  ;;  %v4597_v29 = vor.u32 %v6102_v20, %v4596_v19  ;;  %v4919_v19 = vld [vmem:[%s9301_s1 + $0x630] sm:$0xf] }
  0x80   : > { %1434 = vmatpush.bf16.msra.mxu0 %v4401_v42  ;;  %v4393_v42 = vor.u32 %v6051_v32, %v4392_v28  ;;  %v6251_v32 = vld [vmem:[%s9301_s1 + $0x698] sm:$0xf0] }
  0x81   : > { %1448 = vmatpush.bf16.msra.mxu1 %v4497_v52  ;;  %v6239_v20 = vld [vmem:[%s9301_s1 + $0x638] sm:$0xf0] }
  0x82   : > { %1462 = vmatpush.bf16.msra.mxu2 %v4593_v45  ;;  %v6084_v45 = vld [vmem:[%s9301_s1 + $0x160] sm:$0xf0] }
  0x83   : > { %1480 = vmatpush.bf16.msra.mxu3 %v4641_v46  ;;  %v4449_v46 = vor.u32 %v6064_v36, %v4446_v37  ;;  %v4525_v52 = vor.u32 %v6084_v45, %v4524_v44  ;;  %v6099_v36 = vld [vmem:[%s9301_s1 + $0x1d8] sm:$0xf0]  ;;  %v4476_v37 = vld [vmem:[%s9301_s1 + $0xf8] sm:$0xf]  ;;  %v6248_v44 = vld [vmem:[%s9301_s1 + $0x680] sm:$0xf0] }
  0x84   : > { %1435 = vmatpush.bf16.msra.mxu0 %v4389_v56  ;;  %v4381_v56 = vor.u32 %v6048_v48, %v4380_v47  ;;  %v4572_v47 = vld [vmem:[%s9301_s1 + $0x1b8] sm:$0xf]  ;;  %v6096_v48 = vld [vmem:[%s9301_s1 + $0x1c0] sm:$0xf0] }
  0x85   : > { %1449 = vmatpush.bf16.msra.mxu1 %v4485_v63  ;;  %v4513_v63 = vor.u32 %v6081_v57, %v4512_v54  ;;  %v6221_v57 = vld [vmem:[%s9301_s1 + $0x5a8] sm:$0xf0] }
  0x86   : > { %1463 = vmatpush.bf16.msra.mxu2 %v4581_v58  ;;  %4683 = vmatmul.msk.bf16.vlgmr.msra.gmra.mxu3 %vm752_vm0, %v7299_v25  ;;  %v4669_v58 = vor.u32 %v6120_v51, %v4668_v50 }
  0x87   : > { %1487 = vmatpush.bf16.msrb.mxu3 %v4441_v49  ;;  %v4633_v49 = vor.u32 %v6111_v41, %v4632_v40  ;;  %v4872_v40 = vor.u32 %v6227_v33, %v4871_v30  ;;  %v5051_v30 = vld [vmem:[%s9301_s1 + $0x738] sm:$0xf]  ;;  %v6236_v33 = vld [vmem:[%s9301_s1 + $0x620] sm:$0xf0] }
  0x88   : > { %1436 = vmatpush.bf16.msra.mxu0 %v4377_v2  ;;  %v4369_v2 = vor.u32 %v6045_v60, %v4368_v59  ;;  %v6093_v59 = vld [vmem:[%s9301_s1 + $0x1a8] sm:$0xf0]  ;;  %v4452_v60 = vld [vmem:[%s9301_s1 + $0xc8] sm:$0xf] }
  0x89   : > { %1450 = vmatpush.bf16.msra.mxu1 %v4473_v14  ;;  %v4883_v14 = vld [vmem:[%s9301_s1 + $0x5e8] sm:$0xf] }
  0x8a   : > { %1464 = vmatpush.bf16.msra.mxu2 %v4569_v7  ;;  %v6078_v7 = vld [vmem:[%s9301_s1 + $0x130] sm:$0xf0]  ;;  %v4884_v28 = vor.u32 %v6230_v18, %v4883_v14 }
  0x8b   : > { %1488 = vmatpush.bf16.msrb.mxu3 %v4429_v61  ;;  %v4621_v61 = vor.u32 %v6108_v55, %v4620_v53  ;;  %v4847_v53 = vld [vmem:[%s9301_s1 + $0x5a0] sm:$0xf] }
  0x8c   : > { %1437 = vmatpush.bf16.msra.mxu0 %v4365_v17  ;;  %v4501_v17 = vor.u32 %v6078_v7, %v4500_v4  ;;  %v4943_v55 = vld [vmem:[%s9301_s1 + $0x660] sm:$0xf]  ;;  %v6218_v7 = vld [vmem:[%s9301_s1 + $0x590] sm:$0xf0] }
  0x8d   : > { %1451 = vmatpush.bf16.msra.mxu1 %v4461_v31  ;;  %v4967_v31 = vld [vmem:[%s9301_s1 + $0x690] sm:$0xf] }
  0x8e   : > { %1465 = vmatpush.bf16.msra.mxu2 %v4557_v21  ;;  %v4357_v21 = vor.u32 %v6042_v9, %v4356_v3  ;;  %v6242_v3 = vld [vmem:[%s9301_s1 + $0x650] sm:$0xf0] }
  0x8f   : > { %1489 = vmatpush.bf16.msrb.mxu3 %v4417_v10  ;;  %v4644_v10 = vld [vmem:[%s9301_s1 + $0x248] sm:$0xf]  ;;  %v6090_v9 = vld [vmem:[%s9301_s1 + $0x190] sm:$0xf0] }
  0x90   : > { %1438 = vmatpush.bf16.msra.mxu0 %v4353_v34  ;;  %v4645_v24 = vor.u32 %v6114_v12, %v4644_v10  ;;  %v4584_v34 = vld [vmem:[%s9301_s1 + $0x1d0] sm:$0xf]  ;;  %v5123_v12 = vld [vmem:[%s9301_s1 + $0x7c8] sm:$0xf] }
  0x91   : > { %1452 = vmatpush.bf16.msra.mxu1 %v4449_v46  ;;  %v4585_v41 = vor.u32 %v6099_v36, %v4584_v34  ;;  %v6224_v46 = vld [vmem:[%s9301_s1 + $0x5c0] sm:$0xf0]  ;;  %v4811_v36 = vld [vmem:[%s9301_s1 + $0x558] sm:$0xf] }
  0x92   : > { %1466 = vmatpush.bf16.msra.mxu2 %v4545_v38  ;;  %v6072_v38 = vld [vmem:[%s9301_s1 + $0x100] sm:$0xf0] }
  0x93   : > { %1490 = vmatpush.bf16.msrb.mxu3 %v4405_v26  ;;  %1439 = vmatmul.bf16.vlgmr.msra.gmra.mxu0 %v7256_v5  ;;  %v4980_v26 = vor.u32 %v6254_v16, %v4979_v15  ;;  %v4477_v45 = vor.u32 %v6072_v38, %v4476_v37  ;;  %v5063_v15 = vld [vmem:[%s9301_s1 + $0x750] sm:$0xf]  ;;  %v6275_v16 = vld [vmem:[%s9301_s1 + $0x758] sm:$0xf0]  ;;  %v6212_v37 = vld [vmem:[%s9301_s1 + $0x560] sm:$0xf0] }
  0x94   : > { %1501 = vmatpush.bf16.msrb.mxu0 %v4537_v39  ;;  %1453 = vmatmul.bf16.vlgmr.msra.gmra.mxu1 %v7258_v6  ;;  %v4968_v39 = vor.u32 %v6251_v32, %v4967_v31  ;;  %v6272_v31 = vld [vmem:[%s9301_s1 + $0x740] sm:$0xf0]  ;;  %v4824_v32 = vor.u32 %v6215_v23, %v4823_v22  ;;  %v5099_v38 = vld [vmem:[%s9301_s1 + $0x798] sm:$0xf]  ;;  %v5015_v22 = vld [vmem:[%s9301_s1 + $0x6f0] sm:$0xf] }
  0x95   : > { %1467 = vmatmul.bf16.vlgmr.msra.gmra.mxu2 %v7269_v11  ;;  %1515 = vmatpush.bf16.msrb.mxu1 %v4633_v49  ;;  %v4464_v49 = vld [vmem:[%s9301_s1 + $0xe0] sm:$0xf]  ;;  %v6263_v23 = vld [vmem:[%s9301_s1 + $0x6f8] sm:$0xf0] }
  0x96   : > { %1533 = vmatpush.bf16.msrb.mxu2 %v4681_v43  ;;  %v4955_v43 = vld [vmem:[%s9301_s1 + $0x678] sm:$0xf] }
  0x97   : > { %1491 = vmatpush.bf16.msrb.mxu3 %v4393_v42  ;;  %v4859_v42 = vld [vmem:[%s9301_s1 + $0x5b8] sm:$0xf]  ;;  %v4956_v50 = vor.u32 %v6248_v44, %v4955_v43  ;;  %v4799_v43 = vld [vmem:[%s9301_s1 + $0x540] sm:$0xf]  ;;  %v6209_v44 = vld [vmem:[%s9301_s1 + $0x548] sm:$0xf0] }
  0x98   : > { %1502 = vmatpush.bf16.msrb.mxu0 %v4525_v52  ;;  %v4860_v51 = vor.u32 %v6224_v46, %v4859_v42  ;;  %v4573_v52 = vor.u32 %v6096_v48, %v4572_v47  ;;  %v6269_v46 = vld [vmem:[%s9301_s1 + $0x728] sm:$0xf0]  ;;  %v1543_v47 = vld [vmem:[%s6746_s20] sm:$0xfc] }
  0x99   : > { %1516 = vmatpush.bf16.msrb.mxu1 %v4621_v61  ;;  %v6066_v61 = vld [vmem:[%s9301_s1 + $0xd0] sm:$0xf0]  ;;  %v6253_v48 = vld [vmem:[%s9301_s1 + $0x6ac] sm:$0xf] }
  0x9a   : > { %1534 = vmatpush.bf16.msrb.mxu2 %v4669_v58  ;;  %v4560_v58 = vld [vmem:[%s9301_s1 + $0x1a0] sm:$0xf]  ;;  %v4453_v4 = vor.u32 %v6066_v61, %v4452_v60  ;;  %v4885_v61 = vld [vmem:[%s9301_s1 + $0x5f4] sm:$0xf0] }
  0x9b   : > { %1492 = vmatpush.bf16.msrb.mxu3 %v4381_v56  ;;  %v6245_v56 = vld [vmem:[%s9301_s1 + $0x668] sm:$0xf0]  ;;  %v4561_v0 = vor.u32 %v6093_v59, %v4560_v58 }
  0x9c   : > { %1503 = vmatpush.bf16.msrb.mxu0 %v4513_v63  ;;  %v4944_v35 = vor.u32 %v6245_v56, %v4943_v55  ;;  %v6278_v63 = vld [vmem:[%s9301_s1 + $0x770] sm:$0xf0]  ;;  %v5077_v55 = vld [vmem:[%s9301_s1 + $0x774] sm:$0xf0]  ;;  %v6229_v58 = vld [vmem:[%s9301_s1 + $0x5ec] sm:$0xf] }
  0x9d   : > { %1517 = vmatpush.bf16.msrb.mxu1 %v4609_v13  ;;  %v5076_v10 = vor.u32 %v6278_v63, %v5075_v62  ;;  %v6290_v13 = vld [vmem:[%s9301_s1 + $0x7d0] sm:$0xf0] }
  0x9e   : > { %1535 = vmatpush.bf16.msrb.mxu2 %v4657_v8  ;;  %v4548_v8 = vld [vmem:[%s9301_s1 + $0x188] sm:$0xf]  ;;  %v6266_v62 = vld [vmem:[%s9301_s1 + $0x710] sm:$0xf0] }
  0x9f   : > { %1493 = vmatpush.bf16.msrb.mxu3 %v4369_v2  ;;  %v4931_v2 = vld [vmem:[%s9301_s1 + $0x648] sm:$0xf]  ;;  %v4549_v18 = vor.u32 %v6090_v9, %v4548_v8 }
  0xa0   : > { %1504 = vmatpush.bf16.msrb.mxu0 %v4501_v17  ;;  %v4932_v14 = vor.u32 %v6242_v3, %v4931_v2  ;;  %v4836_v17 = vor.u32 %v6218_v7, %v4835_v1  ;;  %v4800_v2 = vor.u32 %v6209_v44, %v4799_v43  ;;  %v1550_v7 = vld [vmem:[%s6746_s20 + $0x38] sm:$0xf]  ;;  %v6244_v43 = vld [vmem:[%s9301_s1 + $0x664] sm:$0xf] }
  0xa1   : > { %1518 = vmatpush.bf16.msrb.mxu1 %v4597_v29  ;;  %v4920_v29 = vor.u32 %v6239_v20, %v4919_v19  ;;  %v6226_v19 = vld [vmem:[%s9301_s1 + $0x5d4] sm:$0xf]  ;;  %v4873_v20 = vld [vmem:[%s9301_s1 + $0x5dc] sm:$0xf0] }
  0xa2   : > { %1536 = vmatpush.bf16.msrb.mxu2 %v4645_v24  ;;  %v5064_v24 = vor.u32 %v6275_v16, %v5063_v15  ;;  %v5065_v15 = vld [vmem:[%s9301_s1 + $0x75c] sm:$0xf0]  ;;  %v4888_v16 = vor.u32 %v6229_v58, %v4885_v61 }
  0xa3   : > { %1494 = vmatpush.bf16.msrb.mxu3 %v4357_v21  ;;  %v5124_v21 = vor.u32 %v6290_v13, %v5123_v12  ;;  %v6250_v13 = vld [vmem:[%s9301_s1 + $0x694] sm:$0xf] }
  0xa4   : > { %1505 = vmatpush.bf16.msrb.mxu0 %v4489_v27  ;;  %v4907_v27 = vld [vmem:[%s9301_s1 + $0x618] sm:$0xf] }
  0xa5   : > { %1519 = vmatpush.bf16.msrb.mxu1 %v4585_v41  ;;  %4684 = vmatmul.msk.bf16.vlgmr.msrb.gmra.mxu2 %vm752_vm0, %v7299_v25  ;;  %v4848_v25 = vor.u32 %v6221_v57, %v4847_v53  ;;  %v6233_v41 = vld [vmem:[%s9301_s1 + $0x608] sm:$0xf0]  ;;  %v4908_v42 = vor.u32 %v6236_v33, %v4907_v27  ;;  %v6271_v27 = vld [vmem:[%s9301_s1 + $0x73c] sm:$0xf]  ;;  %v5053_v33 = vld [vmem:[%s9301_s1 + $0x744] sm:$0xf0] }
  0xa6   : > { %2130 = vmatpush.bf16.msra.mxu2 %v4884_v28  ;;  %1495 = vmatmul.bf16.vlgmr.msrb.gmra.mxu3 %v7256_v5  ;;  %v6069_v5 = vld [vmem:[%s9301_s1 + $0xe8] sm:$0xf0]  ;;  %v6287_v28 = vld [vmem:[%s9301_s1 + $0x7b8] sm:$0xf0] }
  0xa7   : > { %2144 = vmatpush.bf16.msra.mxu3 %v4980_v26  ;;  %v4465_v54 = vor.u32 %v6069_v5, %v4464_v49  ;;  %v5111_v26 = vld [vmem:[%s9301_s1 + $0x7b0] sm:$0xf]  ;;  %v1547_v49 = vld [vmem:[%s6746_s20 + $0x20] sm:$0xf]  ;;  %v1544_v5 = vld [vmem:[%s6746_s20 + $0x8] sm:$0xfc] }
  0xa8   : > { %1506 = vmatpush.bf16.msrb.mxu0 %v4477_v45  ;;  %v5112_v34 = vor.u32 %v6287_v28, %v5111_v26  ;;  %v5039_v45 = vld [vmem:[%s9301_s1 + $0x720] sm:$0xf]  ;;  %v6277_v53 = vld [vmem:[%s9301_s1 + $0x76c] sm:$0xf]  ;;  %v1551_v63 = vpack.c.bf16 %v1547_v49, %v1543_v47  ;;  %v6268_v47 = vld [vmem:[%s9301_s1 + $0x724] sm:$0xf] }
  0xa9   : > { %1520 = vmatpush.bf16.msrb.mxu1 %v4573_v52  ;;  %v4981_v52 = vld [vmem:[%s9301_s1 + $0x6b4] sm:$0xf0]  ;;  %v5040_v56 = vor.u32 %v6269_v46, %v5039_v45  ;;  %v6281_v57 = vld [vmem:[%s9301_s1 + $0x788] sm:$0xf0]  ;;  %v779_v1 = vpop.f32.mrf.mxu1  ;;  %v5080_v3 = vor.u32 %v6277_v53, %v5077_v55  ;;  %v4945_v46 = vld [vmem:[%s9301_s1 + $0x66c] sm:$0xf0] }
  0xaa   : > { %2131 = vmatpush.bf16.msra.mxu2 %v4872_v40  ;;  %v4895_v40 = vld [vmem:[%s9301_s1 + $0x600] sm:$0xf]  ;;  %v793_v60 = vpop.f32.mrf.mxu2  ;;  %v4984_v9 = vor.u32 %v6253_v48, %v4981_v52  ;;  %v1545_v52 = vld [vmem:[%s6746_s20 + $0x10] sm:$0xfc]  ;;  %v4948_v61 = vor.u32 %v6244_v43, %v4945_v46  ;;  %v6211_v43 = vld [vmem:[%s9301_s1 + $0x55c] sm:$0xf] }
  0xab   : > { %2145 = vmatpush.bf16.msra.mxu3 %v4968_v39  ;;  %v5052_v39 = vor.u32 %v6272_v31, %v5051_v30  ;;  %v4896_v59 = vor.u32 %v6233_v41, %v4895_v40  ;;  %v807_v12 = vpop.f32.mrf.mxu3  ;;  %v6260_v40 = vld [vmem:[%s9301_s1 + $0x6e0] sm:$0xf0]  ;;  %v1549_v53 = vld [vmem:[%s6746_s20 + $0x30] sm:$0xf] }
  0xac   : > { %1507 = vmatpush.bf16.msrb.mxu0 %v4465_v54  ;;  %v5087_v54 = vld [vmem:[%s9301_s1 + $0x780] sm:$0xf] }
  0xad   : > { %1521 = vmatpush.bf16.msrb.mxu1 %v4561_v0  ;;  %v765_v0 = vpop.f32.mrf.mxu0 }
  0xae   : > { %2132 = vmatpush.bf16.msra.mxu2 %v4860_v51  ;;  %v780_v8 = vadd.f32 %v779_v1, %v765_v0  ;;  %v6241_v1 = vld [vmem:[%s9301_s1 + $0x64c] sm:$0xf] }
  0xaf   : > { %2146 = vmatpush.bf16.msra.mxu3 %v4956_v50  ;;  %v1548_v50 = vld [vmem:[%s6746_s20 + $0x28] sm:$0xf] }
  0xb0   : > { %1508 = vmatpush.bf16.msrb.mxu0 %v4453_v4  ;;  %v1546_v4 = vld [vmem:[%s6746_s20 + $0x18] sm:$0xfc] }
  0xb1   : > { %1522 = vmatpush.bf16.msrb.mxu1 %v4549_v18  ;;  %v4969_v18 = vld [vmem:[%s9301_s1 + $0x69c] sm:$0xf0]  ;;  %v1554_v28 = vpack.c.bf16 %v1550_v7, %v1546_v4  ;;  %v7839_v55 = vpop.f32.mrf.mxu1  ;;  %v6217_v4 = vld [vmem:[%s9301_s1 + $0x58c] sm:$0xf]  ;;  %v4837_v7 = vld [vmem:[%s9301_s1 + $0x594] sm:$0xf0] }
  0xb2   : > { %2133 = vmatpush.bf16.msra.mxu2 %v4848_v25  ;;  %v1552_v25 = vpack.c.bf16 %v1548_v50, %v1544_v5  ;;  %v4972_v31 = vor.u32 %v6250_v13, %v4969_v18  ;;  %v7819_v44 = vpop.f32.mrf.mxu2  ;;  %v6238_v18 = vld [vmem:[%s9301_s1 + $0x634] sm:$0xf] }
  0xb3   : > { %2147 = vmatpush.bf16.msra.mxu3 %v4944_v35  ;;  %1509 = vmatmul.bf16.vlgmr.msrb.gmra.mxu0 %v7258_v6  ;;  %v6284_v6 = vld [vmem:[%s9301_s1 + $0x7a0] sm:$0xf0]  ;;  %v5027_v35 = vld [vmem:[%s9301_s1 + $0x708] sm:$0xf]  ;;  %v7814_v41 = vrot.slane %v1554_v28, 1  ;;  %v7832_v49 = vpop.f32.mrf.mxu3 }
  0xb4   : > { %2158 = vmatpush.bf16.msra.mxu0 %v5076_v10  ;;  %1523 = vmatmul.bf16.vlgmr.msrb.gmra.mxu1 %v7269_v11  ;;  %v4812_v11 = vor.u32 %v6212_v37, %v4811_v36  ;;  %v5100_v51 = vor.u32 %v6284_v6, %v5099_v38  ;;  %v5088_v10 = vor.u32 %v6281_v57, %v5087_v54  ;;  %v7784_v26 = vrot.slane %v1552_v25, 1  ;;  %v4957_v37 = vld [vmem:[%s9301_s1 + $0x684] sm:$0xf0]  ;;  %v6223_v38 = vld [vmem:[%s9301_s1 + $0x5bc] sm:$0xf] }
  0xb5   : > { %2176 = vmatpush.bf16.msra.mxu1 %v5124_v21  ;;  %v794_v21 = vadd.f32 %v793_v60, %v780_v8  ;;  %v5016_v36 = vor.u32 %v6263_v23, %v5015_v22  ;;  %v5003_v6 = vld [vmem:[%s9301_s1 + $0x6d8] sm:$0xf]  ;;  %v7830_v48 = vpop.f32.mrf.mxu0  ;;  %v4991_v54 = vld [vmem:[%s9301_s1 + $0x6c0] sm:$0xf]  ;;  %v6257_v57 = vld [vmem:[%s9301_s1 + $0x6c8] sm:$0xf0] }
  0xb6   : > { %2134 = vmatpush.bf16.msra.mxu2 %v4836_v17  ;;  %v5028_v17 = vor.u32 %v6266_v62, %v5027_v35  ;;  %v5004_v50 = vor.u32 %v6260_v40, %v5003_v6  ;;  %v5125_v60 = vld [vmem:[%s9301_s1 + $0x7d4] sm:$0xf0]  ;;  %v6265_v35 = vld [vmem:[%s9301_s1 + $0x70c] sm:$0xf]  ;;  %v4992_v0 = vor.u32 %v6257_v57, %v4991_v54  ;;  %v6214_v23 = vld [vmem:[%s9301_s1 + $0x574] sm:$0xf] }
  0xb7   : > { %2148 = vmatpush.bf16.msra.mxu3 %v4932_v14  ;;  %v6274_v14 = vld [vmem:[%s9301_s1 + $0x754] sm:$0xf]  ;;  %v7786_v30 = vadd.f32 %v807_v12, %v794_v21  ;;  %v5029_v62 = vld [vmem:[%s9301_s1 + $0x714] sm:$0xf0]  ;;  %v4825_v28 = vld [vmem:[%s9301_s1 + $0x57c] sm:$0xf0] }
  0xb8   : > { %2159 = vmatpush.bf16.msra.mxu0 %v5064_v24  ;;  %v7782_v24 = vrot.slane %v1551_v63, 1  ;;  %v1553_v63 = vpack.c.bf16 %v1549_v53, %v1545_v52  ;;  %v5032_v8 = vor.u32 %v6265_v35, %v5029_v62  ;;  %v6235_v6 = vld [vmem:[%s9301_s1 + $0x61c] sm:$0xf]  ;;  %v4909_v40 = vld [vmem:[%s9301_s1 + $0x624] sm:$0xf0] }
  0xb9   : > { %2177 = vmatpush.bf16.msra.mxu1 %v5112_v34  ;;  %v4876_v34 = vor.u32 %v6226_v19, %v4873_v20  ;;  %v4921_v19 = vld [vmem:[%s9301_s1 + $0x63c] sm:$0xf0]  ;;  %v5089_v52 = vld [vmem:[%s9301_s1 + $0x78c] sm:$0xf0]  ;;  %v4912_v53 = vor.u32 %v6235_v6, %v4909_v40  ;;  %v6231_v57 = vld [vmem:[%s9301_s1 + $0x5f8] sm:$0xf0] }
  0xba   : > { %2135 = vmatpush.bf16.msra.mxu2 %v4824_v32  ;;  %v6247_v32 = vld [vmem:[%s9301_s1 + $0x67c] sm:$0xf]  ;;  %v7882_v13 = vrot.slane %v1553_v63, 1  ;;  %v4891_v54 = vld [vmem:[%s9301_s1 + $0x5f0] sm:$0xf] }
  0xbb   : > { %2149 = vmatpush.bf16.msra.mxu3 %v4920_v29  ;;  %v5068_v29 = vor.u32 %v6274_v14, %v5065_v15  ;;  %v4960_v45 = vor.u32 %v6247_v32, %v4957_v37  ;;  %v6262_v14 = vld [vmem:[%s9301_s1 + $0x6f4] sm:$0xf]  ;;  %v5017_v15 = vld [vmem:[%s9301_s1 + $0x6fc] sm:$0xf0]  ;;  %v821_v20 = vpop.f32.mrf.mxu3  ;;  %v5005_v37 = vld [vmem:[%s9301_s1 + $0x6e4] sm:$0xf0] }
  0xbc   : > { %2160 = vmatpush.bf16.msra.mxu0 %v5052_v39  ;;  %v4861_v39 = vld [vmem:[%s9301_s1 + $0x5c4] sm:$0xf0]  ;;  %v5020_v32 = vor.u32 %v6262_v14, %v5017_v15  ;;  %v6279_v62 = vld [vmem:[%s9301_s1 + $0x778] sm:$0xf0]  ;;  %v6208_v63 = vld [vmem:[%s9301_s1 + $0x544] sm:$0xf] }
  0xbd   : > { %2178 = vmatpush.bf16.msra.mxu1 %v5100_v51  ;;  %v4864_v5 = vor.u32 %v6223_v38, %v4861_v39  ;;  %v6220_v51 = vld [vmem:[%s9301_s1 + $0x5a4] sm:$0xf]  ;;  %v4828_v39 = vor.u32 %v6214_v23, %v4825_v28  ;;  %v4975_v23 = vld [vmem:[%s9301_s1 + $0x698] sm:$0xf]  ;;  %v4963_v40 = vld [vmem:[%s9301_s1 + $0x680] sm:$0xf] }
  0xbe   : > { %2136 = vmatpush.bf16.msra.mxu2 %v4812_v11  ;;  %v5041_v11 = vld [vmem:[%s9301_s1 + $0x72c] sm:$0xf0]  ;;  %v6228_v14 = vld [vmem:[%s9301_s1 + $0x5e0] sm:$0xf0] }
  0xbf   : > { %2150 = vmatpush.bf16.msra.mxu3 %v4908_v42  ;;  %v5056_v42 = vor.u32 %v6271_v27, %v5053_v33  ;;  %v5044_v58 = vor.u32 %v6268_v47, %v5041_v11  ;;  %v6283_v27 = vld [vmem:[%s9301_s1 + $0x79c] sm:$0xf]  ;;  %v5101_v33 = vld [vmem:[%s9301_s1 + $0x7a4] sm:$0xf0]  ;;  %v6232_v11 = vld [vmem:[%s9301_s1 + $0x604] sm:$0xf] }
  0xc0   : > { %2161 = vmatpush.bf16.msra.mxu0 %v5040_v56  ;;  %v4849_v56 = vld [vmem:[%s9301_s1 + $0x5ac] sm:$0xf0]  ;;  %v835_v21 = vpop.f32.mrf.mxu0  ;;  %v6252_v28 = vld [vmem:[%s9301_s1 + $0x6a0] sm:$0xf0] }
  0xc1   : > { %2179 = vmatpush.bf16.msra.mxu1 %v5088_v10  ;;  %v4852_v25 = vor.u32 %v6220_v51, %v4849_v56  ;;  %v5113_v10 = vld [vmem:[%s9301_s1 + $0x7bc] sm:$0xf0]  ;;  %v6280_v51 = vld [vmem:[%s9301_s1 + $0x784] sm:$0xf]  ;;  %v4993_v56 = vld [vmem:[%s9301_s1 + $0x6cc] sm:$0xf0] }
  0xc2   : > { %2137 = vmatpush.bf16.msra.mxu2 %v4800_v2  ;;  %v4933_v2 = vld [vmem:[%s9301_s1 + $0x654] sm:$0xf0]  ;;  %v5092_v35 = vor.u32 %v6280_v51, %v5089_v52  ;;  %v5047_v51 = vld [vmem:[%s9301_s1 + $0x728] sm:$0xf] }
  0xc3   : > { %2151 = vmatpush.bf16.msra.mxu3 %v4896_v59  ;;  %v6289_v59 = vld [vmem:[%s9301_s1 + $0x7cc] sm:$0xf]  ;;  %v4936_v12 = vor.u32 %v6241_v1, %v4933_v2  ;;  %v5095_v52 = vld [vmem:[%s9301_s1 + $0x788] sm:$0xf] }
  0xc4   : > { %2162 = vmatpush.bf16.msra.mxu0 %v5028_v17  ;;  %5133 = vmatmul.msk.bf16.vlgmr.msra.gmra.mxu1 %vm752_vm0, %v7814_v41  ;;  %v4840_v17 = vor.u32 %v6217_v4, %v4837_v7  ;;  %v4987_v4 = vld [vmem:[%s9301_s1 + $0x6b0] sm:$0xf]  ;;  %v6255_v7 = vld [vmem:[%s9301_s1 + $0x6b8] sm:$0xf0] }
  0xc5   : > { %2186 = vmatpush.bf16.msrb.mxu1 %v4888_v16  ;;  %2138 = vmatmul.bf16.vlgmr.msra.gmra.mxu2 %v7782_v24  ;;  %v863_v16 = vpop.f32.mrf.mxu2 }
  0xc6   : > { %2200 = vmatpush.bf16.msrb.mxu2 %v4984_v9  ;;  %2152 = vmatmul.bf16.vlgmr.msra.gmra.mxu3 %v7784_v26  ;;  %v6286_v9 = vld [vmem:[%s9301_s1 + $0x7b4] sm:$0xf] }
  0xc7   : > { %2214 = vmatpush.bf16.msrb.mxu3 %v5080_v3  ;;  %v5128_v3 = vor.u32 %v6289_v59, %v5125_v60  ;;  %v5116_v22 = vor.u32 %v6286_v9, %v5113_v10  ;;  %v5083_v59 = vld [vmem:[%s9301_s1 + $0x770] sm:$0xf] }
  0xc8   : > { %2163 = vmatpush.bf16.msra.mxu0 %v5016_v36  ;;  %v6259_v36 = vld [vmem:[%s9301_s1 + $0x6dc] sm:$0xf]  ;;  %v5131_v60 = vld [vmem:[%s9301_s1 + $0x7d0] sm:$0xf]  ;;  %v5084_v15 = vor.u32 %v6279_v62, %v5083_v59  ;;  %v5334_v59 = vld [vmem:[%s9301_s1 + $0x888] sm:$0xf] }
  0xc9   : > { %2187 = vmatpush.bf16.msrb.mxu1 %v4876_v34  ;;  %v4924_v34 = vor.u32 %v6238_v18, %v4921_v19  ;;  %v5008_v47 = vor.u32 %v6259_v36, %v5005_v37  ;;  %v6288_v18 = vld [vmem:[%s9301_s1 + $0x7c0] sm:$0xf0]  ;;  %v4988_v19 = vor.u32 %v6255_v7, %v4987_v4  ;;  %v4976_v36 = vor.u32 %v6252_v28, %v4975_v23  ;;  %v5059_v37 = vld [vmem:[%s9301_s1 + $0x740] sm:$0xf]  ;;  %v6246_v62 = vld [vmem:[%s9301_s1 + $0x670] sm:$0xf0] }
  0xca   : > { %2201 = vmatpush.bf16.msrb.mxu2 %v4972_v31  ;;  %v836_v31 = vadd.f32 %v835_v21, %v821_v20  ;;  %v5071_v20 = vld [vmem:[%s9301_s1 + $0x758] sm:$0xf]  ;;  %v6276_v21 = vld [vmem:[%s9301_s1 + $0x760] sm:$0xf0]  ;;  %v5035_v7 = vld [vmem:[%s9301_s1 + $0x710] sm:$0xf] }
  0xcb   : > { %2215 = vmatpush.bf16.msrb.mxu3 %v5068_v29  ;;  %v849_v29 = vpop.f32.mrf.mxu1  ;;  %v5023_v28 = vld [vmem:[%s9301_s1 + $0x6f8] sm:$0xf] }
  0xcc   : > { %2164 = vmatpush.bf16.msra.mxu0 %v5004_v50  ;;  %v850_v38 = vadd.f32 %v849_v29, %v836_v31  ;;  %v6256_v50 = vld [vmem:[%s9301_s1 + $0x6c4] sm:$0xf]  ;;  %v4867_v31 = vld [vmem:[%s9301_s1 + $0x5c0] sm:$0xf] }
  0xcd   : > { %2188 = vmatpush.bf16.msrb.mxu1 %v4864_v5  ;;  %v4897_v5 = vld [vmem:[%s9301_s1 + $0x60c] sm:$0xf0]  ;;  %v7973_v1 = vpop.f32.mrf.mxu2  ;;  %v4996_v2 = vor.u32 %v6256_v50, %v4993_v56 }
  0xce   : > { %2202 = vmatpush.bf16.msrb.mxu2 %v4960_v45  ;;  %v4813_v45 = vld [vmem:[%s9301_s1 + $0x564] sm:$0xf0]  ;;  %v7927_v46 = vadd.f32 %v863_v16, %v850_v38  ;;  %v6273_v38 = vld [vmem:[%s9301_s1 + $0x748] sm:$0xf0] }
  0xcf   : > { %2216 = vmatpush.bf16.msrb.mxu3 %v5056_v42  ;;  %v5104_v42 = vor.u32 %v6283_v27, %v5101_v33  ;;  %v5072_v27 = vor.u32 %v6276_v21, %v5071_v20  ;;  %v5107_v33 = vld [vmem:[%s9301_s1 + $0x7a0] sm:$0xf]  ;;  %v5060_v50 = vor.u32 %v6273_v38, %v5059_v37  ;;  %v6216_v20 = vld [vmem:[%s9301_s1 + $0x580] sm:$0xf0] }
  0xd0   : > { %2165 = vmatpush.bf16.msra.mxu0 %v4992_v0  ;;  %v7971_v0 = vpop.f32.mrf.mxu3 }
  0xd1   : > { %2189 = vmatpush.bf16.msrb.mxu1 %v4852_v25  ;;  %v4801_v25 = vld [vmem:[%s9301_s1 + $0x54c] sm:$0xf0] }
  0xd2   : > { %2203 = vmatpush.bf16.msrb.mxu2 %v4948_v61  ;;  %v6291_v61 = vld [vmem:[%s9301_s1 + $0x7d8] sm:$0xf0]  ;;  %v4804_v16 = vor.u32 %v6208_v63, %v4801_v25  ;;  %v4843_v25 = vld [vmem:[%s9301_s1 + $0x590] sm:$0xf] }
  0xd3   : > { %2217 = vmatpush.bf16.msrb.mxu3 %v5044_v58  ;;  %2166 = vmatmul.bf16.vlgmr.msra.gmra.mxu0 %v7882_v13  ;;  %v4816_v58 = vor.u32 %v6211_v43, %v4813_v45  ;;  %v5132_v9 = vor.u32 %v6291_v61, %v5131_v60  ;;  %v7981_v10 = vpop.f32.mrf.mxu1  ;;  %v4855_v45 = vld [vmem:[%s9301_s1 + $0x5a8] sm:$0xf]  ;;  %v6314_v60 = vld [vmem:[%s9301_s1 + $0x890] sm:$0xf0] }
  0xd4   : > { %2232 = vmatpush.bf16.msrb.mxu0 %v5128_v3  ;;  %v4892_v3 = vor.u32 %v6231_v57, %v4891_v54  ;;  %v5335_v4 = vor.u32 %v6314_v60, %v5334_v59  ;;  %v6258_v59 = vld [vmem:[%s9301_s1 + $0x6d0] sm:$0xf0]  ;;  %v5430_v60 = vld [vmem:[%s9301_s1 + $0x948] sm:$0xf] }
  0xd5   : > { %2190 = vmatpush.bf16.msrb.mxu1 %v4840_v17  ;;  %v5119_v17 = vld [vmem:[%s9301_s1 + $0x7b8] sm:$0xf] }
  0xd6   : > { %2204 = vmatpush.bf16.msrb.mxu2 %v4936_v12  ;;  %v4879_v12 = vld [vmem:[%s9301_s1 + $0x5d8] sm:$0xf]  ;;  %v5120_v29 = vor.u32 %v6288_v18, %v5119_v17  ;;  %v6243_v17 = vld [vmem:[%s9301_s1 + $0x658] sm:$0xf0] }
  0xd7   : > { %2218 = vmatpush.bf16.msrb.mxu3 %v5032_v8  ;;  %v4900_v8 = vor.u32 %v6232_v11, %v4897_v5 }
  0xd8   : > { %2233 = vmatpush.bf16.msrb.mxu0 %v5116_v22  ;;  %v4880_v22 = vor.u32 %v6228_v14, %v4879_v12  ;;  %v877_v11 = vpop.f32.mrf.mxu2  ;;  %v5322_v12 = vld [vmem:[%s9301_s1 + $0x870] sm:$0xf]  ;;  %v6311_v14 = vld [vmem:[%s9301_s1 + $0x878] sm:$0xf0] }
  0xd9   : > { %2191 = vmatpush.bf16.msrb.mxu1 %v4828_v39  ;;  %v8027_v39 = vpop.f32.mrf.mxu0  ;;  %v891_v5 = vpop.f32.mrf.mxu3  ;;  %v5323_v23 = vor.u32 %v6311_v14, %v5322_v12  ;;  %v5526_v14 = vld [vmem:[%s9301_s1 + $0xa08] sm:$0xf] }
  0xda   : > { %2205 = vmatpush.bf16.msrb.mxu2 %v4924_v34  ;;  %v6285_v34 = vld [vmem:[%s9301_s1 + $0x7a8] sm:$0xf0]  ;;  %v892_v56 = vadd.f32 %v891_v5, %v877_v11  ;;  %v5298_v5 = vld [vmem:[%s9301_s1 + $0x840] sm:$0xf] }
  0xdb   : > { %2219 = vmatpush.bf16.msrb.mxu3 %v5020_v32  ;;  %v6225_v32 = vld [vmem:[%s9301_s1 + $0x5c8] sm:$0xf0]  ;;  %v5108_v43 = vor.u32 %v6285_v34, %v5107_v33  ;;  %v919_v57 = vpop.f32.mrf.mxu1  ;;  %v4927_v34 = vld [vmem:[%s9301_s1 + $0x638] sm:$0xf] }
  0xdc   : > { %2234 = vmatpush.bf16.msrb.mxu0 %v5104_v42  ;;  %v4868_v6 = vor.u32 %v6225_v32, %v4867_v31  ;;  %v6249_v42 = vld [vmem:[%s9301_s1 + $0x688] sm:$0xf0]  ;;  %v6264_v31 = vld [vmem:[%s9301_s1 + $0x700] sm:$0xf0]  ;;  %v5310_v32 = vld [vmem:[%s9301_s1 + $0x858] sm:$0xf] }
  0xdd   : > { %2192 = vmatpush.bf16.msrb.mxu1 %v4816_v58  ;;  %v4964_v54 = vor.u32 %v6249_v42, %v4963_v40  ;;  %v6270_v58 = vld [vmem:[%s9301_s1 + $0x730] sm:$0xf0]  ;;  %v6213_v40 = vld [vmem:[%s9301_s1 + $0x568] sm:$0xf0]  ;;  %v5024_v42 = vor.u32 %v6264_v31, %v5023_v28  ;;  %v5274_v31 = vld [vmem:[%s9301_s1 + $0x810] sm:$0xf] }
  0xde   : > { %2206 = vmatpush.bf16.msrb.mxu2 %v4912_v53  ;;  %v6282_v53 = vld [vmem:[%s9301_s1 + $0x790] sm:$0xf0]  ;;  %v6261_v11 = vld [vmem:[%s9301_s1 + $0x6e8] sm:$0xf0] }
  0xdf   : > { %2220 = vmatpush.bf16.msrb.mxu3 %v5008_v47  ;;  %v6222_v47 = vld [vmem:[%s9301_s1 + $0x5b0] sm:$0xf0]  ;;  %v5096_v63 = vor.u32 %v6282_v53, %v5095_v52  ;;  %v4915_v52 = vld [vmem:[%s9301_s1 + $0x620] sm:$0xf]  ;;  %v6237_v53 = vld [vmem:[%s9301_s1 + $0x628] sm:$0xf0] }
  0xe0   : > { %2235 = vmatpush.bf16.msrb.mxu0 %v5092_v35  ;;  %v4856_v61 = vor.u32 %v6222_v47, %v4855_v45  ;;  %v4951_v35 = vld [vmem:[%s9301_s1 + $0x668] sm:$0xf]  ;;  %v5011_v45 = vld [vmem:[%s9301_s1 + $0x6e0] sm:$0xf] }
  0xe1   : > { %2193 = vmatpush.bf16.msrb.mxu1 %v4804_v16  ;;  %v4939_v16 = vld [vmem:[%s9301_s1 + $0x650] sm:$0xf]  ;;  %v905_v18 = vpop.f32.mrf.mxu0 }
  0xe2   : > { %2207 = vmatpush.bf16.msrb.mxu2 %v4900_v8  ;;  %v4952_v8 = vor.u32 %v6246_v62, %v4951_v35  ;;  %v4916_v35 = vor.u32 %v6237_v53, %v4915_v52  ;;  %v5286_v62 = vld [vmem:[%s9301_s1 + $0x828] sm:$0xf]  ;;  %v5262_v52 = vld [vmem:[%s9301_s1 + $0x7f8] sm:$0xf] }
  0xe3   : > { %2221 = vmatpush.bf16.msrb.mxu3 %v4996_v2  ;;  %5134 = vmatmul.msk.bf16.vlgmr.msrb.gmra.mxu0 %vm752_vm0, %v7814_v41  ;;  %v6219_v2 = vld [vmem:[%s9301_s1 + $0x598] sm:$0xf0]  ;;  %v8118_v38 = vpop.f32.mrf.mxu1 }
  0xe4   : > { %2242 = vmatpush.bf16.msra.mxu0 %v4892_v3  ;;  %2194 = vmatmul.bf16.vlgmr.msrb.gmra.mxu1 %v7782_v24  ;;  %v5048_v3 = vor.u32 %v6270_v58, %v5047_v51 }
  0xe5   : > { %2256 = vmatpush.bf16.msra.mxu1 %v4988_v19  ;;  %2208 = vmatmul.bf16.vlgmr.msrb.gmra.mxu2 %v7784_v26  ;;  %v4831_v19 = vld [vmem:[%s9301_s1 + $0x578] sm:$0xf] }
  0xe6   : > { %2270 = vmatpush.bf16.msra.mxu2 %v5084_v15  ;;  %2222 = vmatmul.bf16.vlgmr.msrb.gmra.mxu3 %v7882_v13  ;;  %v4844_v15 = vor.u32 %v6219_v2, %v4843_v25  ;;  %v4832_v33 = vor.u32 %v6216_v20, %v4831_v19  ;;  %v5574_v25 = vld [vmem:[%s9301_s1 + $0xa68] sm:$0xf]  ;;  %v6335_v20 = vld [vmem:[%s9301_s1 + $0x938] sm:$0xf0] }
  0xe7   : > { %2288 = vmatpush.bf16.msra.mxu3 %v5132_v9  ;;  %v6267_v9 = vld [vmem:[%s9301_s1 + $0x718] sm:$0xf0] }
  0xe8   : > { %2243 = vmatpush.bf16.msra.mxu0 %v4880_v22  ;;  %v5036_v21 = vor.u32 %v6267_v9, %v5035_v7  ;;  %v906_v22 = vadd.f32 %v905_v18, %v892_v56  ;;  %v4807_v56 = vld [vmem:[%s9301_s1 + $0x548] sm:$0xf]  ;;  %v6234_v7 = vld [vmem:[%s9301_s1 + $0x610] sm:$0xf0] }
  0xe9   : > { %2257 = vmatpush.bf16.msra.mxu1 %v4976_v36  ;;  %v6240_v36 = vld [vmem:[%s9301_s1 + $0x640] sm:$0xf0]  ;;  %v8184_v9 = vpop.f32.mrf.mxu0 }
  0xea   : > { %2271 = vmatpush.bf16.msra.mxu2 %v5072_v27  ;;  %v6308_v27 = vld [vmem:[%s9301_s1 + $0x860] sm:$0xf0]  ;;  %v8116_v37 = vadd.f32 %v919_v57, %v906_v22  ;;  %v4928_v47 = vor.u32 %v6240_v36, %v4927_v34  ;;  %v5012_v57 = vor.u32 %v6261_v11, %v5011_v45  ;;  %v5562_v34 = vld [vmem:[%s9301_s1 + $0xa50] sm:$0xf]  ;;  %v6371_v36 = vld [vmem:[%s9301_s1 + $0xa58] sm:$0xf0]  ;;  %v782_v45 = vadd.f32 %v7839_v55, %v7830_v48 }
  0xeb   : > { %2289 = vmatpush.bf16.msra.mxu3 %v5120_v29  ;;  %v4940_v29 = vor.u32 %v6243_v17, %v4939_v16  ;;  %v5418_v16 = vld [vmem:[%s9301_s1 + $0x930] sm:$0xf]  ;;  %v8195_v17 = vpop.f32.mrf.mxu3  ;;  %v2308_v22 = vld [vmem:[%s6746_s20 + $0x20] sm:$0x1f]  ;;  %v5550_v55 = vld [vmem:[%s9301_s1 + $0xa38] sm:$0xf] }
  0xec   : > { %2244 = vmatpush.bf16.msra.mxu0 %v4868_v6  ;;  %v4819_v6 = vld [vmem:[%s9301_s1 + $0x560] sm:$0xf]  ;;  %v6332_v11 = vld [vmem:[%s9301_s1 + $0x920] sm:$0xf0] }
  0xed   : > { %2258 = vmatpush.bf16.msra.mxu1 %v4964_v54  ;;  %v4820_v51 = vor.u32 %v6213_v40, %v4819_v6  ;;  %v6210_v54 = vld [vmem:[%s9301_s1 + $0x550] sm:$0xf0]  ;;  %v5419_v6 = vor.u32 %v6335_v20, %v5418_v16  ;;  %v5514_v40 = vld [vmem:[%s9301_s1 + $0x9f0] sm:$0xf]  ;;  %v6296_v48 = vld [vmem:[%s9301_s1 + $0x800] sm:$0xf0] }
  0xee   : > { %2272 = vmatpush.bf16.msra.mxu2 %v5060_v50  ;;  %v6305_v50 = vld [vmem:[%s9301_s1 + $0x848] sm:$0xf0]  ;;  %v4808_v2 = vor.u32 %v6210_v54, %v4807_v56  ;;  %v6368_v56 = vld [vmem:[%s9301_s1 + $0xa40] sm:$0xf0]  ;;  %v5502_v54 = vld [vmem:[%s9301_s1 + $0x9d8] sm:$0xf] }
  0xef   : > { %2290 = vmatpush.bf16.msra.mxu3 %v5108_v43  ;;  %v5311_v43 = vor.u32 %v6308_v27, %v5310_v32  ;;  %v5299_v58 = vor.u32 %v6305_v50, %v5298_v5  ;;  %v6299_v32 = vld [vmem:[%s9301_s1 + $0x818] sm:$0xf0]  ;;  %v5432_v20 = vld [vmem:[%s9301_s1 + $0x954] sm:$0xf0] }
  0xf0   : > { %2245 = vmatpush.bf16.msra.mxu0 %v4856_v61  ;;  %v6338_v61 = vld [vmem:[%s9301_s1 + $0x950] sm:$0xf0]  ;;  %v2307_v5 = vld [vmem:[%s6746_s20 + $0x18] sm:$0xf8] }
  0xf1   : > { %2259 = vmatpush.bf16.msra.mxu1 %v4952_v8  ;;  %v8182_v8 = vpop.f32.mrf.mxu2  ;;  %v5431_v12 = vor.u32 %v6338_v61, %v5430_v60  ;;  %v2311_v50 = vld [vmem:[%s6746_s20 + $0x38] sm:$0x1f]  ;;  %v6329_v60 = vld [vmem:[%s9301_s1 + $0x908] sm:$0xf0] }
  0xf2   : > { %2273 = vmatpush.bf16.msra.mxu2 %v5048_v3  ;;  %v6374_v3 = vld [vmem:[%s9301_s1 + $0xa70] sm:$0xf0] }
  0xf3   : > { %2291 = vmatpush.bf16.msra.mxu3 %v5096_v63  ;;  %v6302_v63 = vld [vmem:[%s9301_s1 + $0x830] sm:$0xf0]  ;;  %v5575_v28 = vor.u32 %v6374_v3, %v5574_v25  ;;  %v5250_v3 = vld [vmem:[%s9301_s1 + $0x7e0] sm:$0xf] }
  0xf4   : > { %2246 = vmatpush.bf16.msra.mxu0 %v4844_v15  ;;  %v6362_v15 = vld [vmem:[%s9301_s1 + $0xa10] sm:$0xf0]  ;;  %v5287_v19 = vor.u32 %v6302_v63, %v5286_v62  ;;  %v2315_v62 = vpack.c.bf16 %v2311_v50, %v2307_v5  ;;  %v796_v63 = vadd.f32 %v7819_v44, %v782_v45  ;;  %v5551_v44 = vor.u32 %v6368_v56, %v5550_v55  ;;  %v5420_v5 = vld [vmem:[%s9301_s1 + $0x93c] sm:$0xf0]  ;;  %v5478_v50 = vld [vmem:[%s9301_s1 + $0x9a8] sm:$0xf] }
  0xf5   : > { %2260 = vmatpush.bf16.msra.mxu1 %v4940_v29  ;;  %v5370_v55 = vld [vmem:[%s9301_s1 + $0x8d0] sm:$0xf] }
  0xf6   : > { %2274 = vmatpush.bf16.msra.mxu2 %v5036_v21  ;;  %5135 = vmatmul.msk.bf16.vlgmr.msra.gmra.mxu3 %vm752_vm0, %v7814_v41  ;;  %v4999_v41 = vld [vmem:[%s9301_s1 + $0x6c8] sm:$0xf]  ;;  %v2304_v21 = vld [vmem:[%s6746_s20] sm:$0xf8] }
  0xf7   : > { %2915 = vmatpush.bf16.msrb.mxu3 %v5335_v4  ;;  %v4903_v4 = vld [vmem:[%s9301_s1 + $0x608] sm:$0xf]  ;;  %v5000_v18 = vor.u32 %v6258_v59, %v4999_v41  ;;  %v6356_v41 = vld [vmem:[%s9301_s1 + $0x9e0] sm:$0xf0] }
  0xf8   : > { %2247 = vmatpush.bf16.msra.mxu0 %v4832_v33  ;;  %v4904_v29 = vor.u32 %v6234_v7, %v4903_v4  ;;  %v5527_v33 = vor.u32 %v6362_v15, %v5526_v14  ;;  %v6293_v4 = vld [vmem:[%s9301_s1 + $0x7e8] sm:$0xf0]  ;;  %v5538_v7 = vld [vmem:[%s9301_s1 + $0xa20] sm:$0xf]  ;;  %v5336_v14 = vld [vmem:[%s9301_s1 + $0x894] sm:$0xf0]  ;;  %v5503_v16 = vor.u32 %v6356_v41, %v5502_v54 }
  0xf9   : > { %2261 = vmatpush.bf16.msra.mxu1 %v4928_v47  ;;  %v5275_v47 = vor.u32 %v6299_v32, %v5274_v31  ;;  %v2454_v31 = vshrl.u32 %v2315_v62, 16  ;;  %v2457_v32 = vshll.u32 %v2315_v62, 16  ;;  %v6331_v62 = vld [vmem:[%s9301_s1 + $0x91c] sm:$0xf] }
  0xfa   : > { %2275 = vmatpush.bf16.msra.mxu2 %v5024_v42  ;;  %v5406_v42 = vld [vmem:[%s9301_s1 + $0x918] sm:$0xf] }
  0xfb   : > { %2916 = vmatpush.bf16.msrb.mxu3 %v5323_v23  ;;  %v1384_v23 = vpop.f32.mrf.mxu1  ;;  %v5407_v59 = vor.u32 %v6332_v11, %v5406_v42  ;;  %v6310_v42 = vld [vmem:[%s9301_s1 + $0x874] sm:$0xf]  ;;  %v2456_v56 = vrot.slane %v2454_v31, 1  ;;  %v2459_v54 = vrot.slane %v2457_v32, 2  ;;  %v6328_v31 = vld [vmem:[%s9301_s1 + $0x904] sm:$0xf] }
  0xfc   : > { %2248 = vmatpush.bf16.msra.mxu0 %v4820_v51  ;;  %v1385_v27 = vadd.f32 %v1384_v23, %v7786_v30  ;;  %v6359_v30 = vld [vmem:[%s9301_s1 + $0x9f8] sm:$0xf0]  ;;  %v5563_v51 = vor.u32 %v6371_v36, %v5562_v34  ;;  %v6353_v23 = vld [vmem:[%s9301_s1 + $0x9c8] sm:$0xf0]  ;;  %v5251_v34 = vor.u32 %v6293_v4, %v5250_v3  ;;  %v5382_v36 = vld [vmem:[%s9301_s1 + $0x8e8] sm:$0xf] }
  0xfd   : > { %2262 = vmatpush.bf16.msra.mxu1 %v4916_v35  ;;  %v5515_v53 = vor.u32 %v6359_v30, %v5514_v40  ;;  %v6334_v11 = vld [vmem:[%s9301_s1 + $0x934] sm:$0xf]  ;;  %v5396_v32 = vld [vmem:[%s9301_s1 + $0x90c] sm:$0xf0] }
  0xfe   : > { %2276 = vmatpush.bf16.msra.mxu2 %v5012_v57  ;;  %v1398_v57 = vpop.f32.mrf.mxu2  ;;  %v2306_v3 = vld [vmem:[%s6746_s20 + $0x10] sm:$0xf8] }
  0xff   : > { %2917 = vmatpush.bf16.msrb.mxu3 %v5311_v43  ;;  %v2312_v43 = vpack.c.bf16 %v2308_v22, %v2304_v21  ;;  %v1399_v25 = vadd.f32 %v1398_v57, %v1385_v27  ;;  %v5490_v21 = vld [vmem:[%s9301_s1 + $0x9c0] sm:$0xf]  ;;  %v810_v27 = vadd.f32 %v7832_v49, %v796_v63  ;;  %v2310_v4 = vld [vmem:[%s6746_s20 + $0x30] sm:$0x1f] }
 0x100   : > { %2249 = vmatpush.bf16.msra.mxu0 %v4808_v2  ;;  %v5263_v2 = vor.u32 %v6296_v48, %v5262_v52  ;;  %v5324_v49 = vld [vmem:[%s9301_s1 + $0x87c] sm:$0xf0]  ;;  %v6350_v48 = vld [vmem:[%s9301_s1 + $0x9b0] sm:$0xf0] }
 0x101   : > { %2263 = vmatpush.bf16.msra.mxu1 %v4904_v29  ;;  %v2430_v61 = vshrl.u32 %v2312_v43, 16  ;;  %v2433_v35 = vshll.u32 %v2312_v43, 16 }
 0x102   : > { %2277 = vmatpush.bf16.msra.mxu2 %v5000_v18 }
 0x103   : > { %2918 = vmatpush.bf16.msrb.mxu3 %v5299_v58  ;;  %2250 = vmatmul.bf16.vlgmr.msra.gmra.mxu0 %v7782_v24  ;;  %v1426_v58 = vpop.f32.mrf.mxu0  ;;  %v5394_v24 = vld [vmem:[%s9301_s1 + $0x900] sm:$0xf]  ;;  %v1386_v22 = vpop.f32.mrf.mxu1  ;;  %v2435_v29 = vrot.slane %v2433_v35, 2  ;;  %v6307_v35 = vld [vmem:[%s9301_s1 + $0x85c] sm:$0xf] }
 0x104   : > { %2929 = vmatpush.bf16.msrb.mxu0 %v5431_v12  ;;  %2264 = vmatmul.bf16.vlgmr.msra.gmra.mxu1 %v7784_v26  ;;  %v6365_v12 = vld [vmem:[%s9301_s1 + $0xa28] sm:$0xf0]  ;;  %v5395_v18 = vor.u32 %v6329_v60, %v5394_v24  ;;  %v1387_v43 = vadd.f32 %v1386_v22, %v810_v27  ;;  %v2314_v22 = vpack.c.bf16 %v2310_v4, %v2306_v3 }
 0x105   : > { %2943 = vmatpush.bf16.msrb.mxu1 %v5527_v33  ;;  %2278 = vmatmul.bf16.vlgmr.msra.gmra.mxu2 %v7882_v13  ;;  %v1412_v13 = vpop.f32.mrf.mxu3  ;;  %v6313_v26 = vld [vmem:[%s9301_s1 + $0x88c] sm:$0xf]  ;;  %v5539_v40 = vor.u32 %v6365_v12, %v5538_v7  ;;  %v5466_v12 = vld [vmem:[%s9301_s1 + $0x990] sm:$0xf] }
 0x106   : > { %2961 = vmatpush.bf16.msrb.mxu2 %v5575_v28  ;;  %v1413_v15 = vadd.f32 %v1412_v13, %v1399_v25  ;;  %v2432_v28 = vrot.slane %v2430_v61, 1  ;;  %v5339_v45 = vor.u32 %v6313_v26, %v5336_v14  ;;  %v2309_v24 = vld [vmem:[%s6746_s20 + $0x28] sm:$0x1f]  ;;  %v5423_v61 = vor.u32 %v6334_v11, %v5420_v5  ;;  %v6347_v26 = vld [vmem:[%s9301_s1 + $0x998] sm:$0xf0] }
 0x107   : > { %2919 = vmatpush.bf16.msrb.mxu3 %v5287_v19  ;;  %v6337_v19 = vld [vmem:[%s9301_s1 + $0x94c] sm:$0xf]  ;;  %v5327_v25 = vor.u32 %v6310_v42, %v5324_v49  ;;  %v5479_v13 = vor.u32 %v6350_v48, %v5478_v50  ;;  %v8347_v14 = vor.u32 %v2459_v54, %v2456_v56  ;;  %v5399_v49 = vor.u32 %v6328_v31, %v5396_v32  ;;  %v5442_v54 = vld [vmem:[%s9301_s1 + $0x960] sm:$0xf]  ;;  %v5504_v31 = vld [vmem:[%s9301_s1 + $0x9e4] sm:$0xf0] }
 0x108   : > { %2930 = vmatpush.bf16.msrb.mxu0 %v5419_v6  ;;  %v8290_v33 = vadd.f32 %v1426_v58, %v1413_v15  ;;  %v6326_v6 = vld [vmem:[%s9301_s1 + $0x8f0] sm:$0xf0]  ;;  %v5435_v30 = vor.u32 %v6337_v19, %v5432_v20  ;;  %v6323_v58 = vld [vmem:[%s9301_s1 + $0x8d8] sm:$0xf0]  ;;  %v6320_v19 = vld [vmem:[%s9301_s1 + $0x8c0] sm:$0xf0] }
 0x109   : > { %2944 = vmatpush.bf16.msrb.mxu1 %v5515_v53  ;;  %v5383_v52 = vor.u32 %v6326_v6, %v5382_v36  ;;  %v8319_v53 = vor.u32 %v2435_v29, %v2432_v28  ;;  %v5371_v7 = vor.u32 %v6323_v58, %v5370_v55  ;;  %v5467_v28 = vor.u32 %v6347_v26, %v5466_v12  ;;  %v5300_v29 = vld [vmem:[%s9301_s1 + $0x84c] sm:$0xf0]  ;;  %v6344_v36 = vld [vmem:[%s9301_s1 + $0x980] sm:$0xf0]  ;;  %v6317_v42 = vld [vmem:[%s9301_s1 + $0x8a8] sm:$0xf0] }
 0x10a   : > { %2962 = vmatpush.bf16.msrb.mxu2 %v5563_v51  ;;  %v1400_v51 = vpop.f32.mrf.mxu2  ;;  %v2446_v11 = vshrl.u32 %v2314_v22, 16  ;;  %v2449_v5 = vshll.u32 %v2314_v22, 16  ;;  %v6325_v48 = vld [vmem:[%s9301_s1 + $0x8ec] sm:$0xf]  ;;  %v5384_v55 = vld [vmem:[%s9301_s1 + $0x8f4] sm:$0xf0] }
 0x10b   : > { %2920 = vmatpush.bf16.msrb.mxu3 %v5275_v47  ;;  %v5491_v47 = vor.u32 %v6353_v23, %v5490_v21  ;;  %v1401_v41 = vadd.f32 %v1400_v51, %v1387_v43  ;;  %v1428_v60 = vpop.f32.mrf.mxu0  ;;  %v6304_v21 = vld [vmem:[%s9301_s1 + $0x844] sm:$0xf]  ;;  %v6301_v43 = vld [vmem:[%s9301_s1 + $0x82c] sm:$0xf] }
 0x10c   : > { %2931 = vmatpush.bf16.msrb.mxu0 %v5407_v59  ;;  %v2305_v59 = vld [vmem:[%s6746_s20 + $0x8] sm:$0xf8]  ;;  %v5303_v50 = vor.u32 %v6304_v21, %v5300_v29  ;;  %v6355_v29 = vld [vmem:[%s9301_s1 + $0x9dc] sm:$0xf] }
 0x10d   : > { %2945 = vmatpush.bf16.msrb.mxu1 %v5503_v16  ;;  %v1414_v57 = vpop.f32.mrf.mxu3  ;;  %v2313_v15 = vpack.c.bf16 %v2309_v24, %v2305_v59  ;;  %v6373_v24 = vld [vmem:[%s9301_s1 + $0xa6c] sm:$0xf] }
 0x10e   : > { %2963 = vmatpush.bf16.msrb.mxu2 %v5551_v44  ;;  %v1415_v63 = vadd.f32 %v1414_v57, %v1401_v41  ;;  %v5312_v44 = vld [vmem:[%s9301_s1 + $0x864] sm:$0xf0]  ;;  %v6341_v41 = vld [vmem:[%s9301_s1 + $0x968] sm:$0xf0] }
 0x10f   : > { %2921 = vmatpush.bf16.msrb.mxu3 %v5263_v2  ;;  %v5408_v2 = vld [vmem:[%s9301_s1 + $0x924] sm:$0xf0]  ;;  %v5315_v23 = vor.u32 %v6307_v35, %v5312_v44  ;;  %v2438_v6 = vshrl.u32 %v2313_v15, 16  ;;  %v5387_v35 = vor.u32 %v6325_v48, %v5384_v55  ;;  %v6316_v55 = vld [vmem:[%s9301_s1 + $0x8a4] sm:$0xf] }
 0x110   : > { %2932 = vmatpush.bf16.msrb.mxu0 %v5395_v18  ;;  %v8349_v16 = vadd.f32 %v1428_v60, %v1415_v63  ;;  %v5358_v18 = vld [vmem:[%s9301_s1 + $0x8b8] sm:$0xf]  ;;  %v5411_v20 = vor.u32 %v6331_v62, %v5408_v2  ;;  %v2448_v62 = vrot.slane %v2446_v11, 1  ;;  %v2451_v63 = vrot.slane %v2449_v5, 2  ;;  %v6292_v11 = vld [vmem:[%s9301_s1 + $0x7e4] sm:$0xf] }
 0x111   : > { %2946 = vmatpush.bf16.msrb.mxu1 %v5491_v47  ;;  %v5359_v27 = vor.u32 %v6320_v19, %v5358_v18  ;;  %v5528_v47 = vld [vmem:[%s9301_s1 + $0xa14] sm:$0xf0]  ;;  %v2440_v57 = vrot.slane %v2438_v6, 1  ;;  %v5276_v18 = vld [vmem:[%s9301_s1 + $0x81c] sm:$0xf0]  ;;  %v1454_v22 = vpop.f32.mrf.mxu1 }
 0x112   : > { %2964 = vmatpush.bf16.msrb.mxu2 %v5539_v40  ;;  %v2441_v40 = vshll.u32 %v2313_v15, 16  ;;  %v5576_v60 = vld [vmem:[%s9301_s1 + $0xa74] sm:$0xf0]  ;;  %v6298_v15 = vld [vmem:[%s9301_s1 + $0x814] sm:$0xf] }
 0x113   : > { %2922 = vmatpush.bf16.msrb.mxu3 %v5251_v34  ;;  %v5454_v34 = vld [vmem:[%s9301_s1 + $0x978] sm:$0xf]  ;;  %v1440_v2 = vpop.f32.mrf.mxu0  ;;  %v5579_v26 = vor.u32 %v6373_v24, %v5576_v60  ;;  %v6295_v6 = vld [vmem:[%s9301_s1 + $0x7fc] sm:$0xf]  ;;  %v5252_v5 = vld [vmem:[%s9301_s1 + $0x7ec] sm:$0xf0] }
 0x114   : > { %2933 = vmatpush.bf16.msrb.mxu0 %v5383_v52  ;;  %v5455_v51 = vor.u32 %v6344_v36, %v5454_v34  ;;  %v5288_v52 = vld [vmem:[%s9301_s1 + $0x834] sm:$0xf0]  ;;  %v2443_v58 = vrot.slane %v2441_v40, 2  ;;  %v1441_v44 = vadd.f32 %v1440_v2, %v7927_v46  ;;  %v5564_v46 = vld [vmem:[%s9301_s1 + $0xa5c] sm:$0xf0] }
 0x115   : > { %2947 = vmatpush.bf16.msrb.mxu1 %v5479_v13  ;;  %5584 = vmatmul.msk.bf16.vlgmr.msrb.gmra.mxu2 %vm752_vm0, %v8347_v14  ;;  %v5516_v13 = vld [vmem:[%s9301_s1 + $0x9fc] sm:$0xf0]  ;;  %v5291_v3 = vor.u32 %v6301_v43, %v5288_v52  ;;  %v1482_v4 = vpop.f32.mrf.mxu3  ;;  %v5360_v34 = vld [vmem:[%s9301_s1 + $0x8c4] sm:$0xf0]  ;;  %v6363_v24 = vld [vmem:[%s9301_s1 + $0xa18] sm:$0xf0] }
 0x116   : > { %2971 = vmatpush.bf16.msra.mxu2 %v5339_v45  ;;  %2923 = vmatmul.bf16.vlgmr.msrb.gmra.mxu3 %v8319_v53  ;;  %v6361_v45 = vld [vmem:[%s9301_s1 + $0xa0c] sm:$0xf]  ;;  %v8428_v12 = vor.u32 %v2443_v58, %v2440_v57  ;;  %v1455_v32 = vadd.f32 %v1454_v22, %v1441_v44  ;;  %v5264_v40 = vld [vmem:[%s9301_s1 + $0x804] sm:$0xf0]  ;;  %v6339_v58 = vld [vmem:[%s9301_s1 + $0x958] sm:$0xf0] }
 0x117   : > { %2985 = vmatpush.bf16.msra.mxu3 %v5435_v30  ;;  %v5346_v30 = vld [vmem:[%s9301_s1 + $0x8a0] sm:$0xf]  ;;  %v5531_v59 = vor.u32 %v6361_v45, %v5528_v47  ;;  %v5267_v48 = vor.u32 %v6295_v6, %v5264_v40  ;;  %v6336_v22 = vld [vmem:[%s9301_s1 + $0x940] sm:$0xf0]  ;;  %v6357_v40 = vld [vmem:[%s9301_s1 + $0x9e8] sm:$0xf0] }
 0x118   : > { %2934 = vmatpush.bf16.msrb.mxu0 %v5371_v7  ;;  %v5347_v56 = vor.u32 %v6317_v42, %v5346_v30  ;;  %v5443_v7 = vor.u32 %v6341_v41, %v5442_v54  ;;  %v5507_v30 = vor.u32 %v6355_v29, %v5504_v31  ;;  %v6367_v42 = vld [vmem:[%s9301_s1 + $0xa3c] sm:$0xf]  ;;  %v1468_v45 = vpop.f32.mrf.mxu2  ;;  %v5438_v54 = vld [vmem:[%s9301_s1 + $0x950] sm:$0xf]  ;;  %v6312_v31 = vld [vmem:[%s9301_s1 + $0x880] sm:$0xf0] }
 0x119   : > { %2948 = vmatpush.bf16.msrb.mxu1 %v5467_v28  ;;  %v5510_v6 = vld [vmem:[%s9301_s1 + $0x9e0] sm:$0xf] }
 0x11a   : > { %2972 = vmatpush.bf16.msra.mxu2 %v5327_v25  ;;  %v6358_v25 = vld [vmem:[%s9301_s1 + $0x9f4] sm:$0xf] }
 0x11b   : > { %2986 = vmatpush.bf16.msra.mxu3 %v5423_v61  ;;  %v838_v61 = vadd.f32 %v8027_v39, %v7971_v0  ;;  %v6322_v0 = vld [vmem:[%s9301_s1 + $0x8d4] sm:$0xf]  ;;  %v5372_v39 = vld [vmem:[%s9301_s1 + $0x8dc] sm:$0xf0]  ;;  %v5519_v19 = vor.u32 %v6358_v25, %v5516_v13  ;;  %v1442_v52 = vpop.f32.mrf.mxu0  ;;  %v5342_v25 = vld [vmem:[%s9301_s1 + $0x890] sm:$0xf]  ;;  %v1456_v13 = vpop.f32.mrf.mxu1 }
 0x11c   : > { %2935 = vmatpush.bf16.msrb.mxu0 %v5359_v27  ;;  %v5375_v28 = vor.u32 %v6322_v0, %v5372_v39  ;;  %v5279_v27 = vor.u32 %v6298_v15, %v5276_v18  ;;  %v5255_v39 = vor.u32 %v6292_v11, %v5252_v5  ;;  %v5522_v18 = vld [vmem:[%s9301_s1 + $0x9f8] sm:$0xf]  ;;  %v6309_v11 = vld [vmem:[%s9301_s1 + $0x868] sm:$0xf0]  ;;  %v6343_v5 = vld [vmem:[%s9301_s1 + $0x97c] sm:$0xf] }
 0x11d   : > { %2949 = vmatpush.bf16.msrb.mxu1 %v5455_v51  ;;  %v852_v21 = vadd.f32 %v7981_v10, %v838_v61  ;;  %v6319_v10 = vld [vmem:[%s9301_s1 + $0x8bc] sm:$0xf]  ;;  %v1469_v51 = vadd.f32 %v1468_v45, %v1455_v32  ;;  %v1484_v61 = vpop.f32.mrf.mxu3  ;;  %v6346_v32 = vld [vmem:[%s9301_s1 + $0x994] sm:$0xf]  ;;  %v6333_v45 = vld [vmem:[%s9301_s1 + $0x928] sm:$0xf0] }
 0x11e   : > { %2973 = vmatpush.bf16.msra.mxu2 %v5315_v23  ;;  %v8443_v23 = vor.u32 %v2451_v63, %v2448_v62  ;;  %v5363_v47 = vor.u32 %v6319_v10, %v5360_v34  ;;  %v6364_v62 = vld [vmem:[%s9301_s1 + $0xa24] sm:$0xf]  ;;  %v5540_v63 = vld [vmem:[%s9301_s1 + $0xa2c] sm:$0xf0] }
 0x11f   : > { %2987 = vmatpush.bf16.msra.mxu3 %v5411_v20  ;;  %v6370_v20 = vld [vmem:[%s9301_s1 + $0xa54] sm:$0xf]  ;;  %v866_v43 = vadd.f32 %v7973_v1, %v852_v21  ;;  %v5492_v1 = vld [vmem:[%s9301_s1 + $0x9cc] sm:$0xf0]  ;;  %v8502_v60 = vadd.f32 %v1482_v4, %v1469_v51  ;;  %v6349_v4 = vld [vmem:[%s9301_s1 + $0x9ac] sm:$0xf]  ;;  %v5543_v15 = vor.u32 %v6364_v62, %v5540_v63  ;;  %v5511_v51 = vor.u32 %v6357_v40, %v5510_v6 }
 0x120   : > { %2936 = vmatpush.bf16.msrb.mxu0 %v5347_v56  ;;  %v5567_v36 = vor.u32 %v6370_v20, %v5564_v46  ;;  %v5348_v56 = vld [vmem:[%s9301_s1 + $0x8ac] sm:$0xf0]  ;;  %v5426_v21 = vld [vmem:[%s9301_s1 + $0x938] sm:$0xf]  ;;  %v1470_v29 = vpop.f32.mrf.mxu2  ;;  %v6375_v63 = vld [vmem:[%s9301_s1 + $0xa78] sm:$0xf0] }
 0x121   : > { %2950 = vmatpush.bf16.msrb.mxu1 %v5443_v7  ;;  %v1443_v41 = vadd.f32 %v1442_v52, %v866_v43  ;;  %v5351_v2 = vor.u32 %v6316_v55, %v5348_v56  ;;  %v5480_v7 = vld [vmem:[%s9301_s1 + $0x9b4] sm:$0xf0]  ;;  %v5414_v43 = vld [vmem:[%s9301_s1 + $0x920] sm:$0xf]  ;;  %v5498_v55 = vld [vmem:[%s9301_s1 + $0x9c8] sm:$0xf] }
 0x122   : > { %2974 = vmatpush.bf16.msra.mxu2 %v5303_v50  ;;  %v6352_v50 = vld [vmem:[%s9301_s1 + $0x9c4] sm:$0xf]  ;;  %v5483_v46 = vor.u32 %v6349_v4, %v5480_v7  ;;  %v6354_v56 = vld [vmem:[%s9301_s1 + $0x9d0] sm:$0xf0]  ;;  %v5582_v62 = vld [vmem:[%s9301_s1 + $0xa70] sm:$0xf] }
 0x123   : > { %2988 = vmatpush.bf16.msra.mxu3 %v5399_v49  ;;  %2937 = vmatmul.bf16.vlgmr.msrb.gmra.mxu0 %v8428_v12  ;;  %v5552_v49 = vld [vmem:[%s9301_s1 + $0xa44] sm:$0xf0]  ;;  %v1457_v0 = vadd.f32 %v1456_v13, %v1443_v41  ;;  %v5486_v13 = vld [vmem:[%s9301_s1 + $0x9b0] sm:$0xf] }
 0x124   : > { %2999 = vmatpush.bf16.msra.mxu0 %v5531_v59  ;;  %2951 = vmatmul.bf16.vlgmr.msrb.gmra.mxu1 %v8443_v23  ;;  %v5555_v57 = vor.u32 %v6367_v42, %v5552_v49  ;;  %v5534_v59 = vld [vmem:[%s9301_s1 + $0xa10] sm:$0xf] }
 0x125   : > { %3017 = vmatpush.bf16.msra.mxu1 %v5579_v26  ;;  %v5535_v44 = vor.u32 %v6363_v24, %v5534_v59  ;;  %v5439_v26 = vor.u32 %v6339_v58, %v5438_v54  ;;  %v1471_v10 = vadd.f32 %v1470_v29, %v1457_v0  ;;  %v5306_v58 = vld [vmem:[%s9301_s1 + $0x848] sm:$0xf]  ;;  %v6306_v59 = vld [vmem:[%s9301_s1 + $0x850] sm:$0xf0]  ;;  %v6340_v24 = vld [vmem:[%s9301_s1 + $0x964] sm:$0xf] }
 0x126   : > { %2975 = vmatpush.bf16.msra.mxu2 %v5291_v3  ;;  %v6315_v3 = vld [vmem:[%s9301_s1 + $0x898] sm:$0xf0]  ;;  %v5390_v7 = vld [vmem:[%s9301_s1 + $0x8f0] sm:$0xf]  ;;  %v5378_v29 = vld [vmem:[%s9301_s1 + $0x8d8] sm:$0xf] }
 0x127   : > { %2989 = vmatpush.bf16.msra.mxu3 %v5387_v35  ;;  %v5495_v35 = vor.u32 %v6352_v50, %v5492_v1  ;;  %v5343_v20 = vor.u32 %v6315_v3, %v5342_v25  ;;  %v5456_v50 = vld [vmem:[%s9301_s1 + $0x984] sm:$0xf0]  ;;  %v5307_v3 = vor.u32 %v6306_v59, %v5306_v58  ;;  %v6327_v0 = vld [vmem:[%s9301_s1 + $0x8f8] sm:$0xf0]  ;;  %v6366_v58 = vld [vmem:[%s9301_s1 + $0xa30] sm:$0xf0] }
 0x128   : > { %3000 = vmatpush.bf16.msra.mxu0 %v5519_v19  ;;  %v6360_v19 = vld [vmem:[%s9301_s1 + $0xa00] sm:$0xf0]  ;;  %v5459_v41 = vor.u32 %v6343_v5, %v5456_v50  ;;  %v5366_v50 = vld [vmem:[%s9301_s1 + $0x8c0] sm:$0xf] }
 0x129   : > { %3018 = vmatpush.bf16.msra.mxu1 %v5567_v36  ;;  %v5523_v34 = vor.u32 %v6360_v19, %v5522_v18  ;;  %v5427_v36 = vor.u32 %v6336_v22, %v5426_v21  ;;  %v1496_v1 = vpop.f32.mrf.mxu3  ;;  %v5570_v19 = vld [vmem:[%s9301_s1 + $0xa58] sm:$0xf]  ;;  %v1538_v22 = vpop.f32.mrf.mxu2 }
 0x12a   : > { %2976 = vmatpush.bf16.msra.mxu2 %v5279_v27  ;;  %v5468_v27 = vld [vmem:[%s9301_s1 + $0x99c] sm:$0xf0]  ;;  %v1497_v52 = vadd.f32 %v1496_v1, %v8116_v37  ;;  %v6330_v37 = vld [vmem:[%s9301_s1 + $0x910] sm:$0xf0]  ;;  %v6321_v1 = vld [vmem:[%s9301_s1 + $0x8c8] sm:$0xf0] }
 0x12b   : > { %2990 = vmatpush.bf16.msra.mxu3 %v5375_v28  ;;  %v5330_v28 = vld [vmem:[%s9301_s1 + $0x878] sm:$0xf]  ;;  %v5471_v49 = vor.u32 %v6346_v32, %v5468_v27 }
 0x12c   : > { %3001 = vmatpush.bf16.msra.mxu0 %v5507_v30  ;;  %v8552_v30 = vadd.f32 %v1484_v61, %v1471_v10  ;;  %v5331_v42 = vor.u32 %v6312_v31, %v5330_v28  ;;  %v5444_v61 = vld [vmem:[%s9301_s1 + $0x96c] sm:$0xf0]  ;;  %v6324_v31 = vld [vmem:[%s9301_s1 + $0x8e0] sm:$0xf0] }
 0x12d   : > { %3019 = vmatpush.bf16.msra.mxu1 %v5555_v57  ;;  %v5402_v57 = vld [vmem:[%s9301_s1 + $0x908] sm:$0xf]  ;;  %v5447_v4 = vor.u32 %v6340_v24, %v5444_v61  ;;  %v5367_v24 = vor.u32 %v6321_v1, %v5366_v50  ;;  %v6342_v61 = vld [vmem:[%s9301_s1 + $0x970] sm:$0xf0]  ;;  %v5953_v1 = vld [vmem:[%s9301_s1 + $0xc78] sm:$0xf] }
 0x12e   : > { %2977 = vmatpush.bf16.msra.mxu2 %v5267_v48  ;;  %v5415_v48 = vor.u32 %v6333_v45, %v5414_v43  ;;  %v5403_v25 = vor.u32 %v6330_v37, %v5402_v57  ;;  %v5379_v43 = vor.u32 %v6324_v31, %v5378_v29  ;;  %v5462_v45 = vld [vmem:[%s9301_s1 + $0x980] sm:$0xf]  ;;  %v5450_v57 = vld [vmem:[%s9301_s1 + $0x968] sm:$0xf] }
 0x12f   : > { %2991 = vmatpush.bf16.msra.mxu3 %v5363_v47  ;;  %v5318_v47 = vld [vmem:[%s9301_s1 + $0x860] sm:$0xf]  ;;  %v5546_v37 = vld [vmem:[%s9301_s1 + $0xa28] sm:$0xf] }
 0x130   : > { %3002 = vmatpush.bf16.msra.mxu0 %v5495_v35  ;;  %v5319_v54 = vor.u32 %v6309_v11, %v5318_v47  ;;  %v5499_v35 = vor.u32 %v6354_v56, %v5498_v55  ;;  %v1510_v21 = vpop.f32.mrf.mxu0  ;;  %v6345_v47 = vld [vmem:[%s9301_s1 + $0x988] sm:$0xf0]  ;;  %v5270_v55 = vld [vmem:[%s9301_s1 + $0x800] sm:$0xf] }
 0x131   : > { %3020 = vmatpush.bf16.msra.mxu1 %v5543_v15  ;;  %v6303_v15 = vld [vmem:[%s9301_s1 + $0x838] sm:$0xf0]  ;;  %v1511_v27 = vadd.f32 %v1510_v21, %v1497_v52  ;;  %v1524_v6 = vpop.f32.mrf.mxu1  ;;  %v1498_v11 = vpop.f32.mrf.mxu3  ;;  %v6297_v56 = vld [vmem:[%s9301_s1 + $0x808] sm:$0xf0] }
 0x132   : > { %2978 = vmatpush.bf16.msra.mxu2 %v5255_v39  ;;  %v894_v39 = vadd.f32 %v8195_v17, %v8182_v8  ;;  %v5391_v8 = vor.u32 %v6327_v0, %v5390_v7  ;;  %v5474_v17 = vld [vmem:[%s9301_s1 + $0x998] sm:$0xf]  ;;  %v5547_v7 = vor.u32 %v6366_v58, %v5546_v37  ;;  %v6446_v0 = vld [vmem:[%s9301_s1 + $0xcb0] sm:$0xf0]  ;;  %v5989_v58 = vld [vmem:[%s9301_s1 + $0xcc0] sm:$0xf] }
 0x133   : > { %2992 = vmatpush.bf16.msra.mxu3 %v5351_v2  ;;  %v6351_v2 = vld [vmem:[%s9301_s1 + $0x9b8] sm:$0xf0] }
 0x134   : > { %3003 = vmatpush.bf16.msra.mxu0 %v5483_v46  ;;  %5585 = vmatmul.msk.bf16.vlgmr.msra.gmra.mxu1 %vm752_vm0, %v8347_v14  ;;  %v5487_v18 = vor.u32 %v6351_v2, %v5486_v13  ;;  %v6348_v46 = vld [vmem:[%s9301_s1 + $0x9a0] sm:$0xf0]  ;;  %v908_v32 = vadd.f32 %v8184_v9, %v894_v39  ;;  %v6369_v9 = vld [vmem:[%s9301_s1 + $0xa48] sm:$0xf0]  ;;  %v5977_v13 = vld [vmem:[%s9301_s1 + $0xca8] sm:$0xf] }
 0x135   : > { %3027 = vmatpush.bf16.msrb.mxu1 %v5343_v20  ;;  %2979 = vmatmul.bf16.vlgmr.msra.gmra.mxu2 %v8319_v53  ;;  %v6372_v20 = vld [vmem:[%s9301_s1 + $0xa60] sm:$0xf0]  ;;  %v5475_v40 = vor.u32 %v6348_v46, %v5474_v17  ;;  %v6025_v2 = vld [vmem:[%s9301_s1 + $0xd08] sm:$0xf]  ;;  %v5978_v29 = vor.u32 %v6446_v0, %v5977_v13  ;;  %v3092_v13 = vld [vmem:[%s6746_s20 + $0x18] sm:$0xf0] }
 0x136   : > { %3041 = vmatpush.bf16.msrb.mxu2 %v5439_v26  ;;  %2993 = vmatmul.bf16.vlgmr.msra.gmra.mxu3 %v8428_v12  ;;  %v5294_v26 = vld [vmem:[%s9301_s1 + $0x830] sm:$0xf]  ;;  %v5571_v10 = vor.u32 %v6372_v20, %v5570_v19  ;;  %v5258_v39 = vld [vmem:[%s9301_s1 + $0x7e8] sm:$0xf] }
 0x137   : > { %3055 = vmatpush.bf16.msrb.mxu3 %v5535_v44  ;;  %v5583_v44 = vor.u32 %v6375_v63, %v5582_v62  ;;  %v5295_v28 = vor.u32 %v6303_v15, %v5294_v26  ;;  %v6398_v62 = vld [vmem:[%s9301_s1 + $0xb30] sm:$0xf0]  ;;  %v1540_v15 = vpop.f32.mrf.mxu2  ;;  %v5881_v20 = vld [vmem:[%s9301_s1 + $0xbe8] sm:$0xf] }
 0x138   : > { %3004 = vmatpush.bf16.msra.mxu0 %v5471_v49  ;;  %v1525_v49 = vadd.f32 %v1524_v6, %v1511_v27  ;;  %v1512_v63 = vpop.f32.mrf.mxu0  ;;  %v6455_v27 = vld [vmem:[%s9301_s1 + $0xcf8] sm:$0xf0] }
 0x139   : > { %3028 = vmatpush.bf16.msrb.mxu1 %v5331_v42  ;;  %v5558_v42 = vld [vmem:[%s9301_s1 + $0xa40] sm:$0xf]  ;;  %v1526_v26 = vpop.f32.mrf.mxu1  ;;  %v6443_v6 = vld [vmem:[%s9301_s1 + $0xc98] sm:$0xf0] }
 0x13a   : > { %3042 = vmatpush.bf16.msrb.mxu2 %v5427_v36  ;;  %v6300_v36 = vld [vmem:[%s9301_s1 + $0x820] sm:$0xf0]  ;;  %v8672_v52 = vadd.f32 %v1538_v22, %v1525_v49  ;;  %v5773_v22 = vld [vmem:[%s9301_s1 + $0xb10] sm:$0xf] }
 0x13b   : > { %3056 = vmatpush.bf16.msrb.mxu3 %v5523_v34  ;;  %v5282_v34 = vld [vmem:[%s9301_s1 + $0x818] sm:$0xf] }
 0x13c   : > { %3005 = vmatpush.bf16.msra.mxu0 %v5459_v41  ;;  %v5283_v5 = vor.u32 %v6300_v36, %v5282_v34  ;;  %v5354_v41 = vld [vmem:[%s9301_s1 + $0x8a8] sm:$0xf]  ;;  %v5965_v36 = vld [vmem:[%s9301_s1 + $0xc90] sm:$0xf] }
 0x13d   : > { %3029 = vmatpush.bf16.msrb.mxu1 %v5319_v54  ;;  %v5463_v54 = vor.u32 %v6345_v47, %v5462_v45  ;;  %v6392_v45 = vld [vmem:[%s9301_s1 + $0xb00] sm:$0xf0]  ;;  %v5966_v47 = vor.u32 %v6443_v6, %v5965_v36  ;;  %v6431_v36 = vld [vmem:[%s9301_s1 + $0xc38] sm:$0xf0] }
 0x13e   : > { %3043 = vmatpush.bf16.msrb.mxu2 %v5415_v48  ;;  %v5559_v48 = vor.u32 %v6369_v9, %v5558_v42  ;;  %v5869_v42 = vld [vmem:[%s9301_s1 + $0xbd0] sm:$0xf]  ;;  %v6419_v9 = vld [vmem:[%s9301_s1 + $0xbd8] sm:$0xf0] }
 0x13f   : > { %3057 = vmatpush.bf16.msrb.mxu3 %v5511_v51  ;;  %v922_v51 = vadd.f32 %v8118_v38, %v908_v32  ;;  %v6318_v38 = vld [vmem:[%s9301_s1 + $0x8b0] sm:$0xf0]  ;;  %v6013_v32 = vld [vmem:[%s9301_s1 + $0xcf0] sm:$0xf]  ;;  %v5870_v50 = vor.u32 %v6419_v9, %v5869_v42  ;;  %v6391_v9 = vld [vmem:[%s9301_s1 + $0xafc] sm:$0xf] }
 0x140   : > { %3006 = vmatpush.bf16.msra.mxu0 %v5447_v4  ;;  %v5355_v46 = vor.u32 %v6318_v38, %v5354_v41  ;;  %v6014_v49 = vor.u32 %v6455_v27, %v6013_v32  ;;  %v5941_v41 = vld [vmem:[%s9301_s1 + $0xc60] sm:$0xf] }
 0x141   : > { %3030 = vmatpush.bf16.msrb.mxu1 %v5307_v3  ;;  %v1499_v59 = vadd.f32 %v1498_v11, %v922_v51  ;;  %v6458_v3 = vld [vmem:[%s9301_s1 + $0xd10] sm:$0xf0]  ;;  %v6001_v11 = vld [vmem:[%s9301_s1 + $0xcd8] sm:$0xf]  ;;  %v6440_v51 = vld [vmem:[%s9301_s1 + $0xc80] sm:$0xf0] }
 0x142   : > { %3044 = vmatpush.bf16.msrb.mxu2 %v5403_v25  ;;  %v5271_v25 = vor.u32 %v6297_v56, %v5270_v55  ;;  %v6026_v21 = vor.u32 %v6458_v3, %v6025_v2  ;;  %v5857_v55 = vld [vmem:[%s9301_s1 + $0xbb8] sm:$0xf]  ;;  %v5954_v38 = vor.u32 %v6440_v51, %v5953_v1  ;;  %v6380_v51 = vld [vmem:[%s9301_s1 + $0xaa0] sm:$0xf0] }
 0x143   : > { %3058 = vmatpush.bf16.msrb.mxu3 %v5499_v35  ;;  %3007 = vmatmul.bf16.vlgmr.msra.gmra.mxu0 %v8443_v23  ;;  %v5785_v35 = vld [vmem:[%s9301_s1 + $0xb28] sm:$0xf]  ;;  %v1513_v4 = vadd.f32 %v1512_v63, %v1499_v59  ;;  %v6449_v59 = vld [vmem:[%s9301_s1 + $0xcc8] sm:$0xf0]  ;;  %v3096_v2 = vld [vmem:[%s6746_s20 + $0x38] sm:$0x3f] }
 0x144   : > { %3073 = vmatpush.bf16.msrb.mxu0 %v5583_v44  ;;  %v6294_v44 = vld [vmem:[%s9301_s1 + $0x7f0] sm:$0xf0]  ;;  %v5786_v19 = vor.u32 %v6398_v62, %v5785_v35  ;;  %v6397_v35 = vld [vmem:[%s9301_s1 + $0xb2c] sm:$0xf]  ;;  %v5845_v62 = vld [vmem:[%s9301_s1 + $0xba0] sm:$0xf]  ;;  %v5990_v3 = vor.u32 %v6449_v59, %v5989_v58 }
 0x145   : > { %3031 = vmatpush.bf16.msrb.mxu1 %v5295_v28  ;;  %v1527_v17 = vadd.f32 %v1526_v26, %v1513_v4  ;;  %v6395_v28 = vld [vmem:[%s9301_s1 + $0xb18] sm:$0xf0]  ;;  %v5259_v31 = vor.u32 %v6294_v44, %v5258_v39  ;;  %v5737_v4 = vld [vmem:[%s9301_s1 + $0xac8] sm:$0xf]  ;;  %v5713_v1 = vld [vmem:[%s9301_s1 + $0xa98] sm:$0xf] }
 0x146   : > { %3045 = vmatpush.bf16.msrb.mxu2 %v5391_v8  ;;  %v6422_v8 = vld [vmem:[%s9301_s1 + $0xbf0] sm:$0xf0]  ;;  %v5929_v44 = vld [vmem:[%s9301_s1 + $0xc48] sm:$0xf]  ;;  %v6377_v58 = vld [vmem:[%s9301_s1 + $0xa88] sm:$0xf0] }
 0x147   : > { %3059 = vmatpush.bf16.msrb.mxu3 %v5487_v18  ;;  %v5451_v18 = vor.u32 %v6342_v61, %v5450_v57  ;;  %v5882_v34 = vor.u32 %v6422_v8, %v5881_v20  ;;  %v5775_v20 = vld [vmem:[%s9301_s1 + $0xb1c] sm:$0xf0]  ;;  %v3100_v8 = vpack.c.bf16 %v3096_v2, %v3092_v13 }
 0x148   : > { %3074 = vmatpush.bf16.msrb.mxu0 %v5571_v10  ;;  %v8740_v10 = vadd.f32 %v1540_v15, %v1527_v17  ;;  %v2139_v57 = vpop.f32.mrf.mxu2  ;;  %v2181_v15 = vpop.f32.mrf.mxu1 }
 0x149   : > { %3032 = vmatpush.bf16.msrb.mxu1 %v5283_v5  ;;  %v6452_v5 = vld [vmem:[%s9301_s1 + $0xce0] sm:$0xf0]  ;;  %v2153_v37 = vpop.f32.mrf.mxu3 }
 0x14a   : > { %3046 = vmatpush.bf16.msrb.mxu2 %v5379_v43  ;;  %v5761_v43 = vld [vmem:[%s9301_s1 + $0xaf8] sm:$0xf]  ;;  %v6002_v56 = vor.u32 %v6452_v5, %v6001_v11  ;;  %v2154_v61 = vadd.f32 %v2153_v37, %v2139_v57  ;;  %v5821_v11 = vld [vmem:[%s9301_s1 + $0xb70] sm:$0xf]  ;;  %v6407_v5 = vld [vmem:[%s9301_s1 + $0xb78] sm:$0xf0] }
 0x14b   : > { %3060 = vmatpush.bf16.msrb.mxu3 %v5475_v40  ;;  %v5774_v40 = vor.u32 %v6395_v28, %v5773_v22  ;;  %v5725_v22 = vld [vmem:[%s9301_s1 + $0xab0] sm:$0xf]  ;;  %v6383_v28 = vld [vmem:[%s9301_s1 + $0xab8] sm:$0xf0]  ;;  %v5809_v57 = vld [vmem:[%s9301_s1 + $0xb58] sm:$0xf] }
 0x14c   : > { %3075 = vmatpush.bf16.msrb.mxu0 %v5559_v48  ;;  %v5762_v48 = vor.u32 %v6392_v45, %v5761_v43  ;;  %v8857_v43 = vrot.slane %v3100_v8, 2  ;;  %v6404_v37 = vld [vmem:[%s9301_s1 + $0xb60] sm:$0xf0]  ;;  %v5797_v8 = vld [vmem:[%s9301_s1 + $0xb40] sm:$0xf] }
 0x14d   : > { %3033 = vmatpush.bf16.msrb.mxu1 %v5271_v25  ;;  %v6413_v25 = vld [vmem:[%s9301_s1 + $0xba8] sm:$0xf0] }
 0x14e   : > { %3047 = vmatpush.bf16.msrb.mxu2 %v5367_v24  ;;  %v5846_v26 = vor.u32 %v6413_v25, %v5845_v62  ;;  %v6421_v62 = vld [vmem:[%s9301_s1 + $0xbec] sm:$0xf]  ;;  %v3093_v25 = vld [vmem:[%s6746_s20 + $0x20] sm:$0x3f] }
 0x14f   : > { %3061 = vmatpush.bf16.msrb.mxu3 %v5463_v54  ;;  %v5749_v54 = vld [vmem:[%s9301_s1 + $0xae0] sm:$0xf] }
 0x150   : > { %3076 = vmatpush.bf16.msrb.mxu0 %v5547_v7  ;;  %v6386_v7 = vld [vmem:[%s9301_s1 + $0xad0] sm:$0xf0]  ;;  %v2141_v27 = vpop.f32.mrf.mxu2  ;;  %v2183_v59 = vpop.f32.mrf.mxu1 }
 0x151   : > { %3034 = vmatpush.bf16.msrb.mxu1 %v5259_v31  ;;  %v5738_v17 = vor.u32 %v6386_v7, %v5737_v4  ;;  %v2155_v42 = vpop.f32.mrf.mxu3  ;;  %v5883_v4 = vld [vmem:[%s9301_s1 + $0xbf4] sm:$0xf0]  ;;  %v3091_v7 = vld [vmem:[%s6746_s20 + $0x10] sm:$0xf0] }
 0x152   : > { %3048 = vmatpush.bf16.msrb.mxu2 %v5355_v46  ;;  %v5833_v46 = vld [vmem:[%s9301_s1 + $0xb88] sm:$0xf]  ;;  %v2156_v45 = vadd.f32 %v2155_v42, %v2141_v27 }
 0x153   : > { %3062 = vmatpush.bf16.msrb.mxu3 %v5451_v18  ;;  %5586 = vmatmul.msk.bf16.vlgmr.msrb.gmra.mxu0 %vm752_vm0, %v8347_v14  ;;  %v5787_v14 = vld [vmem:[%s9301_s1 + $0xb34] sm:$0xf0]  ;;  %v6434_v18 = vld [vmem:[%s9301_s1 + $0xc50] sm:$0xf0] }
 0x154   : > { %3676 = vmatpush.bf16.msra.mxu0 %v5786_v19  ;;  %3035 = vmatmul.bf16.vlgmr.msrb.gmra.mxu1 %v8319_v53  ;;  %v6437_v53 = vld [vmem:[%s9301_s1 + $0xc68] sm:$0xf0]  ;;  %v5790_v39 = vor.u32 %v6397_v35, %v5787_v14  ;;  %v6394_v19 = vld [vmem:[%s9301_s1 + $0xb14] sm:$0xf]  ;;  %v5930_v31 = vor.u32 %v6434_v18, %v5929_v44  ;;  %v5739_v14 = vld [vmem:[%s9301_s1 + $0xad4] sm:$0xf0]  ;;  %v5810_v44 = vor.u32 %v6404_v37, %v5809_v57 }
 0x155   : > { %3690 = vmatpush.bf16.msra.mxu1 %v5882_v34  ;;  %3049 = vmatmul.bf16.vlgmr.msrb.gmra.mxu2 %v8428_v12  ;;  %v6389_v12 = vld [vmem:[%s9301_s1 + $0xae8] sm:$0xf0]  ;;  %v5942_v0 = vor.u32 %v6437_v53, %v5941_v41  ;;  %v5778_v32 = vor.u32 %v6394_v19, %v5775_v20  ;;  %v5917_v34 = vld [vmem:[%s9301_s1 + $0xc30] sm:$0xf]  ;;  %v6388_v41 = vld [vmem:[%s9301_s1 + $0xae4] sm:$0xf] }
 0x156   : > { %3704 = vmatpush.bf16.msra.mxu2 %v5978_v29  ;;  %3063 = vmatmul.bf16.vlgmr.msrb.gmra.mxu3 %v8443_v23  ;;  %v6416_v23 = vld [vmem:[%s9301_s1 + $0xbc0] sm:$0xf0]  ;;  %v5750_v63 = vor.u32 %v6389_v12, %v5749_v54  ;;  %v2167_v29 = vpop.f32.mrf.mxu0  ;;  %v5822_v12 = vor.u32 %v6407_v5, %v5821_v11  ;;  %v5701_v53 = vld [vmem:[%s9301_s1 + $0xa80] sm:$0xf]  ;;  %v6385_v35 = vld [vmem:[%s9301_s1 + $0xacc] sm:$0xf] }
 0x157   : > { %3722 = vmatpush.bf16.msra.mxu3 %v6026_v21  ;;  %v5858_v24 = vor.u32 %v6416_v23, %v5857_v55  ;;  %v6410_v21 = vld [vmem:[%s9301_s1 + $0xb90] sm:$0xf0]  ;;  %v2168_v6 = vadd.f32 %v2167_v29, %v2154_v61  ;;  %v5905_v23 = vld [vmem:[%s9301_s1 + $0xc18] sm:$0xf]  ;;  %v6425_v61 = vld [vmem:[%s9301_s1 + $0xc08] sm:$0xf0]  ;;  %v5702_v19 = vor.u32 %v6377_v58, %v5701_v53  ;;  %v5742_v27 = vor.u32 %v6385_v35, %v5739_v14 }
 0x158   : > { %3677 = vmatpush.bf16.msra.mxu0 %v5774_v40  ;;  %v5834_v40 = vor.u32 %v6410_v21, %v5833_v46  ;;  %v3094_v18 = vld [vmem:[%s6746_s20 + $0x28] sm:$0x3f]  ;;  %v6027_v20 = vld [vmem:[%s9301_s1 + $0xd14] sm:$0xf0]  ;;  %v6454_v11 = vld [vmem:[%s9301_s1 + $0xcf4] sm:$0xf] }
 0x159   : > { %3691 = vmatpush.bf16.msra.mxu1 %v5870_v50  ;;  %v2182_v50 = vadd.f32 %v2181_v15, %v2168_v6  ;;  %v3090_v15 = vld [vmem:[%s6746_s20 + $0x8] sm:$0xf0]  ;;  %v6379_v57 = vld [vmem:[%s9301_s1 + $0xa9c] sm:$0xf]  ;;  %v6003_v58 = vld [vmem:[%s9301_s1 + $0xce4] sm:$0xf0] }
 0x15a   : > { %3705 = vmatpush.bf16.msra.mxu2 %v5966_v47  ;;  %v5726_v47 = vor.u32 %v6383_v28, %v5725_v22  ;;  %v5886_v22 = vor.u32 %v6421_v62, %v5883_v4  ;;  %v6445_v29 = vld [vmem:[%s9301_s1 + $0xcac] sm:$0xf]  ;;  %v3098_v6 = vpack.c.bf16 %v3094_v18, %v3090_v15  ;;  %v6451_v53 = vld [vmem:[%s9301_s1 + $0xcdc] sm:$0xf]  ;;  %v6376_v62 = vld [vmem:[%s9301_s1 + $0xa84] sm:$0xf] }
 0x15b   : > { %3723 = vmatpush.bf16.msra.mxu3 %v6014_v49  ;;  %v5763_v49 = vld [vmem:[%s9301_s1 + $0xb04] sm:$0xf0]  ;;  %v8878_v54 = vadd.f32 %v2182_v50, %v8290_v33  ;;  %v5714_v33 = vor.u32 %v6380_v51, %v5713_v1  ;;  %v6442_v51 = vld [vmem:[%s9301_s1 + $0xc94] sm:$0xf]  ;;  %v5703_v4 = vld [vmem:[%s9301_s1 + $0xa8c] sm:$0xf0] }
 0x15c   : > { %3678 = vmatpush.bf16.msra.mxu0 %v5762_v48  ;;  %v5918_v48 = vor.u32 %v6431_v36, %v5917_v34  ;;  %v5766_v55 = vor.u32 %v6391_v9, %v5763_v49  ;;  %v6418_v34 = vld [vmem:[%s9301_s1 + $0xbd4] sm:$0xf]  ;;  %v5871_v36 = vld [vmem:[%s9301_s1 + $0xbdc] sm:$0xf0]  ;;  %v5889_v15 = vld [vmem:[%s9301_s1 + $0xbf0] sm:$0xf] }
 0x15d   : > { %3692 = vmatpush.bf16.msra.mxu1 %v5858_v24  ;;  %v5893_v24 = vld [vmem:[%s9301_s1 + $0xc00] sm:$0xf]  ;;  %v6382_v49 = vld [vmem:[%s9301_s1 + $0xab4] sm:$0xf]  ;;  %v5874_v1 = vor.u32 %v6418_v34, %v5871_v36  ;;  %v6423_v18 = vld [vmem:[%s9301_s1 + $0xbf8] sm:$0xf0] }
 0x15e   : > { %3706 = vmatpush.bf16.msra.mxu2 %v5954_v38  ;;  %v5751_v38 = vld [vmem:[%s9301_s1 + $0xaec] sm:$0xf0]  ;;  %v2169_v13 = vpop.f32.mrf.mxu0  ;;  %v5781_v36 = vld [vmem:[%s9301_s1 + $0xb18] sm:$0xf] }
 0x15f   : > { %3724 = vmatpush.bf16.msra.mxu3 %v6002_v56  ;;  %v6428_v56 = vld [vmem:[%s9301_s1 + $0xc20] sm:$0xf0] }
 0x160   : > { %3679 = vmatpush.bf16.msra.mxu0 %v5750_v63  ;;  %v3089_v63 = vld [vmem:[%s6746_s20] sm:$0xf0]  ;;  %v5906_v2 = vor.u32 %v6428_v56, %v5905_v23  ;;  %v8973_v23 = vrot.slane %v3098_v6, 2  ;;  %v6415_v56 = vld [vmem:[%s9301_s1 + $0xbbc] sm:$0xf] }
 0x161   : > { %3693 = vmatpush.bf16.msra.mxu1 %v5846_v26  ;;  %v6457_v26 = vld [vmem:[%s9301_s1 + $0xd0c] sm:$0xf]  ;;  %v3097_v46 = vpack.c.bf16 %v3093_v25, %v3089_v63  ;;  %v6412_v63 = vld [vmem:[%s9301_s1 + $0xba4] sm:$0xf]  ;;  %v5847_v25 = vld [vmem:[%s9301_s1 + $0xbac] sm:$0xf0] }
 0x162   : > { %3707 = vmatpush.bf16.msra.mxu2 %v5942_v0  ;;  %v3095_v0 = vld [vmem:[%s6746_s20 + $0x30] sm:$0x3f]  ;;  %v6030_v42 = vor.u32 %v6457_v26, %v6027_v20  ;;  %v6399_v20 = vld [vmem:[%s9301_s1 + $0xb38] sm:$0xf0]  ;;  %v5877_v6 = vld [vmem:[%s9301_s1 + $0xbd8] sm:$0xf] }
 0x163   : > { %3725 = vmatpush.bf16.msra.mxu3 %v5990_v3  ;;  %v5754_v3 = vor.u32 %v6388_v41, %v5751_v38  ;;  %v3099_v28 = vpack.c.bf16 %v3095_v0, %v3091_v7  ;;  %v8963_v5 = vrot.slane %v3097_v46, 2  ;;  %v2195_v41 = vpop.f32.mrf.mxu1  ;;  %v6448_v7 = vld [vmem:[%s9301_s1 + $0xcc4] sm:$0xf]  ;;  %v5991_v0 = vld [vmem:[%s9301_s1 + $0xccc] sm:$0xf0] }
 0x164   : > { %3680 = vmatpush.bf16.msra.mxu0 %v5738_v17  ;;  %v6401_v17 = vld [vmem:[%s9301_s1 + $0xb48] sm:$0xf0]  ;;  %v5793_v26 = vld [vmem:[%s9301_s1 + $0xb30] sm:$0xf] }
 0x165   : > { %3694 = vmatpush.bf16.msra.mxu1 %v5834_v40  ;;  %v5798_v9 = vor.u32 %v6401_v17, %v5797_v8  ;;  %v8965_v50 = vrot.slane %v3099_v28, 2  ;;  %v6436_v8 = vld [vmem:[%s9301_s1 + $0xc64] sm:$0xf]  ;;  %v5943_v17 = vld [vmem:[%s9301_s1 + $0xc6c] sm:$0xf0] }
 0x166   : > { %3708 = vmatpush.bf16.msra.mxu2 %v5930_v31  ;;  %6035 = vmatmul.msk.bf16.vlgmr.msra.gmra.mxu3 %vm752_vm0, %v8857_v43  ;;  %v5979_v31 = vld [vmem:[%s9301_s1 + $0xcb4] sm:$0xf0]  ;;  %v5946_v34 = vor.u32 %v6436_v8, %v5943_v17  ;;  %v6447_v8 = vld [vmem:[%s9301_s1 + $0xcb8] sm:$0xf0] }
 0x167   : > { %3732 = vmatpush.bf16.msrb.mxu3 %v5790_v39  ;;  %v2170_v39 = vadd.f32 %v2169_v13, %v2156_v45  ;;  %v5727_v45 = vld [vmem:[%s9301_s1 + $0xabc] sm:$0xf0]  ;;  %v5835_v28 = vld [vmem:[%s9301_s1 + $0xb94] sm:$0xf0] }
 0x168   : > { %3681 = vmatpush.bf16.msra.mxu0 %v5726_v47  ;;  %v5982_v47 = vor.u32 %v6445_v29, %v5979_v31  ;;  %v2209_v13 = vpop.f32.mrf.mxu2  ;;  %v5994_v29 = vor.u32 %v6448_v7, %v5991_v0  ;;  %v5890_v31 = vor.u32 %v6423_v18, %v5889_v15  ;;  %v6390_v0 = vld [vmem:[%s9301_s1 + $0xaf0] sm:$0xf0]  ;;  %v6400_v15 = vld [vmem:[%s9301_s1 + $0xb44] sm:$0xf]  ;;  %v5799_v18 = vld [vmem:[%s9301_s1 + $0xb4c] sm:$0xf0] }
 0x169   : > { %3695 = vmatpush.bf16.msra.mxu1 %v5822_v12  ;;  %v2184_v21 = vadd.f32 %v2183_v59, %v2170_v39  ;;  %v5859_v12 = vld [vmem:[%s9301_s1 + $0xbc4] sm:$0xf0]  ;;  %v2223_v35 = vpop.f32.mrf.mxu3  ;;  %v2210_v39 = vadd.f32 %v2209_v13, %v2195_v41 }
 0x16a   : > { %3709 = vmatpush.bf16.msra.mxu2 %v5918_v48  ;;  %v5967_v48 = vld [vmem:[%s9301_s1 + $0xc9c] sm:$0xf0]  ;;  %v5862_v59 = vor.u32 %v6415_v56, %v5859_v12 }
 0x16b   : > { %3733 = vmatpush.bf16.msrb.mxu3 %v5778_v32  ;;  %v5894_v32 = vor.u32 %v6425_v61, %v5893_v24  ;;  %v8949_v40 = vadd.f32 %v2184_v21, %v8349_v16  ;;  %v6015_v16 = vld [vmem:[%s9301_s1 + $0xcfc] sm:$0xf0]  ;;  %v5970_v37 = vor.u32 %v6442_v51, %v5967_v48  ;;  %v6439_v24 = vld [vmem:[%s9301_s1 + $0xc7c] sm:$0xf]  ;;  %v5955_v61 = vld [vmem:[%s9301_s1 + $0xc84] sm:$0xf0]  ;;  %v2224_v46 = vadd.f32 %v2223_v35, %v2210_v39 }
 0x16c   : > { %3682 = vmatpush.bf16.msra.mxu0 %v5714_v33  ;;  %v6018_v38 = vor.u32 %v6454_v11, %v6015_v16  ;;  %v5715_v33 = vld [vmem:[%s9301_s1 + $0xaa4] sm:$0xf0]  ;;  %v5706_v21 = vor.u32 %v6376_v62, %v5703_v4  ;;  %v5931_v11 = vld [vmem:[%s9301_s1 + $0xc54] sm:$0xf0]  ;;  %v5823_v51 = vld [vmem:[%s9301_s1 + $0xb7c] sm:$0xf0] }
 0x16d   : > { %3696 = vmatpush.bf16.msra.mxu1 %v5810_v44  ;;  %v5718_v14 = vor.u32 %v6379_v57, %v5715_v33  ;;  %v5958_v44 = vor.u32 %v6439_v24, %v5955_v61  ;;  %v5865_v57 = vld [vmem:[%s9301_s1 + $0xbc0] sm:$0xf]  ;;  %v6417_v33 = vld [vmem:[%s9301_s1 + $0xbc8] sm:$0xf0]  ;;  %v6403_v35 = vld [vmem:[%s9301_s1 + $0xb5c] sm:$0xf] }
 0x16e   : > { %3710 = vmatpush.bf16.msra.mxu2 %v5906_v2  ;;  %v2237_v2 = vpop.f32.mrf.mxu0  ;;  %v5919_v24 = vld [vmem:[%s9301_s1 + $0xc3c] sm:$0xf0]  ;;  %v5866_v62 = vor.u32 %v6417_v33, %v5865_v57  ;;  %v6414_v4 = vld [vmem:[%s9301_s1 + $0xbb0] sm:$0xf0]  ;;  %v6427_v39 = vld [vmem:[%s9301_s1 + $0xc1c] sm:$0xf] }
 0x16f   : > { %3734 = vmatpush.bf16.msrb.mxu3 %v5766_v55  ;;  %v5730_v55 = vor.u32 %v6382_v49, %v5727_v45  ;;  %v6396_v45 = vld [vmem:[%s9301_s1 + $0xb20] sm:$0xf0]  ;;  %v5961_v57 = vld [vmem:[%s9301_s1 + $0xc80] sm:$0xf]  ;;  %v6441_v33 = vld [vmem:[%s9301_s1 + $0xc88] sm:$0xf0] }
 0x170   : > { %3683 = vmatpush.bf16.msra.mxu0 %v5702_v19  ;;  %v5850_v19 = vor.u32 %v6412_v63, %v5847_v25  ;;  %v2211_v48 = vpop.f32.mrf.mxu2  ;;  %v5782_v41 = vor.u32 %v6396_v45, %v5781_v36  ;;  %v6459_v36 = vld [vmem:[%s9301_s1 + $0xd18] sm:$0xf0] }
 0x171   : > { %3697 = vmatpush.bf16.msra.mxu1 %v5798_v9  ;;  %v2197_v9 = vpop.f32.mrf.mxu1 }
 0x172   : > { %3711 = vmatpush.bf16.msra.mxu2 %v5894_v32  ;;  %v2238_v32 = vadd.f32 %v2237_v2, %v2224_v46  ;;  %v2212_v12 = vadd.f32 %v2211_v48, %v2197_v9  ;;  %v5757_v2 = vld [vmem:[%s9301_s1 + $0xae8] sm:$0xf]  ;;  %v5745_v46 = vld [vmem:[%s9301_s1 + $0xad0] sm:$0xf]  ;;  %v6444_v9 = vld [vmem:[%s9301_s1 + $0xca0] sm:$0xf0] }
 0x173   : > { %3735 = vmatpush.bf16.msrb.mxu3 %v5754_v3  ;;  %3684 = vmatmul.bf16.vlgmr.msra.gmra.mxu0 %v8963_v5  ;;  %v6006_v3 = vor.u32 %v6451_v53, %v6003_v58  ;;  %v6393_v58 = vld [vmem:[%s9301_s1 + $0xb08] sm:$0xf0]  ;;  %v6384_v48 = vld [vmem:[%s9301_s1 + $0xac0] sm:$0xf0] }
 0x174   : > { %3746 = vmatpush.bf16.msrb.mxu0 %v5886_v22  ;;  %3698 = vmatmul.bf16.vlgmr.msra.gmra.mxu1 %v8973_v23  ;;  %v6409_v22 = vld [vmem:[%s9301_s1 + $0xb8c] sm:$0xf]  ;;  %v9063_v16 = vadd.f32 %v2238_v32, %v8502_v60  ;;  %v5895_v32 = vld [vmem:[%s9301_s1 + $0xc0c] sm:$0xf0] }
 0x175   : > { %3760 = vmatpush.bf16.msrb.mxu1 %v5982_v47  ;;  %3712 = vmatmul.bf16.vlgmr.msra.gmra.mxu2 %v8965_v50  ;;  %v5838_v49 = vor.u32 %v6409_v22, %v5835_v28  ;;  %v6433_v47 = vld [vmem:[%s9301_s1 + $0xc4c] sm:$0xf]  ;;  %v6411_v22 = vld [vmem:[%s9301_s1 + $0xb98] sm:$0xf0]  ;;  %v5802_v28 = vor.u32 %v6400_v15, %v5799_v18  ;;  %v5709_v18 = vld [vmem:[%s9301_s1 + $0xa88] sm:$0xf] }
 0x176   : > { %3778 = vmatpush.bf16.msrb.mxu2 %v6030_v42  ;;  %v6420_v42 = vld [vmem:[%s9301_s1 + $0xbe0] sm:$0xf0]  ;;  %v5934_v60 = vor.u32 %v6433_v47, %v5931_v11  ;;  %v5829_v47 = vld [vmem:[%s9301_s1 + $0xb78] sm:$0xf] }
 0x177   : > { %3736 = vmatpush.bf16.msrb.mxu3 %v5742_v27  ;;  %v5794_v27 = vor.u32 %v6399_v20, %v5793_v26  ;;  %v5878_v56 = vor.u32 %v6420_v42, %v5877_v6  ;;  %v5985_v20 = vld [vmem:[%s9301_s1 + $0xcb0] sm:$0xf]  ;;  %v5973_v42 = vld [vmem:[%s9301_s1 + $0xc98] sm:$0xf]  ;;  %v6408_v11 = vld [vmem:[%s9301_s1 + $0xb80] sm:$0xf0] }
 0x178   : > { %3747 = vmatpush.bf16.msrb.mxu0 %v5874_v1  ;;  %v6406_v1 = vld [vmem:[%s9301_s1 + $0xb74] sm:$0xf] }
 0x179   : > { %3761 = vmatpush.bf16.msrb.mxu1 %v5970_v37  ;;  %v2239_v37 = vpop.f32.mrf.mxu0  ;;  %v5826_v53 = vor.u32 %v6406_v1, %v5823_v51  ;;  %v5733_v51 = vld [vmem:[%s9301_s1 + $0xab8] sm:$0xf] }
 0x17a   : > { %3779 = vmatpush.bf16.msrb.mxu2 %v6018_v38  ;;  %v5769_v38 = vld [vmem:[%s9301_s1 + $0xb00] sm:$0xf] }
 0x17b   : > { %3737 = vmatpush.bf16.msrb.mxu3 %v5730_v55  ;;  %v2225_v55 = vpop.f32.mrf.mxu3  ;;  %v5770_v25 = vor.u32 %v6393_v58, %v5769_v38  ;;  %v5830_v38 = vor.u32 %v6408_v11, %v5829_v47  ;;  %v5817_v58 = vld [vmem:[%s9301_s1 + $0xb60] sm:$0xf] }
 0x17c   : > { %3748 = vmatpush.bf16.msrb.mxu0 %v5862_v59  ;;  %v6430_v59 = vld [vmem:[%s9301_s1 + $0xc34] sm:$0xf]  ;;  %v2226_v61 = vadd.f32 %v2225_v55, %v2212_v12  ;;  %v6021_v12 = vld [vmem:[%s9301_s1 + $0xcf8] sm:$0xf]  ;;  %v5913_v11 = vld [vmem:[%s9301_s1 + $0xc20] sm:$0xf] }
 0x17d   : > { %3762 = vmatpush.bf16.msrb.mxu1 %v5958_v44  ;;  %v5922_v13 = vor.u32 %v6430_v59, %v5919_v24  ;;  %v5907_v44 = vld [vmem:[%s9301_s1 + $0xc24] sm:$0xf0]  ;;  %v6405_v59 = vld [vmem:[%s9301_s1 + $0xb68] sm:$0xf0]  ;;  %v5721_v24 = vld [vmem:[%s9301_s1 + $0xaa0] sm:$0xf] }
 0x17e   : > { %3780 = vmatpush.bf16.msrb.mxu2 %v6006_v3  ;;  %v2240_v63 = vadd.f32 %v2239_v37, %v2226_v61  ;;  %v5853_v3 = vld [vmem:[%s9301_s1 + $0xba8] sm:$0xf]  ;;  %v5910_v17 = vor.u32 %v6427_v39, %v5907_v44  ;;  %v6381_v61 = vld [vmem:[%s9301_s1 + $0xaa8] sm:$0xf0]  ;;  %v6402_v39 = vld [vmem:[%s9301_s1 + $0xb50] sm:$0xf0] }
 0x17f   : > { %3738 = vmatpush.bf16.msrb.mxu3 %v5718_v14  ;;  %v5811_v14 = vld [vmem:[%s9301_s1 + $0xb64] sm:$0xf0] }
 0x180   : > { %3749 = vmatpush.bf16.msrb.mxu0 %v5850_v19  ;;  %v5814_v7 = vor.u32 %v6403_v35, %v5811_v14  ;;  %v9117_v26 = vadd.f32 %v2240_v63, %v8552_v30  ;;  %v5854_v19 = vor.u32 %v6414_v4, %v5853_v3  ;;  %v5758_v30 = vor.u32 %v6390_v0, %v5757_v2  ;;  %v6009_v63 = vld [vmem:[%s9301_s1 + $0xce0] sm:$0xf]  ;;  %v5949_v2 = vld [vmem:[%s9301_s1 + $0xc68] sm:$0xf]  ;;  %v6438_v3 = vld [vmem:[%s9301_s1 + $0xc70] sm:$0xf0] }
 0x181   : > { %3763 = vmatpush.bf16.msrb.mxu1 %v5946_v34  ;;  %v6033_v34 = vld [vmem:[%s9301_s1 + $0xd10] sm:$0xf]  ;;  %v2251_v1 = vpop.f32.mrf.mxu0  ;;  %v5805_v0 = vld [vmem:[%s9301_s1 + $0xb48] sm:$0xf] }
 0x182   : > { %3781 = vmatpush.bf16.msrb.mxu2 %v5994_v29  ;;  %v6387_v29 = vld [vmem:[%s9301_s1 + $0xad8] sm:$0xf0]  ;;  %v6034_v55 = vor.u32 %v6459_v36, %v6033_v34 }
 0x183   : > { %3739 = vmatpush.bf16.msrb.mxu3 %v5706_v21  ;;  %v5841_v21 = vld [vmem:[%s9301_s1 + $0xb90] sm:$0xf]  ;;  %v2293_v14 = vpop.f32.mrf.mxu3 }
 0x184   : > { %3750 = vmatpush.bf16.msrb.mxu0 %v5838_v49  ;;  %v5842_v6 = vor.u32 %v6411_v22, %v5841_v21  ;;  %v5746_v49 = vor.u32 %v6387_v29, %v5745_v46  ;;  %v5806_v22 = vor.u32 %v6402_v39, %v5805_v0  ;;  %v6435_v29 = vld [vmem:[%s9301_s1 + $0xc58] sm:$0xf0] }
 0x185   : > { %3764 = vmatpush.bf16.msrb.mxu1 %v5934_v60  ;;  %6036 = vmatmul.msk.bf16.vlgmr.msrb.gmra.mxu2 %vm752_vm0, %v8857_v43  ;;  %v2265_v60 = vpop.f32.mrf.mxu1 }
 0x186   : > { %3788 = vmatpush.bf16.msra.mxu2 %v5794_v27  ;;  %3740 = vmatmul.bf16.vlgmr.msrb.gmra.mxu3 %v8963_v5  ;;  %v5986_v27 = vor.u32 %v6447_v8, %v5985_v20  ;;  %v2266_v37 = vadd.f32 %v2265_v60, %v2251_v1  ;;  %v5950_v8 = vor.u32 %v6438_v3, %v5949_v2  ;;  %v6429_v1 = vld [vmem:[%s9301_s1 + $0xc28] sm:$0xf0] }
 0x187   : > { %3802 = vmatpush.bf16.msra.mxu3 %v5890_v31  ;;  %v6424_v31 = vld [vmem:[%s9301_s1 + $0xc04] sm:$0xf] }
 0x188   : > { %3751 = vmatpush.bf16.msrb.mxu0 %v5826_v53  ;;  %v5898_v45 = vor.u32 %v6424_v31, %v5895_v32  ;;  %v5734_v53 = vor.u32 %v6384_v48, %v5733_v51  ;;  %v2279_v4 = vpop.f32.mrf.mxu2  ;;  %v5914_v48 = vor.u32 %v6429_v1, %v5913_v11 }
 0x189   : > { %3765 = vmatpush.bf16.msrb.mxu1 %v5922_v13  ;;  %v5818_v13 = vor.u32 %v6405_v59, %v5817_v58  ;;  %v2280_v44 = vadd.f32 %v2279_v4, %v2266_v37  ;;  %v2253_v15 = vpop.f32.mrf.mxu0 }
 0x18a   : > { %3789 = vmatpush.bf16.msra.mxu2 %v5782_v41  ;;  %v6456_v41 = vld [vmem:[%s9301_s1 + $0xd00] sm:$0xf0] }
 0x18b   : > { %3803 = vmatpush.bf16.msra.mxu3 %v5878_v56  ;;  %v5974_v56 = vor.u32 %v6444_v9, %v5973_v42  ;;  %v6022_v35 = vor.u32 %v6456_v41, %v6021_v12  ;;  %v2294_v46 = vadd.f32 %v2293_v14, %v2280_v44  ;;  %v6432_v42 = vld [vmem:[%s9301_s1 + $0xc40] sm:$0xf0] }
 0x18c   : > { %3752 = vmatpush.bf16.msrb.mxu0 %v5814_v7  ;;  %v5722_v7 = vor.u32 %v6381_v61, %v5721_v24 }
 0x18d   : > { %3766 = vmatpush.bf16.msrb.mxu1 %v5910_v17  ;;  %v6450_v17 = vld [vmem:[%s9301_s1 + $0xcd0] sm:$0xf0]  ;;  %v2267_v21 = vpop.f32.mrf.mxu1 }
 0x18e   : > { %3790 = vmatpush.bf16.msra.mxu2 %v5770_v25  ;;  %v6453_v25 = vld [vmem:[%s9301_s1 + $0xce8] sm:$0xf0]  ;;  %v2268_v31 = vadd.f32 %v2267_v21, %v2253_v15 }
 0x18f   : > { %3804 = vmatpush.bf16.msra.mxu3 %v5866_v62  ;;  %v5962_v62 = vor.u32 %v6441_v33, %v5961_v57  ;;  %v6010_v20 = vor.u32 %v6453_v25, %v6009_v63 }
 0x190   : > { %3753 = vmatpush.bf16.msrb.mxu0 %v5802_v28  ;;  %v5937_v28 = vld [vmem:[%s9301_s1 + $0xc50] sm:$0xf]  ;;  %v2281_v9 = vpop.f32.mrf.mxu2 }
 0x191   : > { %3767 = vmatpush.bf16.msrb.mxu1 %v5898_v45  ;;  %v5938_v36 = vor.u32 %v6435_v29, %v5937_v28  ;;  %v2282_v45 = vadd.f32 %v2281_v9, %v2268_v31  ;;  %v9271_v31 = vld [vmem:[%s9302_s2] sm:$0x7] }
 0x192   : > { %3791 = vmatpush.bf16.msra.mxu2 %v5758_v30  ;;  %v5997_v30 = vld [vmem:[%s9301_s1 + $0xcc8] sm:$0xf] }
 0x193   : > { %3805 = vmatpush.bf16.msra.mxu3 %v5854_v19  ;;  %3754 = vmatmul.bf16.vlgmr.msrb.gmra.mxu0 %v8973_v23  ;;  %v6378_v19 = vld [vmem:[%s9301_s1 + $0xa90] sm:$0xf0]  ;;  %v5998_v34 = vor.u32 %v6450_v17, %v5997_v30 }
 0x194   : > { %3816 = vmatpush.bf16.msra.mxu0 %v5986_v27  ;;  %3768 = vmatmul.bf16.vlgmr.msrb.gmra.mxu1 %v8965_v50  ;;  %v5710_v32 = vor.u32 %v6378_v19, %v5709_v18  ;;  %v2300_v27 = vadd.f32 %v2294_v46, %v8672_v52 }
 0x195   : > { %3834 = vmatpush.bf16.msra.mxu1 %v6034_v55 }
 0x196   : > { %3792 = vmatpush.bf16.msra.mxu2 %v5746_v49  ;;  %v2295_v49 = vpop.f32.mrf.mxu3 }
 0x197   : > { %3806 = vmatpush.bf16.msra.mxu3 %v5842_v6  ;;  %v5925_v6 = vld [vmem:[%s9301_s1 + $0xc38] sm:$0xf]  ;;  %v2296_v47 = vadd.f32 %v2295_v49, %v2282_v45 }
 0x198   : > { %3817 = vmatpush.bf16.msra.mxu0 %v5974_v56  ;;  %v5926_v52 = vor.u32 %v6432_v42, %v5925_v6  ;;  %v2966_v41 = vpop.f32.mrf.mxu2  ;;  %v3852_v42 = vperm.slane %v9271_v31, 0 }
 0x199   : > { %3835 = vmatpush.bf16.msra.mxu1 %v6022_v35  ;;  %v2303_v51 = vadd.f32 %v2296_v47, %v8740_v10 }
 0x19a   : > { %3793 = vmatpush.bf16.msra.mxu2 %v5734_v53 }
 0x19b   : > { %3807 = vmatpush.bf16.msra.mxu3 %v5830_v38 }
 0x19c   : > { %3818 = vmatpush.bf16.msra.mxu0 %v5962_v62 }
 0x19d   : > { %3836 = vmatpush.bf16.msra.mxu1 %v6010_v20 }
 0x19e   : > { %3794 = vmatpush.bf16.msra.mxu2 %v5722_v7  ;;  %v2924_v10 = vpop.f32.mrf.mxu3 }
 0x19f   : > { %3808 = vmatpush.bf16.msra.mxu3 %v5818_v13 }
 0x1a0   : > { %3819 = vmatpush.bf16.msra.mxu0 %v5950_v8  ;;  %v2938_v12 = vpop.f32.mrf.mxu0  ;;  %v2968_v57 = vpop.f32.mrf.mxu2 }
 0x1a1   : > { %3837 = vmatpush.bf16.msra.mxu1 %v5998_v34  ;;  %v2952_v56 = vpop.f32.mrf.mxu1  ;;  %v2939_v20 = vadd.f32 %v2938_v12, %v2924_v10 }
 0x1a2   : > { %3795 = vmatpush.bf16.msra.mxu2 %v5710_v32 }
 0x1a3   : > { %3809 = vmatpush.bf16.msra.mxu3 %v5806_v22  ;;  %v2953_v30 = vadd.f32 %v2952_v56, %v2939_v20 }
 0x1a4   : > { %3820 = vmatpush.bf16.msra.mxu0 %v5938_v36  ;;  %6037 = vmatmul.msk.bf16.vlgmr.msra.gmra.mxu1 %vm752_vm0, %v8857_v43 }
 0x1a5   : > { %3796 = vmatmul.bf16.vlgmr.msra.gmra.mxu2 %v8963_v5  ;;  %v6426_v5 = vld [vmem:[%s9301_s1 + $0xc10] sm:$0xf0]  ;;  %v2967_v22 = vadd.f32 %v2966_v41, %v2953_v30 }
 0x1a6   : > { %3810 = vmatmul.bf16.vlgmr.msra.gmra.mxu3 %v8973_v23  ;;  %v5901_v23 = vld [vmem:[%s9301_s1 + $0xc08] sm:$0xf]  ;;  %v2926_v38 = vpop.f32.mrf.mxu3 }
 0x1a7   : > { %v5902_v55 = vor.u32 %v6426_v5, %v5901_v23  ;;  %v3083_v34 = vadd.f32 %v2967_v22, %v8878_v54 }
 0x1a8   : > { %3821 = vmatpush.bf16.msra.mxu0 %v5926_v52  ;;  %v2940_v43 = vpop.f32.mrf.mxu0 }
 0x1a9   : > { %v2954_v60 = vpop.f32.mrf.mxu1  ;;  %v2941_v28 = vadd.f32 %v2940_v43, %v2926_v38 }
 0x1ab   : > { %v2955_v36 = vadd.f32 %v2954_v60, %v2941_v28 }
 0x1ac   : > { %3822 = vmatpush.bf16.msra.mxu0 %v5914_v48 }
 0x1ad   : > { %v2969_v52 = vadd.f32 %v2968_v57, %v2955_v36 }
 0x1af   : > { %v3086_v48 = vadd.f32 %v2969_v52, %v8949_v40 }
 0x1b0   : > { %3823 = vmatpush.bf16.msra.mxu0 %v5902_v55 }
 0x1b1   : > { %v9260_v33 = vpop.f32.mrf.mxu1 }
 0x1b3   : > { %3824 = vmatmul.bf16.vlgmr.msra.gmra.mxu0 %v8965_v50 }
 0x1b8   : > { %v2980_v53 = vpop.f32.mrf.mxu2 }
 0x1b9   : > { %v2994_v37 = vpop.f32.mrf.mxu3  ;;  %v9262_v59 = vpop.f32.mrf.mxu1 }
 0x1ba   : > { %v2995_v55 = vadd.f32 %v2994_v37, %v2980_v53  ;;  %v3853_v37 = vperm.slane %v9271_v31, 1 }
 0x1c0   : > { %v3008_v58 = vpop.f32.mrf.mxu0  ;;  %v2982_v61 = vpop.f32.mrf.mxu2 }
 0x1c1   : > { %v2996_v24 = vpop.f32.mrf.mxu3  ;;  %v3009_v41 = vadd.f32 %v3008_v58, %v2995_v55 }
 0x1c2   : > { %v2997_v57 = vadd.f32 %v2996_v24, %v2982_v61 }
 0x1c3   : > { %v3023_v43 = vadd.f32 %v9260_v33, %v3009_v41 }
 0x1c5   : > { %v3084_v40 = vadd.f32 %v3023_v43, %v9063_v16 }
 0x1c8   : > { %v3010_v35 = vpop.f32.mrf.mxu0 }
 0x1d0   : > { %v3078_v63 = vpop.f32.mrf.mxu0 }
 0x1d1   : > { %v3036_v14 = vpop.f32.mrf.mxu1 }
 0x1d8   : > { %v3050_v62 = vpop.f32.mrf.mxu2  ;;  %v3080_v44 = vpop.f32.mrf.mxu0 }
 0x1d9   : > { %v3064_v50 = vpop.f32.mrf.mxu3  ;;  %v3051_v25 = vadd.f32 %v3050_v62, %v3036_v14  ;;  %v3038_v3 = vpop.f32.mrf.mxu1 }
 0x1db   : > { %v3065_v13 = vadd.f32 %v3064_v50, %v3051_v25 }
 0x1dd   : > { %v3079_v2 = vadd.f32 %v3078_v63, %v3065_v13  ;;  %v3011_v63 = vadd.f32 %v3010_v35, %v2997_v57 }
 0x1df   : > { %v9264_v4 = vadd.f32 %v3079_v2, %v2300_v27  ;;  %v3025_v2 = vadd.f32 %v9262_v59, %v3011_v63 }
 0x1e0   : > { %v3052_v7 = vpop.f32.mrf.mxu2 }
 0x1e1   : > { %v3066_v0 = vpop.f32.mrf.mxu3  ;;  %v3053_v39 = vadd.f32 %v3052_v7, %v3038_v3 }
 0x1e3   : > { %v3067_v15 = vadd.f32 %v3066_v0, %v3053_v39  ;;  %v3087_v39 = vadd.f32 %v3025_v2, %v9117_v26 }
 0x1e5   : > { %v3081_v18 = vadd.f32 %v3080_v44, %v3067_v15 }
 0x1e7   : > { %v9266_v19 = vadd.f32 %v3081_v18, %v2303_v51 }
 0x1e9   : > { %v3727_v21 = vpop.f32.mrf.mxu3 }
 0x1f0   : > { %v3685_v8 = vpop.f32.mrf.mxu0 }
 0x1f1   : > { %v3699_v17 = vpop.f32.mrf.mxu1  ;;  %v3729_v1 = vpop.f32.mrf.mxu3 }
 0x1f2   : > { %v3700_v46 = vadd.f32 %v3699_v17, %v3685_v8 }
 0x1f8   : > { %v3713_v29 = vpop.f32.mrf.mxu2  ;;  %v3687_v27 = vpop.f32.mrf.mxu0 }
 0x1f9   : > { %v3714_v32 = vadd.f32 %v3713_v29, %v3700_v46  ;;  %v3701_v9 = vpop.f32.mrf.mxu1 }
 0x1fa   : > { %v3702_v45 = vadd.f32 %v3701_v9, %v3687_v27 }
 0x1fb   : > { %v3728_v6 = vadd.f32 %v3727_v21, %v3714_v32  ;;  %v3854_v21 = vperm.slane %v9271_v31, 2 }
 0x1fd   : > { %v3844_v49 = vadd.f32 %v3728_v6, %v3083_v34 }
 0x1ff   : > { %v3858_v47 = vadd.f32 %v3852_v42, %v3844_v49 }
 0x200   : > { %v3715_v11 = vpop.f32.mrf.mxu2 }
 0x201   : > { %v3864_v54 = vmax.f32 %v3858_v47, 0.0  ;;  %v3716_v51 = vadd.f32 %v3715_v11, %v3702_v45 }
 0x203   : > { %3873 = vst [vmem:[%s9279_s11] sm:$0xff] %v3864_v54  ;;  %v3730_v23 = vadd.f32 %v3729_v1, %v3716_v51 }
 0x205   : > { %v3847_v5 = vadd.f32 %v3730_v23, %v3086_v48 }
 0x207   : > { %v3861_v56 = vadd.f32 %v3852_v42, %v3847_v5 }
 0x208   : > { %v3783_v38 = vpop.f32.mrf.mxu2 }
 0x209   : > { %v3867_v10 = vmax.f32 %v3861_v56, 0.0  ;;  %v3741_v12 = vpop.f32.mrf.mxu3 }
 0x20b   : > { %3876 = vst [vmem:[%s9279_s11 + $0x18] sm:$0x3] %v3867_v10 }
 0x210   : > { %v3755_v60 = vpop.f32.mrf.mxu0  ;;  %v3785_v24 = vpop.f32.mrf.mxu2 }
 0x211   : > { %v3756_v14 = vadd.f32 %v3755_v60, %v3741_v12  ;;  %v3769_v50 = vpop.f32.mrf.mxu1  ;;  %v3743_v53 = vpop.f32.mrf.mxu3 }
 0x213   : > { %v3770_v62 = vadd.f32 %v3769_v50, %v3756_v14 }
 0x215   : > { %v3784_v25 = vadd.f32 %v3783_v38, %v3770_v62 }
 0x217   : > { %v3845_v13 = vadd.f32 %v3784_v25, %v3084_v40 }
 0x218   : > { %v3757_v58 = vpop.f32.mrf.mxu0 }
 0x219   : > { %v3859_v3 = vadd.f32 %v3853_v37, %v3845_v13  ;;  %v3758_v7 = vadd.f32 %v3757_v58, %v3743_v53  ;;  %v3771_v33 = vpop.f32.mrf.mxu1 }
 0x21b   : > { %v3865_v61 = vmax.f32 %v3859_v3, 0.0  ;;  %v3772_v0 = vadd.f32 %v3771_v33, %v3758_v7 }
 0x21d   : > { %3874 = vst [vmem:[%s9279_s11 + $0x8] sm:$0xff] %v3865_v61  ;;  %v3786_v16 = vadd.f32 %v3785_v24, %v3772_v0 }
 0x21f   : > { %v3848_v35 = vadd.f32 %v3786_v16, %v3087_v39 }
 0x221   : > { %v3862_v44 = vadd.f32 %v3853_v37, %v3848_v35  ;;  %v3839_v30 = vpop.f32.mrf.mxu1 }
 0x223   : > { %v3868_v15 = vmax.f32 %v3862_v44, 0.0 }
 0x225   : > { %3877 = vst [vmem:[%s9279_s11 + $0x20] sm:$0x3] %v3868_v15 }
 0x228   : > { %v3797_v18 = vpop.f32.mrf.mxu2 }
 0x229   : > { %v3811_v20 = vpop.f32.mrf.mxu3  ;;  %v3841_v6 = vpop.f32.mrf.mxu1 }
 0x22a   : > { %v3812_v8 = vadd.f32 %v3811_v20, %v3797_v18 }
 0x230   : > { %v3825_v59 = vpop.f32.mrf.mxu0  ;;  %v3799_v22 = vpop.f32.mrf.mxu2 }
 0x231   : > { %v3826_v17 = vadd.f32 %v3825_v59, %v3812_v8  ;;  %v3813_v28 = vpop.f32.mrf.mxu3 }
 0x232   : > { %v3814_v29 = vadd.f32 %v3813_v28, %v3799_v22 }
 0x233   : > { %v3840_v46 = vadd.f32 %v3839_v30, %v3826_v17 }
 0x235   : > { %v3846_v26 = vadd.f32 %v3840_v46, %v9264_v4 }
 0x237   : > { %v3860_v32 = vadd.f32 %v3854_v21, %v3846_v26 }
 0x238   : > { %v3827_v27 = vpop.f32.mrf.mxu0 }
 0x239   : > { %v3866_v34 = vmax.f32 %v3860_v32, 0.0  ;;  %v3828_v36 = vadd.f32 %v3827_v27, %v3814_v29 }
 0x23b   : > { %3875 = vst.msk [vmem:[%s9279_s11 + $0x10] sm:$0xff] %vm752_vm0, %v3866_v34  ;;  %v3842_v42 = vadd.f32 %v3841_v6, %v3828_v36 }
 0x23d   : > { %v3849_v9 = vadd.f32 %v3842_v42, %v9266_v19 }
 0x23f   : > { %v3863_v49 = vadd.f32 %v3854_v21, %v3849_v9  ;;  %19 = sbr.rel (!%p17_p0) target bundleno = 1 (0x1), region = 45 }
 0x241   : > { %v3869_v45 = vmax.f32 %v3863_v49, 0.0 }
 0x243   : > { %3879 = vst.msk [vmem:[%s9279_s11 + $0x28] sm:$0x3] %vm3878_vm1, %v3869_v45 }

</bundles_post_ra>
